<compile_context>
chip_gen: v7x
topology: tpu7x:2x2x1
jax: 0.10.0
libtpu: 0.0.40
codegen_flags: <defaults>
</compile_context>

<pallas_src>
import jax
import jax.numpy as jnp
from jax.experimental import pallas as pl
from jax.experimental.pallas import tpu as pltpu

IN_DIM = 2
HID_DIM = 100
OUT_H = 200
OUT_W = 200
OUT_DIM = OUT_H * OUT_W            # 40000
TILE_N = 20480                     # lane-aligned output tile (multiple of 128)

# Padded sizes for the roofline / CostEstimate.
_K_PAD_I8 = 128                    # int8 sublane tiling pads K 100 -> 128
_N_PAD = 40064                     # lanes pad 40000 -> 40064


def desire_kernel(dr_ref, dt_ref, w1_ref, b1_ref, w2_ref, scale_ref, b2_ref,
                  o_ref):
    """One (1, TILE_N) output tile of the fused 2-layer MLP.

    dr_ref, dt_ref : (1,1) f32 in SMEM (scalars)
    w1_ref         : (2, 100) f32 VMEM       b1_ref : (1, 100) f32 VMEM
    w2_ref         : (100, TILE_N) int8 VMEM (weight-only quantized)
    scale_ref      : (1, TILE_N) f32 per-output-column dequant scale
    b2_ref         : (1, TILE_N) f32
    o_ref          : (1, TILE_N) f32
    """
    # ---- first Linear, folded in (≈400 FLOPs, free on the VPU) ----
    dr = dr_ref[0, 0]
    dt = dt_ref[0, 0]
    h = dr * w1_ref[0:1, :] + dt * w1_ref[1:2, :] + b1_ref[...]     # (1,100) f32
    h_bf = h.astype(jnp.bfloat16)

    # ---- second Linear: int8 weight-only dequant + bf16 MXU dot ----
    w2_bf = w2_ref[...].astype(jnp.bfloat16)                        # VPU cast
    acc = jnp.dot(h_bf, w2_bf, preferred_element_type=jnp.float32)  # (1,TILE_N)
    # Per-column scale applied to the f32 accumulator; bias stays f32.
    o_ref[...] = acc * scale_ref[...] + b2_ref[...]


@jax.jit
def desire_mapper_forward(dr, dt, w1_t, b1, w2_i8, w2_scale, b2):
    """dr, dt: (1, 1) f32.  Returns (1, 1, 200, 200) f32 (NCHW)."""
    n_tiles = pl.cdiv(OUT_DIM, TILE_N)                              # 2

    cost = pl.CostEstimate(
        flops=2 * HID_DIM * OUT_DIM,
        transcendentals=0,
        bytes_accessed=(_K_PAD_I8 * _N_PAD * 1      # W2 (int8, padded)
                        + _N_PAD * 4                # scales (f32)
                        + _N_PAD * 4                # b2 (f32)
                        + _N_PAD * 4                # output (f32)
                        + 2 * 8 * 128 * 4),         # w1 / b1 (padded, tiny)
    )

    out = pl.pallas_call(
        desire_kernel,
        out_shape=jax.ShapeDtypeStruct((1, OUT_DIM), jnp.float32),
        grid_spec=pltpu.PrefetchScalarGridSpec(
            num_scalar_prefetch=0,
            grid=(n_tiles,),
            in_specs=[
                pl.BlockSpec(memory_space=pltpu.MemorySpace.SMEM),      # dr
                pl.BlockSpec(memory_space=pltpu.MemorySpace.SMEM),      # dt
                pl.BlockSpec((IN_DIM, HID_DIM), lambda j: (0, 0)),      # W1^T
                pl.BlockSpec((1, HID_DIM), lambda j: (0, 0)),           # b1
                pl.BlockSpec((HID_DIM, TILE_N), lambda j: (0, j)),      # W2^T tile (int8)
                pl.BlockSpec((1, TILE_N), lambda j: (0, j)),            # scales tile
                pl.BlockSpec((1, TILE_N), lambda j: (0, j)),            # b2 tile
            ],
            out_specs=pl.BlockSpec((1, TILE_N), lambda j: (0, j)),
        ),
        compiler_params=pltpu.CompilerParams(
            dimension_semantics=("parallel",),
            vmem_limit_bytes=32 * 1024 * 1024),
        cost_estimate=cost,
    )(dr, dt, w1_t, b1, w2_i8, w2_scale, b2)

    # NCHW reshape required by the module contract.  (On v7x, a consumer that
    # can take the flat (1, 40000) layout avoids a ~1 us relayout.)
    return out.reshape(1, 1, OUT_H, OUT_W)


def _init_params(key):
    """nn.Linear-style uniform(-1/sqrt(fan_in)) init.

    Weights stored transposed as (in_features, out_features).  W2 is
    weight-only quantized ONCE here to int8 with a per-output-column scale;
    b1, b2 and the scales stay f32.
    """
    k1, k2, k3, k4 = jax.random.split(key, 4)
    bound1 = 1.0 / jnp.sqrt(IN_DIM)
    bound2 = 1.0 / jnp.sqrt(HID_DIM)
    w1_t = jax.random.uniform(k1, (IN_DIM, HID_DIM), jnp.float32, -bound1, bound1)
    b1 = jax.random.uniform(k2, (1, HID_DIM), jnp.float32, -bound1, bound1)
    w2_t = jax.random.uniform(k3, (HID_DIM, OUT_DIM), jnp.float32, -bound2, bound2)
    b2 = jax.random.uniform(k4, (1, OUT_DIM), jnp.float32, -bound2, bound2)

    # Symmetric per-output-column int8 quantization of W2.
    w2_scale = jnp.maximum(
        jnp.max(jnp.abs(w2_t), axis=0, keepdims=True) / 127.0, 1e-12
    ).astype(jnp.float32)                                           # (1, OUT_DIM)
    w2_i8 = jnp.clip(jnp.round(w2_t / w2_scale), -127, 127).astype(jnp.int8)
    return w1_t, b1, w2_i8, w2_scale, b2


if __name__ == "__main__":
    key = jax.random.PRNGKey(0)
    kp, kd = jax.random.split(key)
    w1_t, b1, w2_i8, w2_scale, b2 = _init_params(kp)

    kdr, kdt = jax.random.split(kd)
    dr = jax.random.normal(kdr, (1, 1), jnp.float32)
    dt = jax.random.normal(kdt, (1, 1), jnp.float32)

    out = desire_mapper_forward(dr, dt, w1_t, b1, w2_i8, w2_scale, b2)
    out = jax.block_until_ready(out)

    # Plain-JAX reference mirroring the kernel's precision choices
    # (int8 weight-only W2 with per-column scale, bf16 h, f32 accumulate,
    # f32 bias/scales).
    h_ref = (dr * w1_t[0:1, :] + dt * w1_t[1:2, :] + b1).astype(jnp.bfloat16)
    ref = (jnp.dot(h_ref, w2_i8.astype(jnp.bfloat16),
                   preferred_element_type=jnp.float32) * w2_scale + b2)
    ref = ref.reshape(1, 1, OUT_H, OUT_W)

    assert out.shape == (1, 1, OUT_H, OUT_W)
    assert jnp.allclose(out, ref, atol=2e-3, rtol=2e-3), float(
        jnp.max(jnp.abs(out - ref)))

    print("KERNEL_OK")
</pallas_src>

<mosaic_0001>
module attributes {stable_mosaic.version = 11 : i64} {
  func.func @desire_kernel(%arg0: i32, %arg1: memref<1x1xf32, #tpu.memory_space<smem>>, %arg2: memref<1x1xf32, #tpu.memory_space<smem>>, %arg3: memref<2x100xf32, #tpu.memory_space<vmem>>, %arg4: memref<1x100xf32, #tpu.memory_space<vmem>>, %arg5: memref<100x20480xi8, #tpu.memory_space<vmem>>, %arg6: memref<1x20480xf32, #tpu.memory_space<vmem>>, %arg7: memref<1x20480xf32, #tpu.memory_space<vmem>>, %arg8: memref<1x20480xf32, #tpu.memory_space<vmem>>) attributes {dimension_semantics = [#tpu.dimension_semantics<parallel>], iteration_bounds = array<i64: 2>, scalar_prefetch = 0 : i64, scratch_operands = 0 : i64, tpu.core_type = #tpu.core_type<tc>, window_params = [{transform_indices = @transform_0, window_bounds = array<i64: 1, 1>}, {transform_indices = @transform_1, window_bounds = array<i64: 1, 1>}, {pipeline_mode = #tpu.pipeline_mode<synchronous>, transform_indices = @transform_2, window_bounds = array<i64: 2, 100>}, {pipeline_mode = #tpu.pipeline_mode<synchronous>, transform_indices = @transform_3, window_bounds = array<i64: 1, 100>}, {transform_indices = @transform_4, window_bounds = array<i64: 100, 20480>}, {transform_indices = @transform_5, window_bounds = array<i64: 1, 20480>}, {transform_indices = @transform_6, window_bounds = array<i64: 1, 20480>}, {transform_indices = @transform_7, window_bounds = array<i64: 1, 20480>}]} {
    %c0 = arith.constant 0 : index
    %c0_0 = arith.constant 0 : index
    %0 = memref.load %arg1[%c0, %c0_0] : memref<1x1xf32, #tpu.memory_space<smem>>
    %c0_1 = arith.constant 0 : index
    %c0_2 = arith.constant 0 : index
    %1 = memref.load %arg2[%c0_1, %c0_2] : memref<1x1xf32, #tpu.memory_space<smem>>
    %c0_3 = arith.constant 0 : index
    %c0_4 = arith.constant 0 : index
    %2 = vector.load %arg3[%c0_3, %c0_4] : memref<2x100xf32, #tpu.memory_space<vmem>>, vector<1x100xf32>
    %3 = vector.broadcast %0 : f32 to vector<1x100xf32>
    %4 = arith.mulf %3, %2 : vector<1x100xf32>
    %c1 = arith.constant 1 : index
    %c0_5 = arith.constant 0 : index
    %5 = vector.load %arg3[%c1, %c0_5] : memref<2x100xf32, #tpu.memory_space<vmem>>, vector<1x100xf32>
    %6 = vector.broadcast %1 : f32 to vector<1x100xf32>
    %7 = arith.mulf %6, %5 : vector<1x100xf32>
    %8 = arith.addf %4, %7 : vector<1x100xf32>
    %c0_6 = arith.constant 0 : index
    %c0_7 = arith.constant 0 : index
    %9 = vector.load %arg4[%c0_6, %c0_7] : memref<1x100xf32, #tpu.memory_space<vmem>>, vector<1x100xf32>
    %10 = arith.addf %8, %9 : vector<1x100xf32>
    %11 = arith.truncf %10 : vector<1x100xf32> to vector<1x100xbf16>
    %c0_8 = arith.constant 0 : index
    %c0_9 = arith.constant 0 : index
    %12 = vector.load %arg5[%c0_8, %c0_9] : memref<100x20480xi8, #tpu.memory_space<vmem>>, vector<100x20480xi8>
    %13 = arith.sitofp %12 : vector<100x20480xi8> to vector<100x20480xbf16>
    %cst = arith.constant dense<0.000000e+00> : vector<1x20480xf32>
    %14 = tpu.matmul %11, %13, %cst {dimension_numbers = #tpu.dot_dimension_numbers<[1], [0], [0], [1], [0, 0, 1, 1], [], []>} : vector<1x100xbf16>, vector<100x20480xbf16>, vector<1x20480xf32> -> vector<1x20480xf32>
    %c0_10 = arith.constant 0 : index
    %c0_11 = arith.constant 0 : index
    %15 = vector.load %arg6[%c0_10, %c0_11] : memref<1x20480xf32, #tpu.memory_space<vmem>>, vector<1x20480xf32>
    %16 = arith.mulf %14, %15 : vector<1x20480xf32>
    %c0_12 = arith.constant 0 : index
    %c0_13 = arith.constant 0 : index
    %17 = vector.load %arg7[%c0_12, %c0_13] : memref<1x20480xf32, #tpu.memory_space<vmem>>, vector<1x20480xf32>
    %18 = arith.addf %16, %17 : vector<1x20480xf32>
    %c0_14 = arith.constant 0 : index
    %c0_15 = arith.constant 0 : index
    %19 = vector.load %arg8[%c0_14, %c0_15] : memref<1x20480xf32, #tpu.memory_space<vmem>>, vector<1x20480xf32>
    tpu.vector_store %arg8[%c0_14, %c0_15], %18 {strides = array<i32>} : memref<1x20480xf32, #tpu.memory_space<vmem>>, vector<1x20480xf32>,
    return
  }
  func.func @transform_0(%arg0: i32) -> (i32, i32) {
    %c0_i32 = arith.constant 0 : i32
    %c0_i32_0 = arith.constant 0 : i32
    %c0_i32_1 = arith.constant 0 : i32
    return %c0_i32, %c0_i32_0 : i32, i32
  }
  func.func @transform_1(%arg0: i32) -> (i32, i32) {
    %c0_i32 = arith.constant 0 : i32
    %c0_i32_0 = arith.constant 0 : i32
    %c0_i32_1 = arith.constant 0 : i32
    return %c0_i32, %c0_i32_0 : i32, i32
  }
  func.func @transform_2(%arg0: i32) -> (i32, i32) {
    %c0_i32 = arith.constant 0 : i32
    %c0_i32_0 = arith.constant 0 : i32
    %c0_i32_1 = arith.constant 0 : i32
    return %c0_i32, %c0_i32_0 : i32, i32
  }
  func.func @transform_3(%arg0: i32) -> (i32, i32) {
    %c0_i32 = arith.constant 0 : i32
    %c0_i32_0 = arith.constant 0 : i32
    %c0_i32_1 = arith.constant 0 : i32
    return %c0_i32, %c0_i32_0 : i32, i32
  }
  func.func @transform_4(%arg0: i32) -> (i32, i32) {
    %c0_i32 = arith.constant 0 : i32
    %c0_i32_0 = arith.constant 0 : i32
    return %c0_i32, %arg0 : i32, i32
  }
  func.func @transform_5(%arg0: i32) -> (i32, i32) {
    %c0_i32 = arith.constant 0 : i32
    %c0_i32_0 = arith.constant 0 : i32
    return %c0_i32, %arg0 : i32, i32
  }
  func.func @transform_6(%arg0: i32) -> (i32, i32) {
    %c0_i32 = arith.constant 0 : i32
    %c0_i32_0 = arith.constant 0 : i32
    return %c0_i32, %arg0 : i32, i32
  }
  func.func @transform_7(%arg0: i32) -> (i32, i32) {
    %c0_i32 = arith.constant 0 : i32
    %c0_i32_0 = arith.constant 0 : i32
    return %c0_i32, %arg0 : i32, i32
  }
}

</mosaic_0001>

<bundles_post_ra>
// kernel: desire_mapper_forward.1
= control target key start
LH: loop header
LB: loop body
LE: loop exit
PB: predicated region body
PF: predicated region fallthrough
CT: control target
= control target key end

     0   :  { %s19289_s0 = inlined_call_operand.<no memory space> [shape: f32[1,1], index: 0, kind: input, shape index: {}]   ;;  %s19290_s1 = inlined_call_operand.<no memory space> [shape: f32[1,1], index: 1, kind: input, shape index: {}]   ;;  %s19291_s2 = inlined_call_operand.hbm [shape: f32[2,100], index: 2, kind: input, shape index: {}]   ;;  %s19292_s3 = inlined_call_operand.hbm [shape: f32[1,100], index: 3, kind: input, shape index: {}]   ;;  %s19293_s4 = inlined_call_operand.hbm [shape: s8[100,40000], index: 4, kind: input, shape index: {}]   ;;  %s19294_s5 = inlined_call_operand.hbm [shape: f32[1,40000], index: 5, kind: input, shape index: {}]   ;;  %s19295_s6 = inlined_call_operand.hbm [shape: f32[1,40000], index: 6, kind: input, shape index: {}]   ;;  %s19296_s7 = inlined_call_operand.vmem [shape: f32[1,40000], index: 7, kind: output, shape index: {}]  }
   0x1   :  { %12 = sst [smem:[#allocation2]] %s19289_s0 }
   0x2   :  { %13 = sst [smem:[#allocation3]] %s19290_s1 }
   0x3   :  { %14 = vsyncpa [#allocation5], 0 }
   0x4   :  { %15 = vsyncpa [#allocation7], 0  ;;  %s16655_s28 = smov 0   ;;  %s16657_s29 = smov 0  }
   0x5   :  { %s16659_s30 = smov 0   ;;  %s16661_s8 = smov 0  }
   0x6 LB: > { %s16674_s0 = sadd.s32 4294967295, %s16532_s8   ;;  %s16677_s1 = sadd.s32 1, %s16532_s8   ;;  %s16532_s8 = sphi %s16661_s8, %s19328_s8   ;;  %s16528_s30 = sphi %s16659_s30, %s19327_s30   ;;  %s16524_s29 = sphi %s16657_s29, %s19326_s29   ;;  %s16520_s28 = sphi %s16655_s28, %s19325_s28  }
   0x7   : > { %s109_s9 = ssub.s32 %s16532_s8, %s16677_s1  ;;  %s112_s10 = sadd.s32 1, %s16528_s30 }
   0x8   : > { %p110_p0 = scmp.eq.s32.totalorder %s109_s9, 0  ;;  %p119_p1 = scmp.ne.s32.totalorder %s16528_s30, %s16524_s29 }
   0x9   : > { %p120_p2 = scmp.eq.s32.totalorder %s16532_s8, 0  ;;  %p125_p3 = scmp.ne.s32.totalorder %s16524_s29, %s16520_s28 }
   0xa   : > { %s16687_s11 = scalar_select %p110_p0, %s16528_s30, %s112_s10  }
   0xb   : > { %p16689_p4 = por %p120_p2, %p119_p1  ;;  %p19297_p5 = scmp.eq.s32.totalorder %s16674_s0, 0 }
   0xc   : > { %p201_p6 = scmp.eq.s32.totalorder %s16674_s0, 1  ;;  %p14761_p7 = scmp.ge.s32.totalorder %s16532_s8, 1 }
   0xd   : > { %s19300_s12 = scalar_select %p16689_p4, 1, 0 }
   0xe   : > { %p16698_p8 = por %p19297_p5, %p125_p3  ;;  %p214_p9 = scmp.lt.s32.totalorder %s16532_s8, 3 }
   0xf   : > { %p16703_p10 = por %p201_p6, %p119_p1  ;;  %s16598_s16 = smov [#allocation4]  }
  0x10   : > { %s19301_s13 = scalar_select %p16698_p8, 1, 0 }
  0x11   : > { %s19302_s14 = scalar_select %p16703_p10, 1, 0 }
  0x12   : > { %p16707_p11 = pnand %p14761_p7, %p214_p9  ;;  %s233_s17 = sshll.u32 %s16598_s16, 4  ;;  %s234_s17 = int_to_ptr.vmem [resolvable:$true] %s233_s17 }
  0x13   : > { %s16599_s18 = smov [#allocation6]   ;;  %s16286_s23 = scalar_lea.hbm %s19291_s2, 32 }
  0x14   : > { %s19303_s15 = scalar_select %p16707_p11, 1, 0 }
  0x15   : > { %p16107_p12 = pneg %p16707_p11  ;;  %s244_s19 = sshll.u32 %s16599_s18, 4  ;;  %s16719_s19 = int_to_ptr.vmem [resolvable:$true] %s244_s19 }
  0x16   : > { %p16287_p0 = scmp.ne.s32.totalorder %s19291_s2, %s16286_s23  ;;  %p16293_p6 = scmp.lt.u32.totalorder %s16286_s23, %s19291_s2 }
  0x17   : > { %p16715_p13 = pnand %p16107_p12, %p19297_p5 }
  0x19   : > { %p16288_p1 = pneg %p16715_p13 }
  0x1b   : > { %p16289_p2 = pnand %p16288_p1, %p16287_p0 }
  0x1d   : > { %p16290_p3 = pneg %p16289_p2 }
  0x1f   : > { %p16295_p7 = pnand %p16293_p6, %p16290_p3 }
  0x21   : > { %16298 = shalt.err (!%p16295_p7)
}
  0x22   : > { %s16299_s28 = scalar_lea.vmem %s234_s17, 32  ;;  %p16307_p10 = scmp.lt.s32.totalorder %s234_s17, %s234_s17 }
  0x23   : > { %p16300_p9 = scmp.ne.s32.totalorder %s234_s17, %s16299_s28  ;;  %p16308_p8 = scmp.lt.s32.totalorder %s16299_s28, %s16299_s28 }
  0x25   : > { %p16302_p12 = pnand %p16300_p9, %p16288_p1  ;;  %p16309_p11 = por %p16308_p8, %p16307_p10 }
  0x27   : > { %p16303_p5 = pneg %p16302_p12 }
  0x29   : > { %p16310_p4 = pnand %p16309_p11, %p16303_p5 }
  0x2b   : > { %16313 = shalt.err (!%p16310_p4)
}
  0x2c   : > { %16110 = dma.hbm_to_vmem [thread:$0]  (!%p16715_p13), %s19291_s2, 32, %s234_s17, [#allocation5]  }
  0x2d   : > { %s16314_s21 = scalar_lea.hbm %s19292_s3, 16 }
  0x2e   : > { %p16315_p0 = scmp.ne.s32.totalorder %s19292_s3, %s16314_s21  ;;  %p16321_p4 = scmp.lt.u32.totalorder %s16314_s21, %s19292_s3 }
  0x30   : > { %p16317_p8 = pnand %p16315_p0, %p16288_p1 }
  0x32   : > { %p16318_p5 = pneg %p16317_p8 }
  0x34   : > { %p16323_p10 = pnand %p16321_p4, %p16318_p5 }
  0x36   : > { %16326 = shalt.err (!%p16323_p10)
}
  0x37   : > { %s16327_s17 = scalar_lea.vmem %s16719_s19, 16  ;;  %s16334_s26 = scalar_lea.vmem %s16719_s19, 32 }
  0x38   : > { %p16328_p11 = scmp.ne.s32.totalorder %s16719_s19, %s16327_s17  ;;  %p16335_p6 = scmp.lt.s32.totalorder %s16719_s19, %s16719_s19 }
  0x39   : > { %p16336_p7 = scmp.lt.s32.totalorder %s16334_s26, %s16327_s17 }
  0x3a   : > { %p16330_p2 = pnand %p16328_p11, %p16288_p1 }
  0x3b   : > { %p16337_p9 = por %p16336_p7, %p16335_p6 }
  0x3c   : > { %p16331_p3 = pneg %p16330_p2 }
  0x3e   : > { %p16338_p12 = pnand %p16337_p9, %p16331_p3 }
  0x40   : > { %16341 = shalt.err (!%p16338_p12)
}
  0x41   : > { %16113 = dma.hbm_to_vmem [thread:$0]  (!%p16715_p13), %s19292_s3, 16, %s16719_s19, [#allocation7]  }
  0x42   : > { %p14764_p0 = scmp.ge.s32.totalorder %s16532_s8, 2 }
  0x43   : > { %p19305_p1 = scmp.ne.s32.totalorder (!%p14764_p0), %s19300_s12, 0 }
  0x44   : > { %251 = sbr.rel (%p14764_p0) target bundleno = 183 (0xb7), region = 32 }
  0x4b   : > { %254 = sbr.rel (!%p19305_p1) target bundleno = 111 (0x6f), region = 36  ;;  %s255_s9 = sand.u32 (%p19305_p1), 1, %s16532_s8  }
  0x4c   : > { %s257_s10 = sand.u32 (%p19305_p1), 1, %s16528_s30   ;;  %s260_s18 = smul.u32 (%p19305_p1), 160, %s16532_s8 }
  0x4d   : > { %s16091_s16 = smul.u32 (%p19305_p1), 4160, %s257_s10  ;;  %s16781_s22 = scalar_lea.sflag (%p19305_p1), [#allocation5], %s255_s9 }
  0x4e   : > { %s261_s21 = ssub.s32 (%p19305_p1), 313, %s260_s18 }
  0x4f   : > { %p262_p8 = scmp.lt.s32.totalorder (%p19305_p1), %s261_s21, 160  ;;  %s259_s23 = scalar_lea.vmem (%p19305_p1), [#allocation8], %s16091_s16 }
  0x52   : > { %s19330_s21 = smov (!%p262_p8, %s261_s21), 160 }
  0x53   : > { %s16778_s20 = smul.u32 416, %s19330_s21 }
  0x55   : > { %s266_s19 = ssub.s32 66560, %s16778_s20 }
  0x56   : > { %267 = vsyncadd %s16781_s22, %s266_s19  ;;  %p14765_p13 = scmp.ne.s32.totalorder %s16778_s20, 0  ;;  %s16084_s24 = smul.u32 5120, %s16532_s8 }
  0x57   : > { %s14767_s25 = sshll.u32 %s19330_s21, 1  ;;  %s273_s17 = sshll.u32 %s259_s23, 4  ;;  %s16792_s17 = int_to_ptr.vmem [resolvable:$true] %s273_s17 }
  0x58   : > { %s16790_s28 = scalar_lea.hbm %s19293_s4, %s16084_s24  ;;  %s16346_s18 = scalar_lea.hbm %s19293_s4, 130208 }
  0x59   : > { %s16342_s9 = scalar_lea.hbm %s16790_s28, %s16778_s20  ;;  %p16347_p11 = scmp.lt.u32.totalorder %s16790_s28, %s19293_s4 }
  0x5a   : > { %p16343_p5 = scmp.ne.s32.totalorder %s16790_s28, %s16342_s9  ;;  %p16348_p2 = scmp.lt.u32.totalorder %s16346_s18, %s16342_s9 }
  0x5b   : > { %p16350_p6 = scmp.lt.u32.totalorder %s16342_s9, %s16790_s28 }
  0x5c   : > { %p16344_p4 = pnand %p16343_p5, %p14765_p13  ;;  %p16349_p3 = por %p16348_p2, %p16347_p11 }
  0x5e   : > { %p16345_p10 = pneg %p16344_p4  ;;  %p16351_p7 = por %p16350_p6, %p16349_p3 }
  0x60   : > { %p16352_p9 = pnand %p16351_p7, %p16345_p10 }
  0x62   : > { %16355 = shalt.err (!%p16352_p9)
}
  0x63   : > { %s16356_s24 = scalar_lea.vmem %s16792_s17, %s16778_s20  ;;  %s16600_s26 = smov [#allocation8]  }
  0x64   : > { %p16357_p12 = scmp.ne.s32.totalorder %s16792_s17, %s16356_s24  ;;  %s16360_s27 = sshll.u32 %s16600_s26, 4  ;;  %s16361_s27 = int_to_ptr.vmem [resolvable:$false] %s16360_s27 }
  0x65   : > { %s16362_s10 = scalar_lea.vmem %s16361_s27, 133120  ;;  %p16363_p8 = scmp.lt.s32.totalorder %s16792_s17, %s16361_s27 }
  0x66   : > { %p16358_p0 = pnand %p16357_p12, %p14765_p13  ;;  %p16364_p5 = scmp.lt.s32.totalorder %s16362_s10, %s16356_s24 }
  0x68   : > { %p16359_p1 = pneg %p16358_p0  ;;  %p16365_p4 = por %p16364_p5, %p16363_p8 }
  0x6a   : > { %p16366_p11 = pnand %p16365_p4, %p16359_p1 }
  0x6c   : > { %16369 = shalt.err (!%p16366_p11)
}
  0x6d   : > { %s16601_s9 = smov 10016   ;;  %s16602_s16 = smov 5120  }
  0x6e   : > { %279 = dma.hbm_to_vmem [thread:$0]  (%p14765_p13), %s16790_s28, %s16778_s20, %s16792_s17, %s16781_s22, %s16601_s9, %s16602_s16, %s14767_s25  }
  0x6f PF: > { %p19306_p10 = scmp.ne.s32.totalorder %s19300_s12, 0 }
  0x70   : > { %s283_s18 = sand.u32 (%p19306_p10), 1, %s16532_s8   ;;  %s285_s19 = sand.u32 (%p19306_p10), 1, %s16528_s30  }
  0x71   : > { %282 = sbr.rel (!%p19306_p10) target bundleno = 147 (0x93), region = 40  ;;  %s16829_s21 = scalar_lea.sflag (%p19306_p10), [#allocation5], %s283_s18 }
  0x72   : > { %s16092_s23 = smul.u32 (%p19306_p10), 160, %s285_s19 }
  0x73   : > { %s288_s24 = smul.u32 (%p19306_p10), 160, %s16532_s8 }
  0x74   : > { %s287_s20 = scalar_lea.vmem (%p19306_p10), [#allocation9], %s16092_s23 }
  0x75   : > { %s289_s26 = ssub.s32 (%p19306_p10), 313, %s288_s24 }
  0x76   : > { %p290_p2 = scmp.lt.s32.totalorder (%p19306_p10), %s289_s26, 160 }
  0x78   : > { %s19332_s26 = smov (!%p290_p2, %s289_s26), 160 }
  0x79   : > { %s16826_s27 = sshll.u32 %s19332_s26, 4 }
  0x7a   : > { %s294_s10 = ssub.s32 2560, %s16826_s27 }
  0x7b   : > { %295 = vsyncadd %s16829_s21, %s294_s10  ;;  %p14771_p13 = scmp.ne.s32.totalorder %s16826_s27, 0  ;;  %s16085_s22 = smul.u32 2560, %s16532_s8 }
  0x7c   : > { %s300_s25 = sshll.u32 %s287_s20, 4  ;;  %s16374_s23 = scalar_lea.hbm %s19294_s5, 5008  ;;  %s301_s25 = int_to_ptr.vmem [resolvable:$true] %s300_s25 }
  0x7d   : > { %s16837_s9 = scalar_lea.hbm %s19294_s5, %s16085_s22 }
  0x7e   : > { %s16370_s16 = scalar_lea.hbm %s16837_s9, %s16826_s27  ;;  %p16375_p9 = scmp.lt.u32.totalorder %s16837_s9, %s19294_s5 }
  0x7f   : > { %p16371_p3 = scmp.ne.s32.totalorder %s16837_s9, %s16370_s16  ;;  %p16376_p12 = scmp.lt.u32.totalorder %s16374_s23, %s16370_s16 }
  0x80   : > { %p16378_p1 = scmp.lt.u32.totalorder %s16370_s16, %s16837_s9 }
  0x81   : > { %p16372_p6 = pnand %p16371_p3, %p14771_p13  ;;  %p16377_p0 = por %p16376_p12, %p16375_p9 }
  0x83   : > { %p16373_p7 = pneg %p16372_p6  ;;  %p16379_p8 = por %p16378_p1, %p16377_p0 }
  0x85   : > { %p16380_p5 = pnand %p16379_p8, %p16373_p7 }
  0x87   : > { %16383 = shalt.err (!%p16380_p5)
}
  0x88   : > { %s16384_s10 = scalar_lea.vmem %s301_s25, %s16826_s27  ;;  %s16603_s20 = smov [#allocation9]  }
  0x89   : > { %p16385_p4 = scmp.ne.s32.totalorder %s301_s25, %s16384_s10  ;;  %s16388_s22 = sshll.u32 %s16603_s20, 4  ;;  %s16389_s22 = int_to_ptr.vmem [resolvable:$false] %s16388_s22 }
  0x8a   : > { %s16390_s17 = scalar_lea.vmem %s16389_s22, 5120  ;;  %p16391_p2 = scmp.lt.s32.totalorder %s301_s25, %s16389_s22 }
  0x8b   : > { %p16386_p11 = pnand %p16385_p4, %p14771_p13  ;;  %p16392_p3 = scmp.lt.s32.totalorder %s16390_s17, %s16384_s10 }
  0x8d   : > { %p16387_p10 = pneg %p16386_p11  ;;  %p16393_p6 = por %p16392_p3, %p16391_p2 }
  0x8f   : > { %p16394_p9 = pnand %p16393_p6, %p16387_p10 }
  0x91   : > { %16397 = shalt.err (!%p16394_p9)
}
  0x92   : > { %303 = dma.hbm_to_vmem [thread:$0]  (%p14771_p13), %s16837_s9, %s16826_s27, %s301_s25, %s16829_s21  }
  0x93 PF: > { %p19307_p7 = scmp.ne.s32.totalorder %s19300_s12, 0 }
  0x94   : > { %s307_s28 = sand.u32 (%p19307_p7), 1, %s16532_s8   ;;  %s309_s16 = sand.u32 (%p19307_p7), 1, %s16528_s30  }
  0x95   : > { %306 = sbr.rel (!%p19307_p7) target bundleno = 183 (0xb7), region = 44  ;;  %s16868_s10 = scalar_lea.sflag (%p19307_p7), [#allocation5], %s307_s28 }
  0x96   : > { %s16093_s18 = smul.u32 (%p19307_p7), 160, %s309_s16 }
  0x97   : > { %s312_s19 = smul.u32 (%p19307_p7), 160, %s16532_s8 }
  0x98   : > { %s311_s27 = scalar_lea.vmem (%p19307_p7), [#allocation10], %s16093_s18 }
  0x99   : > { %s313_s23 = ssub.s32 (%p19307_p7), 313, %s312_s19 }
  0x9a   : > { %p314_p12 = scmp.lt.s32.totalorder (%p19307_p7), %s313_s23, 160 }
  0x9c   : > { %s19334_s23 = smov (!%p314_p12, %s313_s23), 160 }
  0x9d   : > { %s16865_s24 = sshll.u32 %s19334_s23, 4 }
  0x9e   : > { %s318_s26 = ssub.s32 2560, %s16865_s24 }
  0x9f   : > { %319 = vsyncadd %s16868_s10, %s318_s26  ;;  %p14774_p13 = scmp.ne.s32.totalorder %s16865_s24, 0  ;;  %s16086_s12 = smul.u32 2560, %s16532_s8 }
  0xa0   : > { %s324_s21 = sshll.u32 %s311_s27, 4  ;;  %s16402_s8 = scalar_lea.hbm %s19295_s6, 5008  ;;  %s325_s21 = int_to_ptr.vmem [resolvable:$true] %s324_s21 }
  0xa1   : > { %s16876_s20 = scalar_lea.hbm %s19295_s6, %s16086_s12 }
  0xa2   : > { %s16398_s22 = scalar_lea.hbm %s16876_s20, %s16865_s24  ;;  %p16403_p5 = scmp.lt.u32.totalorder %s16876_s20, %s19295_s6 }
  0xa3   : > { %p16399_p0 = scmp.ne.s32.totalorder %s16876_s20, %s16398_s22  ;;  %p16404_p4 = scmp.lt.u32.totalorder %s16402_s8, %s16398_s22 }
  0xa4   : > { %p16406_p10 = scmp.lt.u32.totalorder %s16398_s22, %s16876_s20 }
  0xa5   : > { %p16400_p1 = pnand %p16399_p0, %p14774_p13  ;;  %p16405_p11 = por %p16404_p4, %p16403_p5 }
  0xa7   : > { %p16401_p8 = pneg %p16400_p1  ;;  %p16407_p2 = por %p16406_p10, %p16405_p11 }
  0xa9   : > { %p16408_p3 = pnand %p16407_p2, %p16401_p8 }
  0xab   : > { %16411 = shalt.err (!%p16408_p3)
}
  0xac   : > { %s16412_s19 = scalar_lea.vmem %s325_s21, %s16865_s24  ;;  %s16604_s23 = smov [#allocation10]  }
  0xad   : > { %p16413_p6 = scmp.ne.s32.totalorder %s325_s21, %s16412_s19  ;;  %s16416_s26 = sshll.u32 %s16604_s23, 4  ;;  %s16417_s26 = int_to_ptr.vmem [resolvable:$false] %s16416_s26 }
  0xae   : > { %s16418_s27 = scalar_lea.vmem %s16417_s26, 5120  ;;  %p16419_p12 = scmp.lt.s32.totalorder %s325_s21, %s16417_s26 }
  0xaf   : > { %p16414_p9 = pnand %p16413_p6, %p14774_p13  ;;  %p16420_p0 = scmp.lt.s32.totalorder %s16418_s27, %s16412_s19 }
  0xb1   : > { %p16415_p7 = pneg %p16414_p9  ;;  %p16421_p1 = por %p16420_p0, %p16419_p12 }
  0xb3   : > { %p16422_p4 = pnand %p16421_p1, %p16415_p7 }
  0xb5   : > { %16425 = shalt.err (!%p16422_p4)
}
  0xb6   : > { %327 = dma.hbm_to_vmem [thread:$0]  (%p14774_p13), %s16876_s20, %s16865_s24, %s325_s21, %s16868_s10  }
  0xb7 PF: > { %p19308_p8 = scmp.ne.s32.totalorder %s19303_s15, 0 }
  0xb8   : > { %p19309_p5 = scmp.eq.s32.totalorder (!%p19308_p8), %s16674_s0, 0 }
  0xb9   : > { %333 = sbr.rel (%p19308_p8) target bundleno = 1720 (0x6b8), region = 48 }
  0xc0   : > { %16507 = dma.done.wait (%p19309_p5), [#allocation5], 32   ;;  %p19310_p11 = pmov %p19309_p5 }
  0xc1   : > { %p19311_p10 = pmov %p19309_p5 }
  0xc2   : > { %16509 = vsyncadd (%p19310_p11), [#allocation5], 4294967264 }
  0xc3   : > { %16511 = dma.done.wait (%p19311_p10), [#allocation7], 16   ;;  %p19312_p2 = pmov %p19309_p5 }
  0xc4   : > { %s343_s24 = sand.u32 1, %s16674_s0   ;;  %s345_s10 = sand.u32 1, %s16524_s29  }
  0xc5   : > { %16513 = vsyncadd (%p19312_p2), [#allocation7], 4294967280  ;;  %s16094_s15 = smul.u32 4160, %s345_s10  ;;  %s344_s12 = scalar_lea.sflag [#allocation5], %s343_s24 }
  0xc6   : > { %p19313_p13 = scmp.ne.s32.totalorder %s19301_s13, 0 }
  0xc7   : > { %s16913_s21 = scalar_lea.vmem [#allocation8], %s16094_s15 }
  0xc8   : > { %16515 = dma.done.wait (%p19313_p13), %s344_s12, 71680  }
  0xc9   : > { %16517 = vsyncadd (%p19313_p13), %s344_s12, 4294895616  ;;  %v16605_v0 = vmov 0   ;;  %v438_v1 = vld [vmem:[%s16913_s21] sm:$0xff]  ;;  %s16929_s13 = sld [smem:[#allocation2]]  ;;  %v428_v52 = vld [vmem:[#allocation4] sm:$0x1] }
  0xca   : > { %7715 = vmatprep.mubr.bf16.mxu0 %v16605_v0  ;;  %7756 = vmatprep.mubr.bf16.mxu1 %v16605_v0  ;;  %v478_v2 = vld [vmem:[%s16913_s21 + $0x140] sm:$0xff]  ;;  %v958_v4 = vunpack.c.l.s8.bf16 %v438_v1  ;;  %v959_v6 = vunpack.c.h.s8.bf16 %v438_v1  ;;  %s16931_s25 = sld [smem:[#allocation3]]  ;;  %v431_v53 = vld [vmem:[#allocation4 + $0x1] sm:$0x1]  ;;  %vm7202_vm0 = vcmask 1041408   ;;  %vm7198_vm1 = vcmask 818176  }
  0xcb   : > { %v518_v3 = vld [vmem:[%s16913_s21 + $0x280] sm:$0xff]  ;;  %v1038_v5 = vunpack.c.l.s8.bf16 %v478_v2  ;;  %v1039_v7 = vunpack.c.h.s8.bf16 %v478_v2  ;;  %s17121_s9 = smul.u32 160, %s345_s10  ;;  %p19314_p3 = scmp.ne.s32.totalorder %s19302_s14, 0 }
  0xcc   : > { %v558_v8 = vld [vmem:[%s16913_s21 + $0x3c0] sm:$0xff]  ;;  %v1118_v9 = vunpack.c.l.s8.bf16 %v518_v3  ;;  %v1119_v11 = vunpack.c.h.s8.bf16 %v518_v3  ;;  %s14150_s28 = smul.u32 (%p19314_p3), 160, %s16674_s0 }
  0xcd   : > { %v1198_v10 = vunpack.c.l.s8.bf16 %v558_v8  ;;  %v1199_v12 = vunpack.c.h.s8.bf16 %v558_v8  ;;  %v598_v13 = vld [vmem:[%s16913_s21 + $0x500] sm:$0xff]  ;;  %v14780_v15 = vcombine.high %v958_v4, %v1038_v5  ;;  %v14782_v16 = vcombine.high %v959_v6, %v1039_v7  ;;  %s17134_s20 = scalar_lea.vmem [#allocation9], %s17121_s9  ;;  %s17147_s22 = scalar_lea.vmem [#allocation10], %s17121_s9 }
  0xce   : > { %v638_v14 = vld [vmem:[%s16913_s21 + $0x640] sm:$0xff]  ;;  %v14779_v17 = vcombine.low %v958_v4, %v1038_v5  ;;  %v14781_v18 = vcombine.low %v959_v6, %v1039_v7  ;;  %v1278_v23 = vunpack.c.l.s8.bf16 %v598_v13  ;;  %v1279_v25 = vunpack.c.h.s8.bf16 %v598_v13  ;;  %v439_v5 = vld [vmem:[%s16913_s21 + $0x8] sm:$0xff]  ;;  %s17271_s17 = scalar_lea.vmem [#allocation11], %s17121_s9   ;;  %s14151_s8 = ssub.s32 (%p19314_p3), 313, %s14150_s28 }
  0xcf   : > { %v678_v19 = vld [vmem:[%s16913_s21 + $0x780] sm:$0xff]  ;;  %v14940_v21 = vcombine.high %v1118_v9, %v1198_v10  ;;  %v14942_v22 = vcombine.high %v1119_v11, %v1199_v12  ;;  %7683 = vmatprep.subr.bf16.mxu0 %v14780_v15  ;;  %7724 = vmatprep.subr.bf16.mxu1 %v14782_v16  ;;  %v1358_v24 = vunpack.c.l.s8.bf16 %v638_v14  ;;  %v1359_v26 = vunpack.c.h.s8.bf16 %v638_v14  ;;  %v479_v6 = vld [vmem:[%s16913_s21 + $0x148] sm:$0xff]  ;;  %s18870_s19 = scalar_lea.vmem (%p19314_p3), %s19296_s7, %s14150_s28   ;;  %p14152_p6 = scmp.lt.s32.totalorder (%p19314_p3), %s14151_s8, 160 }
  0xd0   : > { %v718_v20 = vld [vmem:[%s16913_s21 + $0x8c0] sm:$0xff]  ;;  %7684 = vmatpush1.bf16.msra.mxu0 %v14779_v17  ;;  %7725 = vmatpush1.bf16.msra.mxu1 %v14781_v18  ;;  %v14939_v27 = vcombine.low %v1118_v9, %v1198_v10  ;;  %v14941_v28 = vcombine.low %v1119_v11, %v1199_v12  ;;  %v1438_v29 = vunpack.c.l.s8.bf16 %v678_v19  ;;  %v1439_v33 = vunpack.c.h.s8.bf16 %v678_v19  ;;  %v435_v12 = vld [vmem:[#allocation6] sm:$0x1]  ;;  %v519_v19 = vld [vmem:[%s16913_s21 + $0x288] sm:$0xff] }
  0xd1   : > { %v1518_v30 = vunpack.c.l.s8.bf16 %v718_v20  ;;  %7685 = vmatprep.subr.bf16.mxu0 %v14940_v21  ;;  %7726 = vmatprep.subr.bf16.mxu1 %v14942_v22  ;;  %v15100_v31 = vcombine.high %v1278_v23, %v1358_v24  ;;  %v15102_v32 = vcombine.high %v1279_v25, %v1359_v26  ;;  %v1519_v34 = vunpack.c.h.s8.bf16 %v718_v20  ;;  %v758_v35 = vld [vmem:[%s16913_s21 + $0xa00] sm:$0xff]  ;;  %v559_v20 = vld [vmem:[%s16913_s21 + $0x3c8] sm:$0xff] }
  0xd2   : > { %v798_v36 = vld [vmem:[%s16913_s21 + $0xb40] sm:$0xff]  ;;  %v15099_v37 = vcombine.low %v1278_v23, %v1358_v24  ;;  %v15101_v38 = vcombine.low %v1279_v25, %v1359_v26  ;;  %v1598_v40 = vunpack.c.l.s8.bf16 %v758_v35  ;;  %v1599_v43 = vunpack.c.h.s8.bf16 %v758_v35 }
  0xd3   : > { %v15260_v39 = vcombine.high %v1438_v29, %v1518_v30  ;;  %v15262_v41 = vcombine.high %v1439_v33, %v1519_v34  ;;  %v1678_v42 = vunpack.c.l.s8.bf16 %v798_v36  ;;  %v1679_v44 = vunpack.c.h.s8.bf16 %v798_v36  ;;  %v838_v45 = vld [vmem:[%s16913_s21 + $0xc80] sm:$0xff] }
  0xd4   : > { %7686 = vmatpush1.bf16.msra.mxu0 %v14939_v27  ;;  %7727 = vmatpush1.bf16.msra.mxu1 %v14941_v28  ;;  %v878_v46 = vld [vmem:[%s16913_s21 + $0xdc0] sm:$0xff]  ;;  %v15259_v47 = vcombine.low %v1438_v29, %v1518_v30  ;;  %v429_v48 = vstv %s16929_s13  ;;  %v15261_v49 = vcombine.low %v1439_v33, %v1519_v34  ;;  %v1758_v50 = vunpack.c.l.s8.bf16 %v838_v45  ;;  %v599_v30 = vld [vmem:[%s16913_s21 + $0x508] sm:$0xff] }
  0xd5   : > { %7687 = vmatprep.subr.bf16.mxu0 %v15100_v31  ;;  %7728 = vmatprep.subr.bf16.mxu1 %v15102_v32  ;;  %v1838_v51 = vunpack.c.l.s8.bf16 %v878_v46  ;;  %v432_v54 = vstv %s16931_s25  ;;  %v15420_v55 = vcombine.high %v1598_v40, %v1678_v42  ;;  %v15422_v56 = vcombine.high %v1599_v43, %v1679_v44  ;;  %v918_v59 = vld [vmem:[%s16913_s21 + $0xf00] sm:$0x55]  ;;  %v639_v31 = vld [vmem:[%s16913_s21 + $0x648] sm:$0xff] }
  0xd6   : > { %v1759_v57 = vunpack.c.h.s8.bf16 %v838_v45  ;;  %v1839_v58 = vunpack.c.h.s8.bf16 %v878_v46  ;;  %v430_v60 = vmul.f32 %v429_v48, %v428_v52  ;;  %v433_v61 = vmul.f32 %v432_v54, %v431_v53  ;;  %v799_v52 = vld [vmem:[%s16913_s21 + $0xb48] sm:$0xff] }
  0xd7   : > { %v15419_v62 = vcombine.low %v1598_v40, %v1678_v42  ;;  %v15421_v63 = vcombine.low %v1599_v43, %v1679_v44  ;;  %v1918_v1 = vunpack.c.l.s8.bf16 %v918_v59  ;;  %v15580_v2 = vcombine.high %v1758_v50, %v1838_v51  ;;  %v719_v42 = vld [vmem:[%s16913_s21 + $0x8c8] sm:$0xff] }
  0xd8   : > { %7688 = vmatpush1.bf16.msra.mxu0 %v15099_v37  ;;  %7729 = vmatpush1.bf16.msra.mxu1 %v15101_v38  ;;  %v15582_v3 = vcombine.high %v1759_v57, %v1839_v58  ;;  %v1919_v4 = vunpack.c.h.s8.bf16 %v918_v59  ;;  %v15579_v7 = vcombine.low %v1758_v50, %v1838_v51  ;;  %v15581_v8 = vcombine.low %v1759_v57, %v1839_v58  ;;  %v759_v51 = vld [vmem:[%s16913_s21 + $0xa08] sm:$0xff] }
  0xd9   : > { %7689 = vmatprep.subr.bf16.mxu0 %v15260_v39  ;;  %7730 = vmatprep.subr.bf16.mxu1 %v15262_v41  ;;  %v434_v9 = vadd.f32 %v433_v61, %v430_v60  ;;  %v15740_v10 = vcombine.high %v1918_v1, %v1918_v1  ;;  %v15739_v11 = vcombine.low %v1918_v1, %v1918_v1  ;;  %v960_v13 = vunpack.c.l.s8.bf16 %v439_v5  ;;  %v679_v41 = vld [vmem:[%s16913_s21 + $0x788] sm:$0xff] }
  0xda   : > { %v1040_v14 = vunpack.c.l.s8.bf16 %v479_v6  ;;  %v15742_v15 = vcombine.high %v1919_v4, %v1919_v4  ;;  %v15741_v16 = vcombine.low %v1919_v4, %v1919_v4  ;;  %v961_v17 = vunpack.c.h.s8.bf16 %v439_v5  ;;  %v839_v61 = vld [vmem:[%s16913_s21 + $0xc88] sm:$0xff] }
  0xdb   : > { %v1041_v18 = vunpack.c.h.s8.bf16 %v479_v6  ;;  %v436_v21 = vadd.f32 %v435_v12, %v434_v9  ;;  %v7204_v22 = vsel %vm7202_vm0, %v15739_v11, 0  ;;  %v1120_v24 = vunpack.c.l.s8.bf16 %v519_v19 }
  0xdc   : > { %7690 = vmatpush1.bf16.msra.mxu0 %v15259_v47  ;;  %7731 = vmatpush1.bf16.msra.mxu1 %v15261_v49  ;;  %v14784_v23 = vcombine.high %v960_v13, %v1040_v14  ;;  %v1200_v25 = vunpack.c.l.s8.bf16 %v559_v20  ;;  %v7210_v26 = vsel %vm7202_vm0, %v15741_v16, 0  ;;  %v1121_v28 = vunpack.c.h.s8.bf16 %v519_v19  ;;  %v480_v16 = vld [vmem:[%s16913_s21 + $0x150] sm:$0xff] }
  0xdd   : > { %7691 = vmatprep.subr.bf16.mxu0 %v15420_v55  ;;  %7732 = vmatprep.subr.bf16.mxu1 %v15422_v56  ;;  %v14786_v27 = vcombine.high %v961_v17, %v1041_v18  ;;  %v1201_v29 = vunpack.c.h.s8.bf16 %v559_v20  ;;  %v16950_v32 = vpack.c.bf16 %v436_v21, %v436_v21  ;;  %v14783_v33 = vcombine.low %v960_v13, %v1040_v14 }
  0xde   : > { %v14785_v34 = vcombine.low %v961_v17, %v1041_v18  ;;  %v14944_v35 = vcombine.high %v1120_v24, %v1200_v25  ;;  %v1280_v36 = vunpack.c.l.s8.bf16 %v599_v30  ;;  %v1360_v38 = vunpack.c.l.s8.bf16 %v639_v31 }
  0xdf   : > { %v14946_v37 = vcombine.high %v1121_v28, %v1201_v29  ;;  %v1281_v39 = vunpack.c.h.s8.bf16 %v599_v30  ;;  %v1361_v40 = vunpack.c.h.s8.bf16 %v639_v31  ;;  %v14943_v43 = vcombine.low %v1120_v24, %v1200_v25 }
  0xe0   : > { %7692 = vmatpush1.bf16.msra.mxu0 %v15419_v62  ;;  %7733 = vmatpush1.bf16.msra.mxu1 %v15421_v63  ;;  %v14945_v44 = vcombine.low %v1121_v28, %v1201_v29  ;;  %v1440_v45 = vunpack.c.l.s8.bf16 %v679_v41  ;;  %v1520_v46 = vunpack.c.l.s8.bf16 %v719_v42  ;;  %v15104_v47 = vcombine.high %v1280_v36, %v1360_v38  ;;  %v879_v62 = vld [vmem:[%s16913_s21 + $0xdc8] sm:$0xff]  ;;  %v560_v28 = vld [vmem:[%s16913_s21 + $0x3d0] sm:$0xff] }
  0xe1   : > { %7693 = vmatprep.subr.bf16.mxu0 %v15580_v2  ;;  %7734 = vmatprep.subr.bf16.mxu1 %v15582_v3  ;;  %v15106_v48 = vcombine.high %v1281_v39, %v1361_v40  ;;  %v1441_v49 = vunpack.c.h.s8.bf16 %v679_v41  ;;  %v1521_v50 = vunpack.c.h.s8.bf16 %v719_v42  ;;  %v15103_v53 = vcombine.low %v1280_v36, %v1360_v38  ;;  %v600_v38 = vld [vmem:[%s16913_s21 + $0x510] sm:$0xff] }
  0xe2   : > { %v15105_v54 = vcombine.low %v1281_v39, %v1361_v40  ;;  %v15264_v55 = vcombine.high %v1440_v45, %v1520_v46  ;;  %v1600_v56 = vunpack.c.l.s8.bf16 %v759_v51  ;;  %v1680_v58 = vunpack.c.l.s8.bf16 %v799_v52  ;;  %v640_v39 = vld [vmem:[%s16913_s21 + $0x650] sm:$0xff] }
  0xe3   : > { %v15266_v57 = vcombine.high %v1441_v49, %v1521_v50  ;;  %v1601_v59 = vunpack.c.h.s8.bf16 %v759_v51  ;;  %v1681_v60 = vunpack.c.h.s8.bf16 %v799_v52  ;;  %v15263_v63 = vcombine.low %v1440_v45, %v1520_v46 }
  0xe4   : > { %7694 = vmatpush1.bf16.msra.mxu0 %v15579_v7  ;;  %7735 = vmatpush1.bf16.msra.mxu1 %v15581_v8  ;;  %v15265_v1 = vcombine.low %v1441_v49, %v1521_v50  ;;  %v1760_v2 = vunpack.c.l.s8.bf16 %v839_v61  ;;  %v1840_v3 = vunpack.c.l.s8.bf16 %v879_v62  ;;  %v15424_v4 = vcombine.high %v1600_v56, %v1680_v58  ;;  %v919_v8 = vld [vmem:[%s16913_s21 + $0xf08] sm:$0x55]  ;;  %v720_v49 = vld [vmem:[%s16913_s21 + $0x8d0] sm:$0xff] }
  0xe5   : > { %15899 = vmatprep.subr.msk.bf16.mxu0 %vm7202_vm0, %v15740_v10  ;;  %15901 = vmatprep.subr.msk.bf16.mxu1 %vm7202_vm0, %v15742_v15  ;;  %v15426_v5 = vcombine.high %v1601_v59, %v1681_v60  ;;  %v1761_v6 = vunpack.c.h.s8.bf16 %v839_v61  ;;  %v1841_v7 = vunpack.c.h.s8.bf16 %v879_v62  ;;  %v15423_v9 = vcombine.low %v1600_v56, %v1680_v58  ;;  %v440_v15 = vld [vmem:[%s16913_s21 + $0x10] sm:$0xff] }
  0xe6   : > { %v15425_v10 = vcombine.low %v1601_v59, %v1681_v60  ;;  %v1920_v11 = vunpack.c.l.s8.bf16 %v919_v8  ;;  %v1921_v12 = vunpack.c.h.s8.bf16 %v919_v8  ;;  %v15584_v13 = vcombine.high %v1760_v2, %v1840_v3  ;;  %v760_v58 = vld [vmem:[%s16913_s21 + $0xa10] sm:$0xff] }
  0xe7   : > { %v15586_v14 = vcombine.high %v1761_v6, %v1841_v7  ;;  %v15583_v17 = vcombine.low %v1760_v2, %v1840_v3  ;;  %v15585_v18 = vcombine.low %v1761_v6, %v1841_v7  ;;  %v962_v21 = vunpack.c.l.s8.bf16 %v440_v15  ;;  %v800_v59 = vld [vmem:[%s16913_s21 + $0xb50] sm:$0xff] }
  0xe8   : > { %7696 = vmatpush1.bf16.msra.mxu0 %v7204_v22  ;;  %7737 = vmatpush1.bf16.msra.mxu1 %v7210_v26  ;;  %v15743_v19 = vcombine.low %v1920_v11, %v1920_v11  ;;  %v15745_v20 = vcombine.low %v1921_v12, %v1921_v12  ;;  %v1042_v22 = vunpack.c.l.s8.bf16 %v480_v16  ;;  %v15746_v24 = vcombine.high %v1921_v12, %v1921_v12  ;;  %v880_v6 = vld [vmem:[%s16913_s21 + $0xdd0] sm:$0xff] }
  0xe9   : > { %7765 = vmatprep.subr.bf16.mxu0 %v14784_v23  ;;  %7806 = vmatprep.subr.bf16.mxu1 %v14786_v27  ;;  %v15744_v23 = vcombine.high %v1920_v11, %v1920_v11  ;;  %v963_v25 = vunpack.c.h.s8.bf16 %v440_v15  ;;  %v1043_v26 = vunpack.c.h.s8.bf16 %v480_v16  ;;  %v520_v27 = vld [vmem:[%s16913_s21 + $0x290] sm:$0xff]  ;;  %v1282_v42 = vunpack.c.l.s8.bf16 %v600_v38 }
  0xea   : > { %v7216_v29 = vsel %vm7202_vm0, %v15743_v19, 0  ;;  %v7222_v30 = vsel %vm7202_vm0, %v15745_v20, 0  ;;  %v14788_v31 = vcombine.high %v962_v21, %v1042_v22  ;;  %v1123_v36 = vunpack.c.h.s8.bf16 %v520_v27  ;;  %v920_v15 = vld [vmem:[%s16913_s21 + $0xf10] sm:$0x55]  ;;  %v441_v19 = vld [vmem:[%s16913_s21 + $0x18] sm:$0xff] }
  0xeb   : > { %15900 = vmatmul.mubr.msk.bf16.vlgmr.msra.gmra.mrb[0].mxu0 %vm7198_vm1, %v16950_v32  ;;  %15902 = vmatmul.mubr.msk.bf16.vlgmr.msra.gmra.mrb[0].mxu1 %vm7198_vm1, %v16950_v32  ;;  %v14787_v40 = vcombine.low %v962_v21, %v1042_v22  ;;  %v14789_v41 = vcombine.low %v963_v25, %v1043_v26  ;;  %v1283_v46 = vunpack.c.h.s8.bf16 %v600_v38  ;;  %v1602_v62 = vunpack.c.l.s8.bf16 %v760_v58 }
  0xec   : > { %7766 = vmatpush1.bf16.msra.mxu0 %v14783_v33  ;;  %7807 = vmatpush1.bf16.msra.mxu1 %v14785_v34  ;;  %v1122_v33 = vunpack.c.l.s8.bf16 %v520_v27  ;;  %v14790_v34 = vcombine.high %v963_v25, %v1043_v26  ;;  %v1603_v3 = vunpack.c.h.s8.bf16 %v760_v58  ;;  %v1842_v12 = vunpack.c.l.s8.bf16 %v880_v6 }
  0xed   : > { %7767 = vmatprep.subr.bf16.mxu0 %v14944_v35  ;;  %7808 = vmatprep.subr.bf16.mxu1 %v14946_v37  ;;  %v1202_v35 = vunpack.c.l.s8.bf16 %v560_v28  ;;  %v1203_v37 = vunpack.c.h.s8.bf16 %v560_v28  ;;  %v1923_v22 = vunpack.c.h.s8.bf16 %v920_v15  ;;  %v964_v25 = vunpack.c.l.s8.bf16 %v441_v19 }
  0xee   : > { %7797 = vmatprep.mubr.bf16.mxu0 %v16605_v0  ;;  %7838 = vmatprep.mubr.bf16.mxu1 %v16605_v0 }
  0xef   : > { %v14950_v45 = vcombine.high %v1123_v36, %v1203_v37  ;;  %v14947_v50 = vcombine.low %v1122_v33, %v1202_v35  ;;  %v14949_v51 = vcombine.low %v1123_v36, %v1203_v37  ;;  %v561_v36 = vld [vmem:[%s16913_s21 + $0x3d8] sm:$0xff] }
  0xf0   : > { %7768 = vmatpush1.bf16.msra.mxu0 %v14943_v43  ;;  %7809 = vmatpush1.bf16.msra.mxu1 %v14945_v44  ;;  %v1362_v43 = vunpack.c.l.s8.bf16 %v640_v39  ;;  %v14948_v44 = vcombine.high %v1122_v33, %v1202_v35  ;;  %v965_v33 = vunpack.c.h.s8.bf16 %v441_v19  ;;  %v521_v35 = vld [vmem:[%s16913_s21 + $0x298] sm:$0xff] }
  0xf1   : > { %7769 = vmatprep.subr.bf16.mxu0 %v15104_v47  ;;  %7810 = vmatprep.subr.bf16.mxu1 %v15106_v48  ;;  %v1363_v47 = vunpack.c.h.s8.bf16 %v640_v39  ;;  %v680_v48 = vld [vmem:[%s16913_s21 + $0x790] sm:$0xff]  ;;  %v1124_v39 = vunpack.c.l.s8.bf16 %v521_v35 }
  0xf2   : > { %v15108_v52 = vcombine.high %v1282_v42, %v1362_v43  ;;  %v1443_v56 = vunpack.c.h.s8.bf16 %v680_v48  ;;  %v15107_v60 = vcombine.low %v1282_v42, %v1362_v43  ;;  %v1125_v43 = vunpack.c.h.s8.bf16 %v521_v35 }
  0xf3   : > { %v15109_v61 = vcombine.low %v1283_v46, %v1363_v47 }
  0xf4   : > { %7770 = vmatpush1.bf16.msra.mxu0 %v15103_v53  ;;  %7811 = vmatpush1.bf16.msra.mxu1 %v15105_v54  ;;  %v1442_v53 = vunpack.c.l.s8.bf16 %v680_v48  ;;  %v15110_v54 = vcombine.high %v1283_v46, %v1363_v47  ;;  %v641_v46 = vld [vmem:[%s16913_s21 + $0x658] sm:$0xff] }
  0xf5   : > { %7771 = vmatprep.subr.bf16.mxu0 %v15264_v55  ;;  %7812 = vmatprep.subr.bf16.mxu1 %v15266_v57  ;;  %v1522_v55 = vunpack.c.l.s8.bf16 %v720_v49  ;;  %v1523_v57 = vunpack.c.h.s8.bf16 %v720_v49 }
  0xf7   : > { %v15270_v2 = vcombine.high %v1443_v56, %v1523_v57  ;;  %v15267_v7 = vcombine.low %v1442_v53, %v1522_v55  ;;  %v15269_v8 = vcombine.low %v1443_v56, %v1523_v57  ;;  %v721_v56 = vld [vmem:[%s16913_s21 + $0x8d8] sm:$0xff] }
  0xf8   : > { %7772 = vmatpush1.bf16.msra.mxu0 %v15263_v63  ;;  %7813 = vmatpush1.bf16.msra.mxu1 %v15265_v1  ;;  %v1682_v63 = vunpack.c.l.s8.bf16 %v800_v59  ;;  %v15268_v1 = vcombine.high %v1442_v53, %v1522_v55  ;;  %v681_v55 = vld [vmem:[%s16913_s21 + $0x798] sm:$0xff] }
  0xf9   : > { %7773 = vmatprep.subr.bf16.mxu0 %v15424_v4  ;;  %7814 = vmatprep.subr.bf16.mxu1 %v15426_v5  ;;  %v1683_v4 = vunpack.c.h.s8.bf16 %v800_v59  ;;  %v840_v5 = vld [vmem:[%s16913_s21 + $0xc90] sm:$0xff]  ;;  %v1444_v59 = vunpack.c.l.s8.bf16 %v681_v55 }
  0xfa   : > { %v15427_v16 = vcombine.low %v1602_v62, %v1682_v63 }
  0xfb   : > { %v15430_v11 = vcombine.high %v1603_v3, %v1683_v4 }
  0xfc   : > { %7774 = vmatpush1.bf16.msra.mxu0 %v15423_v9  ;;  %7815 = vmatpush1.bf16.msra.mxu1 %v15425_v10  ;;  %v15428_v9 = vcombine.high %v1602_v62, %v1682_v63  ;;  %v1762_v10 = vunpack.c.l.s8.bf16 %v840_v5  ;;  %v1445_v63 = vunpack.c.h.s8.bf16 %v681_v55 }
  0xfd   : > { %7775 = vmatprep.subr.bf16.mxu0 %v15584_v13  ;;  %7816 = vmatprep.subr.bf16.mxu1 %v15586_v14  ;;  %v1763_v13 = vunpack.c.h.s8.bf16 %v840_v5  ;;  %v1843_v14 = vunpack.c.h.s8.bf16 %v880_v6 }
  0xfe   : > { %v15588_v20 = vcombine.high %v1762_v10, %v1842_v12 }
  0xff   : > { %v15590_v21 = vcombine.high %v1763_v13, %v1843_v14  ;;  %v15589_v26 = vcombine.low %v1763_v13, %v1843_v14  ;;  %v881_v13 = vld [vmem:[%s16913_s21 + $0xdd8] sm:$0xff] }
 0x100   : > { %7776 = vmatpush1.bf16.msra.mxu0 %v15583_v17  ;;  %7817 = vmatpush1.bf16.msra.mxu1 %v15585_v18  ;;  %v15429_v17 = vcombine.low %v1603_v3, %v1683_v4  ;;  %v1922_v18 = vunpack.c.l.s8.bf16 %v920_v15  ;;  %v801_v3 = vld [vmem:[%s16913_s21 + $0xb58] sm:$0xff] }
 0x101   : > { %15903 = vmatprep.subr.msk.bf16.mxu0 %vm7202_vm0, %v15744_v23  ;;  %15905 = vmatprep.subr.msk.bf16.mxu1 %vm7202_vm0, %v15746_v24  ;;  %v481_v23 = vld [vmem:[%s16913_s21 + $0x158] sm:$0xff]  ;;  %v15587_v24 = vcombine.low %v1762_v10, %v1842_v12 }
 0x102   : > { %v15748_v27 = vcombine.high %v1922_v18, %v1922_v18  ;;  %v15747_v28 = vcombine.low %v1922_v18, %v1922_v18  ;;  %v841_v12 = vld [vmem:[%s16913_s21 + $0xc98] sm:$0xff] }
 0x104   : > { %7778 = vmatpush1.bf16.msra.mxu0 %v7216_v29  ;;  %7819 = vmatpush1.bf16.msra.mxu1 %v7222_v30  ;;  %v1044_v29 = vunpack.c.l.s8.bf16 %v481_v23  ;;  %v15750_v30 = vcombine.high %v1923_v22, %v1923_v22  ;;  %v7228_v37 = vsel %vm7202_vm0, %v15747_v28, 0 }
 0x105   : > { %7847 = vmatprep.subr.bf16.mxu0 %v14788_v31  ;;  %7888 = vmatprep.subr.bf16.mxu1 %v14790_v34  ;;  %v15749_v31 = vcombine.low %v1923_v22, %v1923_v22  ;;  %v1045_v34 = vunpack.c.h.s8.bf16 %v481_v23  ;;  %v921_v22 = vld [vmem:[%s16913_s21 + $0xf18] sm:$0x55] }
 0x106   : > { %v14792_v38 = vcombine.high %v964_v25, %v1044_v29  ;;  %v14791_v47 = vcombine.low %v964_v25, %v1044_v29  ;;  %v1924_v25 = vunpack.c.l.s8.bf16 %v921_v22  ;;  %v442_v29 = vld [vmem:[%s16913_s21 + $0x20] sm:$0xff] }
 0x107   : > { %15904 = vmatmul.mubr.msk.bf16.vlgmr.msra.gmra.mrb[4].mxu0 %vm7198_vm1, %v16950_v32  ;;  %15906 = vmatmul.mubr.msk.bf16.vlgmr.msra.gmra.mrb[4].mxu1 %vm7198_vm1, %v16950_v32  ;;  %v14794_v42 = vcombine.high %v965_v33, %v1045_v34  ;;  %v14793_v48 = vcombine.low %v965_v33, %v1045_v34 }
 0x108   : > { %7848 = vmatpush1.bf16.msra.mxu0 %v14787_v40  ;;  %7889 = vmatpush1.bf16.msra.mxu1 %v14789_v41  ;;  %v1204_v40 = vunpack.c.l.s8.bf16 %v561_v36  ;;  %v7234_v41 = vsel %vm7202_vm0, %v15749_v31, 0  ;;  %v15751_v34 = vcombine.low %v1924_v25, %v1924_v25 }
 0x109   : > { %7849 = vmatprep.subr.bf16.mxu0 %v14948_v44  ;;  %7890 = vmatprep.subr.bf16.mxu1 %v14950_v45  ;;  %v1205_v44 = vunpack.c.h.s8.bf16 %v561_v36  ;;  %v601_v45 = vld [vmem:[%s16913_s21 + $0x518] sm:$0xff]  ;;  %v966_v36 = vunpack.c.l.s8.bf16 %v442_v29 }
 0x10a   : > { %7879 = vmatprep.mubr.bf16.mxu0 %v16605_v0  ;;  %7920 = vmatprep.mubr.bf16.mxu1 %v16605_v0  ;;  %v14952_v49 = vcombine.high %v1124_v39, %v1204_v40  ;;  %v1285_v53 = vunpack.c.h.s8.bf16 %v601_v45  ;;  %v14951_v57 = vcombine.low %v1124_v39, %v1204_v40  ;;  %v967_v40 = vunpack.c.h.s8.bf16 %v442_v29  ;;  %v922_v29 = vld [vmem:[%s16913_s21 + $0xf20] sm:$0x55] }
 0x10b   : > { %v14953_v58 = vcombine.low %v1125_v43, %v1205_v44 }
 0x10c   : > { %7850 = vmatpush1.bf16.msra.mxu0 %v14947_v50  ;;  %7891 = vmatpush1.bf16.msra.mxu1 %v14949_v51  ;;  %v1284_v50 = vunpack.c.l.s8.bf16 %v601_v45  ;;  %v14954_v51 = vcombine.high %v1125_v43, %v1205_v44  ;;  %v562_v43 = vld [vmem:[%s16913_s21 + $0x3e0] sm:$0xff]  ;;  %v7240_v44 = vsel %vm7202_vm0, %v15751_v34, 0  ;;  %v443_v34 = vld [vmem:[%s16913_s21 + $0x28] sm:$0xff] }
 0x10d   : > { %7851 = vmatprep.subr.bf16.mxu0 %v15108_v52  ;;  %7892 = vmatprep.subr.bf16.mxu1 %v15110_v54  ;;  %v1364_v52 = vunpack.c.l.s8.bf16 %v641_v46  ;;  %v1365_v54 = vunpack.c.h.s8.bf16 %v641_v46 }
 0x10f   : > { %v15114_v62 = vcombine.high %v1285_v53, %v1365_v54  ;;  %v15111_v4 = vcombine.low %v1284_v50, %v1364_v52  ;;  %v15113_v5 = vcombine.low %v1285_v53, %v1365_v54  ;;  %v642_v53 = vld [vmem:[%s16913_s21 + $0x660] sm:$0xff] }
 0x110   : > { %7852 = vmatpush1.bf16.msra.mxu0 %v15107_v60  ;;  %7893 = vmatpush1.bf16.msra.mxu1 %v15109_v61  ;;  %v1524_v60 = vunpack.c.l.s8.bf16 %v721_v56  ;;  %v15112_v61 = vcombine.high %v1284_v50, %v1364_v52  ;;  %v602_v52 = vld [vmem:[%s16913_s21 + $0x520] sm:$0xff] }
 0x111   : > { %7853 = vmatprep.subr.bf16.mxu0 %v15268_v1  ;;  %7894 = vmatprep.subr.bf16.mxu1 %v15270_v2  ;;  %v1525_v1 = vunpack.c.h.s8.bf16 %v721_v56  ;;  %v761_v2 = vld [vmem:[%s16913_s21 + $0xa18] sm:$0xff]  ;;  %v1286_v56 = vunpack.c.l.s8.bf16 %v602_v52 }
 0x112   : > { %v15272_v6 = vcombine.high %v1444_v59, %v1524_v60  ;;  %v1605_v10 = vunpack.c.h.s8.bf16 %v761_v2  ;;  %v15271_v14 = vcombine.low %v1444_v59, %v1524_v60  ;;  %v1287_v60 = vunpack.c.h.s8.bf16 %v602_v52 }
 0x113   : > { %v15273_v15 = vcombine.low %v1445_v63, %v1525_v1 }
 0x114   : > { %7854 = vmatpush1.bf16.msra.mxu0 %v15267_v7  ;;  %7895 = vmatpush1.bf16.msra.mxu1 %v15269_v8  ;;  %v1604_v7 = vunpack.c.l.s8.bf16 %v761_v2  ;;  %v15274_v8 = vcombine.high %v1445_v63, %v1525_v1  ;;  %v722_v63 = vld [vmem:[%s16913_s21 + $0x8e0] sm:$0xff] }
 0x115   : > { %7855 = vmatprep.subr.bf16.mxu0 %v15428_v9  ;;  %7896 = vmatprep.subr.bf16.mxu1 %v15430_v11  ;;  %v1684_v9 = vunpack.c.l.s8.bf16 %v801_v3  ;;  %v1685_v11 = vunpack.c.h.s8.bf16 %v801_v3 }
 0x117   : > { %v15432_v18 = vcombine.high %v1604_v7, %v1684_v9  ;;  %v15434_v19 = vcombine.high %v1605_v10, %v1685_v11  ;;  %v15431_v23 = vcombine.low %v1604_v7, %v1684_v9  ;;  %v762_v9 = vld [vmem:[%s16913_s21 + $0xa20] sm:$0xff] }
 0x118   : > { %7856 = vmatpush1.bf16.msra.mxu0 %v15427_v16  ;;  %7897 = vmatpush1.bf16.msra.mxu1 %v15429_v17  ;;  %v1764_v16 = vunpack.c.l.s8.bf16 %v841_v12  ;;  %v1844_v17 = vunpack.c.l.s8.bf16 %v881_v13 }
 0x119   : > { %7857 = vmatprep.subr.bf16.mxu0 %v15588_v20  ;;  %7898 = vmatprep.subr.bf16.mxu1 %v15590_v21  ;;  %v1765_v20 = vunpack.c.h.s8.bf16 %v841_v12  ;;  %v1845_v21 = vunpack.c.h.s8.bf16 %v881_v13  ;;  %v1606_v13 = vunpack.c.l.s8.bf16 %v762_v9 }
 0x11a   : > { %v15591_v31 = vcombine.low %v1764_v16, %v1844_v17 }
 0x11b   : > { %v15594_v28 = vcombine.high %v1765_v20, %v1845_v21  ;;  %v15593_v33 = vcombine.low %v1765_v20, %v1845_v21  ;;  %v882_v20 = vld [vmem:[%s16913_s21 + $0xde0] sm:$0xff] }
 0x11c   : > { %7858 = vmatpush1.bf16.msra.mxu0 %v15587_v24  ;;  %7899 = vmatpush1.bf16.msra.mxu1 %v15589_v26  ;;  %v15433_v24 = vcombine.low %v1605_v10, %v1685_v11  ;;  %v1925_v26 = vunpack.c.h.s8.bf16 %v921_v22  ;;  %v802_v10 = vld [vmem:[%s16913_s21 + $0xb60] sm:$0xff] }
 0x11d   : > { %15907 = vmatprep.subr.msk.bf16.mxu0 %vm7202_vm0, %v15748_v27  ;;  %15909 = vmatprep.subr.msk.bf16.mxu1 %vm7202_vm0, %v15750_v30  ;;  %v15592_v27 = vcombine.high %v1764_v16, %v1844_v17  ;;  %v482_v30 = vld [vmem:[%s16913_s21 + $0x160] sm:$0xff]  ;;  %v1607_v17 = vunpack.c.h.s8.bf16 %v762_v9 }
 0x11e   : > { %v15753_v35 = vcombine.low %v1925_v26, %v1925_v26  ;;  %v15754_v39 = vcombine.high %v1925_v26, %v1925_v26  ;;  %v1846_v26 = vunpack.c.l.s8.bf16 %v882_v20 }
 0x120   : > { %7860 = vmatpush1.bf16.msra.mxu0 %v7228_v37  ;;  %7901 = vmatpush1.bf16.msra.mxu1 %v7234_v41  ;;  %v1046_v37 = vunpack.c.l.s8.bf16 %v482_v30  ;;  %v1047_v41 = vunpack.c.h.s8.bf16 %v482_v30  ;;  %v7246_v45 = vsel %vm7202_vm0, %v15753_v35, 0 }
 0x121   : > { %7929 = vmatprep.subr.bf16.mxu0 %v14792_v38  ;;  %7970 = vmatprep.subr.bf16.mxu1 %v14794_v42  ;;  %v15752_v38 = vcombine.high %v1924_v25, %v1924_v25  ;;  %v522_v42 = vld [vmem:[%s16913_s21 + $0x2a0] sm:$0xff] }
 0x122   : > { %v14796_v46 = vcombine.high %v966_v36, %v1046_v37  ;;  %v1127_v50 = vunpack.c.h.s8.bf16 %v522_v42  ;;  %v14795_v54 = vcombine.low %v966_v36, %v1046_v37  ;;  %v14797_v55 = vcombine.low %v967_v40, %v1047_v41 }
 0x123   : > { %15908 = vmatmul.mubr.msk.bf16.vlgmr.msra.gmra.mrb[8].mxu0 %vm7198_vm1, %v16950_v32  ;;  %15910 = vmatmul.mubr.msk.bf16.vlgmr.msra.gmra.mrb[8].mxu1 %vm7198_vm1, %v16950_v32  ;;  %v1927_v37 = vunpack.c.h.s8.bf16 %v922_v29 }
 0x124   : > { %7930 = vmatpush1.bf16.msra.mxu0 %v14791_v47  ;;  %7971 = vmatpush1.bf16.msra.mxu1 %v14793_v48  ;;  %v1126_v47 = vunpack.c.l.s8.bf16 %v522_v42  ;;  %v14798_v48 = vcombine.high %v967_v40, %v1047_v41  ;;  %v968_v40 = vunpack.c.l.s8.bf16 %v443_v34 }
 0x125   : > { %7931 = vmatprep.subr.bf16.mxu0 %v14952_v49  ;;  %7972 = vmatprep.subr.bf16.mxu1 %v14954_v51  ;;  %v1206_v49 = vunpack.c.l.s8.bf16 %v562_v43  ;;  %v1207_v51 = vunpack.c.h.s8.bf16 %v562_v43 }
 0x126   : > { %7961 = vmatprep.mubr.bf16.mxu0 %v16605_v0  ;;  %8002 = vmatprep.mubr.bf16.mxu1 %v16605_v0 }
 0x127   : > { %v14958_v59 = vcombine.high %v1127_v50, %v1207_v51  ;;  %v14955_v1 = vcombine.low %v1126_v47, %v1206_v49  ;;  %v14957_v2 = vcombine.low %v1127_v50, %v1207_v51  ;;  %v563_v50 = vld [vmem:[%s16913_s21 + $0x3e8] sm:$0xff] }
 0x128   : > { %7932 = vmatpush1.bf16.msra.mxu0 %v14951_v57  ;;  %7973 = vmatpush1.bf16.msra.mxu1 %v14953_v58  ;;  %v1366_v57 = vunpack.c.l.s8.bf16 %v642_v53  ;;  %v14956_v58 = vcombine.high %v1126_v47, %v1206_v49  ;;  %v969_v47 = vunpack.c.h.s8.bf16 %v443_v34  ;;  %v523_v49 = vld [vmem:[%s16913_s21 + $0x2a8] sm:$0xff] }
 0x129   : > { %7933 = vmatprep.subr.bf16.mxu0 %v15112_v61  ;;  %7974 = vmatprep.subr.bf16.mxu1 %v15114_v62  ;;  %v1367_v61 = vunpack.c.h.s8.bf16 %v642_v53  ;;  %v682_v62 = vld [vmem:[%s16913_s21 + $0x7a0] sm:$0xff]  ;;  %v1128_v53 = vunpack.c.l.s8.bf16 %v523_v49 }
 0x12a   : > { %v15116_v3 = vcombine.high %v1286_v56, %v1366_v57  ;;  %v1447_v7 = vunpack.c.h.s8.bf16 %v682_v62  ;;  %v15115_v11 = vcombine.low %v1286_v56, %v1366_v57  ;;  %v1129_v57 = vunpack.c.h.s8.bf16 %v523_v49 }
 0x12b   : > { %v15117_v12 = vcombine.low %v1287_v60, %v1367_v61 }
 0x12c   : > { %7934 = vmatpush1.bf16.msra.mxu0 %v15111_v4  ;;  %7975 = vmatpush1.bf16.msra.mxu1 %v15113_v5  ;;  %v1446_v4 = vunpack.c.l.s8.bf16 %v682_v62  ;;  %v15118_v5 = vcombine.high %v1287_v60, %v1367_v61  ;;  %v643_v60 = vld [vmem:[%s16913_s21 + $0x668] sm:$0xff] }
 0x12d   : > { %7935 = vmatprep.subr.bf16.mxu0 %v15272_v6  ;;  %7976 = vmatprep.subr.bf16.mxu1 %v15274_v8  ;;  %v1526_v6 = vunpack.c.l.s8.bf16 %v722_v63  ;;  %v1527_v8 = vunpack.c.h.s8.bf16 %v722_v63 }
 0x12f   : > { %v15278_v16 = vcombine.high %v1447_v7, %v1527_v8  ;;  %v15275_v21 = vcombine.low %v1446_v4, %v1526_v6  ;;  %v15277_v22 = vcombine.low %v1447_v7, %v1527_v8  ;;  %v723_v7 = vld [vmem:[%s16913_s21 + $0x8e8] sm:$0xff] }
 0x130   : > { %7936 = vmatpush1.bf16.msra.mxu0 %v15271_v14  ;;  %7977 = vmatpush1.bf16.msra.mxu1 %v15273_v15  ;;  %v1686_v14 = vunpack.c.l.s8.bf16 %v802_v10  ;;  %v15276_v15 = vcombine.high %v1446_v4, %v1526_v6  ;;  %v683_v6 = vld [vmem:[%s16913_s21 + $0x7a8] sm:$0xff] }
 0x131   : > { %7937 = vmatprep.subr.bf16.mxu0 %v15432_v18  ;;  %7978 = vmatprep.subr.bf16.mxu1 %v15434_v19  ;;  %v1687_v18 = vunpack.c.h.s8.bf16 %v802_v10  ;;  %v842_v19 = vld [vmem:[%s16913_s21 + $0xca0] sm:$0xff]  ;;  %v1448_v10 = vunpack.c.l.s8.bf16 %v683_v6 }
 0x132   : > { %v15435_v30 = vcombine.low %v1606_v13, %v1686_v14 }
 0x133   : > { %v15438_v25 = vcombine.high %v1607_v17, %v1687_v18 }
 0x134   : > { %7938 = vmatpush1.bf16.msra.mxu0 %v15431_v23  ;;  %7979 = vmatpush1.bf16.msra.mxu1 %v15433_v24  ;;  %v15436_v23 = vcombine.high %v1606_v13, %v1686_v14  ;;  %v1766_v24 = vunpack.c.l.s8.bf16 %v842_v19  ;;  %v1449_v14 = vunpack.c.h.s8.bf16 %v683_v6 }
 0x135   : > { %7939 = vmatprep.subr.bf16.mxu0 %v15592_v27  ;;  %7980 = vmatprep.subr.bf16.mxu1 %v15594_v28  ;;  %v1767_v27 = vunpack.c.h.s8.bf16 %v842_v19  ;;  %v1847_v28 = vunpack.c.h.s8.bf16 %v882_v20 }
 0x136   : > { %v15596_v35 = vcombine.high %v1766_v24, %v1846_v26 }
 0x137   : > { %v15598_v36 = vcombine.high %v1767_v27, %v1847_v28  ;;  %v15597_v41 = vcombine.low %v1767_v27, %v1847_v28  ;;  %v883_v27 = vld [vmem:[%s16913_s21 + $0xde8] sm:$0xff] }
 0x138   : > { %7940 = vmatpush1.bf16.msra.mxu0 %v15591_v31  ;;  %7981 = vmatpush1.bf16.msra.mxu1 %v15593_v33  ;;  %v15437_v31 = vcombine.low %v1607_v17, %v1687_v18  ;;  %v1926_v33 = vunpack.c.l.s8.bf16 %v922_v29  ;;  %v803_v17 = vld [vmem:[%s16913_s21 + $0xb68] sm:$0xff] }
 0x139   : > { %15911 = vmatprep.subr.msk.bf16.mxu0 %vm7202_vm0, %v15752_v38  ;;  %15913 = vmatprep.subr.msk.bf16.mxu1 %vm7202_vm0, %v15754_v39  ;;  %v483_v38 = vld [vmem:[%s16913_s21 + $0x168] sm:$0xff]  ;;  %v15595_v39 = vcombine.low %v1766_v24, %v1846_v26 }
 0x13a   : > { %v15756_v42 = vcombine.high %v1926_v33, %v1926_v33  ;;  %v15755_v43 = vcombine.low %v1926_v33, %v1926_v33  ;;  %v843_v26 = vld [vmem:[%s16913_s21 + $0xca8] sm:$0xff] }
 0x13c   : > { %7942 = vmatpush1.bf16.msra.mxu0 %v7240_v44  ;;  %7983 = vmatpush1.bf16.msra.mxu1 %v7246_v45  ;;  %v1048_v44 = vunpack.c.l.s8.bf16 %v483_v38  ;;  %v15758_v45 = vcombine.high %v1927_v37, %v1927_v37  ;;  %v7252_v51 = vsel %vm7202_vm0, %v15755_v43, 0 }
 0x13d   : > { %8011 = vmatprep.subr.bf16.mxu0 %v14796_v46  ;;  %8052 = vmatprep.subr.bf16.mxu1 %v14798_v48  ;;  %v15757_v46 = vcombine.low %v1927_v37, %v1927_v37  ;;  %v1049_v48 = vunpack.c.h.s8.bf16 %v483_v38  ;;  %v923_v37 = vld [vmem:[%s16913_s21 + $0xf28] sm:$0x55] }
 0x13e   : > { %v14800_v52 = vcombine.high %v968_v40, %v1048_v44  ;;  %v14799_v61 = vcombine.low %v968_v40, %v1048_v44  ;;  %v1928_v40 = vunpack.c.l.s8.bf16 %v923_v37  ;;  %v444_v44 = vld [vmem:[%s16913_s21 + $0x30] sm:$0xff] }
 0x13f   : > { %15912 = vmatmul.mubr.msk.bf16.vlgmr.msra.gmra.mrb[12].mxu0 %vm7198_vm1, %v16950_v32  ;;  %15914 = vmatmul.mubr.msk.bf16.vlgmr.msra.gmra.mrb[12].mxu1 %vm7198_vm1, %v16950_v32  ;;  %v14802_v56 = vcombine.high %v969_v47, %v1049_v48  ;;  %v14801_v62 = vcombine.low %v969_v47, %v1049_v48 }
 0x140   : > { %8012 = vmatpush1.bf16.msra.mxu0 %v14795_v54  ;;  %8053 = vmatpush1.bf16.msra.mxu1 %v14797_v55  ;;  %v1208_v54 = vunpack.c.l.s8.bf16 %v563_v50  ;;  %v7258_v55 = vsel %vm7202_vm0, %v15757_v46, 0  ;;  %v15759_v48 = vcombine.low %v1928_v40, %v1928_v40 }
 0x141   : > { %8013 = vmatprep.subr.bf16.mxu0 %v14956_v58  ;;  %8054 = vmatprep.subr.bf16.mxu1 %v14958_v59  ;;  %v1209_v58 = vunpack.c.h.s8.bf16 %v563_v50  ;;  %v603_v59 = vld [vmem:[%s16913_s21 + $0x528] sm:$0xff]  ;;  %v970_v50 = vunpack.c.l.s8.bf16 %v444_v44 }
 0x142   : > { %8043 = vmatprep.mubr.bf16.mxu0 %v16605_v0  ;;  %8084 = vmatprep.mubr.bf16.mxu1 %v16605_v0  ;;  %v14960_v63 = vcombine.high %v1128_v53, %v1208_v54  ;;  %v1289_v4 = vunpack.c.h.s8.bf16 %v603_v59  ;;  %v14959_v8 = vcombine.low %v1128_v53, %v1208_v54  ;;  %v971_v54 = vunpack.c.h.s8.bf16 %v444_v44  ;;  %v924_v44 = vld [vmem:[%s16913_s21 + $0xf30] sm:$0x55] }
 0x143   : > { %v14961_v9 = vcombine.low %v1129_v57, %v1209_v58 }
 0x144   : > { %8014 = vmatpush1.bf16.msra.mxu0 %v14955_v1  ;;  %8055 = vmatpush1.bf16.msra.mxu1 %v14957_v2  ;;  %v1288_v1 = vunpack.c.l.s8.bf16 %v603_v59  ;;  %v14962_v2 = vcombine.high %v1129_v57, %v1209_v58  ;;  %v564_v57 = vld [vmem:[%s16913_s21 + $0x3f0] sm:$0xff]  ;;  %v7264_v58 = vsel %vm7202_vm0, %v15759_v48, 0  ;;  %v445_v48 = vld [vmem:[%s16913_s21 + $0x38] sm:$0xff] }
 0x145   : > { %8015 = vmatprep.subr.bf16.mxu0 %v15116_v3  ;;  %8056 = vmatprep.subr.bf16.mxu1 %v15118_v5  ;;  %v1368_v3 = vunpack.c.l.s8.bf16 %v643_v60  ;;  %v1369_v5 = vunpack.c.h.s8.bf16 %v643_v60 }
 0x147   : > { %v15122_v13 = vcombine.high %v1289_v4, %v1369_v5  ;;  %v15119_v18 = vcombine.low %v1288_v1, %v1368_v3  ;;  %v15121_v19 = vcombine.low %v1289_v4, %v1369_v5  ;;  %v644_v4 = vld [vmem:[%s16913_s21 + $0x670] sm:$0xff] }
 0x148   : > { %8016 = vmatpush1.bf16.msra.mxu0 %v15115_v11  ;;  %8057 = vmatpush1.bf16.msra.mxu1 %v15117_v12  ;;  %v1528_v11 = vunpack.c.l.s8.bf16 %v723_v7  ;;  %v15120_v12 = vcombine.high %v1288_v1, %v1368_v3  ;;  %v604_v3 = vld [vmem:[%s16913_s21 + $0x530] sm:$0xff] }
 0x149   : > { %8017 = vmatprep.subr.bf16.mxu0 %v15276_v15  ;;  %8058 = vmatprep.subr.bf16.mxu1 %v15278_v16  ;;  %v1529_v15 = vunpack.c.h.s8.bf16 %v723_v7  ;;  %v763_v16 = vld [vmem:[%s16913_s21 + $0xa28] sm:$0xff]  ;;  %v1290_v7 = vunpack.c.l.s8.bf16 %v604_v3 }
 0x14a   : > { %v15280_v20 = vcombine.high %v1448_v10, %v1528_v11  ;;  %v1609_v24 = vunpack.c.h.s8.bf16 %v763_v16  ;;  %v15279_v28 = vcombine.low %v1448_v10, %v1528_v11  ;;  %v1291_v11 = vunpack.c.h.s8.bf16 %v604_v3 }
 0x14b   : > { %v15281_v29 = vcombine.low %v1449_v14, %v1529_v15 }
 0x14c   : > { %8018 = vmatpush1.bf16.msra.mxu0 %v15275_v21  ;;  %8059 = vmatpush1.bf16.msra.mxu1 %v15277_v22  ;;  %v1608_v21 = vunpack.c.l.s8.bf16 %v763_v16  ;;  %v15282_v22 = vcombine.high %v1449_v14, %v1529_v15  ;;  %v724_v14 = vld [vmem:[%s16913_s21 + $0x8f0] sm:$0xff] }
 0x14d   : > { %8019 = vmatprep.subr.bf16.mxu0 %v15436_v23  ;;  %8060 = vmatprep.subr.bf16.mxu1 %v15438_v25  ;;  %v1688_v23 = vunpack.c.l.s8.bf16 %v803_v17  ;;  %v1689_v25 = vunpack.c.h.s8.bf16 %v803_v17 }
 0x14f   : > { %v15440_v33 = vcombine.high %v1608_v21, %v1688_v23  ;;  %v15442_v34 = vcombine.high %v1609_v24, %v1689_v25  ;;  %v15439_v38 = vcombine.low %v1608_v21, %v1688_v23  ;;  %v764_v23 = vld [vmem:[%s16913_s21 + $0xa30] sm:$0xff] }
 0x150   : > { %8020 = vmatpush1.bf16.msra.mxu0 %v15435_v30  ;;  %8061 = vmatpush1.bf16.msra.mxu1 %v15437_v31  ;;  %v1768_v30 = vunpack.c.l.s8.bf16 %v843_v26  ;;  %v1848_v31 = vunpack.c.l.s8.bf16 %v883_v27 }
 0x151   : > { %8021 = vmatprep.subr.bf16.mxu0 %v15596_v35  ;;  %8062 = vmatprep.subr.bf16.mxu1 %v15598_v36  ;;  %v1769_v35 = vunpack.c.h.s8.bf16 %v843_v26  ;;  %v1849_v36 = vunpack.c.h.s8.bf16 %v883_v27  ;;  %v1610_v27 = vunpack.c.l.s8.bf16 %v764_v23 }
 0x152   : > { %v15599_v46 = vcombine.low %v1768_v30, %v1848_v31 }
 0x153   : > { %v15602_v43 = vcombine.high %v1769_v35, %v1849_v36  ;;  %v15601_v47 = vcombine.low %v1769_v35, %v1849_v36  ;;  %v884_v35 = vld [vmem:[%s16913_s21 + $0xdf0] sm:$0xff] }
 0x154   : > { %8022 = vmatpush1.bf16.msra.mxu0 %v15595_v39  ;;  %8063 = vmatpush1.bf16.msra.mxu1 %v15597_v41  ;;  %v15441_v39 = vcombine.low %v1609_v24, %v1689_v25  ;;  %v1929_v41 = vunpack.c.h.s8.bf16 %v923_v37  ;;  %v804_v24 = vld [vmem:[%s16913_s21 + $0xb70] sm:$0xff] }
 0x155   : > { %15915 = vmatprep.subr.msk.bf16.mxu0 %vm7202_vm0, %v15756_v42  ;;  %15917 = vmatprep.subr.msk.bf16.mxu1 %vm7202_vm0, %v15758_v45  ;;  %v15600_v42 = vcombine.high %v1768_v30, %v1848_v31  ;;  %v484_v45 = vld [vmem:[%s16913_s21 + $0x170] sm:$0xff]  ;;  %v1611_v31 = vunpack.c.h.s8.bf16 %v764_v23 }
 0x156   : > { %v15761_v49 = vcombine.low %v1929_v41, %v1929_v41  ;;  %v15762_v53 = vcombine.high %v1929_v41, %v1929_v41  ;;  %v1850_v41 = vunpack.c.l.s8.bf16 %v884_v35 }
 0x158   : > { %8024 = vmatpush1.bf16.msra.mxu0 %v7252_v51  ;;  %8065 = vmatpush1.bf16.msra.mxu1 %v7258_v55  ;;  %v1050_v51 = vunpack.c.l.s8.bf16 %v484_v45  ;;  %v1051_v55 = vunpack.c.h.s8.bf16 %v484_v45  ;;  %v7270_v59 = vsel %vm7202_vm0, %v15761_v49, 0 }
 0x159   : > { %8093 = vmatprep.subr.bf16.mxu0 %v14800_v52  ;;  %8134 = vmatprep.subr.bf16.mxu1 %v14802_v56  ;;  %v15760_v52 = vcombine.high %v1928_v40, %v1928_v40  ;;  %v524_v56 = vld [vmem:[%s16913_s21 + $0x2b0] sm:$0xff] }
 0x15a   : > { %v14804_v60 = vcombine.high %v970_v50, %v1050_v51  ;;  %v1131_v1 = vunpack.c.h.s8.bf16 %v524_v56  ;;  %v14803_v5 = vcombine.low %v970_v50, %v1050_v51  ;;  %v14805_v6 = vcombine.low %v971_v54, %v1051_v55 }
 0x15b   : > { %15916 = vmatmul.mubr.msk.bf16.vlgmr.msra.gmra.mrb[16].mxu0 %vm7198_vm1, %v16950_v32  ;;  %15918 = vmatmul.mubr.msk.bf16.vlgmr.msra.gmra.mrb[16].mxu1 %vm7198_vm1, %v16950_v32  ;;  %v1931_v51 = vunpack.c.h.s8.bf16 %v924_v44 }
 0x15c   : > { %8094 = vmatpush1.bf16.msra.mxu0 %v14799_v61  ;;  %8135 = vmatpush1.bf16.msra.mxu1 %v14801_v62  ;;  %v1130_v61 = vunpack.c.l.s8.bf16 %v524_v56  ;;  %v14806_v62 = vcombine.high %v971_v54, %v1051_v55  ;;  %v972_v54 = vunpack.c.l.s8.bf16 %v445_v48 }
 0x15d   : > { %8095 = vmatprep.subr.bf16.mxu0 %v14960_v63  ;;  %8136 = vmatprep.subr.bf16.mxu1 %v14962_v2  ;;  %v1210_v63 = vunpack.c.l.s8.bf16 %v564_v57  ;;  %v1211_v2 = vunpack.c.h.s8.bf16 %v564_v57 }
 0x15e   : > { %8125 = vmatprep.mubr.bf16.mxu0 %v16605_v0  ;;  %8166 = vmatprep.mubr.bf16.mxu1 %v16605_v0 }
 0x15f   : > { %v14966_v10 = vcombine.high %v1131_v1, %v1211_v2  ;;  %v14963_v15 = vcombine.low %v1130_v61, %v1210_v63  ;;  %v14965_v16 = vcombine.low %v1131_v1, %v1211_v2  ;;  %v565_v1 = vld [vmem:[%s16913_s21 + $0x3f8] sm:$0xff] }
 0x160   : > { %8096 = vmatpush1.bf16.msra.mxu0 %v14959_v8  ;;  %8137 = vmatpush1.bf16.msra.mxu1 %v14961_v9  ;;  %v1370_v8 = vunpack.c.l.s8.bf16 %v644_v4  ;;  %v14964_v9 = vcombine.high %v1130_v61, %v1210_v63  ;;  %v973_v61 = vunpack.c.h.s8.bf16 %v445_v48  ;;  %v525_v63 = vld [vmem:[%s16913_s21 + $0x2b8] sm:$0xff] }
 0x161   : > { %8097 = vmatprep.subr.bf16.mxu0 %v15120_v12  ;;  %8138 = vmatprep.subr.bf16.mxu1 %v15122_v13  ;;  %v1371_v12 = vunpack.c.h.s8.bf16 %v644_v4  ;;  %v684_v13 = vld [vmem:[%s16913_s21 + $0x7b0] sm:$0xff]  ;;  %v1132_v4 = vunpack.c.l.s8.bf16 %v525_v63 }
 0x162   : > { %v15124_v17 = vcombine.high %v1290_v7, %v1370_v8  ;;  %v1451_v21 = vunpack.c.h.s8.bf16 %v684_v13  ;;  %v15123_v25 = vcombine.low %v1290_v7, %v1370_v8  ;;  %v1133_v8 = vunpack.c.h.s8.bf16 %v525_v63 }
 0x163   : > { %v15125_v26 = vcombine.low %v1291_v11, %v1371_v12 }
 0x164   : > { %8098 = vmatpush1.bf16.msra.mxu0 %v15119_v18  ;;  %8139 = vmatpush1.bf16.msra.mxu1 %v15121_v19  ;;  %v1450_v18 = vunpack.c.l.s8.bf16 %v684_v13  ;;  %v15126_v19 = vcombine.high %v1291_v11, %v1371_v12  ;;  %v645_v11 = vld [vmem:[%s16913_s21 + $0x678] sm:$0xff] }
 0x165   : > { %8099 = vmatprep.subr.bf16.mxu0 %v15280_v20  ;;  %8140 = vmatprep.subr.bf16.mxu1 %v15282_v22  ;;  %v1530_v20 = vunpack.c.l.s8.bf16 %v724_v14  ;;  %v1531_v22 = vunpack.c.h.s8.bf16 %v724_v14 }
 0x167   : > { %v15286_v30 = vcombine.high %v1451_v21, %v1531_v22  ;;  %v15283_v36 = vcombine.low %v1450_v18, %v1530_v20  ;;  %v15285_v37 = vcombine.low %v1451_v21, %v1531_v22  ;;  %v725_v21 = vld [vmem:[%s16913_s21 + $0x8f8] sm:$0xff] }
 0x168   : > { %8100 = vmatpush1.bf16.msra.mxu0 %v15279_v28  ;;  %8141 = vmatpush1.bf16.msra.mxu1 %v15281_v29  ;;  %v1690_v28 = vunpack.c.l.s8.bf16 %v804_v24  ;;  %v15284_v29 = vcombine.high %v1450_v18, %v1530_v20  ;;  %v685_v20 = vld [vmem:[%s16913_s21 + $0x7b8] sm:$0xff] }
 0x169   : > { %8101 = vmatprep.subr.bf16.mxu0 %v15440_v33  ;;  %8142 = vmatprep.subr.bf16.mxu1 %v15442_v34  ;;  %v1691_v33 = vunpack.c.h.s8.bf16 %v804_v24  ;;  %v844_v34 = vld [vmem:[%s16913_s21 + $0xcb0] sm:$0xff]  ;;  %v1452_v24 = vunpack.c.l.s8.bf16 %v685_v20 }
 0x16a   : > { %v15443_v45 = vcombine.low %v1610_v27, %v1690_v28 }
 0x16b   : > { %v15446_v40 = vcombine.high %v1611_v31, %v1691_v33 }
 0x16c   : > { %8102 = vmatpush1.bf16.msra.mxu0 %v15439_v38  ;;  %8143 = vmatpush1.bf16.msra.mxu1 %v15441_v39  ;;  %v15444_v38 = vcombine.high %v1610_v27, %v1690_v28  ;;  %v1770_v39 = vunpack.c.l.s8.bf16 %v844_v34  ;;  %v1453_v28 = vunpack.c.h.s8.bf16 %v685_v20 }
 0x16d   : > { %8103 = vmatprep.subr.bf16.mxu0 %v15600_v42  ;;  %8144 = vmatprep.subr.bf16.mxu1 %v15602_v43  ;;  %v1771_v42 = vunpack.c.h.s8.bf16 %v844_v34  ;;  %v1851_v43 = vunpack.c.h.s8.bf16 %v884_v35 }
 0x16e   : > { %v15604_v49 = vcombine.high %v1770_v39, %v1850_v41 }
 0x16f   : > { %v15606_v50 = vcombine.high %v1771_v42, %v1851_v43  ;;  %v15605_v55 = vcombine.low %v1771_v42, %v1851_v43  ;;  %v885_v42 = vld [vmem:[%s16913_s21 + $0xdf8] sm:$0xff] }
 0x170   : > { %8104 = vmatpush1.bf16.msra.mxu0 %v15599_v46  ;;  %8145 = vmatpush1.bf16.msra.mxu1 %v15601_v47  ;;  %v15445_v46 = vcombine.low %v1611_v31, %v1691_v33  ;;  %v1930_v47 = vunpack.c.l.s8.bf16 %v924_v44  ;;  %v805_v31 = vld [vmem:[%s16913_s21 + $0xb78] sm:$0xff] }
 0x171   : > { %15919 = vmatprep.subr.msk.bf16.mxu0 %vm7202_vm0, %v15760_v52  ;;  %15921 = vmatprep.subr.msk.bf16.mxu1 %vm7202_vm0, %v15762_v53  ;;  %v485_v52 = vld [vmem:[%s16913_s21 + $0x178] sm:$0xff]  ;;  %v15603_v53 = vcombine.low %v1770_v39, %v1850_v41 }
 0x172   : > { %v15764_v56 = vcombine.high %v1930_v47, %v1930_v47  ;;  %v15763_v57 = vcombine.low %v1930_v47, %v1930_v47  ;;  %v845_v41 = vld [vmem:[%s16913_s21 + $0xcb8] sm:$0xff] }
 0x174   : > { %8106 = vmatpush1.bf16.msra.mxu0 %v7264_v58  ;;  %8147 = vmatpush1.bf16.msra.mxu1 %v7270_v59  ;;  %v1052_v58 = vunpack.c.l.s8.bf16 %v485_v52  ;;  %v15766_v59 = vcombine.high %v1931_v51, %v1931_v51  ;;  %v7276_v2 = vsel %vm7202_vm0, %v15763_v57, 0 }
 0x175   : > { %8175 = vmatprep.subr.bf16.mxu0 %v14804_v60  ;;  %8216 = vmatprep.subr.bf16.mxu1 %v14806_v62  ;;  %v15765_v60 = vcombine.low %v1931_v51, %v1931_v51  ;;  %v1053_v62 = vunpack.c.h.s8.bf16 %v485_v52  ;;  %v925_v51 = vld [vmem:[%s16913_s21 + $0xf38] sm:$0x55] }
 0x176   : > { %v14808_v3 = vcombine.high %v972_v54, %v1052_v58  ;;  %v14807_v12 = vcombine.low %v972_v54, %v1052_v58  ;;  %v1932_v54 = vunpack.c.l.s8.bf16 %v925_v51  ;;  %v446_v58 = vld [vmem:[%s16913_s21 + $0x40] sm:$0xff] }
 0x177   : > { %15920 = vmatmul.mubr.msk.bf16.vlgmr.msra.gmra.mrb[20].mxu0 %vm7198_vm1, %v16950_v32  ;;  %15922 = vmatmul.mubr.msk.bf16.vlgmr.msra.gmra.mrb[20].mxu1 %vm7198_vm1, %v16950_v32  ;;  %v14810_v7 = vcombine.high %v973_v61, %v1053_v62  ;;  %v14809_v13 = vcombine.low %v973_v61, %v1053_v62 }
 0x178   : > { %8176 = vmatpush1.bf16.msra.mxu0 %v14803_v5  ;;  %8217 = vmatpush1.bf16.msra.mxu1 %v14805_v6  ;;  %v1212_v5 = vunpack.c.l.s8.bf16 %v565_v1  ;;  %v7282_v6 = vsel %vm7202_vm0, %v15765_v60, 0  ;;  %v15767_v62 = vcombine.low %v1932_v54, %v1932_v54 }
 0x179   : > { %8177 = vmatprep.subr.bf16.mxu0 %v14964_v9  ;;  %8218 = vmatprep.subr.bf16.mxu1 %v14966_v10  ;;  %v1213_v9 = vunpack.c.h.s8.bf16 %v565_v1  ;;  %v605_v10 = vld [vmem:[%s16913_s21 + $0x538] sm:$0xff]  ;;  %v974_v1 = vunpack.c.l.s8.bf16 %v446_v58 }
 0x17a   : > { %8207 = vmatprep.mubr.bf16.mxu0 %v16605_v0  ;;  %8248 = vmatprep.mubr.bf16.mxu1 %v16605_v0  ;;  %v14968_v14 = vcombine.high %v1132_v4, %v1212_v5  ;;  %v1293_v18 = vunpack.c.h.s8.bf16 %v605_v10  ;;  %v14967_v22 = vcombine.low %v1132_v4, %v1212_v5  ;;  %v975_v5 = vunpack.c.h.s8.bf16 %v446_v58 }
 0x17b   : > { %v14969_v23 = vcombine.low %v1133_v8, %v1213_v9  ;;  %v16606_v58 = vmov 1966171168  }
 0x17c   : > { %8178 = vmatpush1.bf16.msra.mxu0 %v14963_v15  ;;  %8219 = vmatpush1.bf16.msra.mxu1 %v14965_v16  ;;  %v1292_v15 = vunpack.c.l.s8.bf16 %v605_v10  ;;  %v14970_v16 = vcombine.high %v1133_v8, %v1213_v9  ;;  %v566_v8 = vld [vmem:[%s16913_s21 + $0x400] sm:$0xff]  ;;  %v7288_v9 = vsel %vm7202_vm0, %v15767_v62, 0 }
 0x17d   : > { %8179 = vmatprep.subr.bf16.mxu0 %v15124_v17  ;;  %8220 = vmatprep.subr.bf16.mxu1 %v15126_v19  ;;  %v1372_v17 = vunpack.c.l.s8.bf16 %v645_v11  ;;  %v1373_v19 = vunpack.c.h.s8.bf16 %v645_v11 }
 0x17f   : > { %v15130_v27 = vcombine.high %v1293_v18, %v1373_v19  ;;  %v15127_v33 = vcombine.low %v1292_v15, %v1372_v17  ;;  %v15129_v34 = vcombine.low %v1293_v18, %v1373_v19  ;;  %v646_v18 = vld [vmem:[%s16913_s21 + $0x680] sm:$0xff] }
 0x180   : > { %8180 = vmatpush1.bf16.msra.mxu0 %v15123_v25  ;;  %8221 = vmatpush1.bf16.msra.mxu1 %v15125_v26  ;;  %v1532_v25 = vunpack.c.l.s8.bf16 %v725_v21  ;;  %v15128_v26 = vcombine.high %v1292_v15, %v1372_v17  ;;  %v606_v17 = vld [vmem:[%s16913_s21 + $0x540] sm:$0xff] }
 0x181   : > { %8181 = vmatprep.subr.bf16.mxu0 %v15284_v29  ;;  %8222 = vmatprep.subr.bf16.mxu1 %v15286_v30  ;;  %v1533_v29 = vunpack.c.h.s8.bf16 %v725_v21  ;;  %v765_v30 = vld [vmem:[%s16913_s21 + $0xa38] sm:$0xff]  ;;  %v1294_v21 = vunpack.c.l.s8.bf16 %v606_v17 }
 0x182   : > { %v15288_v35 = vcombine.high %v1452_v24, %v1532_v25  ;;  %v1613_v39 = vunpack.c.h.s8.bf16 %v765_v30  ;;  %v15287_v43 = vcombine.low %v1452_v24, %v1532_v25  ;;  %v1375_v24 = vunpack.c.h.s8.bf16 %v646_v18 }
 0x183   : > { %v15289_v44 = vcombine.low %v1453_v28, %v1533_v29 }
 0x184   : > { %8182 = vmatpush1.bf16.msra.mxu0 %v15283_v36  ;;  %8223 = vmatpush1.bf16.msra.mxu1 %v15285_v37  ;;  %v1612_v36 = vunpack.c.l.s8.bf16 %v765_v30  ;;  %v15290_v37 = vcombine.high %v1453_v28, %v1533_v29  ;;  %v11003_v28 = vlaneseq  ;;  %v726_v29 = vld [vmem:[%s16913_s21 + $0x900] sm:$0xff] }
 0x185   : > { %8183 = vmatprep.subr.bf16.mxu0 %v15444_v38  ;;  %8224 = vmatprep.subr.bf16.mxu1 %v15446_v40  ;;  %v1692_v38 = vunpack.c.l.s8.bf16 %v805_v31  ;;  %v1693_v40 = vunpack.c.h.s8.bf16 %v805_v31 }
 0x187   : > { %v15448_v47 = vcombine.high %v1612_v36, %v1692_v38  ;;  %v15450_v48 = vcombine.high %v1613_v39, %v1693_v40  ;;  %v15447_v52 = vcombine.low %v1612_v36, %v1692_v38  ;;  %v1534_v36 = vunpack.c.l.s8.bf16 %v726_v29 }
 0x188   : > { %8184 = vmatpush1.bf16.msra.mxu0 %v15443_v45  ;;  %8225 = vmatpush1.bf16.msra.mxu1 %v15445_v46  ;;  %v1772_v45 = vunpack.c.l.s8.bf16 %v845_v41  ;;  %v1852_v46 = vunpack.c.l.s8.bf16 %v885_v42  ;;  %v1535_v38 = vunpack.c.h.s8.bf16 %v726_v29 }
 0x189   : > { %8185 = vmatprep.subr.bf16.mxu0 %v15604_v49  ;;  %8226 = vmatprep.subr.bf16.mxu1 %v15606_v50  ;;  %v1773_v49 = vunpack.c.h.s8.bf16 %v845_v41  ;;  %v1853_v50 = vunpack.c.h.s8.bf16 %v885_v42  ;;  %v806_v41 = vld [vmem:[%s16913_s21 + $0xb80] sm:$0xff] }
 0x18a   : > { %v15607_v60 = vcombine.low %v1772_v45, %v1852_v46 }
 0x18b   : > { %v15610_v57 = vcombine.high %v1773_v49, %v1853_v50  ;;  %v15609_v61 = vcombine.low %v1773_v49, %v1853_v50 }
 0x18c   : > { %8186 = vmatpush1.bf16.msra.mxu0 %v15603_v53  ;;  %8227 = vmatpush1.bf16.msra.mxu1 %v15605_v55  ;;  %v15449_v53 = vcombine.low %v1613_v39, %v1693_v40  ;;  %v1933_v55 = vunpack.c.h.s8.bf16 %v925_v51  ;;  %v17123_v39 = vshrl.u32 %v11003_v28, 7  ;;  %v766_v40 = vld [vmem:[%s16913_s21 + $0xa40] sm:$0xff] }
 0x18d   : > { %15923 = vmatprep.subr.msk.bf16.mxu0 %vm7202_vm0, %v15764_v56  ;;  %15925 = vmatprep.subr.msk.bf16.mxu1 %vm7202_vm0, %v15766_v59  ;;  %v15608_v56 = vcombine.high %v1772_v45, %v1852_v46  ;;  %v486_v59 = vld [vmem:[%s16913_s21 + $0x180] sm:$0xff]  ;;  %v1694_v45 = vunpack.c.l.s8.bf16 %v806_v41  ;;  %v1615_v46 = vunpack.c.h.s8.bf16 %v766_v40 }
 0x18e   : > { %v15769_v63 = vcombine.low %v1933_v55, %v1933_v55  ;;  %v15770_v4 = vcombine.high %v1933_v55, %v1933_v55  ;;  %v17130_v50 = vsub.s32 0, %v17123_v39  ;;  %v846_v51 = vld [vmem:[%s16913_s21 + $0xcc0] sm:$0xff] }
 0x18f   : > { %v886_v55 = vld [vmem:[%s16913_s21 + $0xe00] sm:$0xff] }
 0x190   : > { %8188 = vmatpush1.bf16.msra.mxu0 %v7276_v2  ;;  %8229 = vmatpush1.bf16.msra.mxu1 %v7282_v6  ;;  %v1054_v2 = vunpack.c.l.s8.bf16 %v486_v59  ;;  %v1055_v6 = vunpack.c.h.s8.bf16 %v486_v59  ;;  %v7294_v10 = vsel %vm7202_vm0, %v15769_v63, 0  ;;  %v17152_v59 = vunpack.c.l.s4 %v16606_v58 }
 0x191   : > { %8257 = vmatprep.subr.bf16.mxu0 %v14808_v3  ;;  %8298 = vmatprep.subr.bf16.mxu1 %v14810_v7  ;;  %v15768_v3 = vcombine.high %v1932_v54, %v1932_v54  ;;  %v526_v7 = vld [vmem:[%s16913_s21 + $0x2c0] sm:$0xff]  ;;  %v17143_v54 = vsub.s32 1, %v17123_v39 }
 0x192   : > { %v14812_v11 = vcombine.high %v974_v1, %v1054_v2  ;;  %v1135_v15 = vunpack.c.h.s8.bf16 %v526_v7  ;;  %v14811_v19 = vcombine.low %v974_v1, %v1054_v2  ;;  %v14813_v20 = vcombine.low %v975_v5, %v1055_v6  ;;  %v926_v2 = vld [vmem:[%s16913_s21 + $0xf40] sm:$0x55] }
 0x193   : > { %15924 = vmatmul.mubr.msk.bf16.vlgmr.msra.gmra.mrb[24].mxu0 %vm7198_vm1, %v16950_v32  ;;  %15926 = vmatmul.mubr.msk.bf16.vlgmr.msra.gmra.mrb[24].mxu1 %vm7198_vm1, %v16950_v32  ;;  %v1774_v1 = vunpack.c.l.s8.bf16 %v846_v51 }
 0x194   : > { %8258 = vmatpush1.bf16.msra.mxu0 %v14807_v12  ;;  %8299 = vmatpush1.bf16.msra.mxu1 %v14809_v13  ;;  %v1134_v12 = vunpack.c.l.s8.bf16 %v526_v7  ;;  %v14814_v13 = vcombine.high %v975_v5, %v1055_v6  ;;  %v1775_v5 = vunpack.c.h.s8.bf16 %v846_v51  ;;  %v1855_v6 = vunpack.c.h.s8.bf16 %v886_v55  ;;  %v567_v51 = vld [vmem:[%s16913_s21 + $0x408] sm:$0xff] }
 0x195   : > { %8259 = vmatprep.subr.bf16.mxu0 %v14968_v14  ;;  %8300 = vmatprep.subr.bf16.mxu1 %v14970_v16  ;;  %v1214_v14 = vunpack.c.l.s8.bf16 %v566_v8  ;;  %v1215_v16 = vunpack.c.h.s8.bf16 %v566_v8 }
 0x196   : > { %8289 = vmatprep.mubr.bf16.mxu0 %v16605_v0  ;;  %8330 = vmatprep.mubr.bf16.mxu1 %v16605_v0 }
 0x197   : > { %v14972_v25 = vcombine.high %v1134_v12, %v1214_v14  ;;  %v14971_v30 = vcombine.low %v1134_v12, %v1214_v14  ;;  %v14973_v31 = vcombine.low %v1135_v15, %v1215_v16  ;;  %v1934_v14 = vunpack.c.l.s8.bf16 %v926_v2 }
 0x198   : > { %8260 = vmatpush1.bf16.msra.mxu0 %v14967_v22  ;;  %8301 = vmatpush1.bf16.msra.mxu1 %v14969_v23  ;;  %v1374_v22 = vunpack.c.l.s8.bf16 %v646_v18  ;;  %v1295_v23 = vunpack.c.h.s8.bf16 %v606_v17  ;;  %v13129_v17 = vunpack.c.0.s8 %v17152_v59 }
 0x199   : > { %8261 = vmatprep.subr.bf16.mxu0 %v15128_v26  ;;  %8302 = vmatprep.subr.bf16.mxu1 %v15130_v27  ;;  %v14974_v26 = vcombine.high %v1135_v15, %v1215_v16  ;;  %v686_v27 = vld [vmem:[%s16913_s21 + $0x7c0] sm:$0xff]  ;;  %v1935_v15 = vunpack.c.h.s8.bf16 %v926_v2  ;;  %v17176_v16 = vld [vmem:[%s16913_s21 + $0x188] sm:$0xff]  ;;  %v1216_v2 = vunpack.c.l.s8.bf16 %v567_v51 }
 0x19a   : > { %v15131_v42 = vcombine.low %v1294_v21, %v1374_v22  ;;  %v1056_v28 = vunpack.c.l.s8.bf16 %v17176_v16 }
 0x19c   : > { %8262 = vmatpush1.bf16.msra.mxu0 %v15127_v33  ;;  %8303 = vmatpush1.bf16.msra.mxu1 %v15129_v34  ;;  %v15132_v33 = vcombine.high %v1294_v21, %v1374_v22  ;;  %v15134_v34 = vcombine.high %v1295_v23, %v1375_v24  ;;  %v15614_v22 = vcombine.high %v1775_v5, %v1855_v6 }
 0x19d   : > { %8263 = vmatprep.subr.bf16.mxu0 %v15288_v35  ;;  %8304 = vmatprep.subr.bf16.mxu1 %v15290_v37  ;;  %v1454_v35 = vunpack.c.l.s8.bf16 %v686_v27  ;;  %v1455_v37 = vunpack.c.h.s8.bf16 %v686_v27  ;;  %v15613_v27 = vcombine.low %v1775_v5, %v1855_v6  ;;  %v1217_v6 = vunpack.c.h.s8.bf16 %v567_v51  ;;  %v927_v51 = vld [vmem:[%s16913_s21 + $0xf48] sm:$0x55] }
 0x19f   : > { %v15294_v49 = vcombine.high %v1455_v37, %v1535_v38 }
 0x1a0   : > { %8264 = vmatpush1.bf16.msra.mxu0 %v15287_v43  ;;  %8305 = vmatpush1.bf16.msra.mxu1 %v15289_v44  ;;  %v15133_v43 = vcombine.low %v1295_v23, %v1375_v24  ;;  %v1614_v44 = vunpack.c.l.s8.bf16 %v766_v40 }
 0x1a1   : > { %8265 = vmatprep.subr.bf16.mxu0 %v15448_v47  ;;  %8306 = vmatprep.subr.bf16.mxu1 %v15450_v48  ;;  %v1695_v47 = vunpack.c.h.s8.bf16 %v806_v41  ;;  %v15292_v48 = vcombine.high %v1454_v35, %v1534_v36 }
 0x1a2   : > { %v15452_v62 = vcombine.high %v1614_v44, %v1694_v45 }
 0x1a3   : > { %v15454_v63 = vcombine.high %v1615_v46, %v1695_v47 }
 0x1a4   : > { %8266 = vmatpush1.bf16.msra.mxu0 %v15447_v52  ;;  %8307 = vmatpush1.bf16.msra.mxu1 %v15449_v53  ;;  %v17137_v52 = vld [vmem:[%s17134_s20] sm:$0xff]  ;;  %v17140_v53 = vsub.s32 2, %v17123_v39 }
 0x1a5   : > { %8267 = vmatprep.subr.bf16.mxu0 %v15608_v56  ;;  %8308 = vmatprep.subr.bf16.mxu1 %v15610_v57  ;;  %v15291_v56 = vcombine.low %v1454_v35, %v1534_v36  ;;  %v17150_v57 = vld [vmem:[%s17147_s22] sm:$0xff]  ;;  %v15772_v36 = vcombine.high %v1934_v14, %v1934_v14 }
 0x1a6   : > { %v12006_v7 = vrot.slane %v17150_v57, %v17130_v50  ;;  %v11014_v8 = vrot.slane %v17137_v52, %v17140_v53  ;;  %v12010_v12 = vrot.slane %v17150_v57, %v17143_v54 }
 0x1a8   : > { %8268 = vmatpush1.bf16.msra.mxu0 %v15607_v60  ;;  %8309 = vmatpush1.bf16.msra.mxu1 %v15609_v61  ;;  %v17155_v60 = vsub.s32 3, %v17123_v39  ;;  %v15293_v61 = vcombine.low %v1455_v37, %v1535_v38  ;;  %v15774_v37 = vcombine.high %v1935_v15, %v1935_v15 }
 0x1a9   : > { %15927 = vmatprep.subr.msk.bf16.mxu0 %vm7202_vm0, %v15768_v3  ;;  %15929 = vmatprep.subr.msk.bf16.mxu1 %vm7202_vm0, %v15770_v4  ;;  %v11006_v3 = vrot.slane %v17137_v52, %v17130_v50  ;;  %v1854_v4 = vunpack.c.l.s8.bf16 %v886_v55 }
 0x1aa   : > { %v12018_v18 = vrot.slane %v17150_v57, %v17155_v60 }
 0x1ab   : > { %v15612_v21 = vcombine.high %v1774_v1, %v1854_v4  ;;  %v15611_v23 = vcombine.low %v1774_v1, %v1854_v4 }
 0x1ac   : > { %8270 = vmatpush1.bf16.msra.mxu0 %v7288_v9  ;;  %8311 = vmatpush1.bf16.msra.mxu1 %v7294_v10  ;;  %v12014_v9 = vrot.slane %v17150_v57, %v17140_v53  ;;  %v11010_v10 = vrot.slane %v17137_v52, %v17143_v54 }
 0x1ad   : > { %8339 = vmatprep.subr.bf16.mxu0 %v14812_v11  ;;  %8380 = vmatprep.subr.bf16.mxu1 %v14814_v13  ;;  %v17169_v11 = vld [vmem:[%s16913_s21 + $0x48] sm:$0xff]  ;;  %v11018_v13 = vrot.slane %v17137_v52, %v17155_v60 }
 0x1ae   : > { %v976_v24 = vunpack.c.l.s8.bf16 %v17169_v11  ;;  %v977_v29 = vunpack.c.h.s8.bf16 %v17169_v11 }
 0x1af   : > { %15928 = vmatmul.mubr.msk.bf16.vlgmr.msra.gmra.mrb[28].mxu0 %vm7198_vm1, %v16950_v32  ;;  %15930 = vmatmul.mubr.msk.bf16.vlgmr.msra.gmra.mrb[28].mxu1 %vm7198_vm1, %v16950_v32 }
 0x1b0   : > { %8340 = vmatpush1.bf16.msra.mxu0 %v14811_v19  ;;  %8381 = vmatpush1.bf16.msra.mxu1 %v14813_v20  ;;  %v15451_v19 = vcombine.low %v1614_v44, %v1694_v45  ;;  %v15453_v20 = vcombine.low %v1615_v46, %v1695_v47  ;;  %v14816_v59 = vcombine.high %v976_v24, %v1056_v28 }
 0x1b1   : > { %8341 = vmatprep.subr.bf16.mxu0 %v14972_v25  ;;  %8382 = vmatprep.subr.bf16.mxu1 %v14974_v26  ;;  %v14815_v11 = vcombine.low %v976_v24, %v1056_v28 }
 0x1b2   : > { %8371 = vmatprep.mubr.bf16.mxu0 %v16605_v0  ;;  %8412 = vmatprep.mubr.bf16.mxu1 %v16605_v0 }
 0x1b4   : > { %8342 = vmatpush1.bf16.msra.mxu0 %v14971_v30  ;;  %8383 = vmatpush1.bf16.msra.mxu1 %v14973_v31  ;;  %v1057_v30 = vunpack.c.h.s8.bf16 %v17176_v16 }
 0x1b5   : > { %8343 = vmatprep.subr.bf16.mxu0 %v15132_v33  ;;  %8384 = vmatprep.subr.bf16.mxu1 %v15134_v34 }
 0x1b8   : > { %8344 = vmatpush1.bf16.msra.mxu0 %v15131_v42  ;;  %8385 = vmatpush1.bf16.msra.mxu1 %v15133_v43  ;;  %v15771_v43 = vcombine.low %v1934_v14, %v1934_v14 }
 0x1b9   : > { %8345 = vmatprep.subr.bf16.mxu0 %v15292_v48  ;;  %8386 = vmatprep.subr.bf16.mxu1 %v15294_v49  ;;  %v15773_v48 = vcombine.low %v1935_v15, %v1935_v15  ;;  %v527_v49 = vld [vmem:[%s16913_s21 + $0x2c8] sm:$0xff] }
 0x1ba   : > { %v1136_v1 = vunpack.c.l.s8.bf16 %v527_v49  ;;  %v1137_v5 = vunpack.c.h.s8.bf16 %v527_v49  ;;  %v17226_v49 = vsub.s32 7, %v17123_v39 }
 0x1bb   : > { %v7306_v4 = vsel %vm7202_vm0, %v15773_v48, 0 }
 0x1bc   : > { %8346 = vmatpush1.bf16.msra.mxu0 %v15291_v56  ;;  %8387 = vmatpush1.bf16.msra.mxu1 %v15293_v61  ;;  %v17188_v56 = vsub.s32 %v13129_v17, %v17123_v39  ;;  %v14818_v61 = vcombine.high %v977_v29, %v1057_v30  ;;  %v14976_v16 = vcombine.high %v1136_v1, %v1216_v2 }
 0x1bd   : > { %8347 = vmatprep.subr.bf16.mxu0 %v15452_v62  ;;  %8388 = vmatprep.subr.bf16.mxu1 %v15454_v63  ;;  %v14978_v17 = vcombine.high %v1137_v5, %v1217_v6 }
 0x1be   : > { %v7717_v25 = vpop.f32.mrb[0].mxu0  ;;  %v7758_v26 = vpop.f32.mrb[0].mxu1 }
 0x1bf   : > { %v11803_v31 = vmul.f32 %v11006_v3, %v7717_v25  ;;  %v11805_v33 = vmul.f32 %v11014_v8, %v7758_v26  ;;  %v7719_v34 = vpop.f32.mrb[1].mxu0  ;;  %v7760_v35 = vpop.f32.mrb[1].mxu1  ;;  %v7300_v3 = vsel %vm7202_vm0, %v15771_v43, 0  ;;  %v647_v8 = vld [vmem:[%s16913_s21 + $0x688] sm:$0xff]  ;;  %v17218_v43 = vsub.s32 6, %v17123_v39 }
 0x1c0   : > { %v11804_v38 = vmul.f32 %v11010_v10, %v7719_v34  ;;  %v11806_v40 = vmul.f32 %v11018_v13, %v7760_v35  ;;  %v7721_v41 = vpop.f32.mrb[2].mxu0  ;;  %v7762_v42 = vpop.f32.mrb[2].mxu1  ;;  %8348 = vmatpush1.bf16.msra.mxu0 %v15451_v19  ;;  %8389 = vmatpush1.bf16.msra.mxu1 %v15453_v20  ;;  %v14817_v13 = vcombine.low %v977_v29, %v1057_v30  ;;  %v1376_v15 = vunpack.c.l.s8.bf16 %v647_v8  ;;  %v687_v20 = vld [vmem:[%s16913_s21 + $0x7c8] sm:$0xff] }
 0x1c1   : > { %v12803_v44 = vadd.f32 %v12006_v7, %v11803_v31  ;;  %v12805_v45 = vadd.f32 %v12014_v9, %v11805_v33  ;;  %v7722_v46 = vpop.f32.mrb[3].mxu0  ;;  %v7763_v47 = vpop.f32.mrb[3].mxu1  ;;  %8349 = vmatprep.subr.bf16.mxu0 %v15612_v21  ;;  %8390 = vmatprep.subr.bf16.mxu1 %v15614_v22  ;;  %v607_v7 = vld [vmem:[%s16913_s21 + $0x548] sm:$0xff]  ;;  %v1377_v19 = vunpack.c.h.s8.bf16 %v647_v8  ;;  %v14975_v22 = vcombine.low %v1136_v1, %v1216_v2 }
 0x1c2   : > { %v12804_v55 = vadd.f32 %v12010_v12, %v11804_v38  ;;  %v12806_v58 = vadd.f32 %v12018_v18, %v11806_v40  ;;  %v1296_v14 = vunpack.c.l.s8.bf16 %v607_v7  ;;  %v1297_v18 = vunpack.c.h.s8.bf16 %v607_v7  ;;  %v727_v21 = vld [vmem:[%s16913_s21 + $0x908] sm:$0xff] }
 0x1c3   : > { %v1456_v25 = vunpack.c.l.s8.bf16 %v687_v20  ;;  %v767_v26 = vld [vmem:[%s16913_s21 + $0xa48] sm:$0xff]  ;;  %v1536_v28 = vunpack.c.l.s8.bf16 %v727_v21  ;;  %v1457_v29 = vunpack.c.h.s8.bf16 %v687_v20  ;;  %v1537_v30 = vunpack.c.h.s8.bf16 %v727_v21 }
 0x1c4   : > { %v13123_v62 = vcombine.low %v12803_v44, %v12804_v55  ;;  %v13124_v63 = vcombine.low %v12805_v45, %v12806_v58  ;;  %8350 = vmatpush1.bf16.msra.mxu0 %v15611_v23  ;;  %8391 = vmatpush1.bf16.msra.mxu1 %v15613_v27  ;;  %v14977_v23 = vcombine.low %v1137_v5, %v1217_v6  ;;  %v807_v31 = vld [vmem:[%s16913_s21 + $0xb88] sm:$0xff]  ;;  %v1616_v35 = vunpack.c.l.s8.bf16 %v767_v26 }
 0x1c5   : > { %15931 = vmatprep.subr.msk.bf16.mxu0 %vm7202_vm0, %v15772_v36  ;;  %15933 = vmatprep.subr.msk.bf16.mxu1 %vm7202_vm0, %v15774_v37  ;;  %v15136_v24 = vcombine.high %v1296_v14, %v1376_v15  ;;  %v15138_v27 = vcombine.high %v1297_v18, %v1377_v19  ;;  %v15135_v33 = vcombine.low %v1296_v14, %v1376_v15  ;;  %v17215_v36 = vsub.s32 4, %v17123_v39  ;;  %v847_v45 = vld [vmem:[%s16913_s21 + $0xcc8] sm:$0xff]  ;;  %v448_v15 = vld [vmem:[%s16913_s21 + $0x50] sm:$0xff] }
 0x1c6   : > { %v17197_v9 = vrot.slane %v13123_v62, %v17188_v56  ;;  %v17200_v10 = vrot.slane %v13124_v63, %v17188_v56  ;;  %v15137_v34 = vcombine.low %v1297_v18, %v1377_v19  ;;  %v1696_v37 = vunpack.c.l.s8.bf16 %v807_v31  ;;  %v887_v46 = vld [vmem:[%s16913_s21 + $0xe08] sm:$0xff] }
 0x1c7   : > { %v1617_v38 = vunpack.c.h.s8.bf16 %v767_v26  ;;  %v1697_v40 = vunpack.c.h.s8.bf16 %v807_v31  ;;  %v15296_v41 = vcombine.high %v1456_v25, %v1536_v28  ;;  %v15298_v42 = vcombine.high %v1457_v29, %v1537_v30 }
 0x1c8   : > { %v13155_v12 = vcombine.low %v17197_v9, %v17200_v10  ;;  %8352 = vmatpush1.bf16.msra.mxu0 %v7300_v3  ;;  %8393 = vmatpush1.bf16.msra.mxu1 %v7306_v4  ;;  %v17221_v44 = vsub.s32 5, %v17123_v39  ;;  %v15295_v47 = vcombine.low %v1456_v25, %v1536_v28  ;;  %v15297_v48 = vcombine.low %v1457_v29, %v1537_v30 }
 0x1c9   : > { %8421 = vmatprep.subr.bf16.mxu0 %v14816_v59  ;;  %8462 = vmatprep.subr.bf16.mxu1 %v14818_v61  ;;  %v11022_v55 = vrot.slane %v17137_v52, %v17215_v36  ;;  %v15456_v58 = vcombine.high %v1616_v35, %v1696_v37  ;;  %v15458_v59 = vcombine.high %v1617_v38, %v1697_v40  ;;  %v1776_v61 = vunpack.c.l.s8.bf16 %v847_v45 }
 0x1ca   : > { %v1856_v62 = vunpack.c.l.s8.bf16 %v887_v46  ;;  %v1777_v63 = vunpack.c.h.s8.bf16 %v847_v45  ;;  %v1857_v1 = vunpack.c.h.s8.bf16 %v887_v46  ;;  %v11030_v39 = vrot.slane %v17137_v52, %v17218_v43 }
 0x1cb   : > { %15932 = vmatmul.mubr.msk.bf16.vlgmr.msra.gmra.mrb[32].mxu0 %vm7198_vm1, %v16950_v32  ;;  %15934 = vmatmul.mubr.msk.bf16.vlgmr.msra.gmra.mrb[32].mxu1 %vm7198_vm1, %v16950_v32  ;;  %v11026_v2 = vrot.slane %v17137_v52, %v17221_v44  ;;  %v1936_v3 = vunpack.c.l.s8.bf16 %v927_v51  ;;  %v1937_v4 = vunpack.c.h.s8.bf16 %v927_v51  ;;  %v12022_v5 = vrot.slane %v17150_v57, %v17215_v36  ;;  %v568_v51 = vld [vmem:[%s16913_s21 + $0x410] sm:$0xff] }
 0x1cc   : > { %8422 = vmatpush1.bf16.msra.mxu0 %v14815_v11  ;;  %8463 = vmatpush1.bf16.msra.mxu1 %v14817_v13  ;;  %v12030_v6 = vrot.slane %v17150_v57, %v17218_v43  ;;  %v11034_v7 = vrot.slane %v17137_v52, %v17226_v49  ;;  %v15455_v8 = vcombine.low %v1616_v35, %v1696_v37  ;;  %v978_v29 = vunpack.c.l.s8.bf16 %v448_v15 }
 0x1cd   : > { %8423 = vmatprep.subr.bf16.mxu0 %v14976_v16  ;;  %8464 = vmatprep.subr.bf16.mxu1 %v14978_v17  ;;  %v12026_v11 = vrot.slane %v17150_v57, %v17221_v44  ;;  %v12034_v13 = vrot.slane %v17150_v57, %v17226_v49  ;;  %v15457_v14 = vcombine.low %v1617_v38, %v1697_v40  ;;  %v488_v16 = vld [vmem:[%s16913_s21 + $0x190] sm:$0xff]  ;;  %v979_v35 = vunpack.c.h.s8.bf16 %v448_v15 }
 0x1ce   : > { %8453 = vmatprep.mubr.bf16.mxu0 %v16605_v0  ;;  %8494 = vmatprep.mubr.bf16.mxu1 %v16605_v0  ;;  %v15616_v17 = vcombine.high %v1776_v61, %v1856_v62  ;;  %v15618_v18 = vcombine.high %v1777_v63, %v1857_v1  ;;  %v15615_v19 = vcombine.low %v1776_v61, %v1856_v62  ;;  %v1058_v57 = vunpack.c.l.s8.bf16 %v488_v16 }
 0x1cf   : > { %v15617_v52 = vcombine.low %v1777_v63, %v1857_v1  ;;  %v1059_v37 = vunpack.c.h.s8.bf16 %v488_v16  ;;  %v15778_v45 = vcombine.high %v1937_v4, %v1937_v4  ;;  %v608_v1 = vld [vmem:[%s16913_s21 + $0x550] sm:$0xff] }
 0x1d0   : > { %8424 = vmatpush1.bf16.msra.mxu0 %v14975_v22  ;;  %8465 = vmatpush1.bf16.msra.mxu1 %v14977_v23  ;;  %v15776_v22 = vcombine.high %v1936_v3, %v1936_v3  ;;  %v15775_v23 = vcombine.low %v1936_v3, %v1936_v3  ;;  %v1299_v16 = vunpack.c.h.s8.bf16 %v608_v1 }
 0x1d1   : > { %8425 = vmatprep.subr.bf16.mxu0 %v15136_v24  ;;  %8466 = vmatprep.subr.bf16.mxu1 %v15138_v27  ;;  %v15777_v24 = vcombine.low %v1937_v4, %v1937_v4  ;;  %v14822_v63 = vcombine.high %v979_v35, %v1059_v37  ;;  %v1219_v4 = vunpack.c.h.s8.bf16 %v568_v51 }
 0x1d3   : > { %v7318_v62 = vsel %vm7202_vm0, %v15777_v24, 0 }
 0x1d4   : > { %8426 = vmatpush1.bf16.msra.mxu0 %v15135_v33  ;;  %8467 = vmatpush1.bf16.msra.mxu1 %v15137_v34 }
 0x1d5   : > { %8427 = vmatprep.subr.bf16.mxu0 %v15296_v41  ;;  %8468 = vmatprep.subr.bf16.mxu1 %v15298_v42 }
 0x1d8   : > { %8428 = vmatpush1.bf16.msra.mxu0 %v15295_v47  ;;  %8469 = vmatpush1.bf16.msra.mxu1 %v15297_v48  ;;  %v528_v48 = vld [vmem:[%s16913_s21 + $0x2d0] sm:$0xff] }
 0x1d9   : > { %8429 = vmatprep.subr.bf16.mxu0 %v15456_v58  ;;  %8470 = vmatprep.subr.bf16.mxu1 %v15458_v59  ;;  %v14820_v58 = vcombine.high %v978_v29, %v1058_v57  ;;  %v1139_v3 = vunpack.c.h.s8.bf16 %v528_v48 }
 0x1da   : > { %v7799_v20 = vpop.f32.mrb[4].mxu0  ;;  %v7840_v21 = vpop.f32.mrb[4].mxu1 }
 0x1db   : > { %v11807_v25 = vmul.f32 %v11022_v55, %v7799_v20  ;;  %v11809_v26 = vmul.f32 %v11030_v39, %v7840_v21  ;;  %v7801_v27 = vpop.f32.mrb[5].mxu0  ;;  %v7842_v28 = vpop.f32.mrb[5].mxu1  ;;  %v7312_v55 = vsel %vm7202_vm0, %v15775_v23, 0  ;;  %v1138_v39 = vunpack.c.l.s8.bf16 %v528_v48  ;;  %v928_v48 = vld [vmem:[%s16913_s21 + $0xf50] sm:$0x55] }
 0x1dc   : > { %v11808_v30 = vmul.f32 %v11026_v2, %v7801_v27  ;;  %v11810_v31 = vmul.f32 %v11034_v7, %v7842_v28  ;;  %v7803_v33 = vpop.f32.mrb[6].mxu0  ;;  %v7844_v34 = vpop.f32.mrb[6].mxu1  ;;  %8430 = vmatpush1.bf16.msra.mxu0 %v15455_v8  ;;  %8471 = vmatpush1.bf16.msra.mxu1 %v15457_v14  ;;  %v1218_v2 = vunpack.c.l.s8.bf16 %v568_v51  ;;  %v14819_v8 = vcombine.low %v978_v29, %v1058_v57  ;;  %v768_v29 = vld [vmem:[%s16913_s21 + $0xa50] sm:$0xff] }
 0x1dd   : > { %v12807_v38 = vadd.f32 %v12022_v5, %v11807_v25  ;;  %v12809_v40 = vadd.f32 %v12030_v6, %v11809_v26  ;;  %v7804_v41 = vpop.f32.mrb[7].mxu0  ;;  %v7845_v42 = vpop.f32.mrb[7].mxu1  ;;  %8431 = vmatprep.subr.bf16.mxu0 %v15616_v17  ;;  %8472 = vmatprep.subr.bf16.mxu1 %v15618_v18  ;;  %v648_v5 = vld [vmem:[%s16913_s21 + $0x690] sm:$0xff]  ;;  %v13163_v20 = vrot.slane %v13155_v12, %v17188_v56  ;;  %v1618_v33 = vunpack.c.l.s8.bf16 %v768_v29 }
 0x1de   : > { %v12808_v46 = vadd.f32 %v12026_v11, %v11808_v30  ;;  %v12810_v47 = vadd.f32 %v12034_v13, %v11810_v31  ;;  %v14821_v11 = vcombine.low %v979_v35, %v1059_v37  ;;  %v1298_v13 = vunpack.c.l.s8.bf16 %v608_v1  ;;  %v808_v57 = vld [vmem:[%s16913_s21 + $0xb90] sm:$0xff]  ;;  %v17277_v41 = vld [vmem:[%s17134_s20 + $0x8] sm:$0xff] }
 0x1df   : > { %v1378_v15 = vunpack.c.l.s8.bf16 %v648_v5  ;;  %v1379_v17 = vunpack.c.h.s8.bf16 %v648_v5  ;;  %v14980_v18 = vcombine.high %v1138_v39, %v1218_v2  ;;  %v14979_v23 = vcombine.low %v1138_v39, %v1218_v2  ;;  %v848_v42 = vld [vmem:[%s16913_s21 + $0xcd0] sm:$0xff] }
 0x1e0   : > { %v13125_v59 = vcombine.low %v12807_v38, %v12808_v46  ;;  %v13126_v61 = vcombine.low %v12809_v40, %v12810_v47  ;;  %8432 = vmatpush1.bf16.msra.mxu0 %v15615_v19  ;;  %8473 = vmatpush1.bf16.msra.mxu1 %v15617_v52  ;;  %v14982_v19 = vcombine.high %v1139_v3, %v1219_v4  ;;  %v688_v52 = vld [vmem:[%s16913_s21 + $0x7d0] sm:$0xff]  ;;  %v1698_v34 = vunpack.c.l.s8.bf16 %v808_v57 }
 0x1e1   : > { %15935 = vmatprep.subr.msk.bf16.mxu0 %vm7202_vm0, %v15776_v22  ;;  %15937 = vmatprep.subr.msk.bf16.mxu1 %vm7202_vm0, %v15778_v45  ;;  %v728_v22 = vld [vmem:[%s16913_s21 + $0x910] sm:$0xff]  ;;  %v14981_v24 = vcombine.low %v1139_v3, %v1219_v4  ;;  %v15140_v9 = vcombine.high %v1298_v13, %v1378_v15  ;;  %v15142_v10 = vcombine.high %v1299_v16, %v1379_v17  ;;  %v1458_v12 = vunpack.c.l.s8.bf16 %v688_v52 }
 0x1e2   : > { %v13147_v6 = vrot.slane %v13125_v59, %v17188_v56  ;;  %v13154_v7 = vrot.slane %v13126_v61, %v17188_v56  ;;  %v1538_v26 = vunpack.c.l.s8.bf16 %v728_v22  ;;  %v1459_v27 = vunpack.c.h.s8.bf16 %v688_v52  ;;  %v888_v45 = vld [vmem:[%s16913_s21 + $0xe10] sm:$0xff] }
 0x1e3   : > { %v1539_v28 = vunpack.c.h.s8.bf16 %v728_v22  ;;  %v15139_v30 = vcombine.low %v1298_v13, %v1378_v15  ;;  %v15141_v31 = vcombine.low %v1299_v16, %v1379_v17  ;;  %v1619_v35 = vunpack.c.h.s8.bf16 %v768_v29  ;;  %v449_v15 = vld [vmem:[%s16913_s21 + $0x58] sm:$0xff] }
 0x1e4   : > { %v13156_v14 = vcombine.low %v13147_v6, %v13154_v7  ;;  %8434 = vmatpush1.bf16.msra.mxu0 %v7312_v55  ;;  %8475 = vmatpush1.bf16.msra.mxu1 %v7318_v62  ;;  %v1699_v37 = vunpack.c.h.s8.bf16 %v808_v57  ;;  %v15300_v38 = vcombine.high %v1458_v12, %v1538_v26  ;;  %v15299_v46 = vcombine.low %v1458_v12, %v1538_v26  ;;  %v17285_v55 = vld [vmem:[%s17147_s22 + $0x8] sm:$0xff]  ;;  %v489_v16 = vld [vmem:[%s16913_s21 + $0x198] sm:$0xff] }
 0x1e5   : > { %8503 = vmatprep.subr.bf16.mxu0 %v14820_v58  ;;  %8544 = vmatprep.subr.bf16.mxu1 %v14822_v63  ;;  %v15302_v40 = vcombine.high %v1459_v27, %v1539_v28  ;;  %v15301_v47 = vcombine.low %v1459_v27, %v1539_v28  ;;  %v11038_v51 = vrot.slane %v17277_v41, %v17130_v50  ;;  %v1778_v61 = vunpack.c.l.s8.bf16 %v848_v42 }
 0x1e6   : > { %v13170_v21 = vrot.slane %v13156_v14, %v17188_v56  ;;  %v15460_v58 = vcombine.high %v1618_v33, %v1698_v34  ;;  %v15462_v59 = vcombine.high %v1619_v35, %v1699_v37  ;;  %v1858_v62 = vunpack.c.l.s8.bf16 %v888_v45 }
 0x1e7   : > { %15936 = vmatmul.mubr.msk.bf16.vlgmr.msra.gmra.mrb[36].mxu0 %vm7198_vm1, %v16950_v32  ;;  %15938 = vmatmul.mubr.msk.bf16.vlgmr.msra.gmra.mrb[36].mxu1 %vm7198_vm1, %v16950_v32  ;;  %v1779_v63 = vunpack.c.h.s8.bf16 %v848_v42  ;;  %v1859_v1 = vunpack.c.h.s8.bf16 %v888_v45  ;;  %v11046_v39 = vrot.slane %v17277_v41, %v17140_v53  ;;  %v11042_v2 = vrot.slane %v17277_v41, %v17143_v54 }
 0x1e8   : > { %v13171_v25 = vcombine.low %v13163_v20, %v13170_v21  ;;  %8504 = vmatpush1.bf16.msra.mxu0 %v14819_v8  ;;  %8545 = vmatpush1.bf16.msra.mxu1 %v14821_v11  ;;  %v1938_v3 = vunpack.c.l.s8.bf16 %v928_v48  ;;  %v1939_v4 = vunpack.c.h.s8.bf16 %v928_v48  ;;  %v12038_v5 = vrot.slane %v17285_v55, %v17130_v50 }
 0x1e9   : > { %8505 = vmatprep.subr.bf16.mxu0 %v14980_v18  ;;  %8546 = vmatprep.subr.bf16.mxu1 %v14982_v19  ;;  %v11050_v6 = vrot.slane %v17277_v41, %v17155_v60  ;;  %v15459_v7 = vcombine.low %v1618_v33, %v1698_v34  ;;  %v15461_v8 = vcombine.low %v1619_v35, %v1699_v37  ;;  %v980_v26 = vunpack.c.l.s8.bf16 %v449_v15 }
 0x1ea   : > { %14123 = vst [vmem:[%s17271_s17] sm:$0xff] %v13171_v25  ;;  %8535 = vmatprep.mubr.bf16.mxu0 %v16605_v0  ;;  %8576 = vmatprep.mubr.bf16.mxu1 %v16605_v0  ;;  %v12046_v11 = vrot.slane %v17285_v55, %v17140_v53  ;;  %v12042_v13 = vrot.slane %v17285_v55, %v17143_v54  ;;  %v1060_v27 = vunpack.c.l.s8.bf16 %v489_v16  ;;  %v1061_v33 = vunpack.c.h.s8.bf16 %v489_v16 }
 0x1eb   : > { %v12050_v14 = vrot.slane %v17285_v55, %v17155_v60  ;;  %v15620_v17 = vcombine.high %v1778_v61, %v1858_v62  ;;  %v15622_v18 = vcombine.high %v1779_v63, %v1859_v1  ;;  %v15619_v19 = vcombine.low %v1778_v61, %v1858_v62 }
 0x1ec   : > { %8506 = vmatpush1.bf16.msra.mxu0 %v14979_v23  ;;  %8547 = vmatpush1.bf16.msra.mxu1 %v14981_v24  ;;  %v15621_v52 = vcombine.low %v1779_v63, %v1859_v1  ;;  %v15780_v22 = vcombine.high %v1938_v3, %v1938_v3  ;;  %v15779_v23 = vcombine.low %v1938_v3, %v1938_v3  ;;  %v609_v63 = vld [vmem:[%s16913_s21 + $0x558] sm:$0xff] }
 0x1ed   : > { %8507 = vmatprep.subr.bf16.mxu0 %v15140_v9  ;;  %8548 = vmatprep.subr.bf16.mxu1 %v15142_v10  ;;  %v15781_v24 = vcombine.low %v1939_v4, %v1939_v4 }
 0x1ee   : > { %v7324_v48 = vsel %vm7202_vm0, %v15779_v23, 0 }
 0x1ef   : > { %v7330_v61 = vsel %vm7202_vm0, %v15781_v24, 0 }
 0x1f0   : > { %8508 = vmatpush1.bf16.msra.mxu0 %v15139_v30  ;;  %8549 = vmatpush1.bf16.msra.mxu1 %v15141_v31  ;;  %v981_v31 = vunpack.c.h.s8.bf16 %v449_v15  ;;  %v1301_v15 = vunpack.c.h.s8.bf16 %v609_v63 }
 0x1f1   : > { %8509 = vmatprep.subr.bf16.mxu0 %v15300_v38  ;;  %8550 = vmatprep.subr.bf16.mxu1 %v15302_v40  ;;  %v15782_v40 = vcombine.high %v1939_v4, %v1939_v4  ;;  %v649_v4 = vld [vmem:[%s16913_s21 + $0x698] sm:$0xff] }
 0x1f2   : > { %v14826_v62 = vcombine.high %v981_v31, %v1061_v33  ;;  %v1381_v16 = vunpack.c.h.s8.bf16 %v649_v4 }
 0x1f4   : > { %8510 = vmatpush1.bf16.msra.mxu0 %v15299_v46  ;;  %8551 = vmatpush1.bf16.msra.mxu1 %v15301_v47  ;;  %v529_v46 = vld [vmem:[%s16913_s21 + $0x2d8] sm:$0xff]  ;;  %v15146_v23 = vcombine.high %v1301_v15, %v1381_v16 }
 0x1f5   : > { %8511 = vmatprep.subr.bf16.mxu0 %v15460_v58  ;;  %8552 = vmatprep.subr.bf16.mxu1 %v15462_v59  ;;  %v569_v47 = vld [vmem:[%s16913_s21 + $0x418] sm:$0xff]  ;;  %v1140_v1 = vunpack.c.l.s8.bf16 %v529_v46 }
 0x1f6   : > { %v7881_v20 = vpop.f32.mrb[8].mxu0  ;;  %v7922_v21 = vpop.f32.mrb[8].mxu1  ;;  %v1221_v3 = vunpack.c.h.s8.bf16 %v569_v47 }
 0x1f7   : > { %v11811_v25 = vmul.f32 %v11038_v51, %v7881_v20  ;;  %v11813_v9 = vmul.f32 %v11046_v39, %v7922_v21  ;;  %v7883_v10 = vpop.f32.mrb[9].mxu0  ;;  %v7924_v12 = vpop.f32.mrb[9].mxu1  ;;  %v14824_v51 = vcombine.high %v980_v26, %v1060_v27  ;;  %v1220_v39 = vunpack.c.l.s8.bf16 %v569_v47  ;;  %v729_v20 = vld [vmem:[%s16913_s21 + $0x918] sm:$0xff] }
 0x1f8   : > { %v11812_v28 = vmul.f32 %v11042_v2, %v7883_v10  ;;  %v11814_v29 = vmul.f32 %v11050_v6, %v7924_v12  ;;  %v7885_v57 = vpop.f32.mrb[10].mxu0  ;;  %v7926_v30 = vpop.f32.mrb[10].mxu1  ;;  %8512 = vmatpush1.bf16.msra.mxu0 %v15459_v7  ;;  %8553 = vmatpush1.bf16.msra.mxu1 %v15461_v8  ;;  %v1141_v2 = vunpack.c.h.s8.bf16 %v529_v46  ;;  %v14823_v7 = vcombine.low %v980_v26, %v1060_v27  ;;  %v769_v12 = vld [vmem:[%s16913_s21 + $0xa58] sm:$0xff] }
 0x1f9   : > { %v12811_v34 = vadd.f32 %v12038_v5, %v11811_v25  ;;  %v12813_v35 = vadd.f32 %v12046_v11, %v11813_v9  ;;  %v7886_v37 = vpop.f32.mrb[11].mxu0  ;;  %v7927_v38 = vpop.f32.mrb[11].mxu1  ;;  %8513 = vmatprep.subr.bf16.mxu0 %v15620_v17  ;;  %8554 = vmatprep.subr.bf16.mxu1 %v15622_v18  ;;  %v14825_v8 = vcombine.low %v981_v31, %v1061_v33  ;;  %v1300_v11 = vunpack.c.l.s8.bf16 %v609_v63  ;;  %v809_v26 = vld [vmem:[%s16913_s21 + $0xb98] sm:$0xff] }
 0x1fa   : > { %v12812_v42 = vadd.f32 %v12042_v13, %v11812_v28  ;;  %v12814_v45 = vadd.f32 %v12050_v14, %v11814_v29  ;;  %v1380_v14 = vunpack.c.l.s8.bf16 %v649_v4  ;;  %v14984_v17 = vcombine.high %v1140_v1, %v1220_v39  ;;  %v889_v37 = vld [vmem:[%s16913_s21 + $0xe18] sm:$0xff] }
 0x1fb   : > { %v14986_v18 = vcombine.high %v1141_v2, %v1221_v3  ;;  %v14983_v21 = vcombine.low %v1140_v1, %v1220_v39  ;;  %v1540_v25 = vunpack.c.l.s8.bf16 %v729_v20  ;;  %v1541_v10 = vunpack.c.h.s8.bf16 %v729_v20 }
 0x1fc   : > { %v13172_v58 = vcombine.low %v12811_v34, %v12812_v42  ;;  %v13173_v59 = vcombine.low %v12813_v35, %v12814_v45  ;;  %8514 = vmatpush1.bf16.msra.mxu0 %v15619_v19  ;;  %8555 = vmatpush1.bf16.msra.mxu1 %v15621_v52  ;;  %v689_v19 = vld [vmem:[%s16913_s21 + $0x7d8] sm:$0xff]  ;;  %v14985_v52 = vcombine.low %v1141_v2, %v1221_v3  ;;  %v1620_v29 = vunpack.c.l.s8.bf16 %v769_v12 }
 0x1fd   : > { %15939 = vmatprep.subr.msk.bf16.mxu0 %vm7202_vm0, %v15780_v22  ;;  %15941 = vmatprep.subr.msk.bf16.mxu1 %vm7202_vm0, %v15782_v40  ;;  %v15144_v22 = vcombine.high %v1300_v11, %v1380_v14  ;;  %v1460_v24 = vunpack.c.l.s8.bf16 %v689_v19  ;;  %v1461_v9 = vunpack.c.h.s8.bf16 %v689_v19  ;;  %v15143_v27 = vcombine.low %v1300_v11, %v1380_v14  ;;  %v849_v35 = vld [vmem:[%s16913_s21 + $0xcd8] sm:$0xff]  ;;  %v450_v14 = vld [vmem:[%s16913_s21 + $0x60] sm:$0xff] }
 0x1fe   : > { %v17312_v5 = vrot.slane %v13172_v58, %v17188_v56  ;;  %v17315_v6 = vrot.slane %v13173_v59, %v17188_v56  ;;  %v15145_v28 = vcombine.low %v1301_v15, %v1381_v16  ;;  %v1700_v57 = vunpack.c.l.s8.bf16 %v809_v26  ;;  %v929_v42 = vld [vmem:[%s16913_s21 + $0xf58] sm:$0x55]  ;;  %v490_v15 = vld [vmem:[%s16913_s21 + $0x1a0] sm:$0xff] }
 0x1ff   : > { %v1621_v30 = vunpack.c.h.s8.bf16 %v769_v12  ;;  %v1701_v31 = vunpack.c.h.s8.bf16 %v809_v26  ;;  %v15304_v33 = vcombine.high %v1460_v24, %v1540_v25  ;;  %v15306_v34 = vcombine.high %v1461_v9, %v1541_v10 }
 0x200   : > { %v13204_v13 = vcombine.low %v17312_v5, %v17315_v6  ;;  %8516 = vmatpush1.bf16.msra.mxu0 %v7324_v48  ;;  %8557 = vmatpush1.bf16.msra.mxu1 %v7330_v61  ;;  %v15303_v38 = vcombine.low %v1460_v24, %v1540_v25  ;;  %v15305_v40 = vcombine.low %v1461_v9, %v1541_v10  ;;  %v1780_v48 = vunpack.c.l.s8.bf16 %v849_v35 }
 0x201   : > { %8585 = vmatprep.subr.bf16.mxu0 %v14824_v51  ;;  %8626 = vmatprep.subr.bf16.mxu1 %v14826_v62  ;;  %v11054_v45 = vrot.slane %v17277_v41, %v17215_v36  ;;  %v15464_v46 = vcombine.high %v1620_v29, %v1700_v57  ;;  %v15466_v47 = vcombine.high %v1621_v30, %v1701_v31  ;;  %v1860_v51 = vunpack.c.l.s8.bf16 %v889_v37 }
 0x202   : > { %v1781_v58 = vunpack.c.h.s8.bf16 %v849_v35  ;;  %v1861_v59 = vunpack.c.h.s8.bf16 %v889_v37  ;;  %v11062_v61 = vrot.slane %v17277_v41, %v17218_v43  ;;  %v11058_v62 = vrot.slane %v17277_v41, %v17221_v44 }
 0x203   : > { %15940 = vmatmul.mubr.msk.bf16.vlgmr.msra.gmra.mrb[40].mxu0 %vm7198_vm1, %v16950_v32  ;;  %15942 = vmatmul.mubr.msk.bf16.vlgmr.msra.gmra.mrb[40].mxu1 %vm7198_vm1, %v16950_v32  ;;  %v1940_v63 = vunpack.c.l.s8.bf16 %v929_v42  ;;  %v1941_v1 = vunpack.c.h.s8.bf16 %v929_v42  ;;  %v12054_v39 = vrot.slane %v17285_v55, %v17215_v36  ;;  %v11066_v2 = vrot.slane %v17277_v41, %v17226_v49  ;;  %v570_v42 = vld [vmem:[%s16913_s21 + $0x420] sm:$0xff] }
 0x204   : > { %8586 = vmatpush1.bf16.msra.mxu0 %v14823_v7  ;;  %8627 = vmatpush1.bf16.msra.mxu1 %v14825_v8  ;;  %v15463_v3 = vcombine.low %v1620_v29, %v1700_v57  ;;  %v15465_v4 = vcombine.low %v1621_v30, %v1701_v31  ;;  %v12062_v7 = vrot.slane %v17285_v55, %v17218_v43  ;;  %v982_v10 = vunpack.c.l.s8.bf16 %v450_v14 }
 0x205   : > { %8587 = vmatprep.subr.bf16.mxu0 %v14984_v17  ;;  %8628 = vmatprep.subr.bf16.mxu1 %v14986_v18  ;;  %v12058_v8 = vrot.slane %v17285_v55, %v17221_v44  ;;  %v12066_v11 = vrot.slane %v17285_v55, %v17226_v49  ;;  %v15624_v16 = vcombine.high %v1780_v48, %v1860_v51  ;;  %v1062_v12 = vunpack.c.l.s8.bf16 %v490_v15 }
 0x206   : > { %8617 = vmatprep.mubr.bf16.mxu0 %v16605_v0  ;;  %8658 = vmatprep.mubr.bf16.mxu1 %v16605_v0  ;;  %v15626_v17 = vcombine.high %v1781_v58, %v1861_v59  ;;  %v15623_v41 = vcombine.low %v1780_v48, %v1860_v51  ;;  %v15625_v20 = vcombine.low %v1781_v58, %v1861_v59  ;;  %v983_v29 = vunpack.c.h.s8.bf16 %v450_v14  ;;  %v610_v59 = vld [vmem:[%s16913_s21 + $0x560] sm:$0xff] }
 0x207   : > { %v1063_v57 = vunpack.c.h.s8.bf16 %v490_v15  ;;  %v15786_v35 = vcombine.high %v1941_v1, %v1941_v1  ;;  %v1303_v15 = vunpack.c.h.s8.bf16 %v610_v59 }
 0x208   : > { %8588 = vmatpush1.bf16.msra.mxu0 %v14983_v21  ;;  %8629 = vmatpush1.bf16.msra.mxu1 %v14985_v52  ;;  %v15784_v21 = vcombine.high %v1940_v63, %v1940_v63  ;;  %v15783_v52 = vcombine.low %v1940_v63, %v1940_v63 }
 0x209   : > { %8589 = vmatprep.subr.bf16.mxu0 %v15144_v22  ;;  %8630 = vmatprep.subr.bf16.mxu1 %v15146_v23  ;;  %v15785_v22 = vcombine.low %v1941_v1, %v1941_v1  ;;  %v14830_v58 = vcombine.high %v983_v29, %v1063_v57  ;;  %v1223_v1 = vunpack.c.h.s8.bf16 %v570_v42 }
 0x20b   : > { %v7342_v51 = vsel %vm7202_vm0, %v15785_v22, 0 }
 0x20c   : > { %8590 = vmatpush1.bf16.msra.mxu0 %v15143_v27  ;;  %8631 = vmatpush1.bf16.msra.mxu1 %v15145_v28 }
 0x20d   : > { %8591 = vmatprep.subr.bf16.mxu0 %v15304_v33  ;;  %8632 = vmatprep.subr.bf16.mxu1 %v15306_v34 }
 0x210   : > { %8592 = vmatpush1.bf16.msra.mxu0 %v15303_v38  ;;  %8633 = vmatpush1.bf16.msra.mxu1 %v15305_v40  ;;  %v530_v40 = vld [vmem:[%s16913_s21 + $0x2e0] sm:$0xff] }
 0x211   : > { %8593 = vmatprep.subr.bf16.mxu0 %v15464_v46  ;;  %8634 = vmatprep.subr.bf16.mxu1 %v15466_v47  ;;  %v14828_v46 = vcombine.high %v982_v10, %v1062_v12  ;;  %v1143_v63 = vunpack.c.h.s8.bf16 %v530_v40 }
 0x212   : > { %v7963_v18 = vpop.f32.mrb[12].mxu0  ;;  %v8004_v19 = vpop.f32.mrb[12].mxu1 }
 0x213   : > { %v11815_v23 = vmul.f32 %v11054_v45, %v7963_v18  ;;  %v11817_v24 = vmul.f32 %v11062_v61, %v8004_v19  ;;  %v7965_v25 = vpop.f32.mrb[13].mxu0  ;;  %v8006_v9 = vpop.f32.mrb[13].mxu1  ;;  %v7336_v45 = vsel %vm7202_vm0, %v15783_v52, 0  ;;  %v1142_v61 = vunpack.c.l.s8.bf16 %v530_v40  ;;  %v930_v40 = vld [vmem:[%s16913_s21 + $0xf60] sm:$0x55] }
 0x214   : > { %v11816_v55 = vmul.f32 %v11058_v62, %v7965_v25  ;;  %v11818_v26 = vmul.f32 %v11066_v2, %v8006_v9  ;;  %v7967_v27 = vpop.f32.mrb[14].mxu0  ;;  %v8008_v28 = vpop.f32.mrb[14].mxu1  ;;  %8594 = vmatpush1.bf16.msra.mxu0 %v15463_v3  ;;  %8635 = vmatpush1.bf16.msra.mxu1 %v15465_v4  ;;  %v1222_v62 = vunpack.c.l.s8.bf16 %v570_v42  ;;  %v14827_v4 = vcombine.low %v982_v10, %v1062_v12  ;;  %v770_v10 = vld [vmem:[%s16913_s21 + $0xa60] sm:$0xff] }
 0x215   : > { %v12815_v30 = vadd.f32 %v12054_v39, %v11815_v23  ;;  %v12817_v31 = vadd.f32 %v12062_v7, %v11817_v24  ;;  %v7968_v33 = vpop.f32.mrb[15].mxu0  ;;  %v8009_v34 = vpop.f32.mrb[15].mxu1  ;;  %8595 = vmatprep.subr.bf16.mxu0 %v15624_v16  ;;  %8636 = vmatprep.subr.bf16.mxu1 %v15626_v17  ;;  %v650_v39 = vld [vmem:[%s16913_s21 + $0x6a0] sm:$0xff]  ;;  %v14829_v7 = vcombine.low %v983_v29, %v1063_v57  ;;  %v1622_v27 = vunpack.c.l.s8.bf16 %v770_v10 }
 0x216   : > { %v12816_v37 = vadd.f32 %v12058_v8, %v11816_v55  ;;  %v12818_v38 = vadd.f32 %v12066_v11, %v11818_v26  ;;  %v1302_v8 = vunpack.c.l.s8.bf16 %v610_v59  ;;  %v1382_v14 = vunpack.c.l.s8.bf16 %v650_v39  ;;  %v810_v12 = vld [vmem:[%s16913_s21 + $0xba0] sm:$0xff]  ;;  %v17377_v33 = vld [vmem:[%s17134_s20 + $0x10] sm:$0xff] }
 0x217   : > { %v1383_v16 = vunpack.c.h.s8.bf16 %v650_v39  ;;  %v14988_v17 = vcombine.high %v1142_v61, %v1222_v62  ;;  %v13212_v18 = vrot.slane %v13204_v13, %v17188_v56  ;;  %v14987_v52 = vcombine.low %v1142_v61, %v1222_v62  ;;  %v850_v34 = vld [vmem:[%s16913_s21 + $0xce0] sm:$0xff] }
 0x218   : > { %v13174_v47 = vcombine.low %v12815_v30, %v12816_v37  ;;  %v13175_v48 = vcombine.low %v12817_v31, %v12818_v38  ;;  %8596 = vmatpush1.bf16.msra.mxu0 %v15623_v41  ;;  %8637 = vmatpush1.bf16.msra.mxu1 %v15625_v20  ;;  %v14990_v41 = vcombine.high %v1143_v63, %v1223_v1  ;;  %v690_v20 = vld [vmem:[%s16913_s21 + $0x7e0] sm:$0xff]  ;;  %v1702_v28 = vunpack.c.l.s8.bf16 %v810_v12 }
 0x219   : > { %15943 = vmatprep.subr.msk.bf16.mxu0 %vm7202_vm0, %v15784_v21  ;;  %15945 = vmatprep.subr.msk.bf16.mxu1 %vm7202_vm0, %v15786_v35  ;;  %v730_v21 = vld [vmem:[%s16913_s21 + $0x920] sm:$0xff]  ;;  %v14989_v22 = vcombine.low %v1143_v63, %v1223_v1  ;;  %v15148_v5 = vcombine.high %v1302_v8, %v1382_v14  ;;  %v15150_v6 = vcombine.high %v1303_v15, %v1383_v16  ;;  %v1462_v13 = vunpack.c.l.s8.bf16 %v690_v20 }
 0x21a   : > { %v13196_v2 = vrot.slane %v13174_v47, %v17188_v56  ;;  %v13203_v3 = vrot.slane %v13175_v48, %v17188_v56  ;;  %v1542_v24 = vunpack.c.l.s8.bf16 %v730_v21  ;;  %v1463_v25 = vunpack.c.h.s8.bf16 %v690_v20  ;;  %v890_v35 = vld [vmem:[%s16913_s21 + $0xe20] sm:$0xff] }
 0x21b   : > { %v1543_v9 = vunpack.c.h.s8.bf16 %v730_v21  ;;  %v15147_v55 = vcombine.low %v1302_v8, %v1382_v14  ;;  %v15149_v26 = vcombine.low %v1303_v15, %v1383_v16  ;;  %v1623_v29 = vunpack.c.h.s8.bf16 %v770_v10  ;;  %v451_v14 = vld [vmem:[%s16913_s21 + $0x68] sm:$0xff] }
 0x21c   : > { %v13205_v11 = vcombine.low %v13196_v2, %v13203_v3  ;;  %8598 = vmatpush1.bf16.msra.mxu0 %v7336_v45  ;;  %8639 = vmatpush1.bf16.msra.mxu1 %v7342_v51  ;;  %v1703_v57 = vunpack.c.h.s8.bf16 %v810_v12  ;;  %v15308_v30 = vcombine.high %v1462_v13, %v1542_v24  ;;  %v15307_v37 = vcombine.low %v1462_v13, %v1542_v24  ;;  %v17385_v45 = vld [vmem:[%s17147_s22 + $0x10] sm:$0xff]  ;;  %v491_v15 = vld [vmem:[%s16913_s21 + $0x1a8] sm:$0xff] }
 0x21d   : > { %8667 = vmatprep.subr.bf16.mxu0 %v14828_v46  ;;  %8708 = vmatprep.subr.bf16.mxu1 %v14830_v58  ;;  %v15310_v31 = vcombine.high %v1463_v25, %v1543_v9  ;;  %v15309_v38 = vcombine.low %v1463_v25, %v1543_v9  ;;  %v11070_v42 = vrot.slane %v17377_v33, %v17130_v50  ;;  %v1782_v48 = vunpack.c.l.s8.bf16 %v850_v34 }
 0x21e   : > { %v13219_v19 = vrot.slane %v13205_v11, %v17188_v56  ;;  %v15468_v46 = vcombine.high %v1622_v27, %v1702_v28  ;;  %v15470_v47 = vcombine.high %v1623_v29, %v1703_v57  ;;  %v1862_v51 = vunpack.c.l.s8.bf16 %v890_v35 }
 0x21f   : > { %15944 = vmatmul.mubr.msk.bf16.vlgmr.msra.gmra.mrb[44].mxu0 %vm7198_vm1, %v16950_v32  ;;  %15946 = vmatmul.mubr.msk.bf16.vlgmr.msra.gmra.mrb[44].mxu1 %vm7198_vm1, %v16950_v32  ;;  %v1783_v58 = vunpack.c.h.s8.bf16 %v850_v34  ;;  %v1863_v59 = vunpack.c.h.s8.bf16 %v890_v35  ;;  %v11078_v61 = vrot.slane %v17377_v33, %v17140_v53  ;;  %v11074_v62 = vrot.slane %v17377_v33, %v17143_v54 }
 0x220   : > { %v13220_v23 = vcombine.low %v13212_v18, %v13219_v19  ;;  %8668 = vmatpush1.bf16.msra.mxu0 %v14827_v4  ;;  %8709 = vmatpush1.bf16.msra.mxu1 %v14829_v7  ;;  %v1942_v63 = vunpack.c.l.s8.bf16 %v930_v40  ;;  %v1943_v1 = vunpack.c.h.s8.bf16 %v930_v40  ;;  %v12070_v39 = vrot.slane %v17385_v45, %v17130_v50 }
 0x221   : > { %8669 = vmatprep.subr.bf16.mxu0 %v14988_v17  ;;  %8710 = vmatprep.subr.bf16.mxu1 %v14990_v41  ;;  %v11082_v2 = vrot.slane %v17377_v33, %v17155_v60  ;;  %v15467_v3 = vcombine.low %v1622_v27, %v1702_v28  ;;  %v15469_v4 = vcombine.low %v1623_v29, %v1703_v57  ;;  %v984_v24 = vunpack.c.l.s8.bf16 %v451_v14 }
 0x222   : > { %14124 = vst [vmem:[%s17271_s17 + $0x8] sm:$0xff] %v13220_v23  ;;  %8699 = vmatprep.mubr.bf16.mxu0 %v16605_v0  ;;  %8740 = vmatprep.mubr.bf16.mxu1 %v16605_v0  ;;  %v12078_v7 = vrot.slane %v17385_v45, %v17140_v53  ;;  %v12074_v8 = vrot.slane %v17385_v45, %v17143_v54  ;;  %v1064_v25 = vunpack.c.l.s8.bf16 %v491_v15  ;;  %v1065_v27 = vunpack.c.h.s8.bf16 %v491_v15 }
 0x223   : > { %v12082_v11 = vrot.slane %v17385_v45, %v17155_v60  ;;  %v15628_v16 = vcombine.high %v1782_v48, %v1862_v51  ;;  %v15630_v17 = vcombine.high %v1783_v58, %v1863_v59  ;;  %v15627_v41 = vcombine.low %v1782_v48, %v1862_v51 }
 0x224   : > { %8670 = vmatpush1.bf16.msra.mxu0 %v14987_v52  ;;  %8711 = vmatpush1.bf16.msra.mxu1 %v14989_v22  ;;  %v15629_v20 = vcombine.low %v1783_v58, %v1863_v59  ;;  %v15788_v21 = vcombine.high %v1942_v63, %v1942_v63  ;;  %v15787_v52 = vcombine.low %v1942_v63, %v1942_v63  ;;  %v611_v58 = vld [vmem:[%s16913_s21 + $0x568] sm:$0xff] }
 0x225   : > { %8671 = vmatprep.subr.bf16.mxu0 %v15148_v5  ;;  %8712 = vmatprep.subr.bf16.mxu1 %v15150_v6  ;;  %v15789_v22 = vcombine.low %v1943_v1, %v1943_v1 }
 0x226   : > { %v7348_v40 = vsel %vm7202_vm0, %v15787_v52, 0 }
 0x227   : > { %v7354_v48 = vsel %vm7202_vm0, %v15789_v22, 0 }
 0x228   : > { %8672 = vmatpush1.bf16.msra.mxu0 %v15147_v55  ;;  %8713 = vmatpush1.bf16.msra.mxu1 %v15149_v26  ;;  %v985_v26 = vunpack.c.h.s8.bf16 %v451_v14  ;;  %v1305_v14 = vunpack.c.h.s8.bf16 %v611_v58 }
 0x229   : > { %8673 = vmatprep.subr.bf16.mxu0 %v15308_v30  ;;  %8714 = vmatprep.subr.bf16.mxu1 %v15310_v31  ;;  %v15790_v31 = vcombine.high %v1943_v1, %v1943_v1  ;;  %v651_v1 = vld [vmem:[%s16913_s21 + $0x6a8] sm:$0xff] }
 0x22a   : > { %v14834_v51 = vcombine.high %v985_v26, %v1065_v27  ;;  %v1385_v15 = vunpack.c.h.s8.bf16 %v651_v1 }
 0x22c   : > { %8674 = vmatpush1.bf16.msra.mxu0 %v15307_v37  ;;  %8715 = vmatpush1.bf16.msra.mxu1 %v15309_v38  ;;  %v531_v37 = vld [vmem:[%s16913_s21 + $0x2e8] sm:$0xff]  ;;  %v15154_v52 = vcombine.high %v1305_v14, %v1385_v15 }
 0x22d   : > { %8675 = vmatprep.subr.bf16.mxu0 %v15468_v46  ;;  %8716 = vmatprep.subr.bf16.mxu1 %v15470_v47  ;;  %v571_v38 = vld [vmem:[%s16913_s21 + $0x428] sm:$0xff]  ;;  %v1144_v59 = vunpack.c.l.s8.bf16 %v531_v37 }
 0x22e   : > { %v8045_v18 = vpop.f32.mrb[16].mxu0  ;;  %v8086_v19 = vpop.f32.mrb[16].mxu1  ;;  %v1225_v63 = vunpack.c.h.s8.bf16 %v571_v38 }
 0x22f   : > { %v11819_v23 = vmul.f32 %v11070_v42, %v8045_v18  ;;  %v11821_v5 = vmul.f32 %v11078_v61, %v8086_v19  ;;  %v8047_v6 = vpop.f32.mrb[17].mxu0  ;;  %v8088_v13 = vpop.f32.mrb[17].mxu1  ;;  %v14832_v42 = vcombine.high %v984_v24, %v1064_v25  ;;  %v1224_v61 = vunpack.c.l.s8.bf16 %v571_v38  ;;  %v731_v18 = vld [vmem:[%s16913_s21 + $0x928] sm:$0xff] }
 0x230   : > { %v11820_v9 = vmul.f32 %v11074_v62, %v8047_v6  ;;  %v11822_v10 = vmul.f32 %v11082_v2, %v8088_v13  ;;  %v8049_v12 = vpop.f32.mrb[18].mxu0  ;;  %v8090_v55 = vpop.f32.mrb[18].mxu1  ;;  %8676 = vmatpush1.bf16.msra.mxu0 %v15467_v3  ;;  %8717 = vmatpush1.bf16.msra.mxu1 %v15469_v4  ;;  %v1145_v62 = vunpack.c.h.s8.bf16 %v531_v37  ;;  %v14831_v3 = vcombine.low %v984_v24, %v1064_v25  ;;  %v771_v13 = vld [vmem:[%s16913_s21 + $0xa68] sm:$0xff] }
 0x231   : > { %v12819_v28 = vadd.f32 %v12070_v39, %v11819_v23  ;;  %v12821_v29 = vadd.f32 %v12078_v7, %v11821_v5  ;;  %v8050_v57 = vpop.f32.mrb[19].mxu0  ;;  %v8091_v30 = vpop.f32.mrb[19].mxu1  ;;  %8677 = vmatprep.subr.bf16.mxu0 %v15628_v16  ;;  %8718 = vmatprep.subr.bf16.mxu1 %v15630_v17  ;;  %v14833_v4 = vcombine.low %v985_v26, %v1065_v27  ;;  %v1304_v7 = vunpack.c.l.s8.bf16 %v611_v58  ;;  %v811_v24 = vld [vmem:[%s16913_s21 + $0xba8] sm:$0xff] }
 0x232   : > { %v12820_v34 = vadd.f32 %v12074_v8, %v11820_v9  ;;  %v12822_v35 = vadd.f32 %v12082_v11, %v11822_v10  ;;  %v1384_v11 = vunpack.c.l.s8.bf16 %v651_v1  ;;  %v14992_v16 = vcombine.high %v1144_v59, %v1224_v61  ;;  %v891_v57 = vld [vmem:[%s16913_s21 + $0xe28] sm:$0xff] }
 0x233   : > { %v14994_v17 = vcombine.high %v1145_v62, %v1225_v63  ;;  %v14991_v19 = vcombine.low %v1144_v59, %v1224_v61  ;;  %v1544_v23 = vunpack.c.l.s8.bf16 %v731_v18  ;;  %v1545_v6 = vunpack.c.h.s8.bf16 %v731_v18 }
 0x234   : > { %v13221_v46 = vcombine.low %v12819_v28, %v12820_v34  ;;  %v13222_v47 = vcombine.low %v12821_v29, %v12822_v35  ;;  %8678 = vmatpush1.bf16.msra.mxu0 %v15627_v41  ;;  %8719 = vmatpush1.bf16.msra.mxu1 %v15629_v20  ;;  %v691_v41 = vld [vmem:[%s16913_s21 + $0x7e8] sm:$0xff]  ;;  %v14993_v20 = vcombine.low %v1145_v62, %v1225_v63  ;;  %v1624_v10 = vunpack.c.l.s8.bf16 %v771_v13 }
 0x235   : > { %15947 = vmatprep.subr.msk.bf16.mxu0 %vm7202_vm0, %v15788_v21  ;;  %15949 = vmatprep.subr.msk.bf16.mxu1 %vm7202_vm0, %v15790_v31  ;;  %v15152_v21 = vcombine.high %v1304_v7, %v1384_v11  ;;  %v1464_v22 = vunpack.c.l.s8.bf16 %v691_v41  ;;  %v1465_v5 = vunpack.c.h.s8.bf16 %v691_v41  ;;  %v15151_v25 = vcombine.low %v1304_v7, %v1384_v11  ;;  %v851_v29 = vld [vmem:[%s16913_s21 + $0xce8] sm:$0xff]  ;;  %v452_v11 = vld [vmem:[%s16913_s21 + $0x70] sm:$0xff] }
 0x236   : > { %v17412_v39 = vrot.slane %v13221_v46, %v17188_v56  ;;  %v17415_v2 = vrot.slane %v13222_v47, %v17188_v56  ;;  %v15153_v9 = vcombine.low %v1305_v14, %v1385_v15  ;;  %v1704_v12 = vunpack.c.l.s8.bf16 %v811_v24  ;;  %v931_v34 = vld [vmem:[%s16913_s21 + $0xf68] sm:$0x55]  ;;  %v492_v14 = vld [vmem:[%s16913_s21 + $0x1b0] sm:$0xff] }
 0x237   : > { %v1625_v55 = vunpack.c.h.s8.bf16 %v771_v13  ;;  %v1705_v26 = vunpack.c.h.s8.bf16 %v811_v24  ;;  %v15312_v27 = vcombine.high %v1464_v22, %v1544_v23  ;;  %v15314_v28 = vcombine.high %v1465_v5, %v1545_v6 }
 0x238   : > { %v13253_v8 = vcombine.low %v17412_v39, %v17415_v2  ;;  %8680 = vmatpush1.bf16.msra.mxu0 %v7348_v40  ;;  %8721 = vmatpush1.bf16.msra.mxu1 %v7354_v48  ;;  %v15311_v30 = vcombine.low %v1464_v22, %v1544_v23  ;;  %v15313_v31 = vcombine.low %v1465_v5, %v1545_v6  ;;  %v1784_v40 = vunpack.c.l.s8.bf16 %v851_v29 }
 0x239   : > { %8749 = vmatprep.subr.bf16.mxu0 %v14832_v42  ;;  %8790 = vmatprep.subr.bf16.mxu1 %v14834_v51  ;;  %v11086_v35 = vrot.slane %v17377_v33, %v17215_v36  ;;  %v15472_v37 = vcombine.high %v1624_v10, %v1704_v12  ;;  %v15474_v38 = vcombine.high %v1625_v55, %v1705_v26  ;;  %v1864_v42 = vunpack.c.l.s8.bf16 %v891_v57 }
 0x23a   : > { %v1785_v46 = vunpack.c.h.s8.bf16 %v851_v29  ;;  %v1865_v47 = vunpack.c.h.s8.bf16 %v891_v57  ;;  %v11094_v48 = vrot.slane %v17377_v33, %v17218_v43  ;;  %v11090_v51 = vrot.slane %v17377_v33, %v17221_v44 }
 0x23b   : > { %15948 = vmatmul.mubr.msk.bf16.vlgmr.msra.gmra.mrb[48].mxu0 %vm7198_vm1, %v16950_v32  ;;  %15950 = vmatmul.mubr.msk.bf16.vlgmr.msra.gmra.mrb[48].mxu1 %vm7198_vm1, %v16950_v32  ;;  %v1944_v58 = vunpack.c.l.s8.bf16 %v931_v34  ;;  %v1945_v59 = vunpack.c.h.s8.bf16 %v931_v34  ;;  %v12086_v61 = vrot.slane %v17385_v45, %v17215_v36  ;;  %v12094_v62 = vrot.slane %v17385_v45, %v17218_v43  ;;  %v572_v34 = vld [vmem:[%s16913_s21 + $0x430] sm:$0xff] }
 0x23c   : > { %8750 = vmatpush1.bf16.msra.mxu0 %v14831_v3  ;;  %8791 = vmatpush1.bf16.msra.mxu1 %v14833_v4  ;;  %v11098_v63 = vrot.slane %v17377_v33, %v17226_v49  ;;  %v15471_v1 = vcombine.low %v1624_v10, %v1704_v12  ;;  %v12090_v3 = vrot.slane %v17385_v45, %v17221_v44  ;;  %v986_v6 = vunpack.c.l.s8.bf16 %v452_v11 }
 0x23d   : > { %8751 = vmatprep.subr.bf16.mxu0 %v14992_v16  ;;  %8792 = vmatprep.subr.bf16.mxu1 %v14994_v17  ;;  %v12098_v4 = vrot.slane %v17385_v45, %v17226_v49  ;;  %v15473_v7 = vcombine.low %v1625_v55, %v1705_v26  ;;  %v15632_v15 = vcombine.high %v1784_v40, %v1864_v42  ;;  %v1066_v45 = vunpack.c.l.s8.bf16 %v492_v14 }
 0x23e   : > { %8781 = vmatprep.mubr.bf16.mxu0 %v16605_v0  ;;  %8822 = vmatprep.mubr.bf16.mxu1 %v16605_v0  ;;  %v15634_v16 = vcombine.high %v1785_v46, %v1865_v47  ;;  %v15631_v17 = vcombine.low %v1784_v40, %v1864_v42  ;;  %v15633_v33 = vcombine.low %v1785_v46, %v1865_v47  ;;  %v987_v10 = vunpack.c.h.s8.bf16 %v452_v11  ;;  %v612_v47 = vld [vmem:[%s16913_s21 + $0x570] sm:$0xff] }
 0x23f   : > { %v1067_v12 = vunpack.c.h.s8.bf16 %v492_v14  ;;  %v15794_v29 = vcombine.high %v1945_v59, %v1945_v59  ;;  %v1307_v14 = vunpack.c.h.s8.bf16 %v612_v47 }
 0x240   : > { %8752 = vmatpush1.bf16.msra.mxu0 %v14991_v19  ;;  %8793 = vmatpush1.bf16.msra.mxu1 %v14993_v20  ;;  %v15792_v19 = vcombine.high %v1944_v58, %v1944_v58  ;;  %v15791_v20 = vcombine.low %v1944_v58, %v1944_v58 }
 0x241   : > { %8753 = vmatprep.subr.bf16.mxu0 %v15152_v21  ;;  %8794 = vmatprep.subr.bf16.mxu1 %v15154_v52  ;;  %v15793_v21 = vcombine.low %v1945_v59, %v1945_v59  ;;  %v14838_v46 = vcombine.high %v987_v10, %v1067_v12  ;;  %v1227_v59 = vunpack.c.h.s8.bf16 %v572_v34 }
 0x243   : > { %v7366_v42 = vsel %vm7202_vm0, %v15793_v21, 0 }
 0x244   : > { %8754 = vmatpush1.bf16.msra.mxu0 %v15151_v25  ;;  %8795 = vmatpush1.bf16.msra.mxu1 %v15153_v9 }
 0x245   : > { %8755 = vmatprep.subr.bf16.mxu0 %v15312_v27  ;;  %8796 = vmatprep.subr.bf16.mxu1 %v15314_v28 }
 0x248   : > { %8756 = vmatpush1.bf16.msra.mxu0 %v15311_v30  ;;  %8797 = vmatpush1.bf16.msra.mxu1 %v15313_v31  ;;  %v532_v31 = vld [vmem:[%s16913_s21 + $0x2f0] sm:$0xff] }
 0x249   : > { %8757 = vmatprep.subr.bf16.mxu0 %v15472_v37  ;;  %8798 = vmatprep.subr.bf16.mxu1 %v15474_v38  ;;  %v14836_v37 = vcombine.high %v986_v6, %v1066_v45  ;;  %v1147_v58 = vunpack.c.h.s8.bf16 %v532_v31 }
 0x24a   : > { %v8127_v41 = vpop.f32.mrb[20].mxu0  ;;  %v8168_v18 = vpop.f32.mrb[20].mxu1 }
 0x24b   : > { %v11823_v52 = vmul.f32 %v11086_v35, %v8127_v41  ;;  %v11825_v22 = vmul.f32 %v11094_v48, %v8168_v18  ;;  %v8129_v23 = vpop.f32.mrb[21].mxu0  ;;  %v8170_v5 = vpop.f32.mrb[21].mxu1  ;;  %v7360_v35 = vsel %vm7202_vm0, %v15791_v20, 0  ;;  %v1146_v48 = vunpack.c.l.s8.bf16 %v532_v31  ;;  %v932_v31 = vld [vmem:[%s16913_s21 + $0xf70] sm:$0x55] }
 0x24c   : > { %v11824_v13 = vmul.f32 %v11090_v51, %v8129_v23  ;;  %v11826_v24 = vmul.f32 %v11098_v63, %v8170_v5  ;;  %v8131_v25 = vpop.f32.mrb[22].mxu0  ;;  %v8172_v9 = vpop.f32.mrb[22].mxu1  ;;  %8758 = vmatpush1.bf16.msra.mxu0 %v15471_v1  ;;  %8799 = vmatpush1.bf16.msra.mxu1 %v15473_v7  ;;  %v1226_v51 = vunpack.c.l.s8.bf16 %v572_v34  ;;  %v14835_v1 = vcombine.low %v986_v6, %v1066_v45  ;;  %v772_v6 = vld [vmem:[%s16913_s21 + $0xa70] sm:$0xff] }
 0x24d   : > { %v12823_v55 = vadd.f32 %v12086_v61, %v11823_v52  ;;  %v12825_v26 = vadd.f32 %v12094_v62, %v11825_v22  ;;  %v8132_v27 = vpop.f32.mrb[23].mxu0  ;;  %v8173_v28 = vpop.f32.mrb[23].mxu1  ;;  %8759 = vmatprep.subr.bf16.mxu0 %v15632_v15  ;;  %8800 = vmatprep.subr.bf16.mxu1 %v15634_v16  ;;  %v652_v61 = vld [vmem:[%s16913_s21 + $0x6b0] sm:$0xff]  ;;  %v13261_v41 = vrot.slane %v13253_v8, %v17188_v56  ;;  %v1626_v25 = vunpack.c.l.s8.bf16 %v772_v6 }
 0x24e   : > { %v12824_v57 = vadd.f32 %v12090_v3, %v11824_v13  ;;  %v12826_v30 = vadd.f32 %v12098_v4, %v11826_v24  ;;  %v14837_v3 = vcombine.low %v987_v10, %v1067_v12  ;;  %v1306_v4 = vunpack.c.l.s8.bf16 %v612_v47  ;;  %v812_v45 = vld [vmem:[%s16913_s21 + $0xbb0] sm:$0xff]  ;;  %v17477_v27 = vld [vmem:[%s17134_s20 + $0x18] sm:$0xff] }
 0x24f   : > { %v1386_v11 = vunpack.c.l.s8.bf16 %v652_v61  ;;  %v1387_v15 = vunpack.c.h.s8.bf16 %v652_v61  ;;  %v14996_v16 = vcombine.high %v1146_v48, %v1226_v51  ;;  %v14995_v20 = vcombine.low %v1146_v48, %v1226_v51  ;;  %v852_v28 = vld [vmem:[%s16913_s21 + $0xcf0] sm:$0xff] }
 0x250   : > { %v13223_v38 = vcombine.low %v12823_v55, %v12824_v57  ;;  %v13224_v40 = vcombine.low %v12825_v26, %v12826_v30  ;;  %8760 = vmatpush1.bf16.msra.mxu0 %v15631_v17  ;;  %8801 = vmatpush1.bf16.msra.mxu1 %v15633_v33  ;;  %v14998_v17 = vcombine.high %v1147_v58, %v1227_v59  ;;  %v692_v33 = vld [vmem:[%s16913_s21 + $0x7f0] sm:$0xff]  ;;  %v1706_v9 = vunpack.c.l.s8.bf16 %v812_v45 }
 0x251   : > { %15951 = vmatprep.subr.msk.bf16.mxu0 %vm7202_vm0, %v15792_v19  ;;  %15953 = vmatprep.subr.msk.bf16.mxu1 %vm7202_vm0, %v15794_v29  ;;  %v732_v19 = vld [vmem:[%s16913_s21 + $0x930] sm:$0xff]  ;;  %v14997_v21 = vcombine.low %v1147_v58, %v1227_v59  ;;  %v15156_v39 = vcombine.high %v1306_v4, %v1386_v11  ;;  %v15158_v2 = vcombine.high %v1307_v14, %v1387_v15  ;;  %v1466_v8 = vunpack.c.l.s8.bf16 %v692_v33 }
 0x252   : > { %v13245_v62 = vrot.slane %v13223_v38, %v17188_v56  ;;  %v13252_v63 = vrot.slane %v13224_v40, %v17188_v56  ;;  %v1546_v22 = vunpack.c.l.s8.bf16 %v732_v19  ;;  %v1467_v23 = vunpack.c.h.s8.bf16 %v692_v33  ;;  %v892_v29 = vld [vmem:[%s16913_s21 + $0xe30] sm:$0xff] }
 0x253   : > { %v1547_v5 = vunpack.c.h.s8.bf16 %v732_v19  ;;  %v15155_v13 = vcombine.low %v1306_v4, %v1386_v11  ;;  %v15157_v24 = vcombine.low %v1307_v14, %v1387_v15  ;;  %v1627_v10 = vunpack.c.h.s8.bf16 %v772_v6  ;;  %v453_v11 = vld [vmem:[%s16913_s21 + $0x78] sm:$0xff] }
 0x254   : > { %v13254_v7 = vcombine.low %v13245_v62, %v13252_v63  ;;  %8762 = vmatpush1.bf16.msra.mxu0 %v7360_v35  ;;  %8803 = vmatpush1.bf16.msra.mxu1 %v7366_v42  ;;  %v1707_v12 = vunpack.c.h.s8.bf16 %v812_v45  ;;  %v15316_v55 = vcombine.high %v1466_v8, %v1546_v22  ;;  %v15315_v57 = vcombine.low %v1466_v8, %v1546_v22  ;;  %v17485_v35 = vld [vmem:[%s17147_s22 + $0x18] sm:$0xff] }
 0x255   : > { %8831 = vmatprep.subr.bf16.mxu0 %v14836_v37  ;;  %8872 = vmatprep.subr.bf16.mxu1 %v14838_v46  ;;  %v15318_v26 = vcombine.high %v1467_v23, %v1547_v5  ;;  %v15317_v30 = vcombine.low %v1467_v23, %v1547_v5  ;;  %v11102_v34 = vrot.slane %v17477_v27, %v17130_v50  ;;  %v1786_v40 = vunpack.c.l.s8.bf16 %v852_v28  ;;  %v493_v14 = vld [vmem:[%s16913_s21 + $0x1b8] sm:$0xff] }
 0x256   : > { %v13268_v18 = vrot.slane %v13254_v7, %v17188_v56  ;;  %v15476_v37 = vcombine.high %v1626_v25, %v1706_v9  ;;  %v15478_v38 = vcombine.high %v1627_v10, %v1707_v12  ;;  %v1866_v42 = vunpack.c.l.s8.bf16 %v892_v29 }
 0x257   : > { %15952 = vmatmul.mubr.msk.bf16.vlgmr.msra.gmra.mrb[52].mxu0 %vm7198_vm1, %v16950_v32  ;;  %15954 = vmatmul.mubr.msk.bf16.vlgmr.msra.gmra.mrb[52].mxu1 %vm7198_vm1, %v16950_v32  ;;  %v1787_v46 = vunpack.c.h.s8.bf16 %v852_v28  ;;  %v1867_v47 = vunpack.c.h.s8.bf16 %v892_v29  ;;  %v11110_v48 = vrot.slane %v17477_v27, %v17140_v53  ;;  %v11106_v51 = vrot.slane %v17477_v27, %v17143_v54 }
 0x258   : > { %v13269_v52 = vcombine.low %v13261_v41, %v13268_v18  ;;  %8832 = vmatpush1.bf16.msra.mxu0 %v14835_v1  ;;  %8873 = vmatpush1.bf16.msra.mxu1 %v14837_v3  ;;  %v1946_v58 = vunpack.c.l.s8.bf16 %v932_v31  ;;  %v1947_v59 = vunpack.c.h.s8.bf16 %v932_v31  ;;  %v12102_v61 = vrot.slane %v17485_v35, %v17130_v50 }
 0x259   : > { %8833 = vmatprep.subr.bf16.mxu0 %v14996_v16  ;;  %8874 = vmatprep.subr.bf16.mxu1 %v14998_v17  ;;  %v11114_v62 = vrot.slane %v17477_v27, %v17155_v60  ;;  %v15475_v63 = vcombine.low %v1626_v25, %v1706_v9  ;;  %v15477_v1 = vcombine.low %v1627_v10, %v1707_v12  ;;  %v988_v22 = vunpack.c.l.s8.bf16 %v453_v11 }
 0x25a   : > { %14125 = vst [vmem:[%s17271_s17 + $0x10] sm:$0xff] %v13269_v52  ;;  %8863 = vmatprep.mubr.bf16.mxu0 %v16605_v0  ;;  %8904 = vmatprep.mubr.bf16.mxu1 %v16605_v0  ;;  %v12110_v3 = vrot.slane %v17485_v35, %v17140_v53  ;;  %v12106_v4 = vrot.slane %v17485_v35, %v17143_v54  ;;  %v1068_v23 = vunpack.c.l.s8.bf16 %v493_v14  ;;  %v1069_v25 = vunpack.c.h.s8.bf16 %v493_v14 }
 0x25b   : > { %v12114_v7 = vrot.slane %v17485_v35, %v17155_v60  ;;  %v15636_v15 = vcombine.high %v1786_v40, %v1866_v42  ;;  %v15638_v16 = vcombine.high %v1787_v46, %v1867_v47  ;;  %v15635_v17 = vcombine.low %v1786_v40, %v1866_v42 }
 0x25c   : > { %8834 = vmatpush1.bf16.msra.mxu0 %v14995_v20  ;;  %8875 = vmatpush1.bf16.msra.mxu1 %v14997_v21  ;;  %v15637_v33 = vcombine.low %v1787_v46, %v1867_v47  ;;  %v15796_v19 = vcombine.high %v1946_v58, %v1946_v58  ;;  %v15795_v20 = vcombine.low %v1946_v58, %v1946_v58  ;;  %v613_v46 = vld [vmem:[%s16913_s21 + $0x578] sm:$0xff] }
 0x25d   : > { %8835 = vmatprep.subr.bf16.mxu0 %v15156_v39  ;;  %8876 = vmatprep.subr.bf16.mxu1 %v15158_v2  ;;  %v15797_v21 = vcombine.low %v1947_v59, %v1947_v59 }
 0x25e   : > { %v7372_v31 = vsel %vm7202_vm0, %v15795_v20, 0 }
 0x25f   : > { %v7378_v40 = vsel %vm7202_vm0, %v15797_v21, 0 }
 0x260   : > { %8836 = vmatpush1.bf16.msra.mxu0 %v15155_v13  ;;  %8877 = vmatpush1.bf16.msra.mxu1 %v15157_v24  ;;  %v989_v24 = vunpack.c.h.s8.bf16 %v453_v11  ;;  %v1309_v11 = vunpack.c.h.s8.bf16 %v613_v46 }
 0x261   : > { %8837 = vmatprep.subr.bf16.mxu0 %v15316_v55  ;;  %8878 = vmatprep.subr.bf16.mxu1 %v15318_v26  ;;  %v15798_v26 = vcombine.high %v1947_v59, %v1947_v59  ;;  %v653_v59 = vld [vmem:[%s16913_s21 + $0x6b8] sm:$0xff] }
 0x262   : > { %v14842_v42 = vcombine.high %v989_v24, %v1069_v25  ;;  %v1389_v14 = vunpack.c.h.s8.bf16 %v653_v59 }
 0x264   : > { %8838 = vmatpush1.bf16.msra.mxu0 %v15315_v57  ;;  %8879 = vmatpush1.bf16.msra.mxu1 %v15317_v30  ;;  %v533_v57 = vld [vmem:[%s16913_s21 + $0x2f8] sm:$0xff]  ;;  %v15162_v20 = vcombine.high %v1309_v11, %v1389_v14 }
 0x265   : > { %8839 = vmatprep.subr.bf16.mxu0 %v15476_v37  ;;  %8880 = vmatprep.subr.bf16.mxu1 %v15478_v38  ;;  %v573_v30 = vld [vmem:[%s16913_s21 + $0x438] sm:$0xff]  ;;  %v1148_v47 = vunpack.c.l.s8.bf16 %v533_v57 }
 0x266   : > { %v8209_v41 = vpop.f32.mrb[24].mxu0  ;;  %v8250_v18 = vpop.f32.mrb[24].mxu1  ;;  %v1229_v58 = vunpack.c.h.s8.bf16 %v573_v30 }
 0x267   : > { %v11827_v52 = vmul.f32 %v11102_v34, %v8209_v41  ;;  %v11829_v39 = vmul.f32 %v11110_v48, %v8250_v18  ;;  %v8211_v2 = vpop.f32.mrb[25].mxu0  ;;  %v8252_v8 = vpop.f32.mrb[25].mxu1  ;;  %v14840_v34 = vcombine.high %v988_v22, %v1068_v23  ;;  %v1228_v48 = vunpack.c.l.s8.bf16 %v573_v30  ;;  %v733_v41 = vld [vmem:[%s16913_s21 + $0x938] sm:$0xff] }
 0x268   : > { %v11828_v5 = vmul.f32 %v11106_v51, %v8211_v2  ;;  %v11830_v6 = vmul.f32 %v11114_v62, %v8252_v8  ;;  %v8213_v45 = vpop.f32.mrb[26].mxu0  ;;  %v8254_v13 = vpop.f32.mrb[26].mxu1  ;;  %8840 = vmatpush1.bf16.msra.mxu0 %v15475_v63  ;;  %8881 = vmatpush1.bf16.msra.mxu1 %v15477_v1  ;;  %v1149_v51 = vunpack.c.h.s8.bf16 %v533_v57  ;;  %v14839_v63 = vcombine.low %v988_v22, %v1068_v23  ;;  %v773_v8 = vld [vmem:[%s16913_s21 + $0xa78] sm:$0xff] }
 0x269   : > { %v12827_v9 = vadd.f32 %v12102_v61, %v11827_v52  ;;  %v12829_v10 = vadd.f32 %v12110_v3, %v11829_v39  ;;  %v8214_v12 = vpop.f32.mrb[27].mxu0  ;;  %v8255_v55 = vpop.f32.mrb[27].mxu1  ;;  %8841 = vmatprep.subr.bf16.mxu0 %v15636_v15  ;;  %8882 = vmatprep.subr.bf16.mxu1 %v15638_v16  ;;  %v14841_v1 = vcombine.low %v989_v24, %v1069_v25  ;;  %v1308_v3 = vunpack.c.l.s8.bf16 %v613_v46  ;;  %v813_v22 = vld [vmem:[%s16913_s21 + $0xbb8] sm:$0xff] }
 0x26a   : > { %v12828_v28 = vadd.f32 %v12106_v4, %v11828_v5  ;;  %v12830_v29 = vadd.f32 %v12114_v7, %v11830_v6  ;;  %v1388_v7 = vunpack.c.l.s8.bf16 %v653_v59  ;;  %v15000_v15 = vcombine.high %v1148_v47, %v1228_v48  ;;  %v893_v12 = vld [vmem:[%s16913_s21 + $0xe38] sm:$0xff] }
 0x26b   : > { %v15002_v16 = vcombine.high %v1149_v51, %v1229_v58  ;;  %v14999_v18 = vcombine.low %v1148_v47, %v1228_v48  ;;  %v1548_v52 = vunpack.c.l.s8.bf16 %v733_v41  ;;  %v1549_v2 = vunpack.c.h.s8.bf16 %v733_v41 }
 0x26c   : > { %v13270_v37 = vcombine.low %v12827_v9, %v12828_v28  ;;  %v13271_v38 = vcombine.low %v12829_v10, %v12830_v29  ;;  %8842 = vmatpush1.bf16.msra.mxu0 %v15635_v17  ;;  %8883 = vmatpush1.bf16.msra.mxu1 %v15637_v33  ;;  %v693_v17 = vld [vmem:[%s16913_s21 + $0x7f8] sm:$0xff]  ;;  %v15001_v33 = vcombine.low %v1149_v51, %v1229_v58  ;;  %v1628_v6 = vunpack.c.l.s8.bf16 %v773_v8 }
 0x26d   : > { %15955 = vmatprep.subr.msk.bf16.mxu0 %vm7202_vm0, %v15796_v19  ;;  %15957 = vmatprep.subr.msk.bf16.mxu1 %vm7202_vm0, %v15798_v26  ;;  %v15160_v19 = vcombine.high %v1308_v3, %v1388_v7  ;;  %v1468_v21 = vunpack.c.l.s8.bf16 %v693_v17  ;;  %v1469_v39 = vunpack.c.h.s8.bf16 %v693_v17  ;;  %v15159_v23 = vcombine.low %v1308_v3, %v1388_v7  ;;  %v853_v10 = vld [vmem:[%s16913_s21 + $0xcf8] sm:$0xff]  ;;  %v454_v7 = vld [vmem:[%s16913_s21 + $0x80] sm:$0xff] }
 0x26e   : > { %v17512_v61 = vrot.slane %v13270_v37, %v17188_v56  ;;  %v17515_v62 = vrot.slane %v13271_v38, %v17188_v56  ;;  %v15161_v5 = vcombine.low %v1309_v11, %v1389_v14  ;;  %v1708_v45 = vunpack.c.l.s8.bf16 %v813_v22  ;;  %v933_v28 = vld [vmem:[%s16913_s21 + $0xf78] sm:$0x55]  ;;  %v494_v11 = vld [vmem:[%s16913_s21 + $0x1c0] sm:$0xff] }
 0x26f   : > { %v1629_v13 = vunpack.c.h.s8.bf16 %v773_v8  ;;  %v1709_v24 = vunpack.c.h.s8.bf16 %v813_v22  ;;  %v15320_v25 = vcombine.high %v1468_v21, %v1548_v52  ;;  %v15322_v9 = vcombine.high %v1469_v39, %v1549_v2 }
 0x270   : > { %v13302_v4 = vcombine.low %v17512_v61, %v17515_v62  ;;  %8844 = vmatpush1.bf16.msra.mxu0 %v7372_v31  ;;  %8885 = vmatpush1.bf16.msra.mxu1 %v7378_v40  ;;  %v15319_v55 = vcombine.low %v1468_v21, %v1548_v52  ;;  %v15321_v26 = vcombine.low %v1469_v39, %v1549_v2  ;;  %v1788_v31 = vunpack.c.l.s8.bf16 %v853_v10 }
 0x271   : > { %8913 = vmatprep.subr.bf16.mxu0 %v14840_v34  ;;  %8954 = vmatprep.subr.bf16.mxu1 %v14842_v42  ;;  %v11118_v29 = vrot.slane %v17477_v27, %v17215_v36  ;;  %v15480_v57 = vcombine.high %v1628_v6, %v1708_v45  ;;  %v15482_v30 = vcombine.high %v1629_v13, %v1709_v24  ;;  %v1868_v34 = vunpack.c.l.s8.bf16 %v893_v12 }
 0x272   : > { %v1789_v37 = vunpack.c.h.s8.bf16 %v853_v10  ;;  %v1869_v38 = vunpack.c.h.s8.bf16 %v893_v12  ;;  %v11126_v40 = vrot.slane %v17477_v27, %v17218_v43  ;;  %v11122_v42 = vrot.slane %v17477_v27, %v17221_v44 }
 0x273   : > { %15956 = vmatmul.mubr.msk.bf16.vlgmr.msra.gmra.mrb[56].mxu0 %vm7198_vm1, %v16950_v32  ;;  %15958 = vmatmul.mubr.msk.bf16.vlgmr.msra.gmra.mrb[56].mxu1 %vm7198_vm1, %v16950_v32  ;;  %v1948_v46 = vunpack.c.l.s8.bf16 %v933_v28  ;;  %v1949_v47 = vunpack.c.h.s8.bf16 %v933_v28  ;;  %v12118_v48 = vrot.slane %v17485_v35, %v17215_v36  ;;  %v12126_v51 = vrot.slane %v17485_v35, %v17218_v43  ;;  %v574_v28 = vld [vmem:[%s16913_s21 + $0x440] sm:$0xff] }
 0x274   : > { %8914 = vmatpush1.bf16.msra.mxu0 %v14839_v63  ;;  %8955 = vmatpush1.bf16.msra.mxu1 %v14841_v1  ;;  %v11130_v58 = vrot.slane %v17477_v27, %v17226_v49  ;;  %v15479_v59 = vcombine.low %v1628_v6, %v1708_v45  ;;  %v12122_v63 = vrot.slane %v17485_v35, %v17221_v44  ;;  %v990_v2 = vunpack.c.l.s8.bf16 %v454_v7 }
 0x275   : > { %8915 = vmatprep.subr.bf16.mxu0 %v15000_v15  ;;  %8956 = vmatprep.subr.bf16.mxu1 %v15002_v16  ;;  %v12130_v1 = vrot.slane %v17485_v35, %v17226_v49  ;;  %v15481_v3 = vcombine.low %v1629_v13, %v1709_v24  ;;  %v15640_v14 = vcombine.high %v1788_v31, %v1868_v34  ;;  %v1070_v35 = vunpack.c.l.s8.bf16 %v494_v11 }
 0x276   : > { %8945 = vmatprep.mubr.bf16.mxu0 %v16605_v0  ;;  %8986 = vmatprep.mubr.bf16.mxu1 %v16605_v0  ;;  %v15642_v15 = vcombine.high %v1789_v37, %v1869_v38  ;;  %v15639_v16 = vcombine.low %v1788_v31, %v1868_v34  ;;  %v15641_v27 = vcombine.low %v1789_v37, %v1869_v38  ;;  %v991_v6 = vunpack.c.h.s8.bf16 %v454_v7  ;;  %v614_v38 = vld [vmem:[%s16913_s21 + $0x580] sm:$0xff] }
 0x277   : > { %v1071_v45 = vunpack.c.h.s8.bf16 %v494_v11  ;;  %v15802_v10 = vcombine.high %v1949_v47, %v1949_v47  ;;  %v1311_v11 = vunpack.c.h.s8.bf16 %v614_v38 }
 0x278   : > { %8916 = vmatpush1.bf16.msra.mxu0 %v14999_v18  ;;  %8957 = vmatpush1.bf16.msra.mxu1 %v15001_v33  ;;  %v15800_v18 = vcombine.high %v1948_v46, %v1948_v46  ;;  %v15799_v33 = vcombine.low %v1948_v46, %v1948_v46 }
 0x279   : > { %8917 = vmatprep.subr.bf16.mxu0 %v15160_v19  ;;  %8958 = vmatprep.subr.bf16.mxu1 %v15162_v20  ;;  %v15801_v19 = vcombine.low %v1949_v47, %v1949_v47  ;;  %v14846_v37 = vcombine.high %v991_v6, %v1071_v45  ;;  %v1231_v47 = vunpack.c.h.s8.bf16 %v574_v28 }
 0x27b   : > { %v7390_v34 = vsel %vm7202_vm0, %v15801_v19, 0 }
 0x27c   : > { %8918 = vmatpush1.bf16.msra.mxu0 %v15159_v23  ;;  %8959 = vmatpush1.bf16.msra.mxu1 %v15161_v5 }
 0x27d   : > { %8919 = vmatprep.subr.bf16.mxu0 %v15320_v25  ;;  %8960 = vmatprep.subr.bf16.mxu1 %v15322_v9 }
 0x280   : > { %8920 = vmatpush1.bf16.msra.mxu0 %v15319_v55  ;;  %8961 = vmatpush1.bf16.msra.mxu1 %v15321_v26  ;;  %v534_v26 = vld [vmem:[%s16913_s21 + $0x300] sm:$0xff] }
 0x281   : > { %8921 = vmatprep.subr.bf16.mxu0 %v15480_v57  ;;  %8962 = vmatprep.subr.bf16.mxu1 %v15482_v30  ;;  %v14844_v57 = vcombine.high %v990_v2, %v1070_v35  ;;  %v1151_v46 = vunpack.c.h.s8.bf16 %v534_v26 }
 0x282   : > { %v8291_v17 = vpop.f32.mrb[28].mxu0  ;;  %v8332_v41 = vpop.f32.mrb[28].mxu1 }
 0x283   : > { %v11831_v20 = vmul.f32 %v11118_v29, %v8291_v17  ;;  %v11833_v21 = vmul.f32 %v11126_v40, %v8332_v41  ;;  %v8293_v52 = vpop.f32.mrb[29].mxu0  ;;  %v8334_v39 = vpop.f32.mrb[29].mxu1  ;;  %v7384_v29 = vsel %vm7202_vm0, %v15799_v33, 0  ;;  %v1150_v40 = vunpack.c.l.s8.bf16 %v534_v26  ;;  %v934_v26 = vld [vmem:[%s16913_s21 + $0xf80] sm:$0x55] }
 0x284   : > { %v11832_v8 = vmul.f32 %v11122_v42, %v8293_v52  ;;  %v11834_v22 = vmul.f32 %v11130_v58, %v8334_v39  ;;  %v8295_v23 = vpop.f32.mrb[30].mxu0  ;;  %v8336_v5 = vpop.f32.mrb[30].mxu1  ;;  %8922 = vmatpush1.bf16.msra.mxu0 %v15479_v59  ;;  %8963 = vmatpush1.bf16.msra.mxu1 %v15481_v3  ;;  %v1230_v42 = vunpack.c.l.s8.bf16 %v574_v28  ;;  %v14843_v59 = vcombine.low %v990_v2, %v1070_v35  ;;  %v774_v2 = vld [vmem:[%s16913_s21 + $0xa80] sm:$0xff] }
 0x285   : > { %v12831_v13 = vadd.f32 %v12118_v48, %v11831_v20  ;;  %v12833_v24 = vadd.f32 %v12126_v51, %v11833_v21  ;;  %v8296_v25 = vpop.f32.mrb[31].mxu0  ;;  %v8337_v9 = vpop.f32.mrb[31].mxu1  ;;  %8923 = vmatprep.subr.bf16.mxu0 %v15640_v14  ;;  %8964 = vmatprep.subr.bf16.mxu1 %v15642_v15  ;;  %v654_v48 = vld [vmem:[%s16913_s21 + $0x6c0] sm:$0xff]  ;;  %v13310_v17 = vrot.slane %v13302_v4, %v17188_v56  ;;  %v1630_v23 = vunpack.c.l.s8.bf16 %v774_v2 }
 0x286   : > { %v12832_v12 = vadd.f32 %v12122_v63, %v11832_v8  ;;  %v12834_v55 = vadd.f32 %v12130_v1, %v11834_v22  ;;  %v14845_v63 = vcombine.low %v991_v6, %v1071_v45  ;;  %v1310_v1 = vunpack.c.l.s8.bf16 %v614_v38  ;;  %v814_v35 = vld [vmem:[%s16913_s21 + $0xbc0] sm:$0xff] }
 0x287   : > { %v1390_v7 = vunpack.c.l.s8.bf16 %v654_v48  ;;  %v1391_v14 = vunpack.c.h.s8.bf16 %v654_v48  ;;  %v15004_v15 = vcombine.high %v1150_v40, %v1230_v42  ;;  %v15003_v33 = vcombine.low %v1150_v40, %v1230_v42  ;;  %v17577_v25 = vld [vmem:[%s17134_s20 + $0x20] sm:$0xff] }
 0x288   : > { %v13272_v30 = vcombine.low %v12831_v13, %v12832_v12  ;;  %v13273_v31 = vcombine.low %v12833_v24, %v12834_v55  ;;  %8924 = vmatpush1.bf16.msra.mxu0 %v15639_v16  ;;  %8965 = vmatpush1.bf16.msra.mxu1 %v15641_v27  ;;  %v15006_v16 = vcombine.high %v1151_v46, %v1231_v47  ;;  %v694_v27 = vld [vmem:[%s16913_s21 + $0x800] sm:$0xff]  ;;  %v1710_v5 = vunpack.c.l.s8.bf16 %v814_v35 }
 0x289   : > { %15959 = vmatprep.subr.msk.bf16.mxu0 %vm7202_vm0, %v15800_v18  ;;  %15961 = vmatprep.subr.msk.bf16.mxu1 %vm7202_vm0, %v15802_v10  ;;  %v734_v18 = vld [vmem:[%s16913_s21 + $0x940] sm:$0xff]  ;;  %v15005_v19 = vcombine.low %v1151_v46, %v1231_v47  ;;  %v15164_v61 = vcombine.high %v1310_v1, %v1390_v7  ;;  %v15166_v62 = vcombine.high %v1311_v11, %v1391_v14  ;;  %v1470_v4 = vunpack.c.l.s8.bf16 %v694_v27 }
 0x28a   : > { %v13294_v51 = vrot.slane %v13272_v30, %v17188_v56  ;;  %v13301_v58 = vrot.slane %v13273_v31, %v17188_v56  ;;  %v1550_v21 = vunpack.c.l.s8.bf16 %v734_v18  ;;  %v1471_v52 = vunpack.c.h.s8.bf16 %v694_v27  ;;  %v854_v9 = vld [vmem:[%s16913_s21 + $0xd00] sm:$0xff] }
 0x28b   : > { %v1551_v39 = vunpack.c.h.s8.bf16 %v734_v18  ;;  %v15163_v8 = vcombine.low %v1310_v1, %v1390_v7  ;;  %v15165_v22 = vcombine.low %v1311_v11, %v1391_v14  ;;  %v1631_v6 = vunpack.c.h.s8.bf16 %v774_v2  ;;  %v894_v10 = vld [vmem:[%s16913_s21 + $0xe40] sm:$0xff]  ;;  %v455_v7 = vld [vmem:[%s16913_s21 + $0x88] sm:$0xff] }
 0x28c   : > { %v13303_v3 = vcombine.low %v13294_v51, %v13301_v58  ;;  %8926 = vmatpush1.bf16.msra.mxu0 %v7384_v29  ;;  %8967 = vmatpush1.bf16.msra.mxu1 %v7390_v34  ;;  %v1711_v45 = vunpack.c.h.s8.bf16 %v814_v35  ;;  %v15324_v13 = vcombine.high %v1470_v4, %v1550_v21  ;;  %v15323_v12 = vcombine.low %v1470_v4, %v1550_v21  ;;  %v17585_v29 = vld [vmem:[%s17147_s22 + $0x20] sm:$0xff]  ;;  %v495_v11 = vld [vmem:[%s16913_s21 + $0x1c8] sm:$0xff] }
 0x28d   : > { %8995 = vmatprep.subr.bf16.mxu0 %v14844_v57  ;;  %9036 = vmatprep.subr.bf16.mxu1 %v14846_v37  ;;  %v15326_v24 = vcombine.high %v1471_v52, %v1551_v39  ;;  %v15325_v55 = vcombine.low %v1471_v52, %v1551_v39  ;;  %v11134_v28 = vrot.slane %v17577_v25, %v17130_v50  ;;  %v1790_v31 = vunpack.c.l.s8.bf16 %v854_v9 }
 0x28e   : > { %v13317_v41 = vrot.slane %v13303_v3, %v17188_v56  ;;  %v15484_v57 = vcombine.high %v1630_v23, %v1710_v5  ;;  %v15486_v30 = vcombine.high %v1631_v6, %v1711_v45  ;;  %v1870_v34 = vunpack.c.l.s8.bf16 %v894_v10 }
 0x28f   : > { %15960 = vmatmul.mubr.msk.bf16.vlgmr.msra.gmra.mrb[60].mxu0 %vm7198_vm1, %v16950_v32  ;;  %15962 = vmatmul.mubr.msk.bf16.vlgmr.msra.gmra.mrb[60].mxu1 %vm7198_vm1, %v16950_v32  ;;  %v1791_v37 = vunpack.c.h.s8.bf16 %v854_v9  ;;  %v1871_v38 = vunpack.c.h.s8.bf16 %v894_v10  ;;  %v11142_v40 = vrot.slane %v17577_v25, %v17140_v53  ;;  %v11138_v42 = vrot.slane %v17577_v25, %v17143_v54 }
 0x290   : > { %v13318_v20 = vcombine.low %v13310_v17, %v13317_v41  ;;  %8996 = vmatpush1.bf16.msra.mxu0 %v14843_v59  ;;  %9037 = vmatpush1.bf16.msra.mxu1 %v14845_v63  ;;  %v1950_v46 = vunpack.c.l.s8.bf16 %v934_v26  ;;  %v1951_v47 = vunpack.c.h.s8.bf16 %v934_v26  ;;  %v12134_v48 = vrot.slane %v17585_v29, %v17130_v50 }
 0x291   : > { %8997 = vmatprep.subr.bf16.mxu0 %v15004_v15  ;;  %9038 = vmatprep.subr.bf16.mxu1 %v15006_v16  ;;  %v11146_v51 = vrot.slane %v17577_v25, %v17155_v60  ;;  %v15483_v58 = vcombine.low %v1630_v23, %v1710_v5  ;;  %v15485_v59 = vcombine.low %v1631_v6, %v1711_v45  ;;  %v992_v21 = vunpack.c.l.s8.bf16 %v455_v7 }
 0x292   : > { %14126 = vst [vmem:[%s17271_s17 + $0x18] sm:$0xff] %v13318_v20  ;;  %9027 = vmatprep.mubr.bf16.mxu0 %v16605_v0  ;;  %9068 = vmatprep.mubr.bf16.mxu1 %v16605_v0  ;;  %v12142_v63 = vrot.slane %v17585_v29, %v17140_v53  ;;  %v12138_v1 = vrot.slane %v17585_v29, %v17143_v54  ;;  %v1072_v52 = vunpack.c.l.s8.bf16 %v495_v11  ;;  %v1073_v23 = vunpack.c.h.s8.bf16 %v495_v11 }
 0x293   : > { %v12146_v3 = vrot.slane %v17585_v29, %v17155_v60  ;;  %v15644_v14 = vcombine.high %v1790_v31, %v1870_v34  ;;  %v15646_v15 = vcombine.high %v1791_v37, %v1871_v38  ;;  %v15643_v16 = vcombine.low %v1790_v31, %v1870_v34 }
 0x294   : > { %8998 = vmatpush1.bf16.msra.mxu0 %v15003_v33  ;;  %9039 = vmatpush1.bf16.msra.mxu1 %v15005_v19  ;;  %v15645_v27 = vcombine.low %v1791_v37, %v1871_v38  ;;  %v15804_v18 = vcombine.high %v1950_v46, %v1950_v46  ;;  %v15803_v33 = vcombine.low %v1950_v46, %v1950_v46  ;;  %v615_v37 = vld [vmem:[%s16913_s21 + $0x588] sm:$0xff] }
 0x295   : > { %8999 = vmatprep.subr.bf16.mxu0 %v15164_v61  ;;  %9040 = vmatprep.subr.bf16.mxu1 %v15166_v62  ;;  %v15805_v19 = vcombine.low %v1951_v47, %v1951_v47 }
 0x296   : > { %v7396_v26 = vsel %vm7202_vm0, %v15803_v33, 0 }
 0x297   : > { %v7402_v31 = vsel %vm7202_vm0, %v15805_v19, 0 }
 0x298   : > { %9000 = vmatpush1.bf16.msra.mxu0 %v15163_v8  ;;  %9041 = vmatpush1.bf16.msra.mxu1 %v15165_v22  ;;  %v993_v22 = vunpack.c.h.s8.bf16 %v455_v7  ;;  %v1313_v7 = vunpack.c.h.s8.bf16 %v615_v37 }
 0x299   : > { %9001 = vmatprep.subr.bf16.mxu0 %v15324_v13  ;;  %9042 = vmatprep.subr.bf16.mxu1 %v15326_v24  ;;  %v15806_v24 = vcombine.high %v1951_v47, %v1951_v47  ;;  %v655_v47 = vld [vmem:[%s16913_s21 + $0x6c8] sm:$0xff] }
 0x29a   : > { %v14850_v34 = vcombine.high %v993_v22, %v1073_v23  ;;  %v1393_v11 = vunpack.c.h.s8.bf16 %v655_v47 }
 0x29c   : > { %9002 = vmatpush1.bf16.msra.mxu0 %v15323_v12  ;;  %9043 = vmatpush1.bf16.msra.mxu1 %v15325_v55  ;;  %v535_v12 = vld [vmem:[%s16913_s21 + $0x308] sm:$0xff]  ;;  %v15170_v33 = vcombine.high %v1313_v7, %v1393_v11 }
 0x29d   : > { %9003 = vmatprep.subr.bf16.mxu0 %v15484_v57  ;;  %9044 = vmatprep.subr.bf16.mxu1 %v15486_v30  ;;  %v575_v55 = vld [vmem:[%s16913_s21 + $0x448] sm:$0xff]  ;;  %v1152_v38 = vunpack.c.l.s8.bf16 %v535_v12 }
 0x29e   : > { %v8373_v17 = vpop.f32.mrb[32].mxu0  ;;  %v8414_v41 = vpop.f32.mrb[32].mxu1  ;;  %v1233_v46 = vunpack.c.h.s8.bf16 %v575_v55 }
 0x29f   : > { %v11835_v20 = vmul.f32 %v11134_v28, %v8373_v17  ;;  %v11837_v61 = vmul.f32 %v11142_v40, %v8414_v41  ;;  %v8375_v62 = vpop.f32.mrb[33].mxu0  ;;  %v8416_v4 = vpop.f32.mrb[33].mxu1  ;;  %v14848_v28 = vcombine.high %v992_v21, %v1072_v52  ;;  %v1232_v40 = vunpack.c.l.s8.bf16 %v575_v55  ;;  %v735_v17 = vld [vmem:[%s16913_s21 + $0x948] sm:$0xff] }
 0x2a0   : > { %v11836_v39 = vmul.f32 %v11138_v42, %v8375_v62  ;;  %v11838_v2 = vmul.f32 %v11146_v51, %v8416_v4  ;;  %v8377_v35 = vpop.f32.mrb[34].mxu0  ;;  %v8418_v8 = vpop.f32.mrb[34].mxu1  ;;  %9004 = vmatpush1.bf16.msra.mxu0 %v15483_v58  ;;  %9045 = vmatpush1.bf16.msra.mxu1 %v15485_v59  ;;  %v1153_v42 = vunpack.c.h.s8.bf16 %v535_v12  ;;  %v14847_v58 = vcombine.low %v992_v21, %v1072_v52  ;;  %v775_v4 = vld [vmem:[%s16913_s21 + $0xa88] sm:$0xff] }
 0x2a1   : > { %v12835_v5 = vadd.f32 %v12134_v48, %v11835_v20  ;;  %v12837_v6 = vadd.f32 %v12142_v63, %v11837_v61  ;;  %v8378_v45 = vpop.f32.mrb[35].mxu0  ;;  %v8419_v13 = vpop.f32.mrb[35].mxu1  ;;  %9005 = vmatprep.subr.bf16.mxu0 %v15644_v14  ;;  %9046 = vmatprep.subr.bf16.mxu1 %v15646_v15  ;;  %v14849_v59 = vcombine.low %v993_v22, %v1073_v23  ;;  %v1312_v63 = vunpack.c.l.s8.bf16 %v615_v37  ;;  %v815_v21 = vld [vmem:[%s16913_s21 + $0xbc8] sm:$0xff] }
 0x2a2   : > { %v12836_v9 = vadd.f32 %v12138_v1, %v11836_v39  ;;  %v12838_v10 = vadd.f32 %v12146_v3, %v11838_v2  ;;  %v1392_v3 = vunpack.c.l.s8.bf16 %v655_v47  ;;  %v15008_v14 = vcombine.high %v1152_v38, %v1232_v40  ;;  %v895_v45 = vld [vmem:[%s16913_s21 + $0xe48] sm:$0xff] }
 0x2a3   : > { %v15010_v15 = vcombine.high %v1153_v42, %v1233_v46  ;;  %v15007_v41 = vcombine.low %v1152_v38, %v1232_v40  ;;  %v1552_v20 = vunpack.c.l.s8.bf16 %v735_v17  ;;  %v1553_v62 = vunpack.c.h.s8.bf16 %v735_v17 }
 0x2a4   : > { %v13319_v57 = vcombine.low %v12835_v5, %v12836_v9  ;;  %v13320_v30 = vcombine.low %v12837_v6, %v12838_v10  ;;  %9006 = vmatpush1.bf16.msra.mxu0 %v15643_v16  ;;  %9047 = vmatpush1.bf16.msra.mxu1 %v15645_v27  ;;  %v695_v16 = vld [vmem:[%s16913_s21 + $0x808] sm:$0xff]  ;;  %v15009_v27 = vcombine.low %v1153_v42, %v1233_v46  ;;  %v1632_v2 = vunpack.c.l.s8.bf16 %v775_v4 }
 0x2a5   : > { %15963 = vmatprep.subr.msk.bf16.mxu0 %vm7202_vm0, %v15804_v18  ;;  %15965 = vmatprep.subr.msk.bf16.mxu1 %vm7202_vm0, %v15806_v24  ;;  %v15168_v18 = vcombine.high %v1312_v63, %v1392_v3  ;;  %v1472_v19 = vunpack.c.l.s8.bf16 %v695_v16  ;;  %v1473_v61 = vunpack.c.h.s8.bf16 %v695_v16  ;;  %v15167_v52 = vcombine.low %v1312_v63, %v1392_v3  ;;  %v855_v6 = vld [vmem:[%s16913_s21 + $0xd08] sm:$0xff]  ;;  %v456_v3 = vld [vmem:[%s16913_s21 + $0x90] sm:$0xff] }
 0x2a6   : > { %v17612_v48 = vrot.slane %v13319_v57, %v17188_v56  ;;  %v17615_v51 = vrot.slane %v13320_v30, %v17188_v56  ;;  %v15169_v39 = vcombine.low %v1313_v7, %v1393_v11  ;;  %v1712_v35 = vunpack.c.l.s8.bf16 %v815_v21  ;;  %v935_v9 = vld [vmem:[%s16913_s21 + $0xf88] sm:$0x55]  ;;  %v496_v7 = vld [vmem:[%s16913_s21 + $0x1d0] sm:$0xff] }
 0x2a7   : > { %v1633_v8 = vunpack.c.h.s8.bf16 %v775_v4  ;;  %v1713_v22 = vunpack.c.h.s8.bf16 %v815_v21  ;;  %v15328_v23 = vcombine.high %v1472_v19, %v1552_v20  ;;  %v15330_v5 = vcombine.high %v1473_v61, %v1553_v62 }
 0x2a8   : > { %v13351_v1 = vcombine.low %v17612_v48, %v17615_v51  ;;  %9008 = vmatpush1.bf16.msra.mxu0 %v7396_v26  ;;  %9049 = vmatpush1.bf16.msra.mxu1 %v7402_v31  ;;  %v15327_v13 = vcombine.low %v1472_v19, %v1552_v20  ;;  %v15329_v24 = vcombine.low %v1473_v61, %v1553_v62  ;;  %v1792_v26 = vunpack.c.l.s8.bf16 %v855_v6 }
 0x2a9   : > { %9077 = vmatprep.subr.bf16.mxu0 %v14848_v28  ;;  %9118 = vmatprep.subr.bf16.mxu1 %v14850_v34  ;;  %v11150_v10 = vrot.slane %v17577_v25, %v17215_v36  ;;  %v15488_v12 = vcombine.high %v1632_v2, %v1712_v35  ;;  %v15490_v55 = vcombine.high %v1633_v8, %v1713_v22  ;;  %v1872_v28 = vunpack.c.l.s8.bf16 %v895_v45 }
 0x2aa   : > { %v1793_v57 = vunpack.c.h.s8.bf16 %v855_v6  ;;  %v1873_v30 = vunpack.c.h.s8.bf16 %v895_v45  ;;  %v11158_v31 = vrot.slane %v17577_v25, %v17218_v43  ;;  %v11154_v34 = vrot.slane %v17577_v25, %v17221_v44 }
 0x2ab   : > { %15964 = vmatmul.mubr.msk.bf16.vlgmr.msra.gmra.mrb[64].mxu0 %vm7198_vm1, %v16950_v32  ;;  %15966 = vmatmul.mubr.msk.bf16.vlgmr.msra.gmra.mrb[64].mxu1 %vm7198_vm1, %v16950_v32  ;;  %v1952_v37 = vunpack.c.l.s8.bf16 %v935_v9  ;;  %v1953_v38 = vunpack.c.h.s8.bf16 %v935_v9  ;;  %v12150_v40 = vrot.slane %v17585_v29, %v17215_v36  ;;  %v12158_v42 = vrot.slane %v17585_v29, %v17218_v43  ;;  %v576_v9 = vld [vmem:[%s16913_s21 + $0x450] sm:$0xff] }
 0x2ac   : > { %9078 = vmatpush1.bf16.msra.mxu0 %v14847_v58  ;;  %9119 = vmatpush1.bf16.msra.mxu1 %v14849_v59  ;;  %v11162_v46 = vrot.slane %v17577_v25, %v17226_v49  ;;  %v15487_v47 = vcombine.low %v1632_v2, %v1712_v35  ;;  %v12154_v58 = vrot.slane %v17585_v29, %v17221_v44  ;;  %v994_v62 = vunpack.c.l.s8.bf16 %v456_v3 }
 0x2ad   : > { %9079 = vmatprep.subr.bf16.mxu0 %v15008_v14  ;;  %9120 = vmatprep.subr.bf16.mxu1 %v15010_v15  ;;  %v12162_v59 = vrot.slane %v17585_v29, %v17226_v49  ;;  %v15489_v63 = vcombine.low %v1633_v8, %v1713_v22  ;;  %v15648_v11 = vcombine.high %v1792_v26, %v1872_v28  ;;  %v1074_v29 = vunpack.c.l.s8.bf16 %v496_v7 }
 0x2ae   : > { %9109 = vmatprep.mubr.bf16.mxu0 %v16605_v0  ;;  %9150 = vmatprep.mubr.bf16.mxu1 %v16605_v0  ;;  %v15650_v14 = vcombine.high %v1793_v57, %v1873_v30  ;;  %v15647_v15 = vcombine.low %v1792_v26, %v1872_v28  ;;  %v15649_v25 = vcombine.low %v1793_v57, %v1873_v30  ;;  %v995_v2 = vunpack.c.h.s8.bf16 %v456_v3  ;;  %v616_v30 = vld [vmem:[%s16913_s21 + $0x590] sm:$0xff] }
 0x2af   : > { %v1075_v35 = vunpack.c.h.s8.bf16 %v496_v7  ;;  %v15810_v6 = vcombine.high %v1953_v38, %v1953_v38  ;;  %v1315_v7 = vunpack.c.h.s8.bf16 %v616_v30 }
 0x2b0   : > { %9080 = vmatpush1.bf16.msra.mxu0 %v15007_v41  ;;  %9121 = vmatpush1.bf16.msra.mxu1 %v15009_v27  ;;  %v15808_v41 = vcombine.high %v1952_v37, %v1952_v37  ;;  %v15807_v27 = vcombine.low %v1952_v37, %v1952_v37 }
 0x2b1   : > { %9081 = vmatprep.subr.bf16.mxu0 %v15168_v18  ;;  %9122 = vmatprep.subr.bf16.mxu1 %v15170_v33  ;;  %v15809_v18 = vcombine.low %v1953_v38, %v1953_v38  ;;  %v14854_v57 = vcombine.high %v995_v2, %v1075_v35  ;;  %v1235_v38 = vunpack.c.h.s8.bf16 %v576_v9 }
 0x2b3   : > { %v7414_v28 = vsel %vm7202_vm0, %v15809_v18, 0 }
 0x2b4   : > { %9082 = vmatpush1.bf16.msra.mxu0 %v15167_v52  ;;  %9123 = vmatpush1.bf16.msra.mxu1 %v15169_v39 }
 0x2b5   : > { %9083 = vmatprep.subr.bf16.mxu0 %v15328_v23  ;;  %9124 = vmatprep.subr.bf16.mxu1 %v15330_v5 }
 0x2b8   : > { %9084 = vmatpush1.bf16.msra.mxu0 %v15327_v13  ;;  %9125 = vmatpush1.bf16.msra.mxu1 %v15329_v24  ;;  %v536_v24 = vld [vmem:[%s16913_s21 + $0x310] sm:$0xff] }
 0x2b9   : > { %9085 = vmatprep.subr.bf16.mxu0 %v15488_v12  ;;  %9126 = vmatprep.subr.bf16.mxu1 %v15490_v55  ;;  %v14852_v12 = vcombine.high %v994_v62, %v1074_v29  ;;  %v1155_v37 = vunpack.c.h.s8.bf16 %v536_v24 }
 0x2ba   : > { %v8455_v16 = vpop.f32.mrb[36].mxu0  ;;  %v8496_v17 = vpop.f32.mrb[36].mxu1 }
 0x2bb   : > { %v11839_v33 = vmul.f32 %v11150_v10, %v8455_v16  ;;  %v11841_v19 = vmul.f32 %v11158_v31, %v8496_v17  ;;  %v8457_v20 = vpop.f32.mrb[37].mxu0  ;;  %v8498_v61 = vpop.f32.mrb[37].mxu1  ;;  %v7408_v10 = vsel %vm7202_vm0, %v15807_v27, 0  ;;  %v1154_v31 = vunpack.c.l.s8.bf16 %v536_v24  ;;  %v936_v24 = vld [vmem:[%s16913_s21 + $0xf90] sm:$0x55] }
 0x2bc   : > { %v11840_v4 = vmul.f32 %v11154_v34, %v8457_v20  ;;  %v11842_v21 = vmul.f32 %v11162_v46, %v8498_v61  ;;  %v8459_v52 = vpop.f32.mrb[38].mxu0  ;;  %v8500_v39 = vpop.f32.mrb[38].mxu1  ;;  %9086 = vmatpush1.bf16.msra.mxu0 %v15487_v47  ;;  %9127 = vmatpush1.bf16.msra.mxu1 %v15489_v63  ;;  %v1234_v34 = vunpack.c.l.s8.bf16 %v576_v9  ;;  %v14851_v47 = vcombine.low %v994_v62, %v1074_v29  ;;  %v776_v62 = vld [vmem:[%s16913_s21 + $0xa90] sm:$0xff] }
 0x2bd   : > { %v12839_v8 = vadd.f32 %v12150_v40, %v11839_v33  ;;  %v12841_v22 = vadd.f32 %v12158_v42, %v11841_v19  ;;  %v8460_v23 = vpop.f32.mrb[39].mxu0  ;;  %v8501_v5 = vpop.f32.mrb[39].mxu1  ;;  %9087 = vmatprep.subr.bf16.mxu0 %v15648_v11  ;;  %9128 = vmatprep.subr.bf16.mxu1 %v15650_v14  ;;  %v656_v40 = vld [vmem:[%s16913_s21 + $0x6d0] sm:$0xff]  ;;  %v13359_v16 = vrot.slane %v13351_v1, %v17188_v56  ;;  %v1634_v52 = vunpack.c.l.s8.bf16 %v776_v62 }
 0x2be   : > { %v12840_v45 = vadd.f32 %v12154_v58, %v11840_v4  ;;  %v12842_v13 = vadd.f32 %v12162_v59, %v11842_v21  ;;  %v14853_v58 = vcombine.low %v995_v2, %v1075_v35  ;;  %v1314_v59 = vunpack.c.l.s8.bf16 %v616_v30  ;;  %v816_v29 = vld [vmem:[%s16913_s21 + $0xbd0] sm:$0xff]  ;;  %v17677_v23 = vld [vmem:[%s17134_s20 + $0x28] sm:$0xff] }
 0x2bf   : > { %v1394_v3 = vunpack.c.l.s8.bf16 %v656_v40  ;;  %v1395_v11 = vunpack.c.h.s8.bf16 %v656_v40  ;;  %v15012_v14 = vcombine.high %v1154_v31, %v1234_v34  ;;  %v15011_v27 = vcombine.low %v1154_v31, %v1234_v34  ;;  %v856_v5 = vld [vmem:[%s16913_s21 + $0xd10] sm:$0xff] }
 0x2c0   : > { %v13321_v55 = vcombine.low %v12839_v8, %v12840_v45  ;;  %v13322_v26 = vcombine.low %v12841_v22, %v12842_v13  ;;  %9088 = vmatpush1.bf16.msra.mxu0 %v15647_v15  ;;  %9129 = vmatpush1.bf16.msra.mxu1 %v15649_v25  ;;  %v15014_v15 = vcombine.high %v1155_v37, %v1235_v38  ;;  %v696_v25 = vld [vmem:[%s16913_s21 + $0x810] sm:$0xff]  ;;  %v1714_v39 = vunpack.c.l.s8.bf16 %v816_v29 }
 0x2c1   : > { %15967 = vmatprep.subr.msk.bf16.mxu0 %vm7202_vm0, %v15808_v41  ;;  %15969 = vmatprep.subr.msk.bf16.mxu1 %vm7202_vm0, %v15810_v6  ;;  %v736_v41 = vld [vmem:[%s16913_s21 + $0x950] sm:$0xff]  ;;  %v15013_v18 = vcombine.low %v1155_v37, %v1235_v38  ;;  %v15172_v48 = vcombine.high %v1314_v59, %v1394_v3  ;;  %v15174_v51 = vcombine.high %v1315_v7, %v1395_v11  ;;  %v1474_v1 = vunpack.c.l.s8.bf16 %v696_v25 }
 0x2c2   : > { %v13343_v42 = vrot.slane %v13321_v55, %v17188_v56  ;;  %v13350_v46 = vrot.slane %v13322_v26, %v17188_v56  ;;  %v1554_v19 = vunpack.c.l.s8.bf16 %v736_v41  ;;  %v1475_v20 = vunpack.c.h.s8.bf16 %v696_v25  ;;  %v896_v6 = vld [vmem:[%s16913_s21 + $0xe50] sm:$0xff] }
 0x2c3   : > { %v1555_v61 = vunpack.c.h.s8.bf16 %v736_v41  ;;  %v15171_v4 = vcombine.low %v1314_v59, %v1394_v3  ;;  %v15173_v21 = vcombine.low %v1315_v7, %v1395_v11  ;;  %v1635_v2 = vunpack.c.h.s8.bf16 %v776_v62  ;;  %v457_v3 = vld [vmem:[%s16913_s21 + $0x98] sm:$0xff] }
 0x2c4   : > { %v13352_v63 = vcombine.low %v13343_v42, %v13350_v46  ;;  %9090 = vmatpush1.bf16.msra.mxu0 %v7408_v10  ;;  %9131 = vmatpush1.bf16.msra.mxu1 %v7414_v28  ;;  %v1715_v35 = vunpack.c.h.s8.bf16 %v816_v29  ;;  %v15332_v8 = vcombine.high %v1474_v1, %v1554_v19  ;;  %v15331_v45 = vcombine.low %v1474_v1, %v1554_v19  ;;  %v17685_v10 = vld [vmem:[%s17147_s22 + $0x28] sm:$0xff]  ;;  %v497_v7 = vld [vmem:[%s16913_s21 + $0x1d8] sm:$0xff] }
 0x2c5   : > { %9159 = vmatprep.subr.bf16.mxu0 %v14852_v12  ;;  %9200 = vmatprep.subr.bf16.mxu1 %v14854_v57  ;;  %v15334_v22 = vcombine.high %v1475_v20, %v1555_v61  ;;  %v15333_v13 = vcombine.low %v1475_v20, %v1555_v61  ;;  %v11166_v9 = vrot.slane %v17677_v23, %v17130_v50  ;;  %v1794_v26 = vunpack.c.l.s8.bf16 %v856_v5 }
 0x2c6   : > { %v13366_v17 = vrot.slane %v13352_v63, %v17188_v56  ;;  %v15492_v12 = vcombine.high %v1634_v52, %v1714_v39  ;;  %v15494_v55 = vcombine.high %v1635_v2, %v1715_v35  ;;  %v1874_v28 = vunpack.c.l.s8.bf16 %v896_v6 }
 0x2c7   : > { %15968 = vmatmul.mubr.msk.bf16.vlgmr.msra.gmra.mrb[68].mxu0 %vm7198_vm1, %v16950_v32  ;;  %15970 = vmatmul.mubr.msk.bf16.vlgmr.msra.gmra.mrb[68].mxu1 %vm7198_vm1, %v16950_v32  ;;  %v1795_v57 = vunpack.c.h.s8.bf16 %v856_v5  ;;  %v1875_v30 = vunpack.c.h.s8.bf16 %v896_v6  ;;  %v11174_v31 = vrot.slane %v17677_v23, %v17140_v53  ;;  %v11170_v34 = vrot.slane %v17677_v23, %v17143_v54 }
 0x2c8   : > { %v13367_v33 = vcombine.low %v13359_v16, %v13366_v17  ;;  %9160 = vmatpush1.bf16.msra.mxu0 %v14851_v47  ;;  %9201 = vmatpush1.bf16.msra.mxu1 %v14853_v58  ;;  %v1954_v37 = vunpack.c.l.s8.bf16 %v936_v24  ;;  %v1955_v38 = vunpack.c.h.s8.bf16 %v936_v24  ;;  %v12166_v40 = vrot.slane %v17685_v10, %v17130_v50 }
 0x2c9   : > { %9161 = vmatprep.subr.bf16.mxu0 %v15012_v14  ;;  %9202 = vmatprep.subr.bf16.mxu1 %v15014_v15  ;;  %v11178_v42 = vrot.slane %v17677_v23, %v17155_v60  ;;  %v15491_v46 = vcombine.low %v1634_v52, %v1714_v39  ;;  %v15493_v47 = vcombine.low %v1635_v2, %v1715_v35  ;;  %v996_v19 = vunpack.c.l.s8.bf16 %v457_v3 }
 0x2ca   : > { %14127 = vst [vmem:[%s17271_s17 + $0x20] sm:$0xff] %v13367_v33  ;;  %9191 = vmatprep.mubr.bf16.mxu0 %v16605_v0  ;;  %9232 = vmatprep.mubr.bf16.mxu1 %v16605_v0  ;;  %v12174_v58 = vrot.slane %v17685_v10, %v17140_v53  ;;  %v12170_v59 = vrot.slane %v17685_v10, %v17143_v54  ;;  %v1076_v20 = vunpack.c.l.s8.bf16 %v497_v7  ;;  %v1077_v52 = vunpack.c.h.s8.bf16 %v497_v7 }
 0x2cb   : > { %v12178_v63 = vrot.slane %v17685_v10, %v17155_v60  ;;  %v15652_v11 = vcombine.high %v1794_v26, %v1874_v28  ;;  %v15654_v14 = vcombine.high %v1795_v57, %v1875_v30  ;;  %v15651_v15 = vcombine.low %v1794_v26, %v1874_v28 }
 0x2cc   : > { %9162 = vmatpush1.bf16.msra.mxu0 %v15011_v27  ;;  %9203 = vmatpush1.bf16.msra.mxu1 %v15013_v18  ;;  %v15653_v25 = vcombine.low %v1795_v57, %v1875_v30  ;;  %v15812_v41 = vcombine.high %v1954_v37, %v1954_v37  ;;  %v15811_v27 = vcombine.low %v1954_v37, %v1954_v37  ;;  %v617_v57 = vld [vmem:[%s16913_s21 + $0x598] sm:$0xff] }
 0x2cd   : > { %9163 = vmatprep.subr.bf16.mxu0 %v15172_v48  ;;  %9204 = vmatprep.subr.bf16.mxu1 %v15174_v51  ;;  %v15813_v18 = vcombine.low %v1955_v38, %v1955_v38 }
 0x2ce   : > { %v7420_v24 = vsel %vm7202_vm0, %v15811_v27, 0 }
 0x2cf   : > { %v7426_v26 = vsel %vm7202_vm0, %v15813_v18, 0 }
 0x2d0   : > { %9164 = vmatpush1.bf16.msra.mxu0 %v15171_v4  ;;  %9205 = vmatpush1.bf16.msra.mxu1 %v15173_v21  ;;  %v997_v21 = vunpack.c.h.s8.bf16 %v457_v3  ;;  %v1317_v3 = vunpack.c.h.s8.bf16 %v617_v57 }
 0x2d1   : > { %9165 = vmatprep.subr.bf16.mxu0 %v15332_v8  ;;  %9206 = vmatprep.subr.bf16.mxu1 %v15334_v22  ;;  %v15814_v22 = vcombine.high %v1955_v38, %v1955_v38  ;;  %v657_v38 = vld [vmem:[%s16913_s21 + $0x6d8] sm:$0xff] }
 0x2d2   : > { %v14858_v28 = vcombine.high %v997_v21, %v1077_v52  ;;  %v1397_v7 = vunpack.c.h.s8.bf16 %v657_v38 }
 0x2d4   : > { %9166 = vmatpush1.bf16.msra.mxu0 %v15331_v45  ;;  %9207 = vmatpush1.bf16.msra.mxu1 %v15333_v13  ;;  %v537_v45 = vld [vmem:[%s16913_s21 + $0x318] sm:$0xff]  ;;  %v15178_v27 = vcombine.high %v1317_v3, %v1397_v7 }
 0x2d5   : > { %9167 = vmatprep.subr.bf16.mxu0 %v15492_v12  ;;  %9208 = vmatprep.subr.bf16.mxu1 %v15494_v55  ;;  %v577_v13 = vld [vmem:[%s16913_s21 + $0x458] sm:$0xff]  ;;  %v1156_v30 = vunpack.c.l.s8.bf16 %v537_v45 }
 0x2d6   : > { %v8537_v16 = vpop.f32.mrb[40].mxu0  ;;  %v8578_v17 = vpop.f32.mrb[40].mxu1  ;;  %v1237_v37 = vunpack.c.h.s8.bf16 %v577_v13 }
 0x2d7   : > { %v11843_v33 = vmul.f32 %v11166_v9, %v8537_v16  ;;  %v11845_v48 = vmul.f32 %v11174_v31, %v8578_v17  ;;  %v8539_v51 = vpop.f32.mrb[41].mxu0  ;;  %v8580_v1 = vpop.f32.mrb[41].mxu1  ;;  %v14856_v9 = vcombine.high %v996_v19, %v1076_v20  ;;  %v1236_v31 = vunpack.c.l.s8.bf16 %v577_v13  ;;  %v737_v16 = vld [vmem:[%s16913_s21 + $0x958] sm:$0xff] }
 0x2d8   : > { %v11844_v61 = vmul.f32 %v11170_v34, %v8539_v51  ;;  %v11846_v62 = vmul.f32 %v11178_v42, %v8580_v1  ;;  %v8541_v29 = vpop.f32.mrb[42].mxu0  ;;  %v8582_v4 = vpop.f32.mrb[42].mxu1  ;;  %9168 = vmatpush1.bf16.msra.mxu0 %v15491_v46  ;;  %9209 = vmatpush1.bf16.msra.mxu1 %v15493_v47  ;;  %v1157_v34 = vunpack.c.h.s8.bf16 %v537_v45  ;;  %v14855_v46 = vcombine.low %v996_v19, %v1076_v20  ;;  %v777_v1 = vld [vmem:[%s16913_s21 + $0xa98] sm:$0xff] }
 0x2d9   : > { %v12843_v39 = vadd.f32 %v12166_v40, %v11843_v33  ;;  %v12845_v2 = vadd.f32 %v12174_v58, %v11845_v48  ;;  %v8542_v35 = vpop.f32.mrb[43].mxu0  ;;  %v8583_v8 = vpop.f32.mrb[43].mxu1  ;;  %9169 = vmatprep.subr.bf16.mxu0 %v15652_v11  ;;  %9210 = vmatprep.subr.bf16.mxu1 %v15654_v14  ;;  %v14857_v47 = vcombine.low %v997_v21, %v1077_v52  ;;  %v1316_v58 = vunpack.c.l.s8.bf16 %v617_v57  ;;  %v817_v19 = vld [vmem:[%s16913_s21 + $0xbd8] sm:$0xff] }
 0x2da   : > { %v12844_v5 = vadd.f32 %v12170_v59, %v11844_v61  ;;  %v12846_v6 = vadd.f32 %v12178_v63, %v11846_v62  ;;  %v1396_v63 = vunpack.c.l.s8.bf16 %v657_v38  ;;  %v15016_v11 = vcombine.high %v1156_v30, %v1236_v31  ;;  %v897_v35 = vld [vmem:[%s16913_s21 + $0xe58] sm:$0xff] }
 0x2db   : > { %v15018_v14 = vcombine.high %v1157_v34, %v1237_v37  ;;  %v15015_v17 = vcombine.low %v1156_v30, %v1236_v31  ;;  %v1556_v33 = vunpack.c.l.s8.bf16 %v737_v16  ;;  %v1557_v51 = vunpack.c.h.s8.bf16 %v737_v16 }
 0x2dc   : > { %v13368_v12 = vcombine.low %v12843_v39, %v12844_v5  ;;  %v13369_v55 = vcombine.low %v12845_v2, %v12846_v6  ;;  %9170 = vmatpush1.bf16.msra.mxu0 %v15651_v15  ;;  %9211 = vmatpush1.bf16.msra.mxu1 %v15653_v25  ;;  %v697_v15 = vld [vmem:[%s16913_s21 + $0x818] sm:$0xff]  ;;  %v15017_v25 = vcombine.low %v1157_v34, %v1237_v37  ;;  %v1636_v62 = vunpack.c.l.s8.bf16 %v777_v1 }
 0x2dd   : > { %15971 = vmatprep.subr.msk.bf16.mxu0 %vm7202_vm0, %v15812_v41  ;;  %15973 = vmatprep.subr.msk.bf16.mxu1 %vm7202_vm0, %v15814_v22  ;;  %v15176_v41 = vcombine.high %v1316_v58, %v1396_v63  ;;  %v1476_v18 = vunpack.c.l.s8.bf16 %v697_v15  ;;  %v1477_v48 = vunpack.c.h.s8.bf16 %v697_v15  ;;  %v15175_v20 = vcombine.low %v1316_v58, %v1396_v63  ;;  %v857_v2 = vld [vmem:[%s16913_s21 + $0xd18] sm:$0xff]  ;;  %v458_v63 = vld [vmem:[%s16913_s21 + $0xa0] sm:$0xff] }
 0x2de   : > { %v17712_v40 = vrot.slane %v13368_v12, %v17188_v56  ;;  %v17715_v42 = vrot.slane %v13369_v55, %v17188_v56  ;;  %v15177_v61 = vcombine.low %v1317_v3, %v1397_v7  ;;  %v1716_v29 = vunpack.c.l.s8.bf16 %v817_v19  ;;  %v937_v5 = vld [vmem:[%s16913_s21 + $0xf98] sm:$0x55]  ;;  %v498_v3 = vld [vmem:[%s16913_s21 + $0x1e0] sm:$0xff] }
 0x2df   : > { %v1637_v4 = vunpack.c.h.s8.bf16 %v777_v1  ;;  %v1717_v21 = vunpack.c.h.s8.bf16 %v817_v19  ;;  %v15336_v52 = vcombine.high %v1476_v18, %v1556_v33  ;;  %v15338_v39 = vcombine.high %v1477_v48, %v1557_v51 }
 0x2e0   : > { %v13400_v59 = vcombine.low %v17712_v40, %v17715_v42  ;;  %9172 = vmatpush1.bf16.msra.mxu0 %v7420_v24  ;;  %9213 = vmatpush1.bf16.msra.mxu1 %v7426_v26  ;;  %v15335_v8 = vcombine.low %v1476_v18, %v1556_v33  ;;  %v15337_v22 = vcombine.low %v1477_v48, %v1557_v51  ;;  %v1796_v24 = vunpack.c.l.s8.bf16 %v857_v2 }
 0x2e1   : > { %9241 = vmatprep.subr.bf16.mxu0 %v14856_v9  ;;  %9282 = vmatprep.subr.bf16.mxu1 %v14858_v28  ;;  %v11182_v6 = vrot.slane %v17677_v23, %v17215_v36  ;;  %v15496_v45 = vcombine.high %v1636_v62, %v1716_v29  ;;  %v15498_v13 = vcombine.high %v1637_v4, %v1717_v21  ;;  %v1876_v9 = vunpack.c.l.s8.bf16 %v897_v35 }
 0x2e2   : > { %v1797_v12 = vunpack.c.h.s8.bf16 %v857_v2  ;;  %v1877_v55 = vunpack.c.h.s8.bf16 %v897_v35  ;;  %v11190_v26 = vrot.slane %v17677_v23, %v17218_v43  ;;  %v11186_v28 = vrot.slane %v17677_v23, %v17221_v44 }
 0x2e3   : > { %15972 = vmatmul.mubr.msk.bf16.vlgmr.msra.gmra.mrb[72].mxu0 %vm7198_vm1, %v16950_v32  ;;  %15974 = vmatmul.mubr.msk.bf16.vlgmr.msra.gmra.mrb[72].mxu1 %vm7198_vm1, %v16950_v32  ;;  %v1956_v57 = vunpack.c.l.s8.bf16 %v937_v5  ;;  %v1957_v30 = vunpack.c.h.s8.bf16 %v937_v5  ;;  %v12182_v31 = vrot.slane %v17685_v10, %v17215_v36  ;;  %v12190_v34 = vrot.slane %v17685_v10, %v17218_v43  ;;  %v578_v5 = vld [vmem:[%s16913_s21 + $0x460] sm:$0xff] }
 0x2e4   : > { %9242 = vmatpush1.bf16.msra.mxu0 %v14855_v46  ;;  %9283 = vmatpush1.bf16.msra.mxu1 %v14857_v47  ;;  %v11194_v37 = vrot.slane %v17677_v23, %v17226_v49  ;;  %v15495_v38 = vcombine.low %v1636_v62, %v1716_v29  ;;  %v12186_v46 = vrot.slane %v17685_v10, %v17221_v44  ;;  %v998_v51 = vunpack.c.l.s8.bf16 %v458_v63 }
 0x2e5   : > { %9243 = vmatprep.subr.bf16.mxu0 %v15016_v11  ;;  %9284 = vmatprep.subr.bf16.mxu1 %v15018_v14  ;;  %v12194_v47 = vrot.slane %v17685_v10, %v17226_v49  ;;  %v15497_v58 = vcombine.low %v1637_v4, %v1717_v21  ;;  %v15656_v7 = vcombine.high %v1796_v24, %v1876_v9  ;;  %v1078_v10 = vunpack.c.l.s8.bf16 %v498_v3 }
 0x2e6   : > { %9273 = vmatprep.mubr.bf16.mxu0 %v16605_v0  ;;  %9314 = vmatprep.mubr.bf16.mxu1 %v16605_v0  ;;  %v15658_v11 = vcombine.high %v1797_v12, %v1877_v55  ;;  %v15655_v14 = vcombine.low %v1796_v24, %v1876_v9  ;;  %v15657_v23 = vcombine.low %v1797_v12, %v1877_v55  ;;  %v999_v62 = vunpack.c.h.s8.bf16 %v458_v63  ;;  %v618_v55 = vld [vmem:[%s16913_s21 + $0x5a0] sm:$0xff] }
 0x2e7   : > { %v1079_v29 = vunpack.c.h.s8.bf16 %v498_v3  ;;  %v15818_v2 = vcombine.high %v1957_v30, %v1957_v30  ;;  %v1319_v3 = vunpack.c.h.s8.bf16 %v618_v55 }
 0x2e8   : > { %9244 = vmatpush1.bf16.msra.mxu0 %v15015_v17  ;;  %9285 = vmatpush1.bf16.msra.mxu1 %v15017_v25  ;;  %v15816_v17 = vcombine.high %v1956_v57, %v1956_v57  ;;  %v15815_v25 = vcombine.low %v1956_v57, %v1956_v57 }
 0x2e9   : > { %9245 = vmatprep.subr.bf16.mxu0 %v15176_v41  ;;  %9286 = vmatprep.subr.bf16.mxu1 %v15178_v27  ;;  %v15817_v41 = vcombine.low %v1957_v30, %v1957_v30  ;;  %v14862_v12 = vcombine.high %v999_v62, %v1079_v29  ;;  %v1239_v30 = vunpack.c.h.s8.bf16 %v578_v5 }
 0x2eb   : > { %v7438_v9 = vsel %vm7202_vm0, %v15817_v41, 0 }
 0x2ec   : > { %9246 = vmatpush1.bf16.msra.mxu0 %v15175_v20  ;;  %9287 = vmatpush1.bf16.msra.mxu1 %v15177_v61 }
 0x2ed   : > { %9247 = vmatprep.subr.bf16.mxu0 %v15336_v52  ;;  %9288 = vmatprep.subr.bf16.mxu1 %v15338_v39 }
 0x2f0   : > { %9248 = vmatpush1.bf16.msra.mxu0 %v15335_v8  ;;  %9289 = vmatpush1.bf16.msra.mxu1 %v15337_v22  ;;  %v538_v22 = vld [vmem:[%s16913_s21 + $0x320] sm:$0xff] }
 0x2f1   : > { %9249 = vmatprep.subr.bf16.mxu0 %v15496_v45  ;;  %9290 = vmatprep.subr.bf16.mxu1 %v15498_v13  ;;  %v14860_v45 = vcombine.high %v998_v51, %v1078_v10  ;;  %v1159_v57 = vunpack.c.h.s8.bf16 %v538_v22 }
 0x2f2   : > { %v8619_v15 = vpop.f32.mrb[44].mxu0  ;;  %v8660_v16 = vpop.f32.mrb[44].mxu1 }
 0x2f3   : > { %v11847_v27 = vmul.f32 %v11182_v6, %v8619_v15  ;;  %v11849_v18 = vmul.f32 %v11190_v26, %v8660_v16  ;;  %v8621_v33 = vpop.f32.mrb[45].mxu0  ;;  %v8662_v48 = vpop.f32.mrb[45].mxu1  ;;  %v7432_v6 = vsel %vm7202_vm0, %v15815_v25, 0  ;;  %v1158_v26 = vunpack.c.l.s8.bf16 %v538_v22  ;;  %v938_v22 = vld [vmem:[%s16913_s21 + $0xfa0] sm:$0x55] }
 0x2f4   : > { %v11848_v1 = vmul.f32 %v11186_v28, %v8621_v33  ;;  %v11850_v19 = vmul.f32 %v11194_v37, %v8662_v48  ;;  %v8623_v20 = vpop.f32.mrb[46].mxu0  ;;  %v8664_v61 = vpop.f32.mrb[46].mxu1  ;;  %9250 = vmatpush1.bf16.msra.mxu0 %v15495_v38  ;;  %9291 = vmatpush1.bf16.msra.mxu1 %v15497_v58  ;;  %v1238_v28 = vunpack.c.l.s8.bf16 %v578_v5  ;;  %v14859_v38 = vcombine.low %v998_v51, %v1078_v10  ;;  %v778_v51 = vld [vmem:[%s16913_s21 + $0xaa0] sm:$0xff] }
 0x2f5   : > { %v12847_v4 = vadd.f32 %v12182_v31, %v11847_v27  ;;  %v12849_v21 = vadd.f32 %v12190_v34, %v11849_v18  ;;  %v8624_v52 = vpop.f32.mrb[47].mxu0  ;;  %v8665_v39 = vpop.f32.mrb[47].mxu1  ;;  %9251 = vmatprep.subr.bf16.mxu0 %v15656_v7  ;;  %9292 = vmatprep.subr.bf16.mxu1 %v15658_v11  ;;  %v658_v31 = vld [vmem:[%s16913_s21 + $0x6e0] sm:$0xff]  ;;  %v13408_v15 = vrot.slane %v13400_v59, %v17188_v56  ;;  %v1638_v20 = vunpack.c.l.s8.bf16 %v778_v51 }
 0x2f6   : > { %v12848_v35 = vadd.f32 %v12186_v46, %v11848_v1  ;;  %v12850_v8 = vadd.f32 %v12194_v47, %v11850_v19  ;;  %v14861_v46 = vcombine.low %v999_v62, %v1079_v29  ;;  %v1318_v47 = vunpack.c.l.s8.bf16 %v618_v55  ;;  %v818_v10 = vld [vmem:[%s16913_s21 + $0xbe0] sm:$0xff]  ;;  %v17777_v52 = vld [vmem:[%s17134_s20 + $0x30] sm:$0xff] }
 0x2f7   : > { %v1398_v63 = vunpack.c.l.s8.bf16 %v658_v31  ;;  %v1399_v7 = vunpack.c.h.s8.bf16 %v658_v31  ;;  %v15020_v11 = vcombine.high %v1158_v26, %v1238_v28  ;;  %v15019_v25 = vcombine.low %v1158_v26, %v1238_v28  ;;  %v858_v39 = vld [vmem:[%s16913_s21 + $0xd20] sm:$0xff] }
 0x2f8   : > { %v13370_v13 = vcombine.low %v12847_v4, %v12848_v35  ;;  %v13371_v24 = vcombine.low %v12849_v21, %v12850_v8  ;;  %9252 = vmatpush1.bf16.msra.mxu0 %v15655_v14  ;;  %9293 = vmatpush1.bf16.msra.mxu1 %v15657_v23  ;;  %v15022_v14 = vcombine.high %v1159_v57, %v1239_v30  ;;  %v698_v23 = vld [vmem:[%s16913_s21 + $0x820] sm:$0xff]  ;;  %v1718_v61 = vunpack.c.l.s8.bf16 %v818_v10 }
 0x2f9   : > { %15975 = vmatprep.subr.msk.bf16.mxu0 %vm7202_vm0, %v15816_v17  ;;  %15977 = vmatprep.subr.msk.bf16.mxu1 %vm7202_vm0, %v15818_v2  ;;  %v738_v17 = vld [vmem:[%s16913_s21 + $0x960] sm:$0xff]  ;;  %v15021_v41 = vcombine.low %v1159_v57, %v1239_v30  ;;  %v15180_v40 = vcombine.high %v1318_v47, %v1398_v63  ;;  %v15182_v42 = vcombine.high %v1319_v3, %v1399_v7  ;;  %v1478_v59 = vunpack.c.l.s8.bf16 %v698_v23 }
 0x2fa   : > { %v13392_v34 = vrot.slane %v13370_v13, %v17188_v56  ;;  %v13399_v37 = vrot.slane %v13371_v24, %v17188_v56  ;;  %v1558_v18 = vunpack.c.l.s8.bf16 %v738_v17  ;;  %v1479_v33 = vunpack.c.h.s8.bf16 %v698_v23  ;;  %v898_v2 = vld [vmem:[%s16913_s21 + $0xe60] sm:$0xff] }
 0x2fb   : > { %v1559_v48 = vunpack.c.h.s8.bf16 %v738_v17  ;;  %v15179_v1 = vcombine.low %v1318_v47, %v1398_v63  ;;  %v15181_v19 = vcombine.low %v1319_v3, %v1399_v7  ;;  %v1639_v62 = vunpack.c.h.s8.bf16 %v778_v51  ;;  %v459_v63 = vld [vmem:[%s16913_s21 + $0xa8] sm:$0xff] }
 0x2fc   : > { %v13401_v58 = vcombine.low %v13392_v34, %v13399_v37  ;;  %9254 = vmatpush1.bf16.msra.mxu0 %v7432_v6  ;;  %9295 = vmatpush1.bf16.msra.mxu1 %v7438_v9  ;;  %v1719_v29 = vunpack.c.h.s8.bf16 %v818_v10  ;;  %v15340_v4 = vcombine.high %v1478_v59, %v1558_v18  ;;  %v15339_v35 = vcombine.low %v1478_v59, %v1558_v18  ;;  %v17785_v6 = vld [vmem:[%s17147_s22 + $0x30] sm:$0xff]  ;;  %v499_v3 = vld [vmem:[%s16913_s21 + $0x1e8] sm:$0xff] }
 0x2fd   : > { %9323 = vmatprep.subr.bf16.mxu0 %v14860_v45  ;;  %9364 = vmatprep.subr.bf16.mxu1 %v14862_v12  ;;  %v15342_v21 = vcombine.high %v1479_v33, %v1559_v48  ;;  %v15341_v8 = vcombine.low %v1479_v33, %v1559_v48  ;;  %v11198_v5 = vrot.slane %v17777_v52, %v17130_v50  ;;  %v1798_v24 = vunpack.c.l.s8.bf16 %v858_v39 }
 0x2fe   : > { %v13415_v16 = vrot.slane %v13401_v58, %v17188_v56  ;;  %v15500_v45 = vcombine.high %v1638_v20, %v1718_v61  ;;  %v15502_v13 = vcombine.high %v1639_v62, %v1719_v29  ;;  %v1878_v9 = vunpack.c.l.s8.bf16 %v898_v2 }
 0x2ff   : > { %15976 = vmatmul.mubr.msk.bf16.vlgmr.msra.gmra.mrb[76].mxu0 %vm7198_vm1, %v16950_v32  ;;  %15978 = vmatmul.mubr.msk.bf16.vlgmr.msra.gmra.mrb[76].mxu1 %vm7198_vm1, %v16950_v32  ;;  %v1799_v12 = vunpack.c.h.s8.bf16 %v858_v39  ;;  %v1879_v55 = vunpack.c.h.s8.bf16 %v898_v2  ;;  %v11206_v26 = vrot.slane %v17777_v52, %v17140_v53  ;;  %v11202_v28 = vrot.slane %v17777_v52, %v17143_v54 }
 0x300   : > { %v13416_v27 = vcombine.low %v13408_v15, %v13415_v16  ;;  %9324 = vmatpush1.bf16.msra.mxu0 %v14859_v38  ;;  %9365 = vmatpush1.bf16.msra.mxu1 %v14861_v46  ;;  %v1958_v57 = vunpack.c.l.s8.bf16 %v938_v22  ;;  %v1959_v30 = vunpack.c.h.s8.bf16 %v938_v22  ;;  %v12198_v31 = vrot.slane %v17785_v6, %v17130_v50 }
 0x301   : > { %9325 = vmatprep.subr.bf16.mxu0 %v15020_v11  ;;  %9366 = vmatprep.subr.bf16.mxu1 %v15022_v14  ;;  %v11210_v34 = vrot.slane %v17777_v52, %v17155_v60  ;;  %v15499_v37 = vcombine.low %v1638_v20, %v1718_v61  ;;  %v15501_v38 = vcombine.low %v1639_v62, %v1719_v29  ;;  %v1000_v18 = vunpack.c.l.s8.bf16 %v459_v63 }
 0x302   : > { %14128 = vst [vmem:[%s17271_s17 + $0x28] sm:$0xff] %v13416_v27  ;;  %9355 = vmatprep.mubr.bf16.mxu0 %v16605_v0  ;;  %9396 = vmatprep.mubr.bf16.mxu1 %v16605_v0  ;;  %v12206_v46 = vrot.slane %v17785_v6, %v17140_v53  ;;  %v12202_v47 = vrot.slane %v17785_v6, %v17143_v54  ;;  %v1080_v33 = vunpack.c.l.s8.bf16 %v499_v3  ;;  %v1081_v20 = vunpack.c.h.s8.bf16 %v499_v3 }
 0x303   : > { %v12210_v58 = vrot.slane %v17785_v6, %v17155_v60  ;;  %v15660_v7 = vcombine.high %v1798_v24, %v1878_v9  ;;  %v15662_v11 = vcombine.high %v1799_v12, %v1879_v55  ;;  %v15659_v14 = vcombine.low %v1798_v24, %v1878_v9 }
 0x304   : > { %9326 = vmatpush1.bf16.msra.mxu0 %v15019_v25  ;;  %9367 = vmatpush1.bf16.msra.mxu1 %v15021_v41  ;;  %v15661_v23 = vcombine.low %v1799_v12, %v1879_v55  ;;  %v15820_v17 = vcombine.high %v1958_v57, %v1958_v57  ;;  %v15819_v25 = vcombine.low %v1958_v57, %v1958_v57  ;;  %v619_v12 = vld [vmem:[%s16913_s21 + $0x5a8] sm:$0xff] }
 0x305   : > { %9327 = vmatprep.subr.bf16.mxu0 %v15180_v40  ;;  %9368 = vmatprep.subr.bf16.mxu1 %v15182_v42  ;;  %v15821_v41 = vcombine.low %v1959_v30, %v1959_v30 }
 0x306   : > { %v7444_v22 = vsel %vm7202_vm0, %v15819_v25, 0 }
 0x307   : > { %v7450_v24 = vsel %vm7202_vm0, %v15821_v41, 0 }
 0x308   : > { %9328 = vmatpush1.bf16.msra.mxu0 %v15179_v1  ;;  %9369 = vmatpush1.bf16.msra.mxu1 %v15181_v19  ;;  %v1001_v19 = vunpack.c.h.s8.bf16 %v459_v63  ;;  %v1321_v63 = vunpack.c.h.s8.bf16 %v619_v12 }
 0x309   : > { %9329 = vmatprep.subr.bf16.mxu0 %v15340_v4  ;;  %9370 = vmatprep.subr.bf16.mxu1 %v15342_v21  ;;  %v15822_v21 = vcombine.high %v1959_v30, %v1959_v30  ;;  %v659_v30 = vld [vmem:[%s16913_s21 + $0x6e8] sm:$0xff] }
 0x30a   : > { %v14866_v9 = vcombine.high %v1001_v19, %v1081_v20  ;;  %v1401_v3 = vunpack.c.h.s8.bf16 %v659_v30 }
 0x30c   : > { %9330 = vmatpush1.bf16.msra.mxu0 %v15339_v35  ;;  %9371 = vmatpush1.bf16.msra.mxu1 %v15341_v8  ;;  %v539_v35 = vld [vmem:[%s16913_s21 + $0x328] sm:$0xff]  ;;  %v15186_v25 = vcombine.high %v1321_v63, %v1401_v3 }
 0x30d   : > { %9331 = vmatprep.subr.bf16.mxu0 %v15500_v45  ;;  %9372 = vmatprep.subr.bf16.mxu1 %v15502_v13  ;;  %v579_v8 = vld [vmem:[%s16913_s21 + $0x468] sm:$0xff]  ;;  %v1160_v55 = vunpack.c.l.s8.bf16 %v539_v35 }
 0x30e   : > { %v8701_v15 = vpop.f32.mrb[48].mxu0  ;;  %v8742_v16 = vpop.f32.mrb[48].mxu1  ;;  %v1241_v57 = vunpack.c.h.s8.bf16 %v579_v8 }
 0x30f   : > { %v11851_v27 = vmul.f32 %v11198_v5, %v8701_v15  ;;  %v11853_v40 = vmul.f32 %v11206_v26, %v8742_v16  ;;  %v8703_v42 = vpop.f32.mrb[49].mxu0  ;;  %v8744_v59 = vpop.f32.mrb[49].mxu1  ;;  %v14864_v5 = vcombine.high %v1000_v18, %v1080_v33  ;;  %v1240_v26 = vunpack.c.l.s8.bf16 %v579_v8  ;;  %v739_v15 = vld [vmem:[%s16913_s21 + $0x968] sm:$0xff] }
 0x310   : > { %v11852_v48 = vmul.f32 %v11202_v28, %v8703_v42  ;;  %v11854_v51 = vmul.f32 %v11210_v34, %v8744_v59  ;;  %v8705_v10 = vpop.f32.mrb[50].mxu0  ;;  %v8746_v1 = vpop.f32.mrb[50].mxu1  ;;  %9332 = vmatpush1.bf16.msra.mxu0 %v15499_v37  ;;  %9373 = vmatpush1.bf16.msra.mxu1 %v15501_v38  ;;  %v1161_v28 = vunpack.c.h.s8.bf16 %v539_v35  ;;  %v14863_v37 = vcombine.low %v1000_v18, %v1080_v33  ;;  %v779_v59 = vld [vmem:[%s16913_s21 + $0xaa8] sm:$0xff] }
 0x311   : > { %v12851_v61 = vadd.f32 %v12198_v31, %v11851_v27  ;;  %v12853_v62 = vadd.f32 %v12206_v46, %v11853_v40  ;;  %v8706_v29 = vpop.f32.mrb[51].mxu0  ;;  %v8747_v4 = vpop.f32.mrb[51].mxu1  ;;  %9333 = vmatprep.subr.bf16.mxu0 %v15660_v7  ;;  %9374 = vmatprep.subr.bf16.mxu1 %v15662_v11  ;;  %v14865_v38 = vcombine.low %v1001_v19, %v1081_v20  ;;  %v1320_v46 = vunpack.c.l.s8.bf16 %v619_v12  ;;  %v819_v18 = vld [vmem:[%s16913_s21 + $0xbe8] sm:$0xff] }
 0x312   : > { %v12852_v39 = vadd.f32 %v12202_v47, %v11852_v48  ;;  %v12854_v2 = vadd.f32 %v12210_v58, %v11854_v51  ;;  %v1400_v58 = vunpack.c.l.s8.bf16 %v659_v30  ;;  %v15024_v7 = vcombine.high %v1160_v55, %v1240_v26  ;;  %v899_v29 = vld [vmem:[%s16913_s21 + $0xe68] sm:$0xff] }
 0x313   : > { %v15026_v11 = vcombine.high %v1161_v28, %v1241_v57  ;;  %v15023_v16 = vcombine.low %v1160_v55, %v1240_v26  ;;  %v1560_v27 = vunpack.c.l.s8.bf16 %v739_v15  ;;  %v1561_v42 = vunpack.c.h.s8.bf16 %v739_v15 }
 0x314   : > { %v13417_v45 = vcombine.low %v12851_v61, %v12852_v39  ;;  %v13418_v13 = vcombine.low %v12853_v62, %v12854_v2  ;;  %9334 = vmatpush1.bf16.msra.mxu0 %v15659_v14  ;;  %9375 = vmatpush1.bf16.msra.mxu1 %v15661_v23  ;;  %v699_v14 = vld [vmem:[%s16913_s21 + $0x828] sm:$0xff]  ;;  %v15025_v23 = vcombine.low %v1161_v28, %v1241_v57  ;;  %v1640_v51 = vunpack.c.l.s8.bf16 %v779_v59 }
 0x315   : > { %15979 = vmatprep.subr.msk.bf16.mxu0 %vm7202_vm0, %v15820_v17  ;;  %15981 = vmatprep.subr.msk.bf16.mxu1 %vm7202_vm0, %v15822_v21  ;;  %v15184_v17 = vcombine.high %v1320_v46, %v1400_v58  ;;  %v1480_v41 = vunpack.c.l.s8.bf16 %v699_v14  ;;  %v1481_v40 = vunpack.c.h.s8.bf16 %v699_v14  ;;  %v15183_v33 = vcombine.low %v1320_v46, %v1400_v58  ;;  %v859_v62 = vld [vmem:[%s16913_s21 + $0xd28] sm:$0xff]  ;;  %v460_v58 = vld [vmem:[%s16913_s21 + $0xb0] sm:$0xff] }
 0x316   : > { %v17812_v31 = vrot.slane %v13417_v45, %v17188_v56  ;;  %v17815_v34 = vrot.slane %v13418_v13, %v17188_v56  ;;  %v15185_v48 = vcombine.low %v1321_v63, %v1401_v3  ;;  %v1720_v10 = vunpack.c.l.s8.bf16 %v819_v18  ;;  %v939_v39 = vld [vmem:[%s16913_s21 + $0xfa8] sm:$0x55]  ;;  %v500_v63 = vld [vmem:[%s16913_s21 + $0x1f0] sm:$0xff] }
 0x317   : > { %v1641_v1 = vunpack.c.h.s8.bf16 %v779_v59  ;;  %v1721_v19 = vunpack.c.h.s8.bf16 %v819_v18  ;;  %v15344_v20 = vcombine.high %v1480_v41, %v1560_v27  ;;  %v15346_v61 = vcombine.high %v1481_v40, %v1561_v42 }
 0x318   : > { %v13449_v47 = vcombine.low %v17812_v31, %v17815_v34  ;;  %9336 = vmatpush1.bf16.msra.mxu0 %v7444_v22  ;;  %9377 = vmatpush1.bf16.msra.mxu1 %v7450_v24  ;;  %v15343_v4 = vcombine.low %v1480_v41, %v1560_v27  ;;  %v15345_v21 = vcombine.low %v1481_v40, %v1561_v42  ;;  %v1800_v22 = vunpack.c.l.s8.bf16 %v859_v62 }
 0x319   : > { %9405 = vmatprep.subr.bf16.mxu0 %v14864_v5  ;;  %9446 = vmatprep.subr.bf16.mxu1 %v14866_v9  ;;  %v11214_v2 = vrot.slane %v17777_v52, %v17215_v36  ;;  %v15504_v35 = vcombine.high %v1640_v51, %v1720_v10  ;;  %v15506_v8 = vcombine.high %v1641_v1, %v1721_v19  ;;  %v1880_v5 = vunpack.c.l.s8.bf16 %v899_v29 }
 0x31a   : > { %v1801_v45 = vunpack.c.h.s8.bf16 %v859_v62  ;;  %v1881_v13 = vunpack.c.h.s8.bf16 %v899_v29  ;;  %v11222_v24 = vrot.slane %v17777_v52, %v17218_v43  ;;  %v11218_v9 = vrot.slane %v17777_v52, %v17221_v44 }
 0x31b   : > { %15980 = vmatmul.mubr.msk.bf16.vlgmr.msra.gmra.mrb[80].mxu0 %vm7198_vm1, %v16950_v32  ;;  %15982 = vmatmul.mubr.msk.bf16.vlgmr.msra.gmra.mrb[80].mxu1 %vm7198_vm1, %v16950_v32  ;;  %v1960_v12 = vunpack.c.l.s8.bf16 %v939_v39  ;;  %v1961_v55 = vunpack.c.h.s8.bf16 %v939_v39  ;;  %v12214_v26 = vrot.slane %v17785_v6, %v17215_v36  ;;  %v12222_v28 = vrot.slane %v17785_v6, %v17218_v43  ;;  %v580_v39 = vld [vmem:[%s16913_s21 + $0x470] sm:$0xff] }
 0x31c   : > { %9406 = vmatpush1.bf16.msra.mxu0 %v14863_v37  ;;  %9447 = vmatpush1.bf16.msra.mxu1 %v14865_v38  ;;  %v11226_v57 = vrot.slane %v17777_v52, %v17226_v49  ;;  %v15503_v30 = vcombine.low %v1640_v51, %v1720_v10  ;;  %v12218_v37 = vrot.slane %v17785_v6, %v17221_v44  ;;  %v1002_v42 = vunpack.c.l.s8.bf16 %v460_v58 }
 0x31d   : > { %9407 = vmatprep.subr.bf16.mxu0 %v15024_v7  ;;  %9448 = vmatprep.subr.bf16.mxu1 %v15026_v11  ;;  %v12226_v38 = vrot.slane %v17785_v6, %v17226_v49  ;;  %v15505_v46 = vcombine.low %v1641_v1, %v1721_v19  ;;  %v15664_v3 = vcombine.high %v1800_v22, %v1880_v5  ;;  %v1082_v6 = vunpack.c.l.s8.bf16 %v500_v63 }
 0x31e   : > { %9437 = vmatprep.mubr.bf16.mxu0 %v16605_v0  ;;  %9478 = vmatprep.mubr.bf16.mxu1 %v16605_v0  ;;  %v15666_v7 = vcombine.high %v1801_v45, %v1881_v13  ;;  %v15663_v11 = vcombine.low %v1800_v22, %v1880_v5  ;;  %v15665_v52 = vcombine.low %v1801_v45, %v1881_v13  ;;  %v1003_v51 = vunpack.c.h.s8.bf16 %v460_v58  ;;  %v620_v13 = vld [vmem:[%s16913_s21 + $0x5b0] sm:$0xff] }
 0x31f   : > { %v1083_v10 = vunpack.c.h.s8.bf16 %v500_v63  ;;  %v15826_v62 = vcombine.high %v1961_v55, %v1961_v55  ;;  %v1323_v63 = vunpack.c.h.s8.bf16 %v620_v13 }
 0x320   : > { %9408 = vmatpush1.bf16.msra.mxu0 %v15023_v16  ;;  %9449 = vmatpush1.bf16.msra.mxu1 %v15025_v23  ;;  %v15824_v16 = vcombine.high %v1960_v12, %v1960_v12  ;;  %v15823_v23 = vcombine.low %v1960_v12, %v1960_v12 }
 0x321   : > { %9409 = vmatprep.subr.bf16.mxu0 %v15184_v17  ;;  %9450 = vmatprep.subr.bf16.mxu1 %v15186_v25  ;;  %v15825_v17 = vcombine.low %v1961_v55, %v1961_v55  ;;  %v14870_v45 = vcombine.high %v1003_v51, %v1083_v10  ;;  %v1243_v55 = vunpack.c.h.s8.bf16 %v580_v39 }
 0x323   : > { %v7462_v5 = vsel %vm7202_vm0, %v15825_v17, 0 }
 0x324   : > { %9410 = vmatpush1.bf16.msra.mxu0 %v15183_v33  ;;  %9451 = vmatpush1.bf16.msra.mxu1 %v15185_v48 }
 0x325   : > { %9411 = vmatprep.subr.bf16.mxu0 %v15344_v20  ;;  %9452 = vmatprep.subr.bf16.mxu1 %v15346_v61 }
 0x328   : > { %9412 = vmatpush1.bf16.msra.mxu0 %v15343_v4  ;;  %9453 = vmatpush1.bf16.msra.mxu1 %v15345_v21  ;;  %v540_v21 = vld [vmem:[%s16913_s21 + $0x330] sm:$0xff] }
 0x329   : > { %9413 = vmatprep.subr.bf16.mxu0 %v15504_v35  ;;  %9454 = vmatprep.subr.bf16.mxu1 %v15506_v8  ;;  %v14868_v35 = vcombine.high %v1002_v42, %v1082_v6  ;;  %v1163_v12 = vunpack.c.h.s8.bf16 %v540_v21 }
 0x32a   : > { %v8783_v14 = vpop.f32.mrb[52].mxu0  ;;  %v8824_v15 = vpop.f32.mrb[52].mxu1 }
 0x32b   : > { %v11855_v25 = vmul.f32 %v11214_v2, %v8783_v14  ;;  %v11857_v41 = vmul.f32 %v11222_v24, %v8824_v15  ;;  %v8785_v27 = vpop.f32.mrb[53].mxu0  ;;  %v8826_v40 = vpop.f32.mrb[53].mxu1  ;;  %v7456_v2 = vsel %vm7202_vm0, %v15823_v23, 0  ;;  %v1162_v24 = vunpack.c.l.s8.bf16 %v540_v21  ;;  %v940_v21 = vld [vmem:[%s16913_s21 + $0xfb0] sm:$0x55] }
 0x32c   : > { %v11856_v59 = vmul.f32 %v11218_v9, %v8785_v27  ;;  %v11858_v18 = vmul.f32 %v11226_v57, %v8826_v40  ;;  %v8787_v33 = vpop.f32.mrb[54].mxu0  ;;  %v8828_v48 = vpop.f32.mrb[54].mxu1  ;;  %9414 = vmatpush1.bf16.msra.mxu0 %v15503_v30  ;;  %9455 = vmatpush1.bf16.msra.mxu1 %v15505_v46  ;;  %v1242_v9 = vunpack.c.l.s8.bf16 %v580_v39  ;;  %v14867_v30 = vcombine.low %v1002_v42, %v1082_v6  ;;  %v780_v42 = vld [vmem:[%s16913_s21 + $0xab0] sm:$0xff] }
 0x32d   : > { %v12855_v1 = vadd.f32 %v12214_v26, %v11855_v25  ;;  %v12857_v19 = vadd.f32 %v12222_v28, %v11857_v41  ;;  %v8788_v20 = vpop.f32.mrb[55].mxu0  ;;  %v8829_v61 = vpop.f32.mrb[55].mxu1  ;;  %9415 = vmatprep.subr.bf16.mxu0 %v15664_v3  ;;  %9456 = vmatprep.subr.bf16.mxu1 %v15666_v7  ;;  %v660_v26 = vld [vmem:[%s16913_s21 + $0x6f0] sm:$0xff]  ;;  %v13457_v14 = vrot.slane %v13449_v47, %v17188_v56  ;;  %v1642_v33 = vunpack.c.l.s8.bf16 %v780_v42 }
 0x32e   : > { %v12856_v29 = vadd.f32 %v12218_v37, %v11856_v59  ;;  %v12858_v4 = vadd.f32 %v12226_v38, %v11858_v18  ;;  %v14869_v37 = vcombine.low %v1003_v51, %v1083_v10  ;;  %v1322_v38 = vunpack.c.l.s8.bf16 %v620_v13  ;;  %v820_v6 = vld [vmem:[%s16913_s21 + $0xbf0] sm:$0xff]  ;;  %v17877_v20 = vld [vmem:[%s17134_s20 + $0x38] sm:$0xff] }
 0x32f   : > { %v1402_v58 = vunpack.c.l.s8.bf16 %v660_v26  ;;  %v1403_v3 = vunpack.c.h.s8.bf16 %v660_v26  ;;  %v15028_v7 = vcombine.high %v1162_v24, %v1242_v9  ;;  %v15027_v23 = vcombine.low %v1162_v24, %v1242_v9  ;;  %v860_v61 = vld [vmem:[%s16913_s21 + $0xd30] sm:$0xff] }
 0x330   : > { %v13419_v8 = vcombine.low %v12855_v1, %v12856_v29  ;;  %v13420_v22 = vcombine.low %v12857_v19, %v12858_v4  ;;  %9416 = vmatpush1.bf16.msra.mxu0 %v15663_v11  ;;  %9457 = vmatpush1.bf16.msra.mxu1 %v15665_v52  ;;  %v15030_v11 = vcombine.high %v1163_v12, %v1243_v55  ;;  %v700_v52 = vld [vmem:[%s16913_s21 + $0x830] sm:$0xff]  ;;  %v1722_v48 = vunpack.c.l.s8.bf16 %v820_v6 }
 0x331   : > { %15983 = vmatprep.subr.msk.bf16.mxu0 %vm7202_vm0, %v15824_v16  ;;  %15985 = vmatprep.subr.msk.bf16.mxu1 %vm7202_vm0, %v15826_v62  ;;  %v740_v16 = vld [vmem:[%s16913_s21 + $0x970] sm:$0xff]  ;;  %v15029_v17 = vcombine.low %v1163_v12, %v1243_v55  ;;  %v15188_v31 = vcombine.high %v1322_v38, %v1402_v58  ;;  %v15190_v34 = vcombine.high %v1323_v63, %v1403_v3  ;;  %v1482_v47 = vunpack.c.l.s8.bf16 %v700_v52 }
 0x332   : > { %v13441_v28 = vrot.slane %v13419_v8, %v17188_v56  ;;  %v13448_v57 = vrot.slane %v13420_v22, %v17188_v56  ;;  %v1562_v41 = vunpack.c.l.s8.bf16 %v740_v16  ;;  %v1483_v27 = vunpack.c.h.s8.bf16 %v700_v52  ;;  %v900_v62 = vld [vmem:[%s16913_s21 + $0xe70] sm:$0xff] }
 0x333   : > { %v1563_v40 = vunpack.c.h.s8.bf16 %v740_v16  ;;  %v15187_v59 = vcombine.low %v1322_v38, %v1402_v58  ;;  %v15189_v18 = vcombine.low %v1323_v63, %v1403_v3  ;;  %v1643_v51 = vunpack.c.h.s8.bf16 %v780_v42  ;;  %v461_v58 = vld [vmem:[%s16913_s21 + $0xb8] sm:$0xff] }
 0x334   : > { %v13450_v46 = vcombine.low %v13441_v28, %v13448_v57  ;;  %9418 = vmatpush1.bf16.msra.mxu0 %v7456_v2  ;;  %9459 = vmatpush1.bf16.msra.mxu1 %v7462_v5  ;;  %v1723_v10 = vunpack.c.h.s8.bf16 %v820_v6  ;;  %v15348_v1 = vcombine.high %v1482_v47, %v1562_v41  ;;  %v15347_v29 = vcombine.low %v1482_v47, %v1562_v41  ;;  %v17885_v2 = vld [vmem:[%s17147_s22 + $0x38] sm:$0xff] }
 0x335   : > { %9487 = vmatprep.subr.bf16.mxu0 %v14868_v35  ;;  %9528 = vmatprep.subr.bf16.mxu1 %v14870_v45  ;;  %v15350_v19 = vcombine.high %v1483_v27, %v1563_v40  ;;  %v15349_v4 = vcombine.low %v1483_v27, %v1563_v40  ;;  %v11230_v39 = vrot.slane %v17877_v20, %v17130_v50  ;;  %v1802_v22 = vunpack.c.l.s8.bf16 %v860_v61  ;;  %v501_v63 = vld [vmem:[%s16913_s21 + $0x1f8] sm:$0xff] }
 0x336   : > { %v13464_v15 = vrot.slane %v13450_v46, %v17188_v56  ;;  %v15508_v35 = vcombine.high %v1642_v33, %v1722_v48  ;;  %v15510_v8 = vcombine.high %v1643_v51, %v1723_v10  ;;  %v1882_v5 = vunpack.c.l.s8.bf16 %v900_v62 }
 0x337   : > { %15984 = vmatmul.mubr.msk.bf16.vlgmr.msra.gmra.mrb[84].mxu0 %vm7198_vm1, %v16950_v32  ;;  %15986 = vmatmul.mubr.msk.bf16.vlgmr.msra.gmra.mrb[84].mxu1 %vm7198_vm1, %v16950_v32  ;;  %v1803_v45 = vunpack.c.h.s8.bf16 %v860_v61  ;;  %v1883_v13 = vunpack.c.h.s8.bf16 %v900_v62  ;;  %v11238_v24 = vrot.slane %v17877_v20, %v17140_v53  ;;  %v11234_v9 = vrot.slane %v17877_v20, %v17143_v54 }
 0x338   : > { %v13465_v25 = vcombine.low %v13457_v14, %v13464_v15  ;;  %9488 = vmatpush1.bf16.msra.mxu0 %v14867_v30  ;;  %9529 = vmatpush1.bf16.msra.mxu1 %v14869_v37  ;;  %v1962_v12 = vunpack.c.l.s8.bf16 %v940_v21  ;;  %v1963_v55 = vunpack.c.h.s8.bf16 %v940_v21  ;;  %v12230_v26 = vrot.slane %v17885_v2, %v17130_v50 }
 0x339   : > { %9489 = vmatprep.subr.bf16.mxu0 %v15028_v7  ;;  %9530 = vmatprep.subr.bf16.mxu1 %v15030_v11  ;;  %v11242_v28 = vrot.slane %v17877_v20, %v17155_v60  ;;  %v15507_v57 = vcombine.low %v1642_v33, %v1722_v48  ;;  %v15509_v30 = vcombine.low %v1643_v51, %v1723_v10  ;;  %v1004_v41 = vunpack.c.l.s8.bf16 %v461_v58 }
 0x33a   : > { %14129 = vst [vmem:[%s17271_s17 + $0x30] sm:$0xff] %v13465_v25  ;;  %9519 = vmatprep.mubr.bf16.mxu0 %v16605_v0  ;;  %9560 = vmatprep.mubr.bf16.mxu1 %v16605_v0  ;;  %v12238_v37 = vrot.slane %v17885_v2, %v17140_v53  ;;  %v12234_v38 = vrot.slane %v17885_v2, %v17143_v54  ;;  %v1084_v27 = vunpack.c.l.s8.bf16 %v501_v63  ;;  %v1085_v33 = vunpack.c.h.s8.bf16 %v501_v63 }
 0x33b   : > { %v12242_v46 = vrot.slane %v17885_v2, %v17155_v60  ;;  %v15668_v3 = vcombine.high %v1802_v22, %v1882_v5  ;;  %v15670_v7 = vcombine.high %v1803_v45, %v1883_v13  ;;  %v15667_v11 = vcombine.low %v1802_v22, %v1882_v5 }
 0x33c   : > { %9490 = vmatpush1.bf16.msra.mxu0 %v15027_v23  ;;  %9531 = vmatpush1.bf16.msra.mxu1 %v15029_v17  ;;  %v15669_v52 = vcombine.low %v1803_v45, %v1883_v13  ;;  %v15828_v16 = vcombine.high %v1962_v12, %v1962_v12  ;;  %v15827_v23 = vcombine.low %v1962_v12, %v1962_v12  ;;  %v621_v45 = vld [vmem:[%s16913_s21 + $0x5b8] sm:$0xff] }
 0x33d   : > { %9491 = vmatprep.subr.bf16.mxu0 %v15188_v31  ;;  %9532 = vmatprep.subr.bf16.mxu1 %v15190_v34  ;;  %v15829_v17 = vcombine.low %v1963_v55, %v1963_v55 }
 0x33e   : > { %v7468_v21 = vsel %vm7202_vm0, %v15827_v23, 0 }
 0x33f   : > { %v7474_v22 = vsel %vm7202_vm0, %v15829_v17, 0 }
 0x340   : > { %9492 = vmatpush1.bf16.msra.mxu0 %v15187_v59  ;;  %9533 = vmatpush1.bf16.msra.mxu1 %v15189_v18  ;;  %v1005_v18 = vunpack.c.h.s8.bf16 %v461_v58  ;;  %v1325_v58 = vunpack.c.h.s8.bf16 %v621_v45 }
 0x341   : > { %9493 = vmatprep.subr.bf16.mxu0 %v15348_v1  ;;  %9534 = vmatprep.subr.bf16.mxu1 %v15350_v19  ;;  %v15830_v19 = vcombine.high %v1963_v55, %v1963_v55  ;;  %v661_v55 = vld [vmem:[%s16913_s21 + $0x6f8] sm:$0xff] }
 0x342   : > { %v14874_v5 = vcombine.high %v1005_v18, %v1085_v33  ;;  %v1405_v63 = vunpack.c.h.s8.bf16 %v661_v55 }
 0x344   : > { %9494 = vmatpush1.bf16.msra.mxu0 %v15347_v29  ;;  %9535 = vmatpush1.bf16.msra.mxu1 %v15349_v4  ;;  %v541_v29 = vld [vmem:[%s16913_s21 + $0x338] sm:$0xff]  ;;  %v15194_v23 = vcombine.high %v1325_v58, %v1405_v63 }
 0x345   : > { %9495 = vmatprep.subr.bf16.mxu0 %v15508_v35  ;;  %9536 = vmatprep.subr.bf16.mxu1 %v15510_v8  ;;  %v581_v4 = vld [vmem:[%s16913_s21 + $0x478] sm:$0xff]  ;;  %v1164_v13 = vunpack.c.l.s8.bf16 %v541_v29 }
 0x346   : > { %v8865_v14 = vpop.f32.mrb[56].mxu0  ;;  %v8906_v15 = vpop.f32.mrb[56].mxu1  ;;  %v1245_v12 = vunpack.c.h.s8.bf16 %v581_v4 }
 0x347   : > { %v11859_v25 = vmul.f32 %v11230_v39, %v8865_v14  ;;  %v11861_v31 = vmul.f32 %v11238_v24, %v8906_v15  ;;  %v8867_v34 = vpop.f32.mrb[57].mxu0  ;;  %v8908_v47 = vpop.f32.mrb[57].mxu1  ;;  %v14872_v39 = vcombine.high %v1004_v41, %v1084_v27  ;;  %v1244_v24 = vunpack.c.l.s8.bf16 %v581_v4  ;;  %v741_v14 = vld [vmem:[%s16913_s21 + $0x978] sm:$0xff] }
 0x348   : > { %v11860_v40 = vmul.f32 %v11234_v9, %v8867_v34  ;;  %v11862_v42 = vmul.f32 %v11242_v28, %v8908_v47  ;;  %v8869_v6 = vpop.f32.mrb[58].mxu0  ;;  %v8910_v59 = vpop.f32.mrb[58].mxu1  ;;  %9496 = vmatpush1.bf16.msra.mxu0 %v15507_v57  ;;  %9537 = vmatpush1.bf16.msra.mxu1 %v15509_v30  ;;  %v1165_v9 = vunpack.c.h.s8.bf16 %v541_v29  ;;  %v14871_v57 = vcombine.low %v1004_v41, %v1084_v27  ;;  %v781_v47 = vld [vmem:[%s16913_s21 + $0xab8] sm:$0xff] }
 0x349   : > { %v12859_v48 = vadd.f32 %v12230_v26, %v11859_v25  ;;  %v12861_v51 = vadd.f32 %v12238_v37, %v11861_v31  ;;  %v8870_v10 = vpop.f32.mrb[59].mxu0  ;;  %v8911_v1 = vpop.f32.mrb[59].mxu1  ;;  %9497 = vmatprep.subr.bf16.mxu0 %v15668_v3  ;;  %9538 = vmatprep.subr.bf16.mxu1 %v15670_v7  ;;  %v14873_v30 = vcombine.low %v1005_v18, %v1085_v33  ;;  %v1324_v37 = vunpack.c.l.s8.bf16 %v621_v45  ;;  %v821_v41 = vld [vmem:[%s16913_s21 + $0xbf8] sm:$0xff] }
 0x34a   : > { %v12860_v61 = vadd.f32 %v12234_v38, %v11860_v40  ;;  %v12862_v62 = vadd.f32 %v12242_v46, %v11862_v42  ;;  %v1404_v46 = vunpack.c.l.s8.bf16 %v661_v55  ;;  %v15032_v3 = vcombine.high %v1164_v13, %v1244_v24  ;;  %v901_v10 = vld [vmem:[%s16913_s21 + $0xe78] sm:$0xff] }
 0x34b   : > { %v15034_v7 = vcombine.high %v1165_v9, %v1245_v12  ;;  %v15031_v15 = vcombine.low %v1164_v13, %v1244_v24  ;;  %v1564_v25 = vunpack.c.l.s8.bf16 %v741_v14  ;;  %v1565_v34 = vunpack.c.h.s8.bf16 %v741_v14 }
 0x34c   : > { %v13466_v35 = vcombine.low %v12859_v48, %v12860_v61  ;;  %v13467_v8 = vcombine.low %v12861_v51, %v12862_v62  ;;  %9498 = vmatpush1.bf16.msra.mxu0 %v15667_v11  ;;  %9539 = vmatpush1.bf16.msra.mxu1 %v15669_v52  ;;  %v701_v11 = vld [vmem:[%s16913_s21 + $0x838] sm:$0xff]  ;;  %v15033_v52 = vcombine.low %v1165_v9, %v1245_v12  ;;  %v1644_v42 = vunpack.c.l.s8.bf16 %v781_v47 }
 0x34d   : > { %15987 = vmatprep.subr.msk.bf16.mxu0 %vm7202_vm0, %v15828_v16  ;;  %15989 = vmatprep.subr.msk.bf16.mxu1 %vm7202_vm0, %v15830_v19  ;;  %v15192_v16 = vcombine.high %v1324_v37, %v1404_v46  ;;  %v1484_v17 = vunpack.c.l.s8.bf16 %v701_v11  ;;  %v1485_v31 = vunpack.c.h.s8.bf16 %v701_v11  ;;  %v15191_v27 = vcombine.low %v1324_v37, %v1404_v46  ;;  %v861_v51 = vld [vmem:[%s16913_s21 + $0xd38] sm:$0xff]  ;;  %v462_v46 = vld [vmem:[%s16913_s21 + $0xc0] sm:$0xff] }
 0x34e   : > { %v17912_v26 = vrot.slane %v13466_v35, %v17188_v56  ;;  %v17915_v28 = vrot.slane %v13467_v8, %v17188_v56  ;;  %v15193_v40 = vcombine.low %v1325_v58, %v1405_v63  ;;  %v1724_v6 = vunpack.c.l.s8.bf16 %v821_v41  ;;  %v941_v61 = vld [vmem:[%s16913_s21 + $0xfb8] sm:$0x55]  ;;  %v502_v58 = vld [vmem:[%s16913_s21 + $0x200] sm:$0xff] }
 0x34f   : > { %v1645_v59 = vunpack.c.h.s8.bf16 %v781_v47  ;;  %v1725_v18 = vunpack.c.h.s8.bf16 %v821_v41  ;;  %v15352_v33 = vcombine.high %v1484_v17, %v1564_v25  ;;  %v15354_v48 = vcombine.high %v1485_v31, %v1565_v34 }
 0x350   : > { %v13498_v38 = vcombine.low %v17912_v26, %v17915_v28  ;;  %9500 = vmatpush1.bf16.msra.mxu0 %v7468_v21  ;;  %9541 = vmatpush1.bf16.msra.mxu1 %v7474_v22  ;;  %v15351_v1 = vcombine.low %v1484_v17, %v1564_v25  ;;  %v15353_v19 = vcombine.low %v1485_v31, %v1565_v34  ;;  %v1804_v21 = vunpack.c.l.s8.bf16 %v861_v51 }
 0x351   : > { %9569 = vmatprep.subr.bf16.mxu0 %v14872_v39  ;;  %9610 = vmatprep.subr.bf16.mxu1 %v14874_v5  ;;  %v11246_v62 = vrot.slane %v17877_v20, %v17215_v36  ;;  %v15512_v29 = vcombine.high %v1644_v42, %v1724_v6  ;;  %v15514_v4 = vcombine.high %v1645_v59, %v1725_v18  ;;  %v1884_v39 = vunpack.c.l.s8.bf16 %v901_v10 }
 0x352   : > { %v1805_v35 = vunpack.c.h.s8.bf16 %v861_v51  ;;  %v1885_v8 = vunpack.c.h.s8.bf16 %v901_v10  ;;  %v11254_v22 = vrot.slane %v17877_v20, %v17218_v43  ;;  %v11250_v5 = vrot.slane %v17877_v20, %v17221_v44 }
 0x353   : > { %15988 = vmatmul.mubr.msk.bf16.vlgmr.msra.gmra.mrb[88].mxu0 %vm7198_vm1, %v16950_v32  ;;  %15990 = vmatmul.mubr.msk.bf16.vlgmr.msra.gmra.mrb[88].mxu1 %vm7198_vm1, %v16950_v32  ;;  %v1964_v45 = vunpack.c.l.s8.bf16 %v941_v61  ;;  %v1965_v13 = vunpack.c.h.s8.bf16 %v941_v61  ;;  %v12246_v24 = vrot.slane %v17885_v2, %v17215_v36  ;;  %v12254_v9 = vrot.slane %v17885_v2, %v17218_v43  ;;  %v582_v61 = vld [vmem:[%s16913_s21 + $0x480] sm:$0xff] }
 0x354   : > { %9570 = vmatpush1.bf16.msra.mxu0 %v14871_v57  ;;  %9611 = vmatpush1.bf16.msra.mxu1 %v14873_v30  ;;  %v11258_v12 = vrot.slane %v17877_v20, %v17226_v49  ;;  %v15511_v55 = vcombine.low %v1644_v42, %v1724_v6  ;;  %v12250_v57 = vrot.slane %v17885_v2, %v17221_v44  ;;  %v1006_v34 = vunpack.c.l.s8.bf16 %v462_v46 }
 0x355   : > { %9571 = vmatprep.subr.bf16.mxu0 %v15032_v3  ;;  %9612 = vmatprep.subr.bf16.mxu1 %v15034_v7  ;;  %v12258_v30 = vrot.slane %v17885_v2, %v17226_v49  ;;  %v15513_v37 = vcombine.low %v1645_v59, %v1725_v18  ;;  %v15672_v63 = vcombine.high %v1804_v21, %v1884_v39  ;;  %v1086_v2 = vunpack.c.l.s8.bf16 %v502_v58 }
 0x356   : > { %9601 = vmatprep.mubr.bf16.mxu0 %v16605_v0  ;;  %9642 = vmatprep.mubr.bf16.mxu1 %v16605_v0  ;;  %v15674_v3 = vcombine.high %v1805_v35, %v1885_v8  ;;  %v15671_v7 = vcombine.low %v1804_v21, %v1884_v39  ;;  %v15673_v20 = vcombine.low %v1805_v35, %v1885_v8  ;;  %v1007_v42 = vunpack.c.h.s8.bf16 %v462_v46  ;;  %v622_v8 = vld [vmem:[%s16913_s21 + $0x5c0] sm:$0xff] }
 0x357   : > { %v1087_v6 = vunpack.c.h.s8.bf16 %v502_v58  ;;  %v15834_v51 = vcombine.high %v1965_v13, %v1965_v13  ;;  %v1327_v58 = vunpack.c.h.s8.bf16 %v622_v8 }
 0x358   : > { %9572 = vmatpush1.bf16.msra.mxu0 %v15031_v15  ;;  %9613 = vmatpush1.bf16.msra.mxu1 %v15033_v52  ;;  %v15832_v15 = vcombine.high %v1964_v45, %v1964_v45  ;;  %v15831_v52 = vcombine.low %v1964_v45, %v1964_v45 }
 0x359   : > { %9573 = vmatprep.subr.bf16.mxu0 %v15192_v16  ;;  %9614 = vmatprep.subr.bf16.mxu1 %v15194_v23  ;;  %v15833_v16 = vcombine.low %v1965_v13, %v1965_v13  ;;  %v14878_v35 = vcombine.high %v1007_v42, %v1087_v6  ;;  %v1247_v13 = vunpack.c.h.s8.bf16 %v582_v61 }
 0x35b   : > { %v7486_v39 = vsel %vm7202_vm0, %v15833_v16, 0 }
 0x35c   : > { %9574 = vmatpush1.bf16.msra.mxu0 %v15191_v27  ;;  %9615 = vmatpush1.bf16.msra.mxu1 %v15193_v40 }
 0x35d   : > { %9575 = vmatprep.subr.bf16.mxu0 %v15352_v33  ;;  %9616 = vmatprep.subr.bf16.mxu1 %v15354_v48 }
 0x360   : > { %9576 = vmatpush1.bf16.msra.mxu0 %v15351_v1  ;;  %9617 = vmatpush1.bf16.msra.mxu1 %v15353_v19  ;;  %v542_v19 = vld [vmem:[%s16913_s21 + $0x340] sm:$0xff] }
 0x361   : > { %9577 = vmatprep.subr.bf16.mxu0 %v15512_v29  ;;  %9618 = vmatprep.subr.bf16.mxu1 %v15514_v4  ;;  %v14876_v29 = vcombine.high %v1006_v34, %v1086_v2  ;;  %v1167_v45 = vunpack.c.h.s8.bf16 %v542_v19 }
 0x362   : > { %v8947_v11 = vpop.f32.mrb[60].mxu0  ;;  %v8988_v14 = vpop.f32.mrb[60].mxu1 }
 0x363   : > { %v11863_v23 = vmul.f32 %v11246_v62, %v8947_v11  ;;  %v11865_v17 = vmul.f32 %v11254_v22, %v8988_v14  ;;  %v8949_v25 = vpop.f32.mrb[61].mxu0  ;;  %v8990_v31 = vpop.f32.mrb[61].mxu1  ;;  %v7480_v62 = vsel %vm7202_vm0, %v15831_v52, 0  ;;  %v1166_v22 = vunpack.c.l.s8.bf16 %v542_v19  ;;  %v942_v19 = vld [vmem:[%s16913_s21 + $0xfc0] sm:$0x55] }
 0x364   : > { %v11864_v47 = vmul.f32 %v11250_v5, %v8949_v25  ;;  %v11866_v41 = vmul.f32 %v11258_v12, %v8990_v31  ;;  %v8951_v27 = vpop.f32.mrb[62].mxu0  ;;  %v8992_v40 = vpop.f32.mrb[62].mxu1  ;;  %9578 = vmatpush1.bf16.msra.mxu0 %v15511_v55  ;;  %9619 = vmatpush1.bf16.msra.mxu1 %v15513_v37  ;;  %v1246_v5 = vunpack.c.l.s8.bf16 %v582_v61  ;;  %v14875_v55 = vcombine.low %v1006_v34, %v1086_v2  ;;  %v782_v34 = vld [vmem:[%s16913_s21 + $0xac0] sm:$0xff] }
 0x365   : > { %v12863_v59 = vadd.f32 %v12246_v24, %v11863_v23  ;;  %v12865_v18 = vadd.f32 %v12254_v9, %v11865_v17  ;;  %v8952_v33 = vpop.f32.mrb[63].mxu0  ;;  %v8993_v48 = vpop.f32.mrb[63].mxu1  ;;  %9579 = vmatprep.subr.bf16.mxu0 %v15672_v63  ;;  %9620 = vmatprep.subr.bf16.mxu1 %v15674_v3  ;;  %v662_v24 = vld [vmem:[%s16913_s21 + $0x700] sm:$0xff]  ;;  %v13506_v11 = vrot.slane %v13498_v38, %v17188_v56  ;;  %v1646_v27 = vunpack.c.l.s8.bf16 %v782_v34 }
 0x366   : > { %v12864_v10 = vadd.f32 %v12250_v57, %v11864_v47  ;;  %v12866_v1 = vadd.f32 %v12258_v30, %v11866_v41  ;;  %v14877_v57 = vcombine.low %v1007_v42, %v1087_v6  ;;  %v1326_v30 = vunpack.c.l.s8.bf16 %v622_v8  ;;  %v822_v2 = vld [vmem:[%s16913_s21 + $0xc00] sm:$0xff] }
 0x367   : > { %v1406_v46 = vunpack.c.l.s8.bf16 %v662_v24  ;;  %v1407_v63 = vunpack.c.h.s8.bf16 %v662_v24  ;;  %v15036_v3 = vcombine.high %v1166_v22, %v1246_v5  ;;  %v15035_v52 = vcombine.low %v1166_v22, %v1246_v5  ;;  %v17977_v33 = vld [vmem:[%s17134_s20 + $0x40] sm:$0xff] }
 0x368   : > { %v13468_v4 = vcombine.low %v12863_v59, %v12864_v10  ;;  %v13469_v21 = vcombine.low %v12865_v18, %v12866_v1  ;;  %9580 = vmatpush1.bf16.msra.mxu0 %v15671_v7  ;;  %9621 = vmatpush1.bf16.msra.mxu1 %v15673_v20  ;;  %v15038_v7 = vcombine.high %v1167_v45, %v1247_v13  ;;  %v702_v20 = vld [vmem:[%s16913_s21 + $0x840] sm:$0xff]  ;;  %v1726_v40 = vunpack.c.l.s8.bf16 %v822_v2 }
 0x369   : > { %15991 = vmatprep.subr.msk.bf16.mxu0 %vm7202_vm0, %v15832_v15  ;;  %15993 = vmatprep.subr.msk.bf16.mxu1 %vm7202_vm0, %v15834_v51  ;;  %v742_v15 = vld [vmem:[%s16913_s21 + $0x980] sm:$0xff]  ;;  %v15037_v16 = vcombine.low %v1167_v45, %v1247_v13  ;;  %v15196_v26 = vcombine.high %v1326_v30, %v1406_v46  ;;  %v15198_v28 = vcombine.high %v1327_v58, %v1407_v63  ;;  %v1486_v38 = vunpack.c.l.s8.bf16 %v702_v20 }
 0x36a   : > { %v13490_v9 = vrot.slane %v13468_v4, %v17188_v56  ;;  %v13497_v12 = vrot.slane %v13469_v21, %v17188_v56  ;;  %v1566_v17 = vunpack.c.l.s8.bf16 %v742_v15  ;;  %v1487_v25 = vunpack.c.h.s8.bf16 %v702_v20  ;;  %v862_v48 = vld [vmem:[%s16913_s21 + $0xd40] sm:$0xff] }
 0x36b   : > { %v1567_v31 = vunpack.c.h.s8.bf16 %v742_v15  ;;  %v15195_v47 = vcombine.low %v1326_v30, %v1406_v46  ;;  %v15197_v41 = vcombine.low %v1327_v58, %v1407_v63  ;;  %v1647_v42 = vunpack.c.h.s8.bf16 %v782_v34  ;;  %v902_v51 = vld [vmem:[%s16913_s21 + $0xe80] sm:$0xff]  ;;  %v463_v46 = vld [vmem:[%s16913_s21 + $0xc8] sm:$0xff] }
 0x36c   : > { %v13499_v37 = vcombine.low %v13490_v9, %v13497_v12  ;;  %9582 = vmatpush1.bf16.msra.mxu0 %v7480_v62  ;;  %9623 = vmatpush1.bf16.msra.mxu1 %v7486_v39  ;;  %v1727_v6 = vunpack.c.h.s8.bf16 %v822_v2  ;;  %v15356_v59 = vcombine.high %v1486_v38, %v1566_v17  ;;  %v15355_v10 = vcombine.low %v1486_v38, %v1566_v17  ;;  %v17985_v62 = vld [vmem:[%s17147_s22 + $0x40] sm:$0xff]  ;;  %v503_v58 = vld [vmem:[%s16913_s21 + $0x208] sm:$0xff] }
 0x36d   : > { %9651 = vmatprep.subr.bf16.mxu0 %v14876_v29  ;;  %9692 = vmatprep.subr.bf16.mxu1 %v14878_v35  ;;  %v15358_v18 = vcombine.high %v1487_v25, %v1567_v31  ;;  %v15357_v1 = vcombine.low %v1487_v25, %v1567_v31  ;;  %v11262_v61 = vrot.slane %v17977_v33, %v17130_v50  ;;  %v1806_v21 = vunpack.c.l.s8.bf16 %v862_v48 }
 0x36e   : > { %v13513_v14 = vrot.slane %v13499_v37, %v17188_v56  ;;  %v15516_v29 = vcombine.high %v1646_v27, %v1726_v40  ;;  %v15518_v4 = vcombine.high %v1647_v42, %v1727_v6  ;;  %v1886_v39 = vunpack.c.l.s8.bf16 %v902_v51 }
 0x36f   : > { %15992 = vmatmul.mubr.msk.bf16.vlgmr.msra.gmra.mrb[92].mxu0 %vm7198_vm1, %v16950_v32  ;;  %15994 = vmatmul.mubr.msk.bf16.vlgmr.msra.gmra.mrb[92].mxu1 %vm7198_vm1, %v16950_v32  ;;  %v1807_v35 = vunpack.c.h.s8.bf16 %v862_v48  ;;  %v1887_v8 = vunpack.c.h.s8.bf16 %v902_v51  ;;  %v11270_v22 = vrot.slane %v17977_v33, %v17140_v53  ;;  %v11266_v5 = vrot.slane %v17977_v33, %v17143_v54 }
 0x370   : > { %v13514_v23 = vcombine.low %v13506_v11, %v13513_v14  ;;  %9652 = vmatpush1.bf16.msra.mxu0 %v14875_v55  ;;  %9693 = vmatpush1.bf16.msra.mxu1 %v14877_v57  ;;  %v1966_v45 = vunpack.c.l.s8.bf16 %v942_v19  ;;  %v1967_v13 = vunpack.c.h.s8.bf16 %v942_v19  ;;  %v12262_v24 = vrot.slane %v17985_v62, %v17130_v50 }
 0x371   : > { %9653 = vmatprep.subr.bf16.mxu0 %v15036_v3  ;;  %9694 = vmatprep.subr.bf16.mxu1 %v15038_v7  ;;  %v11274_v9 = vrot.slane %v17977_v33, %v17155_v60  ;;  %v15515_v12 = vcombine.low %v1646_v27, %v1726_v40  ;;  %v15517_v55 = vcombine.low %v1647_v42, %v1727_v6  ;;  %v1008_v17 = vunpack.c.l.s8.bf16 %v463_v46 }
 0x372   : > { %14130 = vst [vmem:[%s17271_s17 + $0x38] sm:$0xff] %v13514_v23  ;;  %9683 = vmatprep.mubr.bf16.mxu0 %v16605_v0  ;;  %9724 = vmatprep.mubr.bf16.mxu1 %v16605_v0  ;;  %v12270_v57 = vrot.slane %v17985_v62, %v17140_v53  ;;  %v12266_v30 = vrot.slane %v17985_v62, %v17143_v54  ;;  %v1088_v25 = vunpack.c.l.s8.bf16 %v503_v58  ;;  %v1089_v27 = vunpack.c.h.s8.bf16 %v503_v58 }
 0x373   : > { %v12274_v37 = vrot.slane %v17985_v62, %v17155_v60  ;;  %v15676_v63 = vcombine.high %v1806_v21, %v1886_v39  ;;  %v15678_v3 = vcombine.high %v1807_v35, %v1887_v8  ;;  %v15675_v7 = vcombine.low %v1806_v21, %v1886_v39 }
 0x374   : > { %9654 = vmatpush1.bf16.msra.mxu0 %v15035_v52  ;;  %9695 = vmatpush1.bf16.msra.mxu1 %v15037_v16  ;;  %v15677_v20 = vcombine.low %v1807_v35, %v1887_v8  ;;  %v15836_v15 = vcombine.high %v1966_v45, %v1966_v45  ;;  %v15835_v52 = vcombine.low %v1966_v45, %v1966_v45  ;;  %v623_v35 = vld [vmem:[%s16913_s21 + $0x5c8] sm:$0xff] }
 0x375   : > { %9655 = vmatprep.subr.bf16.mxu0 %v15196_v26  ;;  %9696 = vmatprep.subr.bf16.mxu1 %v15198_v28  ;;  %v15837_v16 = vcombine.low %v1967_v13, %v1967_v13 }
 0x376   : > { %v7492_v19 = vsel %vm7202_vm0, %v15835_v52, 0 }
 0x377   : > { %v7498_v21 = vsel %vm7202_vm0, %v15837_v16, 0 }
 0x378   : > { %9656 = vmatpush1.bf16.msra.mxu0 %v15195_v47  ;;  %9697 = vmatpush1.bf16.msra.mxu1 %v15197_v41  ;;  %v1009_v41 = vunpack.c.h.s8.bf16 %v463_v46  ;;  %v1329_v46 = vunpack.c.h.s8.bf16 %v623_v35 }
 0x379   : > { %9657 = vmatprep.subr.bf16.mxu0 %v15356_v59  ;;  %9698 = vmatprep.subr.bf16.mxu1 %v15358_v18  ;;  %v15838_v18 = vcombine.high %v1967_v13, %v1967_v13  ;;  %v663_v13 = vld [vmem:[%s16913_s21 + $0x708] sm:$0xff] }
 0x37a   : > { %v14882_v39 = vcombine.high %v1009_v41, %v1089_v27  ;;  %v1409_v58 = vunpack.c.h.s8.bf16 %v663_v13 }
 0x37c   : > { %9658 = vmatpush1.bf16.msra.mxu0 %v15355_v10  ;;  %9699 = vmatpush1.bf16.msra.mxu1 %v15357_v1  ;;  %v543_v10 = vld [vmem:[%s16913_s21 + $0x348] sm:$0xff]  ;;  %v15202_v52 = vcombine.high %v1329_v46, %v1409_v58 }
 0x37d   : > { %9659 = vmatprep.subr.bf16.mxu0 %v15516_v29  ;;  %9700 = vmatprep.subr.bf16.mxu1 %v15518_v4  ;;  %v583_v1 = vld [vmem:[%s16913_s21 + $0x488] sm:$0xff]  ;;  %v1168_v8 = vunpack.c.l.s8.bf16 %v543_v10 }
 0x37e   : > { %v9029_v11 = vpop.f32.mrb[64].mxu0  ;;  %v9070_v14 = vpop.f32.mrb[64].mxu1  ;;  %v1249_v45 = vunpack.c.h.s8.bf16 %v583_v1 }
 0x37f   : > { %v11867_v23 = vmul.f32 %v11262_v61, %v9029_v11  ;;  %v11869_v26 = vmul.f32 %v11270_v22, %v9070_v14  ;;  %v9031_v28 = vpop.f32.mrb[65].mxu0  ;;  %v9072_v38 = vpop.f32.mrb[65].mxu1  ;;  %v14880_v61 = vcombine.high %v1008_v17, %v1088_v25  ;;  %v1248_v22 = vunpack.c.l.s8.bf16 %v583_v1  ;;  %v743_v11 = vld [vmem:[%s16913_s21 + $0x988] sm:$0xff] }
 0x380   : > { %v11868_v31 = vmul.f32 %v11266_v5, %v9031_v28  ;;  %v11870_v34 = vmul.f32 %v11274_v9, %v9072_v38  ;;  %v9033_v2 = vpop.f32.mrb[66].mxu0  ;;  %v9074_v47 = vpop.f32.mrb[66].mxu1  ;;  %9660 = vmatpush1.bf16.msra.mxu0 %v15515_v12  ;;  %9701 = vmatpush1.bf16.msra.mxu1 %v15517_v55  ;;  %v1169_v5 = vunpack.c.h.s8.bf16 %v543_v10  ;;  %v14879_v12 = vcombine.low %v1008_v17, %v1088_v25  ;;  %v783_v38 = vld [vmem:[%s16913_s21 + $0xac8] sm:$0xff] }
 0x381   : > { %v12867_v40 = vadd.f32 %v12262_v24, %v11867_v23  ;;  %v12869_v42 = vadd.f32 %v12270_v57, %v11869_v26  ;;  %v9034_v6 = vpop.f32.mrb[67].mxu0  ;;  %v9075_v59 = vpop.f32.mrb[67].mxu1  ;;  %9661 = vmatprep.subr.bf16.mxu0 %v15676_v63  ;;  %9702 = vmatprep.subr.bf16.mxu1 %v15678_v3  ;;  %v14881_v55 = vcombine.low %v1009_v41, %v1089_v27  ;;  %v1328_v57 = vunpack.c.l.s8.bf16 %v623_v35  ;;  %v823_v17 = vld [vmem:[%s16913_s21 + $0xc08] sm:$0xff] }
 0x382   : > { %v12868_v48 = vadd.f32 %v12266_v30, %v11868_v31  ;;  %v12870_v51 = vadd.f32 %v12274_v37, %v11870_v34  ;;  %v1408_v37 = vunpack.c.l.s8.bf16 %v663_v13  ;;  %v15040_v63 = vcombine.high %v1168_v8, %v1248_v22  ;;  %v903_v6 = vld [vmem:[%s16913_s21 + $0xe88] sm:$0xff] }
 0x383   : > { %v15042_v3 = vcombine.high %v1169_v5, %v1249_v45  ;;  %v15039_v14 = vcombine.low %v1168_v8, %v1248_v22  ;;  %v1568_v23 = vunpack.c.l.s8.bf16 %v743_v11  ;;  %v1569_v28 = vunpack.c.h.s8.bf16 %v743_v11 }
 0x384   : > { %v13515_v29 = vcombine.low %v12867_v40, %v12868_v48  ;;  %v13516_v4 = vcombine.low %v12869_v42, %v12870_v51  ;;  %9662 = vmatpush1.bf16.msra.mxu0 %v15675_v7  ;;  %9703 = vmatpush1.bf16.msra.mxu1 %v15677_v20  ;;  %v703_v7 = vld [vmem:[%s16913_s21 + $0x848] sm:$0xff]  ;;  %v15041_v20 = vcombine.low %v1169_v5, %v1249_v45  ;;  %v1648_v34 = vunpack.c.l.s8.bf16 %v783_v38 }
 0x385   : > { %15995 = vmatprep.subr.msk.bf16.mxu0 %vm7202_vm0, %v15836_v15  ;;  %15997 = vmatprep.subr.msk.bf16.mxu1 %vm7202_vm0, %v15838_v18  ;;  %v15200_v15 = vcombine.high %v1328_v57, %v1408_v37  ;;  %v1488_v16 = vunpack.c.l.s8.bf16 %v703_v7  ;;  %v1489_v26 = vunpack.c.h.s8.bf16 %v703_v7  ;;  %v15199_v25 = vcombine.low %v1328_v57, %v1408_v37  ;;  %v863_v42 = vld [vmem:[%s16913_s21 + $0xd48] sm:$0xff]  ;;  %v464_v37 = vld [vmem:[%s16913_s21 + $0xd0] sm:$0xff] }
 0x386   : > { %v18012_v24 = vrot.slane %v13515_v29, %v17188_v56  ;;  %v18015_v9 = vrot.slane %v13516_v4, %v17188_v56  ;;  %v15201_v31 = vcombine.low %v1329_v46, %v1409_v58  ;;  %v1728_v2 = vunpack.c.l.s8.bf16 %v823_v17  ;;  %v943_v48 = vld [vmem:[%s16913_s21 + $0xfc8] sm:$0x55]  ;;  %v504_v46 = vld [vmem:[%s16913_s21 + $0x210] sm:$0xff] }
 0x387   : > { %v1649_v47 = vunpack.c.h.s8.bf16 %v783_v38  ;;  %v1729_v41 = vunpack.c.h.s8.bf16 %v823_v17  ;;  %v15360_v27 = vcombine.high %v1488_v16, %v1568_v23  ;;  %v15362_v40 = vcombine.high %v1489_v26, %v1569_v28 }
 0x388   : > { %v13547_v30 = vcombine.low %v18012_v24, %v18015_v9  ;;  %9664 = vmatpush1.bf16.msra.mxu0 %v7492_v19  ;;  %9705 = vmatpush1.bf16.msra.mxu1 %v7498_v21  ;;  %v15359_v59 = vcombine.low %v1488_v16, %v1568_v23  ;;  %v15361_v18 = vcombine.low %v1489_v26, %v1569_v28  ;;  %v1808_v19 = vunpack.c.l.s8.bf16 %v863_v42 }
 0x389   : > { %9733 = vmatprep.subr.bf16.mxu0 %v14880_v61  ;;  %9774 = vmatprep.subr.bf16.mxu1 %v14882_v39  ;;  %v11278_v51 = vrot.slane %v17977_v33, %v17215_v36  ;;  %v15520_v10 = vcombine.high %v1648_v34, %v1728_v2  ;;  %v15522_v1 = vcombine.high %v1649_v47, %v1729_v41  ;;  %v1888_v61 = vunpack.c.l.s8.bf16 %v903_v6 }
 0x38a   : > { %v1809_v29 = vunpack.c.h.s8.bf16 %v863_v42  ;;  %v1889_v4 = vunpack.c.h.s8.bf16 %v903_v6  ;;  %v11286_v21 = vrot.slane %v17977_v33, %v17218_v43  ;;  %v11282_v39 = vrot.slane %v17977_v33, %v17221_v44 }
 0x38b   : > { %15996 = vmatmul.mubr.msk.bf16.vlgmr.msra.gmra.mrb[96].mxu0 %vm7198_vm1, %v16950_v32  ;;  %15998 = vmatmul.mubr.msk.bf16.vlgmr.msra.gmra.mrb[96].mxu1 %vm7198_vm1, %v16950_v32  ;;  %v1968_v35 = vunpack.c.l.s8.bf16 %v943_v48  ;;  %v1969_v8 = vunpack.c.h.s8.bf16 %v943_v48  ;;  %v12278_v22 = vrot.slane %v17985_v62, %v17215_v36  ;;  %v12286_v5 = vrot.slane %v17985_v62, %v17218_v43  ;;  %v584_v48 = vld [vmem:[%s16913_s21 + $0x490] sm:$0xff] }
 0x38c   : > { %9734 = vmatpush1.bf16.msra.mxu0 %v14879_v12  ;;  %9775 = vmatpush1.bf16.msra.mxu1 %v14881_v55  ;;  %v11290_v45 = vrot.slane %v17977_v33, %v17226_v49  ;;  %v15519_v13 = vcombine.low %v1648_v34, %v1728_v2  ;;  %v12282_v12 = vrot.slane %v17985_v62, %v17221_v44  ;;  %v1010_v28 = vunpack.c.l.s8.bf16 %v464_v37 }
 0x38d   : > { %9735 = vmatprep.subr.bf16.mxu0 %v15040_v63  ;;  %9776 = vmatprep.subr.bf16.mxu1 %v15042_v3  ;;  %v12290_v55 = vrot.slane %v17985_v62, %v17226_v49  ;;  %v15521_v57 = vcombine.low %v1649_v47, %v1729_v41  ;;  %v15680_v58 = vcombine.high %v1808_v19, %v1888_v61  ;;  %v1090_v62 = vunpack.c.l.s8.bf16 %v504_v46 }
 0x38e   : > { %9765 = vmatprep.mubr.bf16.mxu0 %v16605_v0  ;;  %9806 = vmatprep.mubr.bf16.mxu1 %v16605_v0  ;;  %v15682_v63 = vcombine.high %v1809_v29, %v1889_v4  ;;  %v15679_v3 = vcombine.low %v1808_v19, %v1888_v61  ;;  %v15681_v33 = vcombine.low %v1809_v29, %v1889_v4  ;;  %v1011_v34 = vunpack.c.h.s8.bf16 %v464_v37  ;;  %v624_v4 = vld [vmem:[%s16913_s21 + $0x5d0] sm:$0xff] }
 0x38f   : > { %v1091_v2 = vunpack.c.h.s8.bf16 %v504_v46  ;;  %v15842_v42 = vcombine.high %v1969_v8, %v1969_v8  ;;  %v1331_v46 = vunpack.c.h.s8.bf16 %v624_v4 }
 0x390   : > { %9736 = vmatpush1.bf16.msra.mxu0 %v15039_v14  ;;  %9777 = vmatpush1.bf16.msra.mxu1 %v15041_v20  ;;  %v15840_v14 = vcombine.high %v1968_v35, %v1968_v35  ;;  %v15839_v20 = vcombine.low %v1968_v35, %v1968_v35 }
 0x391   : > { %9737 = vmatprep.subr.bf16.mxu0 %v15200_v15  ;;  %9778 = vmatprep.subr.bf16.mxu1 %v15202_v52  ;;  %v15841_v15 = vcombine.low %v1969_v8, %v1969_v8  ;;  %v14886_v29 = vcombine.high %v1011_v34, %v1091_v2  ;;  %v1251_v8 = vunpack.c.h.s8.bf16 %v584_v48 }
 0x393   : > { %v7510_v61 = vsel %vm7202_vm0, %v15841_v15, 0 }
 0x394   : > { %9738 = vmatpush1.bf16.msra.mxu0 %v15199_v25  ;;  %9779 = vmatpush1.bf16.msra.mxu1 %v15201_v31 }
 0x395   : > { %9739 = vmatprep.subr.bf16.mxu0 %v15360_v27  ;;  %9780 = vmatprep.subr.bf16.mxu1 %v15362_v40 }
 0x398   : > { %9740 = vmatpush1.bf16.msra.mxu0 %v15359_v59  ;;  %9781 = vmatpush1.bf16.msra.mxu1 %v15361_v18  ;;  %v544_v18 = vld [vmem:[%s16913_s21 + $0x350] sm:$0xff] }
 0x399   : > { %9741 = vmatprep.subr.bf16.mxu0 %v15520_v10  ;;  %9782 = vmatprep.subr.bf16.mxu1 %v15522_v1  ;;  %v14884_v10 = vcombine.high %v1010_v28, %v1090_v62  ;;  %v1171_v35 = vunpack.c.h.s8.bf16 %v544_v18 }
 0x39a   : > { %v9111_v7 = vpop.f32.mrb[68].mxu0  ;;  %v9152_v11 = vpop.f32.mrb[68].mxu1 }
 0x39b   : > { %v11871_v52 = vmul.f32 %v11278_v51, %v9111_v7  ;;  %v11873_v16 = vmul.f32 %v11286_v21, %v9152_v11  ;;  %v9113_v23 = vpop.f32.mrb[69].mxu0  ;;  %v9154_v26 = vpop.f32.mrb[69].mxu1  ;;  %v7504_v51 = vsel %vm7202_vm0, %v15839_v20, 0  ;;  %v1170_v21 = vunpack.c.l.s8.bf16 %v544_v18  ;;  %v944_v18 = vld [vmem:[%s16913_s21 + $0xfd0] sm:$0x55] }
 0x39c   : > { %v11872_v38 = vmul.f32 %v11282_v39, %v9113_v23  ;;  %v11874_v17 = vmul.f32 %v11290_v45, %v9154_v26  ;;  %v9115_v25 = vpop.f32.mrb[70].mxu0  ;;  %v9156_v31 = vpop.f32.mrb[70].mxu1  ;;  %9742 = vmatpush1.bf16.msra.mxu0 %v15519_v13  ;;  %9783 = vmatpush1.bf16.msra.mxu1 %v15521_v57  ;;  %v1250_v39 = vunpack.c.l.s8.bf16 %v584_v48  ;;  %v14883_v13 = vcombine.low %v1010_v28, %v1090_v62  ;;  %v784_v28 = vld [vmem:[%s16913_s21 + $0xad0] sm:$0xff] }
 0x39d   : > { %v12871_v47 = vadd.f32 %v12278_v22, %v11871_v52  ;;  %v12873_v41 = vadd.f32 %v12286_v5, %v11873_v16  ;;  %v9116_v27 = vpop.f32.mrb[71].mxu0  ;;  %v9157_v40 = vpop.f32.mrb[71].mxu1  ;;  %9743 = vmatprep.subr.bf16.mxu0 %v15680_v58  ;;  %9784 = vmatprep.subr.bf16.mxu1 %v15682_v63  ;;  %v664_v22 = vld [vmem:[%s16913_s21 + $0x710] sm:$0xff]  ;;  %v13555_v7 = vrot.slane %v13547_v30, %v17188_v56  ;;  %v1650_v25 = vunpack.c.l.s8.bf16 %v784_v28 }
 0x39e   : > { %v12872_v6 = vadd.f32 %v12282_v12, %v11872_v38  ;;  %v12874_v59 = vadd.f32 %v12290_v55, %v11874_v17  ;;  %v14885_v12 = vcombine.low %v1011_v34, %v1091_v2  ;;  %v1330_v55 = vunpack.c.l.s8.bf16 %v624_v4  ;;  %v824_v62 = vld [vmem:[%s16913_s21 + $0xc10] sm:$0xff]  ;;  %v18077_v27 = vld [vmem:[%s17134_s20 + $0x48] sm:$0xff] }
 0x39f   : > { %v1410_v37 = vunpack.c.l.s8.bf16 %v664_v22  ;;  %v1411_v58 = vunpack.c.h.s8.bf16 %v664_v22  ;;  %v15044_v63 = vcombine.high %v1170_v21, %v1250_v39  ;;  %v15043_v20 = vcombine.low %v1170_v21, %v1250_v39  ;;  %v864_v40 = vld [vmem:[%s16913_s21 + $0xd50] sm:$0xff] }
 0x3a0   : > { %v13517_v1 = vcombine.low %v12871_v47, %v12872_v6  ;;  %v13518_v19 = vcombine.low %v12873_v41, %v12874_v59  ;;  %9744 = vmatpush1.bf16.msra.mxu0 %v15679_v3  ;;  %9785 = vmatpush1.bf16.msra.mxu1 %v15681_v33  ;;  %v15046_v3 = vcombine.high %v1171_v35, %v1251_v8  ;;  %v704_v33 = vld [vmem:[%s16913_s21 + $0x850] sm:$0xff]  ;;  %v1730_v31 = vunpack.c.l.s8.bf16 %v824_v62 }
 0x3a1   : > { %15999 = vmatprep.subr.msk.bf16.mxu0 %vm7202_vm0, %v15840_v14  ;;  %16001 = vmatprep.subr.msk.bf16.mxu1 %vm7202_vm0, %v15842_v42  ;;  %v744_v14 = vld [vmem:[%s16913_s21 + $0x990] sm:$0xff]  ;;  %v15045_v15 = vcombine.low %v1171_v35, %v1251_v8  ;;  %v15204_v24 = vcombine.high %v1330_v55, %v1410_v37  ;;  %v15206_v9 = vcombine.high %v1331_v46, %v1411_v58  ;;  %v1490_v30 = vunpack.c.l.s8.bf16 %v704_v33 }
 0x3a2   : > { %v13539_v5 = vrot.slane %v13517_v1, %v17188_v56  ;;  %v13546_v45 = vrot.slane %v13518_v19, %v17188_v56  ;;  %v1570_v16 = vunpack.c.l.s8.bf16 %v744_v14  ;;  %v1491_v23 = vunpack.c.h.s8.bf16 %v704_v33  ;;  %v904_v42 = vld [vmem:[%s16913_s21 + $0xe90] sm:$0xff] }
 0x3a3   : > { %v1571_v26 = vunpack.c.h.s8.bf16 %v744_v14  ;;  %v15203_v38 = vcombine.low %v1330_v55, %v1410_v37  ;;  %v15205_v17 = vcombine.low %v1331_v46, %v1411_v58  ;;  %v1651_v34 = vunpack.c.h.s8.bf16 %v784_v28  ;;  %v465_v37 = vld [vmem:[%s16913_s21 + $0xd8] sm:$0xff] }
 0x3a4   : > { %v13548_v57 = vcombine.low %v13539_v5, %v13546_v45  ;;  %9746 = vmatpush1.bf16.msra.mxu0 %v7504_v51  ;;  %9787 = vmatpush1.bf16.msra.mxu1 %v7510_v61  ;;  %v1731_v2 = vunpack.c.h.s8.bf16 %v824_v62  ;;  %v15364_v47 = vcombine.high %v1490_v30, %v1570_v16  ;;  %v15363_v6 = vcombine.low %v1490_v30, %v1570_v16  ;;  %v18085_v51 = vld [vmem:[%s17147_s22 + $0x48] sm:$0xff]  ;;  %v505_v46 = vld [vmem:[%s16913_s21 + $0x218] sm:$0xff] }
 0x3a5   : > { %9815 = vmatprep.subr.bf16.mxu0 %v14884_v10  ;;  %9856 = vmatprep.subr.bf16.mxu1 %v14886_v29  ;;  %v15366_v41 = vcombine.high %v1491_v23, %v1571_v26  ;;  %v15365_v59 = vcombine.low %v1491_v23, %v1571_v26  ;;  %v11294_v48 = vrot.slane %v18077_v27, %v17130_v50  ;;  %v1810_v19 = vunpack.c.l.s8.bf16 %v864_v40 }
 0x3a6   : > { %v13562_v11 = vrot.slane %v13548_v57, %v17188_v56  ;;  %v15524_v10 = vcombine.high %v1650_v25, %v1730_v31  ;;  %v15526_v1 = vcombine.high %v1651_v34, %v1731_v2  ;;  %v1890_v61 = vunpack.c.l.s8.bf16 %v904_v42 }
 0x3a7   : > { %16000 = vmatmul.mubr.msk.bf16.vlgmr.msra.gmra.mrb[100].mxu0 %vm7198_vm1, %v16950_v32  ;;  %16002 = vmatmul.mubr.msk.bf16.vlgmr.msra.gmra.mrb[100].mxu1 %vm7198_vm1, %v16950_v32  ;;  %v1811_v29 = vunpack.c.h.s8.bf16 %v864_v40  ;;  %v1891_v4 = vunpack.c.h.s8.bf16 %v904_v42  ;;  %v11302_v21 = vrot.slane %v18077_v27, %v17140_v53  ;;  %v11298_v39 = vrot.slane %v18077_v27, %v17143_v54 }
 0x3a8   : > { %v13563_v52 = vcombine.low %v13555_v7, %v13562_v11  ;;  %9816 = vmatpush1.bf16.msra.mxu0 %v14883_v13  ;;  %9857 = vmatpush1.bf16.msra.mxu1 %v14885_v12  ;;  %v1970_v35 = vunpack.c.l.s8.bf16 %v944_v18  ;;  %v1971_v8 = vunpack.c.h.s8.bf16 %v944_v18  ;;  %v12294_v22 = vrot.slane %v18085_v51, %v17130_v50 }
 0x3a9   : > { %9817 = vmatprep.subr.bf16.mxu0 %v15044_v63  ;;  %9858 = vmatprep.subr.bf16.mxu1 %v15046_v3  ;;  %v11306_v5 = vrot.slane %v18077_v27, %v17155_v60  ;;  %v15523_v45 = vcombine.low %v1650_v25, %v1730_v31  ;;  %v15525_v13 = vcombine.low %v1651_v34, %v1731_v2  ;;  %v1012_v16 = vunpack.c.l.s8.bf16 %v465_v37 }
 0x3aa   : > { %14131 = vst [vmem:[%s17271_s17 + $0x40] sm:$0xff] %v13563_v52  ;;  %9847 = vmatprep.mubr.bf16.mxu0 %v16605_v0  ;;  %9888 = vmatprep.mubr.bf16.mxu1 %v16605_v0  ;;  %v12302_v12 = vrot.slane %v18085_v51, %v17140_v53  ;;  %v12298_v55 = vrot.slane %v18085_v51, %v17143_v54  ;;  %v1092_v23 = vunpack.c.l.s8.bf16 %v505_v46  ;;  %v1093_v25 = vunpack.c.h.s8.bf16 %v505_v46 }
 0x3ab   : > { %v12306_v57 = vrot.slane %v18085_v51, %v17155_v60  ;;  %v15684_v58 = vcombine.high %v1810_v19, %v1890_v61  ;;  %v15686_v63 = vcombine.high %v1811_v29, %v1891_v4  ;;  %v15683_v3 = vcombine.low %v1810_v19, %v1890_v61 }
 0x3ac   : > { %9818 = vmatpush1.bf16.msra.mxu0 %v15043_v20  ;;  %9859 = vmatpush1.bf16.msra.mxu1 %v15045_v15  ;;  %v15685_v33 = vcombine.low %v1811_v29, %v1891_v4  ;;  %v15844_v14 = vcombine.high %v1970_v35, %v1970_v35  ;;  %v15843_v20 = vcombine.low %v1970_v35, %v1970_v35  ;;  %v625_v29 = vld [vmem:[%s16913_s21 + $0x5d8] sm:$0xff] }
 0x3ad   : > { %9819 = vmatprep.subr.bf16.mxu0 %v15204_v24  ;;  %9860 = vmatprep.subr.bf16.mxu1 %v15206_v9  ;;  %v15845_v15 = vcombine.low %v1971_v8, %v1971_v8 }
 0x3ae   : > { %v7516_v18 = vsel %vm7202_vm0, %v15843_v20, 0 }
 0x3af   : > { %v7522_v19 = vsel %vm7202_vm0, %v15845_v15, 0 }
 0x3b0   : > { %9820 = vmatpush1.bf16.msra.mxu0 %v15203_v38  ;;  %9861 = vmatpush1.bf16.msra.mxu1 %v15205_v17  ;;  %v1013_v17 = vunpack.c.h.s8.bf16 %v465_v37  ;;  %v1333_v37 = vunpack.c.h.s8.bf16 %v625_v29 }
 0x3b1   : > { %9821 = vmatprep.subr.bf16.mxu0 %v15364_v47  ;;  %9862 = vmatprep.subr.bf16.mxu1 %v15366_v41  ;;  %v15846_v41 = vcombine.high %v1971_v8, %v1971_v8  ;;  %v665_v8 = vld [vmem:[%s16913_s21 + $0x718] sm:$0xff] }
 0x3b2   : > { %v14890_v61 = vcombine.high %v1013_v17, %v1093_v25  ;;  %v1413_v46 = vunpack.c.h.s8.bf16 %v665_v8 }
 0x3b4   : > { %9822 = vmatpush1.bf16.msra.mxu0 %v15363_v6  ;;  %9863 = vmatpush1.bf16.msra.mxu1 %v15365_v59  ;;  %v545_v6 = vld [vmem:[%s16913_s21 + $0x358] sm:$0xff]  ;;  %v15210_v20 = vcombine.high %v1333_v37, %v1413_v46 }
 0x3b5   : > { %9823 = vmatprep.subr.bf16.mxu0 %v15524_v10  ;;  %9864 = vmatprep.subr.bf16.mxu1 %v15526_v1  ;;  %v585_v59 = vld [vmem:[%s16913_s21 + $0x498] sm:$0xff]  ;;  %v1172_v4 = vunpack.c.l.s8.bf16 %v545_v6 }
 0x3b6   : > { %v9193_v7 = vpop.f32.mrb[72].mxu0  ;;  %v9234_v11 = vpop.f32.mrb[72].mxu1  ;;  %v1253_v35 = vunpack.c.h.s8.bf16 %v585_v59 }
 0x3b7   : > { %v11875_v52 = vmul.f32 %v11294_v48, %v9193_v7  ;;  %v11877_v24 = vmul.f32 %v11302_v21, %v9234_v11  ;;  %v9195_v9 = vpop.f32.mrb[73].mxu0  ;;  %v9236_v30 = vpop.f32.mrb[73].mxu1  ;;  %v14888_v48 = vcombine.high %v1012_v16, %v1092_v23  ;;  %v1252_v21 = vunpack.c.l.s8.bf16 %v585_v59  ;;  %v745_v7 = vld [vmem:[%s16913_s21 + $0x998] sm:$0xff] }
 0x3b8   : > { %v11876_v26 = vmul.f32 %v11298_v39, %v9195_v9  ;;  %v11878_v28 = vmul.f32 %v11306_v5, %v9236_v30  ;;  %v9197_v62 = vpop.f32.mrb[74].mxu0  ;;  %v9238_v38 = vpop.f32.mrb[74].mxu1  ;;  %9824 = vmatpush1.bf16.msra.mxu0 %v15523_v45  ;;  %9865 = vmatpush1.bf16.msra.mxu1 %v15525_v13  ;;  %v1173_v39 = vunpack.c.h.s8.bf16 %v545_v6  ;;  %v14887_v45 = vcombine.low %v1012_v16, %v1092_v23  ;;  %v785_v30 = vld [vmem:[%s16913_s21 + $0xad8] sm:$0xff] }
 0x3b9   : > { %v12875_v31 = vadd.f32 %v12294_v22, %v11875_v52  ;;  %v12877_v34 = vadd.f32 %v12302_v12, %v11877_v24  ;;  %v9198_v2 = vpop.f32.mrb[75].mxu0  ;;  %v9239_v47 = vpop.f32.mrb[75].mxu1  ;;  %9825 = vmatprep.subr.bf16.mxu0 %v15684_v58  ;;  %9866 = vmatprep.subr.bf16.mxu1 %v15686_v63  ;;  %v14889_v13 = vcombine.low %v1013_v17, %v1093_v25  ;;  %v1332_v12 = vunpack.c.l.s8.bf16 %v625_v29  ;;  %v825_v16 = vld [vmem:[%s16913_s21 + $0xc18] sm:$0xff] }
 0x3ba   : > { %v12876_v40 = vadd.f32 %v12298_v55, %v11876_v26  ;;  %v12878_v42 = vadd.f32 %v12306_v57, %v11878_v28  ;;  %v1412_v57 = vunpack.c.l.s8.bf16 %v665_v8  ;;  %v15048_v58 = vcombine.high %v1172_v4, %v1252_v21  ;;  %v905_v2 = vld [vmem:[%s16913_s21 + $0xe98] sm:$0xff] }
 0x3bb   : > { %v15050_v63 = vcombine.high %v1173_v39, %v1253_v35  ;;  %v15047_v11 = vcombine.low %v1172_v4, %v1252_v21  ;;  %v1572_v52 = vunpack.c.l.s8.bf16 %v745_v7  ;;  %v1573_v9 = vunpack.c.h.s8.bf16 %v745_v7 }
 0x3bc   : > { %v13564_v10 = vcombine.low %v12875_v31, %v12876_v40  ;;  %v13565_v1 = vcombine.low %v12877_v34, %v12878_v42  ;;  %9826 = vmatpush1.bf16.msra.mxu0 %v15683_v3  ;;  %9867 = vmatpush1.bf16.msra.mxu1 %v15685_v33  ;;  %v705_v3 = vld [vmem:[%s16913_s21 + $0x858] sm:$0xff]  ;;  %v15049_v33 = vcombine.low %v1173_v39, %v1253_v35  ;;  %v1652_v28 = vunpack.c.l.s8.bf16 %v785_v30 }
 0x3bd   : > { %16003 = vmatprep.subr.msk.bf16.mxu0 %vm7202_vm0, %v15844_v14  ;;  %16005 = vmatprep.subr.msk.bf16.mxu1 %vm7202_vm0, %v15846_v41  ;;  %v15208_v14 = vcombine.high %v1332_v12, %v1412_v57  ;;  %v1492_v15 = vunpack.c.l.s8.bf16 %v705_v3  ;;  %v1493_v24 = vunpack.c.h.s8.bf16 %v705_v3  ;;  %v15207_v23 = vcombine.low %v1332_v12, %v1412_v57  ;;  %v865_v34 = vld [vmem:[%s16913_s21 + $0xd58] sm:$0xff]  ;;  %v466_v57 = vld [vmem:[%s16913_s21 + $0xe0] sm:$0xff] }
 0x3be   : > { %v18112_v22 = vrot.slane %v13564_v10, %v17188_v56  ;;  %v18115_v5 = vrot.slane %v13565_v1, %v17188_v56  ;;  %v15209_v26 = vcombine.low %v1333_v37, %v1413_v46  ;;  %v1732_v62 = vunpack.c.l.s8.bf16 %v825_v16  ;;  %v945_v40 = vld [vmem:[%s16913_s21 + $0xfd8] sm:$0x55]  ;;  %v506_v37 = vld [vmem:[%s16913_s21 + $0x220] sm:$0xff] }
 0x3bf   : > { %v1653_v38 = vunpack.c.h.s8.bf16 %v785_v30  ;;  %v1733_v17 = vunpack.c.h.s8.bf16 %v825_v16  ;;  %v15368_v25 = vcombine.high %v1492_v15, %v1572_v52  ;;  %v15370_v31 = vcombine.high %v1493_v24, %v1573_v9 }
 0x3c0   : > { %v13596_v55 = vcombine.low %v18112_v22, %v18115_v5  ;;  %9828 = vmatpush1.bf16.msra.mxu0 %v7516_v18  ;;  %9869 = vmatpush1.bf16.msra.mxu1 %v7522_v19  ;;  %v15367_v47 = vcombine.low %v1492_v15, %v1572_v52  ;;  %v15369_v41 = vcombine.low %v1493_v24, %v1573_v9  ;;  %v1812_v18 = vunpack.c.l.s8.bf16 %v865_v34 }
 0x3c1   : > { %9897 = vmatprep.subr.bf16.mxu0 %v14888_v48  ;;  %9938 = vmatprep.subr.bf16.mxu1 %v14890_v61  ;;  %v11310_v42 = vrot.slane %v18077_v27, %v17215_v36  ;;  %v15528_v6 = vcombine.high %v1652_v28, %v1732_v62  ;;  %v15530_v59 = vcombine.high %v1653_v38, %v1733_v17  ;;  %v1892_v48 = vunpack.c.l.s8.bf16 %v905_v2 }
 0x3c2   : > { %v1813_v10 = vunpack.c.h.s8.bf16 %v865_v34  ;;  %v1893_v1 = vunpack.c.h.s8.bf16 %v905_v2  ;;  %v11318_v19 = vrot.slane %v18077_v27, %v17218_v43  ;;  %v11314_v61 = vrot.slane %v18077_v27, %v17221_v44 }
 0x3c3   : > { %16004 = vmatmul.mubr.msk.bf16.vlgmr.msra.gmra.mrb[104].mxu0 %vm7198_vm1, %v16950_v32  ;;  %16006 = vmatmul.mubr.msk.bf16.vlgmr.msra.gmra.mrb[104].mxu1 %vm7198_vm1, %v16950_v32  ;;  %v1972_v29 = vunpack.c.l.s8.bf16 %v945_v40  ;;  %v1973_v4 = vunpack.c.h.s8.bf16 %v945_v40  ;;  %v12310_v21 = vrot.slane %v18085_v51, %v17215_v36  ;;  %v12318_v39 = vrot.slane %v18085_v51, %v17218_v43  ;;  %v586_v40 = vld [vmem:[%s16913_s21 + $0x4a0] sm:$0xff] }
 0x3c4   : > { %9898 = vmatpush1.bf16.msra.mxu0 %v14887_v45  ;;  %9939 = vmatpush1.bf16.msra.mxu1 %v14889_v13  ;;  %v11322_v35 = vrot.slane %v18077_v27, %v17226_v49  ;;  %v15527_v8 = vcombine.low %v1652_v28, %v1732_v62  ;;  %v12314_v45 = vrot.slane %v18085_v51, %v17221_v44  ;;  %v1014_v9 = vunpack.c.l.s8.bf16 %v466_v57 }
 0x3c5   : > { %9899 = vmatprep.subr.bf16.mxu0 %v15048_v58  ;;  %9940 = vmatprep.subr.bf16.mxu1 %v15050_v63  ;;  %v12322_v13 = vrot.slane %v18085_v51, %v17226_v49  ;;  %v15529_v12 = vcombine.low %v1653_v38, %v1733_v17  ;;  %v15688_v46 = vcombine.high %v1812_v18, %v1892_v48  ;;  %v1094_v51 = vunpack.c.l.s8.bf16 %v506_v37 }
 0x3c6   : > { %9929 = vmatprep.mubr.bf16.mxu0 %v16605_v0  ;;  %9970 = vmatprep.mubr.bf16.mxu1 %v16605_v0  ;;  %v15690_v58 = vcombine.high %v1813_v10, %v1893_v1  ;;  %v15687_v63 = vcombine.low %v1812_v18, %v1892_v48  ;;  %v15689_v27 = vcombine.low %v1813_v10, %v1893_v1  ;;  %v1015_v28 = vunpack.c.h.s8.bf16 %v466_v57  ;;  %v626_v1 = vld [vmem:[%s16913_s21 + $0x5e0] sm:$0xff] }
 0x3c7   : > { %v1095_v62 = vunpack.c.h.s8.bf16 %v506_v37  ;;  %v15850_v34 = vcombine.high %v1973_v4, %v1973_v4  ;;  %v1335_v37 = vunpack.c.h.s8.bf16 %v626_v1 }
 0x3c8   : > { %9900 = vmatpush1.bf16.msra.mxu0 %v15047_v11  ;;  %9941 = vmatpush1.bf16.msra.mxu1 %v15049_v33  ;;  %v15848_v11 = vcombine.high %v1972_v29, %v1972_v29  ;;  %v15847_v33 = vcombine.low %v1972_v29, %v1972_v29 }
 0x3c9   : > { %9901 = vmatprep.subr.bf16.mxu0 %v15208_v14  ;;  %9942 = vmatprep.subr.bf16.mxu1 %v15210_v20  ;;  %v15849_v14 = vcombine.low %v1973_v4, %v1973_v4  ;;  %v14894_v10 = vcombine.high %v1015_v28, %v1095_v62  ;;  %v1255_v4 = vunpack.c.h.s8.bf16 %v586_v40 }
 0x3cb   : > { %v7534_v48 = vsel %vm7202_vm0, %v15849_v14, 0 }
 0x3cc   : > { %9902 = vmatpush1.bf16.msra.mxu0 %v15207_v23  ;;  %9943 = vmatpush1.bf16.msra.mxu1 %v15209_v26 }
 0x3cd   : > { %9903 = vmatprep.subr.bf16.mxu0 %v15368_v25  ;;  %9944 = vmatprep.subr.bf16.mxu1 %v15370_v31 }
 0x3d0   : > { %9904 = vmatpush1.bf16.msra.mxu0 %v15367_v47  ;;  %9945 = vmatpush1.bf16.msra.mxu1 %v15369_v41  ;;  %v546_v41 = vld [vmem:[%s16913_s21 + $0x360] sm:$0xff] }
 0x3d1   : > { %9905 = vmatprep.subr.bf16.mxu0 %v15528_v6  ;;  %9946 = vmatprep.subr.bf16.mxu1 %v15530_v59  ;;  %v14892_v6 = vcombine.high %v1014_v9, %v1094_v51  ;;  %v1175_v29 = vunpack.c.h.s8.bf16 %v546_v41 }
 0x3d2   : > { %v9275_v3 = vpop.f32.mrb[76].mxu0  ;;  %v9316_v7 = vpop.f32.mrb[76].mxu1 }
 0x3d3   : > { %v11879_v20 = vmul.f32 %v11310_v42, %v9275_v3  ;;  %v11881_v15 = vmul.f32 %v11318_v19, %v9316_v7  ;;  %v9277_v52 = vpop.f32.mrb[77].mxu0  ;;  %v9318_v24 = vpop.f32.mrb[77].mxu1  ;;  %v7528_v42 = vsel %vm7202_vm0, %v15847_v33, 0  ;;  %v1174_v19 = vunpack.c.l.s8.bf16 %v546_v41  ;;  %v946_v41 = vld [vmem:[%s16913_s21 + $0xfe0] sm:$0x55] }
 0x3d4   : > { %v11880_v30 = vmul.f32 %v11314_v61, %v9277_v52  ;;  %v11882_v16 = vmul.f32 %v11322_v35, %v9318_v24  ;;  %v9279_v23 = vpop.f32.mrb[78].mxu0  ;;  %v9320_v26 = vpop.f32.mrb[78].mxu1  ;;  %9906 = vmatpush1.bf16.msra.mxu0 %v15527_v8  ;;  %9947 = vmatpush1.bf16.msra.mxu1 %v15529_v12  ;;  %v1254_v61 = vunpack.c.l.s8.bf16 %v586_v40  ;;  %v14891_v8 = vcombine.low %v1014_v9, %v1094_v51  ;;  %v786_v9 = vld [vmem:[%s16913_s21 + $0xae0] sm:$0xff] }
 0x3d5   : > { %v12879_v38 = vadd.f32 %v12310_v21, %v11879_v20  ;;  %v12881_v17 = vadd.f32 %v12318_v39, %v11881_v15  ;;  %v9280_v25 = vpop.f32.mrb[79].mxu0  ;;  %v9321_v31 = vpop.f32.mrb[79].mxu1  ;;  %9907 = vmatprep.subr.bf16.mxu0 %v15688_v46  ;;  %9948 = vmatprep.subr.bf16.mxu1 %v15690_v58  ;;  %v666_v21 = vld [vmem:[%s16913_s21 + $0x720] sm:$0xff]  ;;  %v13604_v3 = vrot.slane %v13596_v55, %v17188_v56  ;;  %v1654_v23 = vunpack.c.l.s8.bf16 %v786_v9 }
 0x3d6   : > { %v12880_v2 = vadd.f32 %v12314_v45, %v11880_v30  ;;  %v12882_v47 = vadd.f32 %v12322_v13, %v11882_v16  ;;  %v14893_v45 = vcombine.low %v1015_v28, %v1095_v62  ;;  %v1334_v13 = vunpack.c.l.s8.bf16 %v626_v1  ;;  %v826_v51 = vld [vmem:[%s16913_s21 + $0xc20] sm:$0xff]  ;;  %v18177_v25 = vld [vmem:[%s17134_s20 + $0x50] sm:$0xff] }
 0x3d7   : > { %v1414_v57 = vunpack.c.l.s8.bf16 %v666_v21  ;;  %v1415_v46 = vunpack.c.h.s8.bf16 %v666_v21  ;;  %v15052_v58 = vcombine.high %v1174_v19, %v1254_v61  ;;  %v15051_v33 = vcombine.low %v1174_v19, %v1254_v61  ;;  %v866_v31 = vld [vmem:[%s16913_s21 + $0xd60] sm:$0xff] }
 0x3d8   : > { %v13566_v59 = vcombine.low %v12879_v38, %v12880_v2  ;;  %v13567_v18 = vcombine.low %v12881_v17, %v12882_v47  ;;  %9908 = vmatpush1.bf16.msra.mxu0 %v15687_v63  ;;  %9949 = vmatpush1.bf16.msra.mxu1 %v15689_v27  ;;  %v15054_v63 = vcombine.high %v1175_v29, %v1255_v4  ;;  %v706_v27 = vld [vmem:[%s16913_s21 + $0x860] sm:$0xff]  ;;  %v1734_v26 = vunpack.c.l.s8.bf16 %v826_v51 }
 0x3d9   : > { %16007 = vmatprep.subr.msk.bf16.mxu0 %vm7202_vm0, %v15848_v11  ;;  %16009 = vmatprep.subr.msk.bf16.mxu1 %vm7202_vm0, %v15850_v34  ;;  %v746_v11 = vld [vmem:[%s16913_s21 + $0x9a0] sm:$0xff]  ;;  %v15053_v14 = vcombine.low %v1175_v29, %v1255_v4  ;;  %v15212_v22 = vcombine.high %v1334_v13, %v1414_v57  ;;  %v15214_v5 = vcombine.high %v1335_v37, %v1415_v46  ;;  %v1494_v55 = vunpack.c.l.s8.bf16 %v706_v27 }
 0x3da   : > { %v13588_v39 = vrot.slane %v13566_v59, %v17188_v56  ;;  %v13595_v35 = vrot.slane %v13567_v18, %v17188_v56  ;;  %v1574_v15 = vunpack.c.l.s8.bf16 %v746_v11  ;;  %v1495_v52 = vunpack.c.h.s8.bf16 %v706_v27  ;;  %v906_v34 = vld [vmem:[%s16913_s21 + $0xea0] sm:$0xff] }
 0x3db   : > { %v1575_v24 = vunpack.c.h.s8.bf16 %v746_v11  ;;  %v15211_v30 = vcombine.low %v1334_v13, %v1414_v57  ;;  %v15213_v16 = vcombine.low %v1335_v37, %v1415_v46  ;;  %v1655_v28 = vunpack.c.h.s8.bf16 %v786_v9  ;;  %v467_v57 = vld [vmem:[%s16913_s21 + $0xe8] sm:$0xff] }
 0x3dc   : > { %v13597_v12 = vcombine.low %v13588_v39, %v13595_v35  ;;  %9910 = vmatpush1.bf16.msra.mxu0 %v7528_v42  ;;  %9951 = vmatpush1.bf16.msra.mxu1 %v7534_v48  ;;  %v1735_v62 = vunpack.c.h.s8.bf16 %v826_v51  ;;  %v15372_v38 = vcombine.high %v1494_v55, %v1574_v15  ;;  %v15371_v2 = vcombine.low %v1494_v55, %v1574_v15  ;;  %v18185_v42 = vld [vmem:[%s17147_s22 + $0x50] sm:$0xff]  ;;  %v507_v37 = vld [vmem:[%s16913_s21 + $0x228] sm:$0xff] }
 0x3dd   : > { %9979 = vmatprep.subr.bf16.mxu0 %v14892_v6  ;;  %10020 = vmatprep.subr.bf16.mxu1 %v14894_v10  ;;  %v15374_v17 = vcombine.high %v1495_v52, %v1575_v24  ;;  %v15373_v47 = vcombine.low %v1495_v52, %v1575_v24  ;;  %v11326_v40 = vrot.slane %v18177_v25, %v17130_v50  ;;  %v1814_v18 = vunpack.c.l.s8.bf16 %v866_v31 }
 0x3de   : > { %v13611_v7 = vrot.slane %v13597_v12, %v17188_v56  ;;  %v15532_v6 = vcombine.high %v1654_v23, %v1734_v26  ;;  %v15534_v59 = vcombine.high %v1655_v28, %v1735_v62  ;;  %v1894_v48 = vunpack.c.l.s8.bf16 %v906_v34 }
 0x3df   : > { %16008 = vmatmul.mubr.msk.bf16.vlgmr.msra.gmra.mrb[108].mxu0 %vm7198_vm1, %v16950_v32  ;;  %16010 = vmatmul.mubr.msk.bf16.vlgmr.msra.gmra.mrb[108].mxu1 %vm7198_vm1, %v16950_v32  ;;  %v1815_v10 = vunpack.c.h.s8.bf16 %v866_v31  ;;  %v1895_v1 = vunpack.c.h.s8.bf16 %v906_v34  ;;  %v11334_v19 = vrot.slane %v18177_v25, %v17140_v53  ;;  %v11330_v61 = vrot.slane %v18177_v25, %v17143_v54 }
 0x3e0   : > { %v13612_v20 = vcombine.low %v13604_v3, %v13611_v7  ;;  %9980 = vmatpush1.bf16.msra.mxu0 %v14891_v8  ;;  %10021 = vmatpush1.bf16.msra.mxu1 %v14893_v45  ;;  %v1974_v29 = vunpack.c.l.s8.bf16 %v946_v41  ;;  %v1975_v4 = vunpack.c.h.s8.bf16 %v946_v41  ;;  %v12326_v21 = vrot.slane %v18185_v42, %v17130_v50 }
 0x3e1   : > { %9981 = vmatprep.subr.bf16.mxu0 %v15052_v58  ;;  %10022 = vmatprep.subr.bf16.mxu1 %v15054_v63  ;;  %v11338_v39 = vrot.slane %v18177_v25, %v17155_v60  ;;  %v15531_v35 = vcombine.low %v1654_v23, %v1734_v26  ;;  %v15533_v8 = vcombine.low %v1655_v28, %v1735_v62  ;;  %v1016_v15 = vunpack.c.l.s8.bf16 %v467_v57 }
 0x3e2   : > { %14132 = vst [vmem:[%s17271_s17 + $0x48] sm:$0xff] %v13612_v20  ;;  %10011 = vmatprep.mubr.bf16.mxu0 %v16605_v0  ;;  %10052 = vmatprep.mubr.bf16.mxu1 %v16605_v0  ;;  %v12334_v45 = vrot.slane %v18185_v42, %v17140_v53  ;;  %v12330_v13 = vrot.slane %v18185_v42, %v17143_v54  ;;  %v1096_v52 = vunpack.c.l.s8.bf16 %v507_v37  ;;  %v1097_v23 = vunpack.c.h.s8.bf16 %v507_v37 }
 0x3e3   : > { %v12338_v12 = vrot.slane %v18185_v42, %v17155_v60  ;;  %v15692_v46 = vcombine.high %v1814_v18, %v1894_v48  ;;  %v15694_v58 = vcombine.high %v1815_v10, %v1895_v1  ;;  %v15691_v63 = vcombine.low %v1814_v18, %v1894_v48 }
 0x3e4   : > { %9982 = vmatpush1.bf16.msra.mxu0 %v15051_v33  ;;  %10023 = vmatpush1.bf16.msra.mxu1 %v15053_v14  ;;  %v15693_v27 = vcombine.low %v1815_v10, %v1895_v1  ;;  %v15852_v11 = vcombine.high %v1974_v29, %v1974_v29  ;;  %v15851_v33 = vcombine.low %v1974_v29, %v1974_v29  ;;  %v627_v10 = vld [vmem:[%s16913_s21 + $0x5e8] sm:$0xff] }
 0x3e5   : > { %9983 = vmatprep.subr.bf16.mxu0 %v15212_v22  ;;  %10024 = vmatprep.subr.bf16.mxu1 %v15214_v5  ;;  %v15853_v14 = vcombine.low %v1975_v4, %v1975_v4 }
 0x3e6   : > { %v7540_v41 = vsel %vm7202_vm0, %v15851_v33, 0 }
 0x3e7   : > { %v7546_v18 = vsel %vm7202_vm0, %v15853_v14, 0 }
 0x3e8   : > { %9984 = vmatpush1.bf16.msra.mxu0 %v15211_v30  ;;  %10025 = vmatpush1.bf16.msra.mxu1 %v15213_v16  ;;  %v1017_v16 = vunpack.c.h.s8.bf16 %v467_v57  ;;  %v1337_v57 = vunpack.c.h.s8.bf16 %v627_v10 }
 0x3e9   : > { %9985 = vmatprep.subr.bf16.mxu0 %v15372_v38  ;;  %10026 = vmatprep.subr.bf16.mxu1 %v15374_v17  ;;  %v15854_v17 = vcombine.high %v1975_v4, %v1975_v4  ;;  %v667_v4 = vld [vmem:[%s16913_s21 + $0x728] sm:$0xff] }
 0x3ea   : > { %v14898_v48 = vcombine.high %v1017_v16, %v1097_v23  ;;  %v1417_v37 = vunpack.c.h.s8.bf16 %v667_v4 }
 0x3ec   : > { %9986 = vmatpush1.bf16.msra.mxu0 %v15371_v2  ;;  %10027 = vmatpush1.bf16.msra.mxu1 %v15373_v47  ;;  %v547_v2 = vld [vmem:[%s16913_s21 + $0x368] sm:$0xff]  ;;  %v15218_v33 = vcombine.high %v1337_v57, %v1417_v37 }
 0x3ed   : > { %9987 = vmatprep.subr.bf16.mxu0 %v15532_v6  ;;  %10028 = vmatprep.subr.bf16.mxu1 %v15534_v59  ;;  %v587_v47 = vld [vmem:[%s16913_s21 + $0x4a8] sm:$0xff]  ;;  %v1176_v1 = vunpack.c.l.s8.bf16 %v547_v2 }
 0x3ee   : > { %v9357_v3 = vpop.f32.mrb[80].mxu0  ;;  %v9398_v7 = vpop.f32.mrb[80].mxu1  ;;  %v1257_v29 = vunpack.c.h.s8.bf16 %v587_v47 }
 0x3ef   : > { %v11883_v20 = vmul.f32 %v11326_v40, %v9357_v3  ;;  %v11885_v22 = vmul.f32 %v11334_v19, %v9398_v7  ;;  %v9359_v5 = vpop.f32.mrb[81].mxu0  ;;  %v9400_v55 = vpop.f32.mrb[81].mxu1  ;;  %v14896_v40 = vcombine.high %v1016_v15, %v1096_v52  ;;  %v1256_v19 = vunpack.c.l.s8.bf16 %v587_v47  ;;  %v747_v3 = vld [vmem:[%s16913_s21 + $0x9a8] sm:$0xff] }
 0x3f0   : > { %v11884_v24 = vmul.f32 %v11330_v61, %v9359_v5  ;;  %v11886_v9 = vmul.f32 %v11338_v39, %v9400_v55  ;;  %v9361_v51 = vpop.f32.mrb[82].mxu0  ;;  %v9402_v30 = vpop.f32.mrb[82].mxu1  ;;  %9988 = vmatpush1.bf16.msra.mxu0 %v15531_v35  ;;  %10029 = vmatpush1.bf16.msra.mxu1 %v15533_v8  ;;  %v1177_v61 = vunpack.c.h.s8.bf16 %v547_v2  ;;  %v14895_v35 = vcombine.low %v1016_v15, %v1096_v52  ;;  %v787_v55 = vld [vmem:[%s16913_s21 + $0xae8] sm:$0xff] }
 0x3f1   : > { %v12883_v26 = vadd.f32 %v12326_v21, %v11883_v20  ;;  %v12885_v28 = vadd.f32 %v12334_v45, %v11885_v22  ;;  %v9362_v62 = vpop.f32.mrb[83].mxu0  ;;  %v9403_v38 = vpop.f32.mrb[83].mxu1  ;;  %9989 = vmatprep.subr.bf16.mxu0 %v15692_v46  ;;  %10030 = vmatprep.subr.bf16.mxu1 %v15694_v58  ;;  %v14897_v8 = vcombine.low %v1017_v16, %v1097_v23  ;;  %v1336_v45 = vunpack.c.l.s8.bf16 %v627_v10  ;;  %v827_v15 = vld [vmem:[%s16913_s21 + $0xc28] sm:$0xff] }
 0x3f2   : > { %v12884_v31 = vadd.f32 %v12330_v13, %v11884_v24  ;;  %v12886_v34 = vadd.f32 %v12338_v12, %v11886_v9  ;;  %v1416_v12 = vunpack.c.l.s8.bf16 %v667_v4  ;;  %v15056_v46 = vcombine.high %v1176_v1, %v1256_v19  ;;  %v907_v62 = vld [vmem:[%s16913_s21 + $0xea8] sm:$0xff] }
 0x3f3   : > { %v15058_v58 = vcombine.high %v1177_v61, %v1257_v29  ;;  %v15055_v7 = vcombine.low %v1176_v1, %v1256_v19  ;;  %v1576_v20 = vunpack.c.l.s8.bf16 %v747_v3  ;;  %v1577_v5 = vunpack.c.h.s8.bf16 %v747_v3 }
 0x3f4   : > { %v13613_v6 = vcombine.low %v12883_v26, %v12884_v31  ;;  %v13614_v59 = vcombine.low %v12885_v28, %v12886_v34  ;;  %9990 = vmatpush1.bf16.msra.mxu0 %v15691_v63  ;;  %10031 = vmatpush1.bf16.msra.mxu1 %v15693_v27  ;;  %v707_v63 = vld [vmem:[%s16913_s21 + $0x868] sm:$0xff]  ;;  %v15057_v27 = vcombine.low %v1177_v61, %v1257_v29  ;;  %v1656_v9 = vunpack.c.l.s8.bf16 %v787_v55 }
 0x3f5   : > { %16011 = vmatprep.subr.msk.bf16.mxu0 %vm7202_vm0, %v15852_v11  ;;  %16013 = vmatprep.subr.msk.bf16.mxu1 %vm7202_vm0, %v15854_v17  ;;  %v15216_v11 = vcombine.high %v1336_v45, %v1416_v12  ;;  %v1496_v14 = vunpack.c.l.s8.bf16 %v707_v63  ;;  %v1497_v22 = vunpack.c.h.s8.bf16 %v707_v63  ;;  %v15215_v52 = vcombine.low %v1336_v45, %v1416_v12  ;;  %v867_v28 = vld [vmem:[%s16913_s21 + $0xd68] sm:$0xff]  ;;  %v468_v12 = vld [vmem:[%s16913_s21 + $0xf0] sm:$0xff] }
 0x3f6   : > { %v18212_v21 = vrot.slane %v13613_v6, %v17188_v56  ;;  %v18215_v39 = vrot.slane %v13614_v59, %v17188_v56  ;;  %v15217_v24 = vcombine.low %v1337_v57, %v1417_v37  ;;  %v1736_v51 = vunpack.c.l.s8.bf16 %v827_v15  ;;  %v947_v31 = vld [vmem:[%s16913_s21 + $0xfe8] sm:$0x55]  ;;  %v508_v57 = vld [vmem:[%s16913_s21 + $0x230] sm:$0xff] }
 0x3f7   : > { %v1657_v30 = vunpack.c.h.s8.bf16 %v787_v55  ;;  %v1737_v16 = vunpack.c.h.s8.bf16 %v827_v15  ;;  %v15376_v23 = vcombine.high %v1496_v14, %v1576_v20  ;;  %v15378_v26 = vcombine.high %v1497_v22, %v1577_v5 }
 0x3f8   : > { %v13645_v13 = vcombine.low %v18212_v21, %v18215_v39  ;;  %9992 = vmatpush1.bf16.msra.mxu0 %v7540_v41  ;;  %10033 = vmatpush1.bf16.msra.mxu1 %v7546_v18  ;;  %v15375_v38 = vcombine.low %v1496_v14, %v1576_v20  ;;  %v15377_v17 = vcombine.low %v1497_v22, %v1577_v5  ;;  %v1816_v41 = vunpack.c.l.s8.bf16 %v867_v28 }
 0x3f9   : > { %10061 = vmatprep.subr.bf16.mxu0 %v14896_v40  ;;  %10102 = vmatprep.subr.bf16.mxu1 %v14898_v48  ;;  %v11342_v34 = vrot.slane %v18177_v25, %v17215_v36  ;;  %v15536_v2 = vcombine.high %v1656_v9, %v1736_v51  ;;  %v15538_v47 = vcombine.high %v1657_v30, %v1737_v16  ;;  %v1896_v40 = vunpack.c.l.s8.bf16 %v907_v62 }
 0x3fa   : > { %v1817_v6 = vunpack.c.h.s8.bf16 %v867_v28  ;;  %v1897_v59 = vunpack.c.h.s8.bf16 %v907_v62  ;;  %v11350_v18 = vrot.slane %v18177_v25, %v17218_v43  ;;  %v11346_v48 = vrot.slane %v18177_v25, %v17221_v44 }
 0x3fb   : > { %16012 = vmatmul.mubr.msk.bf16.vlgmr.msra.gmra.mrb[112].mxu0 %vm7198_vm1, %v16950_v32  ;;  %16014 = vmatmul.mubr.msk.bf16.vlgmr.msra.gmra.mrb[112].mxu1 %vm7198_vm1, %v16950_v32  ;;  %v1976_v10 = vunpack.c.l.s8.bf16 %v947_v31  ;;  %v1977_v1 = vunpack.c.h.s8.bf16 %v947_v31  ;;  %v12342_v19 = vrot.slane %v18185_v42, %v17215_v36  ;;  %v12350_v61 = vrot.slane %v18185_v42, %v17218_v43  ;;  %v588_v31 = vld [vmem:[%s16913_s21 + $0x4b0] sm:$0xff] }
 0x3fc   : > { %10062 = vmatpush1.bf16.msra.mxu0 %v14895_v35  ;;  %10103 = vmatpush1.bf16.msra.mxu1 %v14897_v8  ;;  %v11354_v29 = vrot.slane %v18177_v25, %v17226_v49  ;;  %v15535_v4 = vcombine.low %v1656_v9, %v1736_v51  ;;  %v12346_v35 = vrot.slane %v18185_v42, %v17221_v44  ;;  %v1018_v5 = vunpack.c.l.s8.bf16 %v468_v12 }
 0x3fd   : > { %10063 = vmatprep.subr.bf16.mxu0 %v15056_v46  ;;  %10104 = vmatprep.subr.bf16.mxu1 %v15058_v58  ;;  %v12354_v8 = vrot.slane %v18185_v42, %v17226_v49  ;;  %v15537_v45 = vcombine.low %v1657_v30, %v1737_v16  ;;  %v15696_v37 = vcombine.high %v1816_v41, %v1896_v40  ;;  %v1098_v42 = vunpack.c.l.s8.bf16 %v508_v57 }
 0x3fe   : > { %10093 = vmatprep.mubr.bf16.mxu0 %v16605_v0  ;;  %10134 = vmatprep.mubr.bf16.mxu1 %v16605_v0  ;;  %v15698_v46 = vcombine.high %v1817_v6, %v1897_v59  ;;  %v15695_v58 = vcombine.low %v1816_v41, %v1896_v40  ;;  %v15697_v25 = vcombine.low %v1817_v6, %v1897_v59  ;;  %v1019_v9 = vunpack.c.h.s8.bf16 %v468_v12  ;;  %v628_v59 = vld [vmem:[%s16913_s21 + $0x5f0] sm:$0xff] }
 0x3ff   : > { %v1099_v51 = vunpack.c.h.s8.bf16 %v508_v57  ;;  %v15858_v28 = vcombine.high %v1977_v1, %v1977_v1  ;;  %v1339_v57 = vunpack.c.h.s8.bf16 %v628_v59 }
 0x400   : > { %10064 = vmatpush1.bf16.msra.mxu0 %v15055_v7  ;;  %10105 = vmatpush1.bf16.msra.mxu1 %v15057_v27  ;;  %v15856_v7 = vcombine.high %v1976_v10, %v1976_v10  ;;  %v15855_v27 = vcombine.low %v1976_v10, %v1976_v10 }
 0x401   : > { %10065 = vmatprep.subr.bf16.mxu0 %v15216_v11  ;;  %10106 = vmatprep.subr.bf16.mxu1 %v15218_v33  ;;  %v15857_v11 = vcombine.low %v1977_v1, %v1977_v1  ;;  %v14902_v6 = vcombine.high %v1019_v9, %v1099_v51  ;;  %v1259_v1 = vunpack.c.h.s8.bf16 %v588_v31 }
 0x403   : > { %v7558_v40 = vsel %vm7202_vm0, %v15857_v11, 0 }
 0x404   : > { %10066 = vmatpush1.bf16.msra.mxu0 %v15215_v52  ;;  %10107 = vmatpush1.bf16.msra.mxu1 %v15217_v24 }
 0x405   : > { %10067 = vmatprep.subr.bf16.mxu0 %v15376_v23  ;;  %10108 = vmatprep.subr.bf16.mxu1 %v15378_v26 }
 0x408   : > { %10068 = vmatpush1.bf16.msra.mxu0 %v15375_v38  ;;  %10109 = vmatpush1.bf16.msra.mxu1 %v15377_v17  ;;  %v548_v17 = vld [vmem:[%s16913_s21 + $0x370] sm:$0xff] }
 0x409   : > { %10069 = vmatprep.subr.bf16.mxu0 %v15536_v2  ;;  %10110 = vmatprep.subr.bf16.mxu1 %v15538_v47  ;;  %v14900_v2 = vcombine.high %v1018_v5, %v1098_v42  ;;  %v1179_v10 = vunpack.c.h.s8.bf16 %v548_v17 }
 0x40a   : > { %v9439_v63 = vpop.f32.mrb[84].mxu0  ;;  %v9480_v3 = vpop.f32.mrb[84].mxu1 }
 0x40b   : > { %v11887_v33 = vmul.f32 %v11342_v34, %v9439_v63  ;;  %v11889_v14 = vmul.f32 %v11350_v18, %v9480_v3  ;;  %v9441_v20 = vpop.f32.mrb[85].mxu0  ;;  %v9482_v22 = vpop.f32.mrb[85].mxu1  ;;  %v7552_v34 = vsel %vm7202_vm0, %v15855_v27, 0  ;;  %v1178_v18 = vunpack.c.l.s8.bf16 %v548_v17  ;;  %v948_v17 = vld [vmem:[%s16913_s21 + $0xff0] sm:$0x55] }
 0x40c   : > { %v11888_v55 = vmul.f32 %v11346_v48, %v9441_v20  ;;  %v11890_v15 = vmul.f32 %v11354_v29, %v9482_v22  ;;  %v9443_v52 = vpop.f32.mrb[86].mxu0  ;;  %v9484_v24 = vpop.f32.mrb[86].mxu1  ;;  %10070 = vmatpush1.bf16.msra.mxu0 %v15535_v4  ;;  %10111 = vmatpush1.bf16.msra.mxu1 %v15537_v45  ;;  %v1258_v48 = vunpack.c.l.s8.bf16 %v588_v31  ;;  %v14899_v4 = vcombine.low %v1018_v5, %v1098_v42  ;;  %v788_v5 = vld [vmem:[%s16913_s21 + $0xaf0] sm:$0xff] }
 0x40d   : > { %v12887_v30 = vadd.f32 %v12342_v19, %v11887_v33  ;;  %v12889_v16 = vadd.f32 %v12350_v61, %v11889_v14  ;;  %v9444_v23 = vpop.f32.mrb[87].mxu0  ;;  %v9485_v26 = vpop.f32.mrb[87].mxu1  ;;  %10071 = vmatprep.subr.bf16.mxu0 %v15696_v37  ;;  %10112 = vmatprep.subr.bf16.mxu1 %v15698_v46  ;;  %v668_v19 = vld [vmem:[%s16913_s21 + $0x730] sm:$0xff]  ;;  %v13653_v63 = vrot.slane %v13645_v13, %v17188_v56  ;;  %v1658_v52 = vunpack.c.l.s8.bf16 %v788_v5 }
 0x40e   : > { %v12888_v62 = vadd.f32 %v12346_v35, %v11888_v55  ;;  %v12890_v38 = vadd.f32 %v12354_v8, %v11890_v15  ;;  %v14901_v35 = vcombine.low %v1019_v9, %v1099_v51  ;;  %v1338_v8 = vunpack.c.l.s8.bf16 %v628_v59  ;;  %v828_v42 = vld [vmem:[%s16913_s21 + $0xc30] sm:$0xff]  ;;  %v18277_v23 = vld [vmem:[%s17134_s20 + $0x58] sm:$0xff] }
 0x40f   : > { %v1418_v12 = vunpack.c.l.s8.bf16 %v668_v19  ;;  %v1419_v37 = vunpack.c.h.s8.bf16 %v668_v19  ;;  %v15060_v46 = vcombine.high %v1178_v18, %v1258_v48  ;;  %v15059_v27 = vcombine.low %v1178_v18, %v1258_v48  ;;  %v868_v26 = vld [vmem:[%s16913_s21 + $0xd70] sm:$0xff] }
 0x410   : > { %v13615_v47 = vcombine.low %v12887_v30, %v12888_v62  ;;  %v13616_v41 = vcombine.low %v12889_v16, %v12890_v38  ;;  %10072 = vmatpush1.bf16.msra.mxu0 %v15695_v58  ;;  %10113 = vmatpush1.bf16.msra.mxu1 %v15697_v25  ;;  %v15062_v58 = vcombine.high %v1179_v10, %v1259_v1  ;;  %v708_v25 = vld [vmem:[%s16913_s21 + $0x870] sm:$0xff]  ;;  %v1738_v24 = vunpack.c.l.s8.bf16 %v828_v42 }
 0x411   : > { %16015 = vmatprep.subr.msk.bf16.mxu0 %vm7202_vm0, %v15856_v7  ;;  %16017 = vmatprep.subr.msk.bf16.mxu1 %vm7202_vm0, %v15858_v28  ;;  %v748_v7 = vld [vmem:[%s16913_s21 + $0x9b0] sm:$0xff]  ;;  %v15061_v11 = vcombine.low %v1179_v10, %v1259_v1  ;;  %v15220_v21 = vcombine.high %v1338_v8, %v1418_v12  ;;  %v15222_v39 = vcombine.high %v1339_v57, %v1419_v37  ;;  %v1498_v13 = vunpack.c.l.s8.bf16 %v708_v25 }
 0x412   : > { %v13637_v61 = vrot.slane %v13615_v47, %v17188_v56  ;;  %v13644_v29 = vrot.slane %v13616_v41, %v17188_v56  ;;  %v1578_v14 = vunpack.c.l.s8.bf16 %v748_v7  ;;  %v1499_v20 = vunpack.c.h.s8.bf16 %v708_v25  ;;  %v908_v28 = vld [vmem:[%s16913_s21 + $0xeb0] sm:$0xff] }
 0x413   : > { %v1579_v22 = vunpack.c.h.s8.bf16 %v748_v7  ;;  %v15219_v55 = vcombine.low %v1338_v8, %v1418_v12  ;;  %v15221_v15 = vcombine.low %v1339_v57, %v1419_v37  ;;  %v1659_v9 = vunpack.c.h.s8.bf16 %v788_v5  ;;  %v469_v12 = vld [vmem:[%s16913_s21 + $0xf8] sm:$0xff] }
 0x414   : > { %v13646_v45 = vcombine.low %v13637_v61, %v13644_v29  ;;  %10074 = vmatpush1.bf16.msra.mxu0 %v7552_v34  ;;  %10115 = vmatpush1.bf16.msra.mxu1 %v7558_v40  ;;  %v1739_v51 = vunpack.c.h.s8.bf16 %v828_v42  ;;  %v15380_v30 = vcombine.high %v1498_v13, %v1578_v14  ;;  %v15379_v62 = vcombine.low %v1498_v13, %v1578_v14  ;;  %v18285_v34 = vld [vmem:[%s17147_s22 + $0x58] sm:$0xff] }
 0x415   : > { %10143 = vmatprep.subr.bf16.mxu0 %v14900_v2  ;;  %10184 = vmatprep.subr.bf16.mxu1 %v14902_v6  ;;  %v15382_v16 = vcombine.high %v1499_v20, %v1579_v22  ;;  %v15381_v38 = vcombine.low %v1499_v20, %v1579_v22  ;;  %v11358_v31 = vrot.slane %v18277_v23, %v17130_v50  ;;  %v1818_v41 = vunpack.c.l.s8.bf16 %v868_v26  ;;  %v509_v57 = vld [vmem:[%s16913_s21 + $0x238] sm:$0xff] }
 0x416   : > { %v13660_v3 = vrot.slane %v13646_v45, %v17188_v56  ;;  %v15540_v2 = vcombine.high %v1658_v52, %v1738_v24  ;;  %v15542_v47 = vcombine.high %v1659_v9, %v1739_v51  ;;  %v1898_v40 = vunpack.c.l.s8.bf16 %v908_v28 }
 0x417   : > { %16016 = vmatmul.mubr.msk.bf16.vlgmr.msra.gmra.mrb[116].mxu0 %vm7198_vm1, %v16950_v32  ;;  %16018 = vmatmul.mubr.msk.bf16.vlgmr.msra.gmra.mrb[116].mxu1 %vm7198_vm1, %v16950_v32  ;;  %v1819_v6 = vunpack.c.h.s8.bf16 %v868_v26  ;;  %v1899_v59 = vunpack.c.h.s8.bf16 %v908_v28  ;;  %v11366_v18 = vrot.slane %v18277_v23, %v17140_v53  ;;  %v11362_v48 = vrot.slane %v18277_v23, %v17143_v54 }
 0x418   : > { %v13661_v33 = vcombine.low %v13653_v63, %v13660_v3  ;;  %10144 = vmatpush1.bf16.msra.mxu0 %v14899_v4  ;;  %10185 = vmatpush1.bf16.msra.mxu1 %v14901_v35  ;;  %v1978_v10 = vunpack.c.l.s8.bf16 %v948_v17  ;;  %v1979_v1 = vunpack.c.h.s8.bf16 %v948_v17  ;;  %v12358_v19 = vrot.slane %v18285_v34, %v17130_v50 }
 0x419   : > { %10145 = vmatprep.subr.bf16.mxu0 %v15060_v46  ;;  %10186 = vmatprep.subr.bf16.mxu1 %v15062_v58  ;;  %v11370_v61 = vrot.slane %v18277_v23, %v17155_v60  ;;  %v15539_v29 = vcombine.low %v1658_v52, %v1738_v24  ;;  %v15541_v4 = vcombine.low %v1659_v9, %v1739_v51  ;;  %v1020_v14 = vunpack.c.l.s8.bf16 %v469_v12 }
 0x41a   : > { %14133 = vst [vmem:[%s17271_s17 + $0x50] sm:$0xff] %v13661_v33  ;;  %10175 = vmatprep.mubr.bf16.mxu0 %v16605_v0  ;;  %10216 = vmatprep.mubr.bf16.mxu1 %v16605_v0  ;;  %v12366_v35 = vrot.slane %v18285_v34, %v17140_v53  ;;  %v12362_v8 = vrot.slane %v18285_v34, %v17143_v54  ;;  %v1100_v20 = vunpack.c.l.s8.bf16 %v509_v57  ;;  %v1101_v52 = vunpack.c.h.s8.bf16 %v509_v57 }
 0x41b   : > { %v12370_v45 = vrot.slane %v18285_v34, %v17155_v60  ;;  %v15700_v37 = vcombine.high %v1818_v41, %v1898_v40  ;;  %v15702_v46 = vcombine.high %v1819_v6, %v1899_v59  ;;  %v15699_v58 = vcombine.low %v1818_v41, %v1898_v40 }
 0x41c   : > { %10146 = vmatpush1.bf16.msra.mxu0 %v15059_v27  ;;  %10187 = vmatpush1.bf16.msra.mxu1 %v15061_v11  ;;  %v15701_v25 = vcombine.low %v1819_v6, %v1899_v59  ;;  %v15860_v7 = vcombine.high %v1978_v10, %v1978_v10  ;;  %v15859_v27 = vcombine.low %v1978_v10, %v1978_v10  ;;  %v629_v6 = vld [vmem:[%s16913_s21 + $0x5f8] sm:$0xff] }
 0x41d   : > { %10147 = vmatprep.subr.bf16.mxu0 %v15220_v21  ;;  %10188 = vmatprep.subr.bf16.mxu1 %v15222_v39  ;;  %v15861_v11 = vcombine.low %v1979_v1, %v1979_v1 }
 0x41e   : > { %v7564_v17 = vsel %vm7202_vm0, %v15859_v27, 0 }
 0x41f   : > { %v7570_v41 = vsel %vm7202_vm0, %v15861_v11, 0 }
 0x420   : > { %10148 = vmatpush1.bf16.msra.mxu0 %v15219_v55  ;;  %10189 = vmatpush1.bf16.msra.mxu1 %v15221_v15  ;;  %v1021_v15 = vunpack.c.h.s8.bf16 %v469_v12  ;;  %v1341_v12 = vunpack.c.h.s8.bf16 %v629_v6 }
 0x421   : > { %10149 = vmatprep.subr.bf16.mxu0 %v15380_v30  ;;  %10190 = vmatprep.subr.bf16.mxu1 %v15382_v16  ;;  %v15862_v16 = vcombine.high %v1979_v1, %v1979_v1  ;;  %v669_v1 = vld [vmem:[%s16913_s21 + $0x738] sm:$0xff] }
 0x422   : > { %v14906_v40 = vcombine.high %v1021_v15, %v1101_v52  ;;  %v1421_v57 = vunpack.c.h.s8.bf16 %v669_v1 }
 0x424   : > { %10150 = vmatpush1.bf16.msra.mxu0 %v15379_v62  ;;  %10191 = vmatpush1.bf16.msra.mxu1 %v15381_v38  ;;  %v549_v62 = vld [vmem:[%s16913_s21 + $0x378] sm:$0xff]  ;;  %v15226_v27 = vcombine.high %v1341_v12, %v1421_v57 }
 0x425   : > { %10151 = vmatprep.subr.bf16.mxu0 %v15540_v2  ;;  %10192 = vmatprep.subr.bf16.mxu1 %v15542_v47  ;;  %v589_v38 = vld [vmem:[%s16913_s21 + $0x4b8] sm:$0xff]  ;;  %v1180_v59 = vunpack.c.l.s8.bf16 %v549_v62 }
 0x426   : > { %v9521_v63 = vpop.f32.mrb[88].mxu0  ;;  %v9562_v3 = vpop.f32.mrb[88].mxu1  ;;  %v1261_v10 = vunpack.c.h.s8.bf16 %v589_v38 }
 0x427   : > { %v11891_v33 = vmul.f32 %v11358_v31, %v9521_v63  ;;  %v11893_v21 = vmul.f32 %v11366_v18, %v9562_v3  ;;  %v9523_v39 = vpop.f32.mrb[89].mxu0  ;;  %v9564_v13 = vpop.f32.mrb[89].mxu1  ;;  %v14904_v31 = vcombine.high %v1020_v14, %v1100_v20  ;;  %v1260_v18 = vunpack.c.l.s8.bf16 %v589_v38  ;;  %v749_v63 = vld [vmem:[%s16913_s21 + $0x9b8] sm:$0xff] }
 0x428   : > { %v11892_v22 = vmul.f32 %v11362_v48, %v9523_v39  ;;  %v11894_v5 = vmul.f32 %v11370_v61, %v9564_v13  ;;  %v9525_v42 = vpop.f32.mrb[90].mxu0  ;;  %v9566_v55 = vpop.f32.mrb[90].mxu1  ;;  %10152 = vmatpush1.bf16.msra.mxu0 %v15539_v29  ;;  %10193 = vmatpush1.bf16.msra.mxu1 %v15541_v4  ;;  %v1181_v48 = vunpack.c.h.s8.bf16 %v549_v62  ;;  %v14903_v29 = vcombine.low %v1020_v14, %v1100_v20  ;;  %v789_v13 = vld [vmem:[%s16913_s21 + $0xaf8] sm:$0xff] }
 0x429   : > { %v12891_v24 = vadd.f32 %v12358_v19, %v11891_v33  ;;  %v12893_v9 = vadd.f32 %v12366_v35, %v11893_v21  ;;  %v9526_v51 = vpop.f32.mrb[91].mxu0  ;;  %v9567_v30 = vpop.f32.mrb[91].mxu1  ;;  %10153 = vmatprep.subr.bf16.mxu0 %v15700_v37  ;;  %10194 = vmatprep.subr.bf16.mxu1 %v15702_v46  ;;  %v14905_v4 = vcombine.low %v1021_v15, %v1101_v52  ;;  %v1340_v35 = vunpack.c.l.s8.bf16 %v629_v6  ;;  %v829_v14 = vld [vmem:[%s16913_s21 + $0xc38] sm:$0xff] }
 0x42a   : > { %v12892_v26 = vadd.f32 %v12362_v8, %v11892_v22  ;;  %v12894_v28 = vadd.f32 %v12370_v45, %v11894_v5  ;;  %v1420_v45 = vunpack.c.l.s8.bf16 %v669_v1  ;;  %v15064_v37 = vcombine.high %v1180_v59, %v1260_v18  ;;  %v909_v51 = vld [vmem:[%s16913_s21 + $0xeb8] sm:$0xff] }
 0x42b   : > { %v15066_v46 = vcombine.high %v1181_v48, %v1261_v10  ;;  %v15063_v3 = vcombine.low %v1180_v59, %v1260_v18  ;;  %v1580_v33 = vunpack.c.l.s8.bf16 %v749_v63  ;;  %v1581_v39 = vunpack.c.h.s8.bf16 %v749_v63 }
 0x42c   : > { %v13662_v2 = vcombine.low %v12891_v24, %v12892_v26  ;;  %v13663_v47 = vcombine.low %v12893_v9, %v12894_v28  ;;  %10154 = vmatpush1.bf16.msra.mxu0 %v15699_v58  ;;  %10195 = vmatpush1.bf16.msra.mxu1 %v15701_v25  ;;  %v709_v58 = vld [vmem:[%s16913_s21 + $0x878] sm:$0xff]  ;;  %v15065_v25 = vcombine.low %v1181_v48, %v1261_v10  ;;  %v1660_v5 = vunpack.c.l.s8.bf16 %v789_v13 }
 0x42d   : > { %16019 = vmatprep.subr.msk.bf16.mxu0 %vm7202_vm0, %v15860_v7  ;;  %16021 = vmatprep.subr.msk.bf16.mxu1 %vm7202_vm0, %v15862_v16  ;;  %v15224_v7 = vcombine.high %v1340_v35, %v1420_v45  ;;  %v1500_v11 = vunpack.c.l.s8.bf16 %v709_v58  ;;  %v1501_v21 = vunpack.c.h.s8.bf16 %v709_v58  ;;  %v15223_v20 = vcombine.low %v1340_v35, %v1420_v45  ;;  %v869_v9 = vld [vmem:[%s16913_s21 + $0xd78] sm:$0xff]  ;;  %v470_v45 = vld [vmem:[%s16913_s21 + $0x100] sm:$0xff] }
 0x42e   : > { %v18312_v19 = vrot.slane %v13662_v2, %v17188_v56  ;;  %v18315_v61 = vrot.slane %v13663_v47, %v17188_v56  ;;  %v15225_v22 = vcombine.low %v1341_v12, %v1421_v57  ;;  %v1740_v42 = vunpack.c.l.s8.bf16 %v829_v14  ;;  %v949_v26 = vld [vmem:[%s16913_s21 + $0xff8] sm:$0x55]  ;;  %v510_v12 = vld [vmem:[%s16913_s21 + $0x240] sm:$0xff] }
 0x42f   : > { %v1661_v55 = vunpack.c.h.s8.bf16 %v789_v13  ;;  %v1741_v15 = vunpack.c.h.s8.bf16 %v829_v14  ;;  %v15384_v52 = vcombine.high %v1500_v11, %v1580_v33  ;;  %v15386_v24 = vcombine.high %v1501_v21, %v1581_v39 }
 0x430   : > { %v13694_v8 = vcombine.low %v18312_v19, %v18315_v61  ;;  %10156 = vmatpush1.bf16.msra.mxu0 %v7564_v17  ;;  %10197 = vmatpush1.bf16.msra.mxu1 %v7570_v41  ;;  %v15383_v30 = vcombine.low %v1500_v11, %v1580_v33  ;;  %v15385_v16 = vcombine.low %v1501_v21, %v1581_v39  ;;  %v1820_v17 = vunpack.c.l.s8.bf16 %v869_v9 }
 0x431   : > { %10225 = vmatprep.subr.bf16.mxu0 %v14904_v31  ;;  %10266 = vmatprep.subr.bf16.mxu1 %v14906_v40  ;;  %v11374_v28 = vrot.slane %v18277_v23, %v17215_v36  ;;  %v15544_v62 = vcombine.high %v1660_v5, %v1740_v42  ;;  %v15546_v38 = vcombine.high %v1661_v55, %v1741_v15  ;;  %v1900_v31 = vunpack.c.l.s8.bf16 %v909_v51 }
 0x432   : > { %v1821_v2 = vunpack.c.h.s8.bf16 %v869_v9  ;;  %v1901_v47 = vunpack.c.h.s8.bf16 %v909_v51  ;;  %v11382_v41 = vrot.slane %v18277_v23, %v17218_v43  ;;  %v11378_v40 = vrot.slane %v18277_v23, %v17221_v44 }
 0x433   : > { %16020 = vmatmul.mubr.msk.bf16.vlgmr.msra.gmra.mrb[120].mxu0 %vm7198_vm1, %v16950_v32  ;;  %16022 = vmatmul.mubr.msk.bf16.vlgmr.msra.gmra.mrb[120].mxu1 %vm7198_vm1, %v16950_v32  ;;  %v1980_v6 = vunpack.c.l.s8.bf16 %v949_v26  ;;  %v1981_v59 = vunpack.c.h.s8.bf16 %v949_v26  ;;  %v12374_v18 = vrot.slane %v18285_v34, %v17215_v36  ;;  %v12382_v48 = vrot.slane %v18285_v34, %v17218_v43  ;;  %v590_v26 = vld [vmem:[%s16913_s21 + $0x4c0] sm:$0xff] }
 0x434   : > { %10226 = vmatpush1.bf16.msra.mxu0 %v14903_v29  ;;  %10267 = vmatpush1.bf16.msra.mxu1 %v14905_v4  ;;  %v11386_v10 = vrot.slane %v18277_v23, %v17226_v49  ;;  %v15543_v1 = vcombine.low %v1660_v5, %v1740_v42  ;;  %v12378_v29 = vrot.slane %v18285_v34, %v17221_v44  ;;  %v1022_v39 = vunpack.c.l.s8.bf16 %v470_v45 }
 0x435   : > { %10227 = vmatprep.subr.bf16.mxu0 %v15064_v37  ;;  %10268 = vmatprep.subr.bf16.mxu1 %v15066_v46  ;;  %v12386_v4 = vrot.slane %v18285_v34, %v17226_v49  ;;  %v15545_v35 = vcombine.low %v1661_v55, %v1741_v15  ;;  %v15704_v57 = vcombine.high %v1820_v17, %v1900_v31  ;;  %v1102_v34 = vunpack.c.l.s8.bf16 %v510_v12 }
 0x436   : > { %10257 = vmatprep.mubr.bf16.mxu0 %v16605_v0  ;;  %10298 = vmatprep.mubr.bf16.mxu1 %v16605_v0  ;;  %v15706_v37 = vcombine.high %v1821_v2, %v1901_v47  ;;  %v15703_v46 = vcombine.low %v1820_v17, %v1900_v31  ;;  %v15705_v23 = vcombine.low %v1821_v2, %v1901_v47  ;;  %v1023_v5 = vunpack.c.h.s8.bf16 %v470_v45  ;;  %v630_v47 = vld [vmem:[%s16913_s21 + $0x600] sm:$0xff] }
 0x437   : > { %v1103_v42 = vunpack.c.h.s8.bf16 %v510_v12  ;;  %v15866_v9 = vcombine.high %v1981_v59, %v1981_v59  ;;  %v1343_v12 = vunpack.c.h.s8.bf16 %v630_v47 }
 0x438   : > { %10228 = vmatpush1.bf16.msra.mxu0 %v15063_v3  ;;  %10269 = vmatpush1.bf16.msra.mxu1 %v15065_v25  ;;  %v15864_v3 = vcombine.high %v1980_v6, %v1980_v6  ;;  %v15863_v25 = vcombine.low %v1980_v6, %v1980_v6 }
 0x439   : > { %10229 = vmatprep.subr.bf16.mxu0 %v15224_v7  ;;  %10270 = vmatprep.subr.bf16.mxu1 %v15226_v27  ;;  %v15865_v7 = vcombine.low %v1981_v59, %v1981_v59  ;;  %v14910_v2 = vcombine.high %v1023_v5, %v1103_v42  ;;  %v1263_v59 = vunpack.c.h.s8.bf16 %v590_v26 }
 0x43b   : > { %v7582_v31 = vsel %vm7202_vm0, %v15865_v7, 0 }
 0x43c   : > { %10230 = vmatpush1.bf16.msra.mxu0 %v15223_v20  ;;  %10271 = vmatpush1.bf16.msra.mxu1 %v15225_v22 }
 0x43d   : > { %10231 = vmatprep.subr.bf16.mxu0 %v15384_v52  ;;  %10272 = vmatprep.subr.bf16.mxu1 %v15386_v24 }
 0x440   : > { %10232 = vmatpush1.bf16.msra.mxu0 %v15383_v30  ;;  %10273 = vmatpush1.bf16.msra.mxu1 %v15385_v16  ;;  %v550_v16 = vld [vmem:[%s16913_s21 + $0x380] sm:$0xff] }
 0x441   : > { %10233 = vmatprep.subr.bf16.mxu0 %v15544_v62  ;;  %10274 = vmatprep.subr.bf16.mxu1 %v15546_v38  ;;  %v14908_v62 = vcombine.high %v1022_v39, %v1102_v34  ;;  %v1183_v6 = vunpack.c.h.s8.bf16 %v550_v16 }
 0x442   : > { %v9603_v58 = vpop.f32.mrb[92].mxu0  ;;  %v9644_v63 = vpop.f32.mrb[92].mxu1 }
 0x443   : > { %v11895_v27 = vmul.f32 %v11374_v28, %v9603_v58  ;;  %v11897_v11 = vmul.f32 %v11382_v41, %v9644_v63  ;;  %v9605_v33 = vpop.f32.mrb[93].mxu0  ;;  %v9646_v21 = vpop.f32.mrb[93].mxu1  ;;  %v7576_v28 = vsel %vm7202_vm0, %v15863_v25, 0  ;;  %v1182_v41 = vunpack.c.l.s8.bf16 %v550_v16  ;;  %v950_v16 = vld [vmem:[%s16913_s21 + $0x1000] sm:$0x55] }
 0x444   : > { %v11896_v13 = vmul.f32 %v11378_v40, %v9605_v33  ;;  %v11898_v14 = vmul.f32 %v11386_v10, %v9646_v21  ;;  %v9607_v20 = vpop.f32.mrb[94].mxu0  ;;  %v9648_v22 = vpop.f32.mrb[94].mxu1  ;;  %10234 = vmatpush1.bf16.msra.mxu0 %v15543_v1  ;;  %10275 = vmatpush1.bf16.msra.mxu1 %v15545_v35  ;;  %v1262_v40 = vunpack.c.l.s8.bf16 %v590_v26  ;;  %v14907_v1 = vcombine.low %v1022_v39, %v1102_v34  ;;  %v790_v39 = vld [vmem:[%s16913_s21 + $0xb00] sm:$0xff] }
 0x445   : > { %v12895_v55 = vadd.f32 %v12374_v18, %v11895_v27  ;;  %v12897_v15 = vadd.f32 %v12382_v48, %v11897_v11  ;;  %v9608_v52 = vpop.f32.mrb[95].mxu0  ;;  %v9649_v24 = vpop.f32.mrb[95].mxu1  ;;  %10235 = vmatprep.subr.bf16.mxu0 %v15704_v57  ;;  %10276 = vmatprep.subr.bf16.mxu1 %v15706_v37  ;;  %v670_v18 = vld [vmem:[%s16913_s21 + $0x740] sm:$0xff]  ;;  %v13702_v58 = vrot.slane %v13694_v8, %v17188_v56  ;;  %v1662_v20 = vunpack.c.l.s8.bf16 %v790_v39 }
 0x446   : > { %v12896_v51 = vadd.f32 %v12378_v29, %v11896_v13  ;;  %v12898_v30 = vadd.f32 %v12386_v4, %v11898_v14  ;;  %v14909_v29 = vcombine.low %v1023_v5, %v1103_v42  ;;  %v1342_v4 = vunpack.c.l.s8.bf16 %v630_v47  ;;  %v830_v34 = vld [vmem:[%s16913_s21 + $0xc40] sm:$0xff] }
 0x447   : > { %v1422_v45 = vunpack.c.l.s8.bf16 %v670_v18  ;;  %v1423_v57 = vunpack.c.h.s8.bf16 %v670_v18  ;;  %v15068_v37 = vcombine.high %v1182_v41, %v1262_v40  ;;  %v15067_v25 = vcombine.low %v1182_v41, %v1262_v40  ;;  %v18377_v52 = vld [vmem:[%s17134_s20 + $0x60] sm:$0xff] }
 0x448   : > { %v13664_v38 = vcombine.low %v12895_v55, %v12896_v51  ;;  %v13665_v17 = vcombine.low %v12897_v15, %v12898_v30  ;;  %10236 = vmatpush1.bf16.msra.mxu0 %v15703_v46  ;;  %10277 = vmatpush1.bf16.msra.mxu1 %v15705_v23  ;;  %v15070_v46 = vcombine.high %v1183_v6, %v1263_v59  ;;  %v710_v23 = vld [vmem:[%s16913_s21 + $0x880] sm:$0xff]  ;;  %v1742_v22 = vunpack.c.l.s8.bf16 %v830_v34 }
 0x449   : > { %16023 = vmatprep.subr.msk.bf16.mxu0 %vm7202_vm0, %v15864_v3  ;;  %16025 = vmatprep.subr.msk.bf16.mxu1 %vm7202_vm0, %v15866_v9  ;;  %v750_v3 = vld [vmem:[%s16913_s21 + $0x9c0] sm:$0xff]  ;;  %v15069_v7 = vcombine.low %v1183_v6, %v1263_v59  ;;  %v15228_v19 = vcombine.high %v1342_v4, %v1422_v45  ;;  %v15230_v61 = vcombine.high %v1343_v12, %v1423_v57  ;;  %v1502_v8 = vunpack.c.l.s8.bf16 %v710_v23 }
 0x44a   : > { %v13686_v48 = vrot.slane %v13664_v38, %v17188_v56  ;;  %v13693_v10 = vrot.slane %v13665_v17, %v17188_v56  ;;  %v1582_v11 = vunpack.c.l.s8.bf16 %v750_v3  ;;  %v1503_v33 = vunpack.c.h.s8.bf16 %v710_v23  ;;  %v870_v24 = vld [vmem:[%s16913_s21 + $0xd80] sm:$0xff] }
 0x44b   : > { %v1583_v21 = vunpack.c.h.s8.bf16 %v750_v3  ;;  %v15227_v13 = vcombine.low %v1342_v4, %v1422_v45  ;;  %v15229_v14 = vcombine.low %v1343_v12, %v1423_v57  ;;  %v1663_v5 = vunpack.c.h.s8.bf16 %v790_v39  ;;  %v910_v9 = vld [vmem:[%s16913_s21 + $0xec0] sm:$0xff]  ;;  %v471_v45 = vld [vmem:[%s16913_s21 + $0x108] sm:$0xff] }
 0x44c   : > { %v13695_v35 = vcombine.low %v13686_v48, %v13693_v10  ;;  %10238 = vmatpush1.bf16.msra.mxu0 %v7576_v28  ;;  %10279 = vmatpush1.bf16.msra.mxu1 %v7582_v31  ;;  %v1743_v42 = vunpack.c.h.s8.bf16 %v830_v34  ;;  %v15388_v55 = vcombine.high %v1502_v8, %v1582_v11  ;;  %v15387_v51 = vcombine.low %v1502_v8, %v1582_v11  ;;  %v18385_v28 = vld [vmem:[%s17147_s22 + $0x60] sm:$0xff]  ;;  %v511_v12 = vld [vmem:[%s16913_s21 + $0x248] sm:$0xff] }
 0x44d   : > { %10307 = vmatprep.subr.bf16.mxu0 %v14908_v62  ;;  %10348 = vmatprep.subr.bf16.mxu1 %v14910_v2  ;;  %v15390_v15 = vcombine.high %v1503_v33, %v1583_v21  ;;  %v15389_v30 = vcombine.low %v1503_v33, %v1583_v21  ;;  %v11390_v26 = vrot.slane %v18377_v52, %v17130_v50  ;;  %v1822_v17 = vunpack.c.l.s8.bf16 %v870_v24 }
 0x44e   : > { %v13709_v63 = vrot.slane %v13695_v35, %v17188_v56  ;;  %v15548_v62 = vcombine.high %v1662_v20, %v1742_v22  ;;  %v15550_v38 = vcombine.high %v1663_v5, %v1743_v42  ;;  %v1902_v31 = vunpack.c.l.s8.bf16 %v910_v9 }
 0x44f   : > { %16024 = vmatmul.mubr.msk.bf16.vlgmr.msra.gmra.mrb[124].mxu0 %vm7198_vm1, %v16950_v32  ;;  %16026 = vmatmul.mubr.msk.bf16.vlgmr.msra.gmra.mrb[124].mxu1 %vm7198_vm1, %v16950_v32  ;;  %v1823_v2 = vunpack.c.h.s8.bf16 %v870_v24  ;;  %v1903_v47 = vunpack.c.h.s8.bf16 %v910_v9  ;;  %v11398_v41 = vrot.slane %v18377_v52, %v17140_v53  ;;  %v11394_v40 = vrot.slane %v18377_v52, %v17143_v54 }
 0x450   : > { %v13710_v27 = vcombine.low %v13702_v58, %v13709_v63  ;;  %10308 = vmatpush1.bf16.msra.mxu0 %v14907_v1  ;;  %10349 = vmatpush1.bf16.msra.mxu1 %v14909_v29  ;;  %v1982_v6 = vunpack.c.l.s8.bf16 %v950_v16  ;;  %v1983_v59 = vunpack.c.h.s8.bf16 %v950_v16  ;;  %v12390_v18 = vrot.slane %v18385_v28, %v17130_v50 }
 0x451   : > { %10309 = vmatprep.subr.bf16.mxu0 %v15068_v37  ;;  %10350 = vmatprep.subr.bf16.mxu1 %v15070_v46  ;;  %v11402_v48 = vrot.slane %v18377_v52, %v17155_v60  ;;  %v15547_v10 = vcombine.low %v1662_v20, %v1742_v22  ;;  %v15549_v1 = vcombine.low %v1663_v5, %v1743_v42  ;;  %v1024_v11 = vunpack.c.l.s8.bf16 %v471_v45 }
 0x452   : > { %14134 = vst [vmem:[%s17271_s17 + $0x58] sm:$0xff] %v13710_v27  ;;  %10339 = vmatprep.mubr.bf16.mxu0 %v16605_v0  ;;  %10380 = vmatprep.mubr.bf16.mxu1 %v16605_v0  ;;  %v12398_v29 = vrot.slane %v18385_v28, %v17140_v53  ;;  %v12394_v4 = vrot.slane %v18385_v28, %v17143_v54  ;;  %v1104_v33 = vunpack.c.l.s8.bf16 %v511_v12  ;;  %v1105_v20 = vunpack.c.h.s8.bf16 %v511_v12 }
 0x453   : > { %v12402_v35 = vrot.slane %v18385_v28, %v17155_v60  ;;  %v15708_v57 = vcombine.high %v1822_v17, %v1902_v31  ;;  %v15710_v37 = vcombine.high %v1823_v2, %v1903_v47  ;;  %v15707_v46 = vcombine.low %v1822_v17, %v1902_v31 }
 0x454   : > { %10310 = vmatpush1.bf16.msra.mxu0 %v15067_v25  ;;  %10351 = vmatpush1.bf16.msra.mxu1 %v15069_v7  ;;  %v15709_v23 = vcombine.low %v1823_v2, %v1903_v47  ;;  %v15868_v3 = vcombine.high %v1982_v6, %v1982_v6  ;;  %v15867_v25 = vcombine.low %v1982_v6, %v1982_v6  ;;  %v631_v2 = vld [vmem:[%s16913_s21 + $0x608] sm:$0xff] }
 0x455   : > { %10311 = vmatprep.subr.bf16.mxu0 %v15228_v19  ;;  %10352 = vmatprep.subr.bf16.mxu1 %v15230_v61  ;;  %v15869_v7 = vcombine.low %v1983_v59, %v1983_v59 }
 0x456   : > { %v7588_v16 = vsel %vm7202_vm0, %v15867_v25, 0 }
 0x457   : > { %v7594_v17 = vsel %vm7202_vm0, %v15869_v7, 0 }
 0x458   : > { %10312 = vmatpush1.bf16.msra.mxu0 %v15227_v13  ;;  %10353 = vmatpush1.bf16.msra.mxu1 %v15229_v14  ;;  %v1025_v14 = vunpack.c.h.s8.bf16 %v471_v45  ;;  %v1345_v45 = vunpack.c.h.s8.bf16 %v631_v2 }
 0x459   : > { %10313 = vmatprep.subr.bf16.mxu0 %v15388_v55  ;;  %10354 = vmatprep.subr.bf16.mxu1 %v15390_v15  ;;  %v15870_v15 = vcombine.high %v1983_v59, %v1983_v59  ;;  %v671_v59 = vld [vmem:[%s16913_s21 + $0x748] sm:$0xff] }
 0x45a   : > { %v14914_v31 = vcombine.high %v1025_v14, %v1105_v20  ;;  %v1425_v12 = vunpack.c.h.s8.bf16 %v671_v59 }
 0x45c   : > { %10314 = vmatpush1.bf16.msra.mxu0 %v15387_v51  ;;  %10355 = vmatpush1.bf16.msra.mxu1 %v15389_v30  ;;  %v551_v51 = vld [vmem:[%s16913_s21 + $0x388] sm:$0xff]  ;;  %v15234_v25 = vcombine.high %v1345_v45, %v1425_v12 }
 0x45d   : > { %10315 = vmatprep.subr.bf16.mxu0 %v15548_v62  ;;  %10356 = vmatprep.subr.bf16.mxu1 %v15550_v38  ;;  %v591_v30 = vld [vmem:[%s16913_s21 + $0x4c8] sm:$0xff]  ;;  %v1184_v47 = vunpack.c.l.s8.bf16 %v551_v51 }
 0x45e   : > { %v9685_v58 = vpop.f32.mrb[96].mxu0  ;;  %v9726_v63 = vpop.f32.mrb[96].mxu1  ;;  %v1265_v6 = vunpack.c.h.s8.bf16 %v591_v30 }
 0x45f   : > { %v11899_v27 = vmul.f32 %v11390_v26, %v9685_v58  ;;  %v11901_v19 = vmul.f32 %v11398_v41, %v9726_v63  ;;  %v9687_v61 = vpop.f32.mrb[97].mxu0  ;;  %v9728_v8 = vpop.f32.mrb[97].mxu1  ;;  %v14912_v26 = vcombine.high %v1024_v11, %v1104_v33  ;;  %v1264_v41 = vunpack.c.l.s8.bf16 %v591_v30  ;;  %v751_v58 = vld [vmem:[%s16913_s21 + $0x9c8] sm:$0xff] }
 0x460   : > { %v11900_v21 = vmul.f32 %v11394_v40, %v9687_v61  ;;  %v11902_v39 = vmul.f32 %v11402_v48, %v9728_v8  ;;  %v9689_v34 = vpop.f32.mrb[98].mxu0  ;;  %v9730_v13 = vpop.f32.mrb[98].mxu1  ;;  %10316 = vmatpush1.bf16.msra.mxu0 %v15547_v10  ;;  %10357 = vmatpush1.bf16.msra.mxu1 %v15549_v1  ;;  %v1185_v40 = vunpack.c.h.s8.bf16 %v551_v51  ;;  %v14911_v10 = vcombine.low %v1024_v11, %v1104_v33  ;;  %v791_v8 = vld [vmem:[%s16913_s21 + $0xb08] sm:$0xff] }
 0x461   : > { %v12899_v22 = vadd.f32 %v12390_v18, %v11899_v27  ;;  %v12901_v5 = vadd.f32 %v12398_v29, %v11901_v19  ;;  %v9690_v42 = vpop.f32.mrb[99].mxu0  ;;  %v9731_v55 = vpop.f32.mrb[99].mxu1  ;;  %10317 = vmatprep.subr.bf16.mxu0 %v15708_v57  ;;  %10358 = vmatprep.subr.bf16.mxu1 %v15710_v37  ;;  %v14913_v1 = vcombine.low %v1025_v14, %v1105_v20  ;;  %v1344_v29 = vunpack.c.l.s8.bf16 %v631_v2  ;;  %v831_v11 = vld [vmem:[%s16913_s21 + $0xc48] sm:$0xff] }
 0x462   : > { %v12900_v24 = vadd.f32 %v12394_v4, %v11900_v21  ;;  %v12902_v9 = vadd.f32 %v12402_v35, %v11902_v39  ;;  %v1424_v35 = vunpack.c.l.s8.bf16 %v671_v59  ;;  %v15072_v57 = vcombine.high %v1184_v47, %v1264_v41  ;;  %v911_v42 = vld [vmem:[%s16913_s21 + $0xec8] sm:$0xff] }
 0x463   : > { %v15074_v37 = vcombine.high %v1185_v40, %v1265_v6  ;;  %v15071_v63 = vcombine.low %v1184_v47, %v1264_v41  ;;  %v1584_v27 = vunpack.c.l.s8.bf16 %v751_v58  ;;  %v1585_v61 = vunpack.c.h.s8.bf16 %v751_v58 }
 0x464   : > { %v13711_v62 = vcombine.low %v12899_v22, %v12900_v24  ;;  %v13712_v38 = vcombine.low %v12901_v5, %v12902_v9  ;;  %10318 = vmatpush1.bf16.msra.mxu0 %v15707_v46  ;;  %10359 = vmatpush1.bf16.msra.mxu1 %v15709_v23  ;;  %v711_v46 = vld [vmem:[%s16913_s21 + $0x888] sm:$0xff]  ;;  %v15073_v23 = vcombine.low %v1185_v40, %v1265_v6  ;;  %v1664_v39 = vunpack.c.l.s8.bf16 %v791_v8 }
 0x465   : > { %16027 = vmatprep.subr.msk.bf16.mxu0 %vm7202_vm0, %v15868_v3  ;;  %16029 = vmatprep.subr.msk.bf16.mxu1 %vm7202_vm0, %v15870_v15  ;;  %v15232_v3 = vcombine.high %v1344_v29, %v1424_v35  ;;  %v1504_v7 = vunpack.c.l.s8.bf16 %v711_v46  ;;  %v1505_v19 = vunpack.c.h.s8.bf16 %v711_v46  ;;  %v15231_v33 = vcombine.low %v1344_v29, %v1424_v35  ;;  %v871_v5 = vld [vmem:[%s16913_s21 + $0xd88] sm:$0xff]  ;;  %v472_v35 = vld [vmem:[%s16913_s21 + $0x110] sm:$0xff] }
 0x466   : > { %v18412_v18 = vrot.slane %v13711_v62, %v17188_v56  ;;  %v18415_v48 = vrot.slane %v13712_v38, %v17188_v56  ;;  %v15233_v21 = vcombine.low %v1345_v45, %v1425_v12  ;;  %v1744_v34 = vunpack.c.l.s8.bf16 %v831_v11  ;;  %v951_v24 = vld [vmem:[%s16913_s21 + $0x1008] sm:$0x55]  ;;  %v512_v45 = vld [vmem:[%s16913_s21 + $0x250] sm:$0xff] }
 0x467   : > { %v1665_v13 = vunpack.c.h.s8.bf16 %v791_v8  ;;  %v1745_v14 = vunpack.c.h.s8.bf16 %v831_v11  ;;  %v15392_v20 = vcombine.high %v1504_v7, %v1584_v27  ;;  %v15394_v22 = vcombine.high %v1505_v19, %v1585_v61 }
 0x468   : > { %v13743_v4 = vcombine.low %v18412_v18, %v18415_v48  ;;  %10320 = vmatpush1.bf16.msra.mxu0 %v7588_v16  ;;  %10361 = vmatpush1.bf16.msra.mxu1 %v7594_v17  ;;  %v15391_v55 = vcombine.low %v1504_v7, %v1584_v27  ;;  %v15393_v15 = vcombine.low %v1505_v19, %v1585_v61  ;;  %v1824_v16 = vunpack.c.l.s8.bf16 %v871_v5 }
 0x469   : > { %10389 = vmatprep.subr.bf16.mxu0 %v14912_v26  ;;  %10430 = vmatprep.subr.bf16.mxu1 %v14914_v31  ;;  %v11406_v9 = vrot.slane %v18377_v52, %v17215_v36  ;;  %v15552_v51 = vcombine.high %v1664_v39, %v1744_v34  ;;  %v15554_v30 = vcombine.high %v1665_v13, %v1745_v14  ;;  %v1904_v26 = vunpack.c.l.s8.bf16 %v911_v42 }
 0x46a   : > { %v1825_v62 = vunpack.c.h.s8.bf16 %v871_v5  ;;  %v1905_v38 = vunpack.c.h.s8.bf16 %v911_v42  ;;  %v11414_v17 = vrot.slane %v18377_v52, %v17218_v43  ;;  %v11410_v31 = vrot.slane %v18377_v52, %v17221_v44 }
 0x46b   : > { %16028 = vmatmul.mubr.msk.bf16.vlgmr.msra.gmra.mrb[128].mxu0 %vm7198_vm1, %v16950_v32  ;;  %16030 = vmatmul.mubr.msk.bf16.vlgmr.msra.gmra.mrb[128].mxu1 %vm7198_vm1, %v16950_v32  ;;  %v1984_v2 = vunpack.c.l.s8.bf16 %v951_v24  ;;  %v1985_v47 = vunpack.c.h.s8.bf16 %v951_v24  ;;  %v12406_v41 = vrot.slane %v18385_v28, %v17215_v36  ;;  %v12414_v40 = vrot.slane %v18385_v28, %v17218_v43  ;;  %v592_v24 = vld [vmem:[%s16913_s21 + $0x4d0] sm:$0xff] }
 0x46c   : > { %10390 = vmatpush1.bf16.msra.mxu0 %v14911_v10  ;;  %10431 = vmatpush1.bf16.msra.mxu1 %v14913_v1  ;;  %v11418_v6 = vrot.slane %v18377_v52, %v17226_v49  ;;  %v15551_v59 = vcombine.low %v1664_v39, %v1744_v34  ;;  %v12410_v10 = vrot.slane %v18385_v28, %v17221_v44  ;;  %v1026_v61 = vunpack.c.l.s8.bf16 %v472_v35 }
 0x46d   : > { %10391 = vmatprep.subr.bf16.mxu0 %v15072_v57  ;;  %10432 = vmatprep.subr.bf16.mxu1 %v15074_v37  ;;  %v12418_v1 = vrot.slane %v18385_v28, %v17226_v49  ;;  %v15553_v29 = vcombine.low %v1665_v13, %v1745_v14  ;;  %v15712_v12 = vcombine.high %v1824_v16, %v1904_v26  ;;  %v1106_v28 = vunpack.c.l.s8.bf16 %v512_v45 }
 0x46e   : > { %10421 = vmatprep.mubr.bf16.mxu0 %v16605_v0  ;;  %10462 = vmatprep.mubr.bf16.mxu1 %v16605_v0  ;;  %v15714_v57 = vcombine.high %v1825_v62, %v1905_v38  ;;  %v15711_v37 = vcombine.low %v1824_v16, %v1904_v26  ;;  %v15713_v52 = vcombine.low %v1825_v62, %v1905_v38  ;;  %v1027_v39 = vunpack.c.h.s8.bf16 %v472_v35  ;;  %v632_v38 = vld [vmem:[%s16913_s21 + $0x610] sm:$0xff] }
 0x46f   : > { %v1107_v34 = vunpack.c.h.s8.bf16 %v512_v45  ;;  %v15874_v5 = vcombine.high %v1985_v47, %v1985_v47  ;;  %v1347_v45 = vunpack.c.h.s8.bf16 %v632_v38 }
 0x470   : > { %10392 = vmatpush1.bf16.msra.mxu0 %v15071_v63  ;;  %10433 = vmatpush1.bf16.msra.mxu1 %v15073_v23  ;;  %v15872_v63 = vcombine.high %v1984_v2, %v1984_v2  ;;  %v15871_v23 = vcombine.low %v1984_v2, %v1984_v2 }
 0x471   : > { %10393 = vmatprep.subr.bf16.mxu0 %v15232_v3  ;;  %10434 = vmatprep.subr.bf16.mxu1 %v15234_v25  ;;  %v15873_v3 = vcombine.low %v1985_v47, %v1985_v47  ;;  %v14918_v62 = vcombine.high %v1027_v39, %v1107_v34  ;;  %v1267_v47 = vunpack.c.h.s8.bf16 %v592_v24 }
 0x473   : > { %v7606_v26 = vsel %vm7202_vm0, %v15873_v3, 0 }
 0x474   : > { %10394 = vmatpush1.bf16.msra.mxu0 %v15231_v33  ;;  %10435 = vmatpush1.bf16.msra.mxu1 %v15233_v21 }
 0x475   : > { %10395 = vmatprep.subr.bf16.mxu0 %v15392_v20  ;;  %10436 = vmatprep.subr.bf16.mxu1 %v15394_v22 }
 0x478   : > { %10396 = vmatpush1.bf16.msra.mxu0 %v15391_v55  ;;  %10437 = vmatpush1.bf16.msra.mxu1 %v15393_v15  ;;  %v552_v15 = vld [vmem:[%s16913_s21 + $0x390] sm:$0xff] }
 0x479   : > { %10397 = vmatprep.subr.bf16.mxu0 %v15552_v51  ;;  %10438 = vmatprep.subr.bf16.mxu1 %v15554_v30  ;;  %v14916_v51 = vcombine.high %v1026_v61, %v1106_v28  ;;  %v1187_v2 = vunpack.c.h.s8.bf16 %v552_v15 }
 0x47a   : > { %v9767_v46 = vpop.f32.mrb[100].mxu0  ;;  %v9808_v58 = vpop.f32.mrb[100].mxu1 }
 0x47b   : > { %v11903_v25 = vmul.f32 %v11406_v9, %v9767_v46  ;;  %v11905_v7 = vmul.f32 %v11414_v17, %v9808_v58  ;;  %v9769_v27 = vpop.f32.mrb[101].mxu0  ;;  %v9810_v19 = vpop.f32.mrb[101].mxu1  ;;  %v7600_v9 = vsel %vm7202_vm0, %v15871_v23, 0  ;;  %v1186_v17 = vunpack.c.l.s8.bf16 %v552_v15  ;;  %v952_v15 = vld [vmem:[%s16913_s21 + $0x1010] sm:$0x55] }
 0x47c   : > { %v11904_v8 = vmul.f32 %v11410_v31, %v9769_v27  ;;  %v11906_v11 = vmul.f32 %v11418_v6, %v9810_v19  ;;  %v9771_v33 = vpop.f32.mrb[102].mxu0  ;;  %v9812_v21 = vpop.f32.mrb[102].mxu1  ;;  %10398 = vmatpush1.bf16.msra.mxu0 %v15551_v59  ;;  %10439 = vmatpush1.bf16.msra.mxu1 %v15553_v29  ;;  %v1266_v31 = vunpack.c.l.s8.bf16 %v592_v24  ;;  %v14915_v59 = vcombine.low %v1026_v61, %v1106_v28  ;;  %v792_v61 = vld [vmem:[%s16913_s21 + $0xb10] sm:$0xff] }
 0x47d   : > { %v12903_v13 = vadd.f32 %v12406_v41, %v11903_v25  ;;  %v12905_v14 = vadd.f32 %v12414_v40, %v11905_v7  ;;  %v9772_v20 = vpop.f32.mrb[103].mxu0  ;;  %v9813_v22 = vpop.f32.mrb[103].mxu1  ;;  %10399 = vmatprep.subr.bf16.mxu0 %v15712_v12  ;;  %10440 = vmatprep.subr.bf16.mxu1 %v15714_v57  ;;  %v672_v41 = vld [vmem:[%s16913_s21 + $0x750] sm:$0xff]  ;;  %v13751_v46 = vrot.slane %v13743_v4, %v17188_v56  ;;  %v1666_v33 = vunpack.c.l.s8.bf16 %v792_v61 }
 0x47e   : > { %v12904_v42 = vadd.f32 %v12410_v10, %v11904_v8  ;;  %v12906_v55 = vadd.f32 %v12418_v1, %v11906_v11  ;;  %v14917_v10 = vcombine.low %v1027_v39, %v1107_v34  ;;  %v1346_v1 = vunpack.c.l.s8.bf16 %v632_v38  ;;  %v832_v28 = vld [vmem:[%s16913_s21 + $0xc50] sm:$0xff]  ;;  %v18477_v20 = vld [vmem:[%s17134_s20 + $0x68] sm:$0xff] }
 0x47f   : > { %v1426_v35 = vunpack.c.l.s8.bf16 %v672_v41  ;;  %v1427_v12 = vunpack.c.h.s8.bf16 %v672_v41  ;;  %v15076_v57 = vcombine.high %v1186_v17, %v1266_v31  ;;  %v15075_v23 = vcombine.low %v1186_v17, %v1266_v31  ;;  %v872_v22 = vld [vmem:[%s16913_s21 + $0xd90] sm:$0xff] }
 0x480   : > { %v13713_v30 = vcombine.low %v12903_v13, %v12904_v42  ;;  %v13714_v16 = vcombine.low %v12905_v14, %v12906_v55  ;;  %10400 = vmatpush1.bf16.msra.mxu0 %v15711_v37  ;;  %10441 = vmatpush1.bf16.msra.mxu1 %v15713_v52  ;;  %v15078_v37 = vcombine.high %v1187_v2, %v1267_v47  ;;  %v712_v52 = vld [vmem:[%s16913_s21 + $0x890] sm:$0xff]  ;;  %v1746_v21 = vunpack.c.l.s8.bf16 %v832_v28 }
 0x481   : > { %16031 = vmatprep.subr.msk.bf16.mxu0 %vm7202_vm0, %v15872_v63  ;;  %16033 = vmatprep.subr.msk.bf16.mxu1 %vm7202_vm0, %v15874_v5  ;;  %v752_v63 = vld [vmem:[%s16913_s21 + $0x9d0] sm:$0xff]  ;;  %v15077_v3 = vcombine.low %v1187_v2, %v1267_v47  ;;  %v15236_v18 = vcombine.high %v1346_v1, %v1426_v35  ;;  %v15238_v48 = vcombine.high %v1347_v45, %v1427_v12  ;;  %v1506_v4 = vunpack.c.l.s8.bf16 %v712_v52 }
 0x482   : > { %v13735_v40 = vrot.slane %v13713_v30, %v17188_v56  ;;  %v13742_v6 = vrot.slane %v13714_v16, %v17188_v56  ;;  %v1586_v7 = vunpack.c.l.s8.bf16 %v752_v63  ;;  %v1507_v27 = vunpack.c.h.s8.bf16 %v712_v52  ;;  %v912_v5 = vld [vmem:[%s16913_s21 + $0xed0] sm:$0xff] }
 0x483   : > { %v1587_v19 = vunpack.c.h.s8.bf16 %v752_v63  ;;  %v15235_v8 = vcombine.low %v1346_v1, %v1426_v35  ;;  %v15237_v11 = vcombine.low %v1347_v45, %v1427_v12  ;;  %v1667_v39 = vunpack.c.h.s8.bf16 %v792_v61  ;;  %v473_v35 = vld [vmem:[%s16913_s21 + $0x118] sm:$0xff] }
 0x484   : > { %v13744_v29 = vcombine.low %v13735_v40, %v13742_v6  ;;  %10402 = vmatpush1.bf16.msra.mxu0 %v7600_v9  ;;  %10443 = vmatpush1.bf16.msra.mxu1 %v7606_v26  ;;  %v1747_v34 = vunpack.c.h.s8.bf16 %v832_v28  ;;  %v15396_v13 = vcombine.high %v1506_v4, %v1586_v7  ;;  %v15395_v42 = vcombine.low %v1506_v4, %v1586_v7  ;;  %v18485_v9 = vld [vmem:[%s17147_s22 + $0x68] sm:$0xff]  ;;  %v513_v45 = vld [vmem:[%s16913_s21 + $0x258] sm:$0xff] }
 0x485   : > { %10471 = vmatprep.subr.bf16.mxu0 %v14916_v51  ;;  %10512 = vmatprep.subr.bf16.mxu1 %v14918_v62  ;;  %v15398_v14 = vcombine.high %v1507_v27, %v1587_v19  ;;  %v15397_v55 = vcombine.low %v1507_v27, %v1587_v19  ;;  %v11422_v24 = vrot.slane %v18477_v20, %v17130_v50  ;;  %v1826_v16 = vunpack.c.l.s8.bf16 %v872_v22 }
 0x486   : > { %v13758_v58 = vrot.slane %v13744_v29, %v17188_v56  ;;  %v15556_v51 = vcombine.high %v1666_v33, %v1746_v21  ;;  %v15558_v30 = vcombine.high %v1667_v39, %v1747_v34  ;;  %v1906_v26 = vunpack.c.l.s8.bf16 %v912_v5 }
 0x487   : > { %16032 = vmatmul.mubr.msk.bf16.vlgmr.msra.gmra.mrb[132].mxu0 %vm7198_vm1, %v16950_v32  ;;  %16034 = vmatmul.mubr.msk.bf16.vlgmr.msra.gmra.mrb[132].mxu1 %vm7198_vm1, %v16950_v32  ;;  %v1827_v62 = vunpack.c.h.s8.bf16 %v872_v22  ;;  %v1907_v38 = vunpack.c.h.s8.bf16 %v912_v5  ;;  %v11430_v17 = vrot.slane %v18477_v20, %v17140_v53  ;;  %v11426_v31 = vrot.slane %v18477_v20, %v17143_v54 }
 0x488   : > { %v13759_v25 = vcombine.low %v13751_v46, %v13758_v58  ;;  %10472 = vmatpush1.bf16.msra.mxu0 %v14915_v59  ;;  %10513 = vmatpush1.bf16.msra.mxu1 %v14917_v10  ;;  %v1986_v2 = vunpack.c.l.s8.bf16 %v952_v15  ;;  %v1987_v47 = vunpack.c.h.s8.bf16 %v952_v15  ;;  %v12422_v41 = vrot.slane %v18485_v9, %v17130_v50 }
 0x489   : > { %10473 = vmatprep.subr.bf16.mxu0 %v15076_v57  ;;  %10514 = vmatprep.subr.bf16.mxu1 %v15078_v37  ;;  %v11434_v40 = vrot.slane %v18477_v20, %v17155_v60  ;;  %v15555_v6 = vcombine.low %v1666_v33, %v1746_v21  ;;  %v15557_v59 = vcombine.low %v1667_v39, %v1747_v34  ;;  %v1028_v7 = vunpack.c.l.s8.bf16 %v473_v35 }
 0x48a   : > { %14135 = vst [vmem:[%s17271_s17 + $0x60] sm:$0xff] %v13759_v25  ;;  %10503 = vmatprep.mubr.bf16.mxu0 %v16605_v0  ;;  %10544 = vmatprep.mubr.bf16.mxu1 %v16605_v0  ;;  %v12430_v10 = vrot.slane %v18485_v9, %v17140_v53  ;;  %v12426_v1 = vrot.slane %v18485_v9, %v17143_v54  ;;  %v1108_v27 = vunpack.c.l.s8.bf16 %v513_v45  ;;  %v1109_v33 = vunpack.c.h.s8.bf16 %v513_v45 }
 0x48b   : > { %v12434_v29 = vrot.slane %v18485_v9, %v17155_v60  ;;  %v15716_v12 = vcombine.high %v1826_v16, %v1906_v26  ;;  %v15718_v57 = vcombine.high %v1827_v62, %v1907_v38  ;;  %v15715_v37 = vcombine.low %v1826_v16, %v1906_v26 }
 0x48c   : > { %10474 = vmatpush1.bf16.msra.mxu0 %v15075_v23  ;;  %10515 = vmatpush1.bf16.msra.mxu1 %v15077_v3  ;;  %v15717_v52 = vcombine.low %v1827_v62, %v1907_v38  ;;  %v15876_v63 = vcombine.high %v1986_v2, %v1986_v2  ;;  %v15875_v23 = vcombine.low %v1986_v2, %v1986_v2  ;;  %v633_v62 = vld [vmem:[%s16913_s21 + $0x618] sm:$0xff] }
 0x48d   : > { %10475 = vmatprep.subr.bf16.mxu0 %v15236_v18  ;;  %10516 = vmatprep.subr.bf16.mxu1 %v15238_v48  ;;  %v15877_v3 = vcombine.low %v1987_v47, %v1987_v47 }
 0x48e   : > { %v7612_v15 = vsel %vm7202_vm0, %v15875_v23, 0 }
 0x48f   : > { %v7618_v16 = vsel %vm7202_vm0, %v15877_v3, 0 }
 0x490   : > { %10476 = vmatpush1.bf16.msra.mxu0 %v15235_v8  ;;  %10517 = vmatpush1.bf16.msra.mxu1 %v15237_v11  ;;  %v1029_v11 = vunpack.c.h.s8.bf16 %v473_v35  ;;  %v1349_v35 = vunpack.c.h.s8.bf16 %v633_v62 }
 0x491   : > { %10477 = vmatprep.subr.bf16.mxu0 %v15396_v13  ;;  %10518 = vmatprep.subr.bf16.mxu1 %v15398_v14  ;;  %v15878_v14 = vcombine.high %v1987_v47, %v1987_v47  ;;  %v673_v47 = vld [vmem:[%s16913_s21 + $0x758] sm:$0xff] }
 0x492   : > { %v14922_v26 = vcombine.high %v1029_v11, %v1109_v33  ;;  %v1429_v45 = vunpack.c.h.s8.bf16 %v673_v47 }
 0x494   : > { %10478 = vmatpush1.bf16.msra.mxu0 %v15395_v42  ;;  %10519 = vmatpush1.bf16.msra.mxu1 %v15397_v55  ;;  %v553_v42 = vld [vmem:[%s16913_s21 + $0x398] sm:$0xff]  ;;  %v15242_v23 = vcombine.high %v1349_v35, %v1429_v45 }
 0x495   : > { %10479 = vmatprep.subr.bf16.mxu0 %v15556_v51  ;;  %10520 = vmatprep.subr.bf16.mxu1 %v15558_v30  ;;  %v593_v55 = vld [vmem:[%s16913_s21 + $0x4d8] sm:$0xff]  ;;  %v1188_v38 = vunpack.c.l.s8.bf16 %v553_v42 }
 0x496   : > { %v9849_v46 = vpop.f32.mrb[104].mxu0  ;;  %v9890_v58 = vpop.f32.mrb[104].mxu1  ;;  %v1269_v2 = vunpack.c.h.s8.bf16 %v593_v55 }
 0x497   : > { %v11907_v25 = vmul.f32 %v11422_v24, %v9849_v46  ;;  %v11909_v18 = vmul.f32 %v11430_v17, %v9890_v58  ;;  %v9851_v48 = vpop.f32.mrb[105].mxu0  ;;  %v9892_v4 = vpop.f32.mrb[105].mxu1  ;;  %v14920_v24 = vcombine.high %v1028_v7, %v1108_v27  ;;  %v1268_v17 = vunpack.c.l.s8.bf16 %v593_v55  ;;  %v753_v46 = vld [vmem:[%s16913_s21 + $0x9d8] sm:$0xff] }
 0x498   : > { %v11908_v19 = vmul.f32 %v11426_v31, %v9851_v48  ;;  %v11910_v61 = vmul.f32 %v11434_v40, %v9892_v4  ;;  %v9853_v28 = vpop.f32.mrb[106].mxu0  ;;  %v9894_v8 = vpop.f32.mrb[106].mxu1  ;;  %10480 = vmatpush1.bf16.msra.mxu0 %v15555_v6  ;;  %10521 = vmatpush1.bf16.msra.mxu1 %v15557_v59  ;;  %v1189_v31 = vunpack.c.h.s8.bf16 %v553_v42  ;;  %v14919_v6 = vcombine.low %v1028_v7, %v1108_v27  ;;  %v793_v4 = vld [vmem:[%s16913_s21 + $0xb18] sm:$0xff] }
 0x499   : > { %v12907_v21 = vadd.f32 %v12422_v41, %v11907_v25  ;;  %v12909_v39 = vadd.f32 %v12430_v10, %v11909_v18  ;;  %v9854_v34 = vpop.f32.mrb[107].mxu0  ;;  %v9895_v13 = vpop.f32.mrb[107].mxu1  ;;  %10481 = vmatprep.subr.bf16.mxu0 %v15716_v12  ;;  %10522 = vmatprep.subr.bf16.mxu1 %v15718_v57  ;;  %v14921_v59 = vcombine.low %v1029_v11, %v1109_v33  ;;  %v1348_v10 = vunpack.c.l.s8.bf16 %v633_v62  ;;  %v833_v7 = vld [vmem:[%s16913_s21 + $0xc58] sm:$0xff] }
 0x49a   : > { %v12908_v22 = vadd.f32 %v12426_v1, %v11908_v19  ;;  %v12910_v5 = vadd.f32 %v12434_v29, %v11910_v61  ;;  %v1428_v29 = vunpack.c.l.s8.bf16 %v673_v47  ;;  %v15080_v12 = vcombine.high %v1188_v38, %v1268_v17  ;;  %v913_v34 = vld [vmem:[%s16913_s21 + $0xed8] sm:$0xff] }
 0x49b   : > { %v15082_v57 = vcombine.high %v1189_v31, %v1269_v2  ;;  %v15079_v58 = vcombine.low %v1188_v38, %v1268_v17  ;;  %v1588_v25 = vunpack.c.l.s8.bf16 %v753_v46  ;;  %v1589_v48 = vunpack.c.h.s8.bf16 %v753_v46 }
 0x49c   : > { %v13760_v51 = vcombine.low %v12907_v21, %v12908_v22  ;;  %v13761_v30 = vcombine.low %v12909_v39, %v12910_v5  ;;  %10482 = vmatpush1.bf16.msra.mxu0 %v15715_v37  ;;  %10523 = vmatpush1.bf16.msra.mxu1 %v15717_v52  ;;  %v713_v37 = vld [vmem:[%s16913_s21 + $0x898] sm:$0xff]  ;;  %v15081_v52 = vcombine.low %v1189_v31, %v1269_v2  ;;  %v1668_v61 = vunpack.c.l.s8.bf16 %v793_v4 }
 0x49d   : > { %16035 = vmatprep.subr.msk.bf16.mxu0 %vm7202_vm0, %v15876_v63  ;;  %16037 = vmatprep.subr.msk.bf16.mxu1 %vm7202_vm0, %v15878_v14  ;;  %v15240_v63 = vcombine.high %v1348_v10, %v1428_v29  ;;  %v1508_v3 = vunpack.c.l.s8.bf16 %v713_v37  ;;  %v1509_v18 = vunpack.c.h.s8.bf16 %v713_v37  ;;  %v15239_v27 = vcombine.low %v1348_v10, %v1428_v29  ;;  %v873_v39 = vld [vmem:[%s16913_s21 + $0xd98] sm:$0xff]  ;;  %v474_v29 = vld [vmem:[%s16913_s21 + $0x120] sm:$0xff] }
 0x49e   : > { %v18512_v41 = vrot.slane %v13760_v51, %v17188_v56  ;;  %v18515_v40 = vrot.slane %v13761_v30, %v17188_v56  ;;  %v15241_v19 = vcombine.low %v1349_v35, %v1429_v45  ;;  %v1748_v28 = vunpack.c.l.s8.bf16 %v833_v7  ;;  %v953_v22 = vld [vmem:[%s16913_s21 + $0x1018] sm:$0x55]  ;;  %v514_v35 = vld [vmem:[%s16913_s21 + $0x260] sm:$0xff] }
 0x49f   : > { %v1669_v8 = vunpack.c.h.s8.bf16 %v793_v4  ;;  %v1749_v11 = vunpack.c.h.s8.bf16 %v833_v7  ;;  %v15400_v33 = vcombine.high %v1508_v3, %v1588_v25  ;;  %v15402_v21 = vcombine.high %v1509_v18, %v1589_v48 }
 0x4a0   : > { %v13792_v1 = vcombine.low %v18512_v41, %v18515_v40  ;;  %10484 = vmatpush1.bf16.msra.mxu0 %v7612_v15  ;;  %10525 = vmatpush1.bf16.msra.mxu1 %v7618_v16  ;;  %v15399_v13 = vcombine.low %v1508_v3, %v1588_v25  ;;  %v15401_v14 = vcombine.low %v1509_v18, %v1589_v48  ;;  %v1828_v15 = vunpack.c.l.s8.bf16 %v873_v39 }
 0x4a1   : > { %10553 = vmatprep.subr.bf16.mxu0 %v14920_v24  ;;  %10594 = vmatprep.subr.bf16.mxu1 %v14922_v26  ;;  %v11438_v5 = vrot.slane %v18477_v20, %v17215_v36  ;;  %v15560_v42 = vcombine.high %v1668_v61, %v1748_v28  ;;  %v15562_v55 = vcombine.high %v1669_v8, %v1749_v11  ;;  %v1908_v24 = vunpack.c.l.s8.bf16 %v913_v34 }
 0x4a2   : > { %v1829_v51 = vunpack.c.h.s8.bf16 %v873_v39  ;;  %v1909_v30 = vunpack.c.h.s8.bf16 %v913_v34  ;;  %v11446_v16 = vrot.slane %v18477_v20, %v17218_v43  ;;  %v11442_v26 = vrot.slane %v18477_v20, %v17221_v44 }
 0x4a3   : > { %16036 = vmatmul.mubr.msk.bf16.vlgmr.msra.gmra.mrb[136].mxu0 %vm7198_vm1, %v16950_v32  ;;  %16038 = vmatmul.mubr.msk.bf16.vlgmr.msra.gmra.mrb[136].mxu1 %vm7198_vm1, %v16950_v32  ;;  %v1988_v62 = vunpack.c.l.s8.bf16 %v953_v22  ;;  %v1989_v38 = vunpack.c.h.s8.bf16 %v953_v22  ;;  %v12438_v17 = vrot.slane %v18485_v9, %v17215_v36  ;;  %v12446_v31 = vrot.slane %v18485_v9, %v17218_v43  ;;  %v594_v22 = vld [vmem:[%s16913_s21 + $0x4e0] sm:$0xff] }
 0x4a4   : > { %10554 = vmatpush1.bf16.msra.mxu0 %v14919_v6  ;;  %10595 = vmatpush1.bf16.msra.mxu1 %v14921_v59  ;;  %v11450_v2 = vrot.slane %v18477_v20, %v17226_v49  ;;  %v15559_v47 = vcombine.low %v1668_v61, %v1748_v28  ;;  %v12442_v6 = vrot.slane %v18485_v9, %v17221_v44  ;;  %v1030_v48 = vunpack.c.l.s8.bf16 %v474_v29 }
 0x4a5   : > { %10555 = vmatprep.subr.bf16.mxu0 %v15080_v12  ;;  %10596 = vmatprep.subr.bf16.mxu1 %v15082_v57  ;;  %v12450_v59 = vrot.slane %v18485_v9, %v17226_v49  ;;  %v15561_v10 = vcombine.low %v1669_v8, %v1749_v11  ;;  %v15720_v45 = vcombine.high %v1828_v15, %v1908_v24  ;;  %v1110_v9 = vunpack.c.l.s8.bf16 %v514_v35 }
 0x4a6   : > { %10585 = vmatprep.mubr.bf16.mxu0 %v16605_v0  ;;  %10626 = vmatprep.mubr.bf16.mxu1 %v16605_v0  ;;  %v15722_v12 = vcombine.high %v1829_v51, %v1909_v30  ;;  %v15719_v57 = vcombine.low %v1828_v15, %v1908_v24  ;;  %v15721_v20 = vcombine.low %v1829_v51, %v1909_v30  ;;  %v1031_v61 = vunpack.c.h.s8.bf16 %v474_v29  ;;  %v634_v30 = vld [vmem:[%s16913_s21 + $0x620] sm:$0xff] }
 0x4a7   : > { %v1111_v28 = vunpack.c.h.s8.bf16 %v514_v35  ;;  %v15882_v39 = vcombine.high %v1989_v38, %v1989_v38  ;;  %v1351_v35 = vunpack.c.h.s8.bf16 %v634_v30 }
 0x4a8   : > { %10556 = vmatpush1.bf16.msra.mxu0 %v15079_v58  ;;  %10597 = vmatpush1.bf16.msra.mxu1 %v15081_v52  ;;  %v15880_v58 = vcombine.high %v1988_v62, %v1988_v62  ;;  %v15879_v52 = vcombine.low %v1988_v62, %v1988_v62 }
 0x4a9   : > { %10557 = vmatprep.subr.bf16.mxu0 %v15240_v63  ;;  %10598 = vmatprep.subr.bf16.mxu1 %v15242_v23  ;;  %v15881_v63 = vcombine.low %v1989_v38, %v1989_v38  ;;  %v14926_v51 = vcombine.high %v1031_v61, %v1111_v28  ;;  %v1271_v38 = vunpack.c.h.s8.bf16 %v594_v22 }
 0x4ab   : > { %v7630_v24 = vsel %vm7202_vm0, %v15881_v63, 0 }
 0x4ac   : > { %10558 = vmatpush1.bf16.msra.mxu0 %v15239_v27  ;;  %10599 = vmatpush1.bf16.msra.mxu1 %v15241_v19 }
 0x4ad   : > { %10559 = vmatprep.subr.bf16.mxu0 %v15400_v33  ;;  %10600 = vmatprep.subr.bf16.mxu1 %v15402_v21 }
 0x4b0   : > { %10560 = vmatpush1.bf16.msra.mxu0 %v15399_v13  ;;  %10601 = vmatpush1.bf16.msra.mxu1 %v15401_v14  ;;  %v554_v14 = vld [vmem:[%s16913_s21 + $0x3a0] sm:$0xff] }
 0x4b1   : > { %10561 = vmatprep.subr.bf16.mxu0 %v15560_v42  ;;  %10602 = vmatprep.subr.bf16.mxu1 %v15562_v55  ;;  %v14924_v42 = vcombine.high %v1030_v48, %v1110_v9  ;;  %v1191_v62 = vunpack.c.h.s8.bf16 %v554_v14 }
 0x4b2   : > { %v9931_v37 = vpop.f32.mrb[108].mxu0  ;;  %v9972_v46 = vpop.f32.mrb[108].mxu1 }
 0x4b3   : > { %v11911_v23 = vmul.f32 %v11438_v5, %v9931_v37  ;;  %v11913_v3 = vmul.f32 %v11446_v16, %v9972_v46  ;;  %v9933_v25 = vpop.f32.mrb[109].mxu0  ;;  %v9974_v18 = vpop.f32.mrb[109].mxu1  ;;  %v7624_v5 = vsel %vm7202_vm0, %v15879_v52, 0  ;;  %v1190_v16 = vunpack.c.l.s8.bf16 %v554_v14  ;;  %v954_v14 = vld [vmem:[%s16913_s21 + $0x1020] sm:$0x55] }
 0x4b4   : > { %v11912_v4 = vmul.f32 %v11442_v26, %v9933_v25  ;;  %v11914_v7 = vmul.f32 %v11450_v2, %v9974_v18  ;;  %v9935_v27 = vpop.f32.mrb[110].mxu0  ;;  %v9976_v19 = vpop.f32.mrb[110].mxu1  ;;  %10562 = vmatpush1.bf16.msra.mxu0 %v15559_v47  ;;  %10603 = vmatpush1.bf16.msra.mxu1 %v15561_v10  ;;  %v1270_v26 = vunpack.c.l.s8.bf16 %v594_v22  ;;  %v14923_v47 = vcombine.low %v1030_v48, %v1110_v9  ;;  %v794_v48 = vld [vmem:[%s16913_s21 + $0xb20] sm:$0xff] }
 0x4b5   : > { %v12911_v8 = vadd.f32 %v12438_v17, %v11911_v23  ;;  %v12913_v11 = vadd.f32 %v12446_v31, %v11913_v3  ;;  %v9936_v33 = vpop.f32.mrb[111].mxu0  ;;  %v9977_v21 = vpop.f32.mrb[111].mxu1  ;;  %10563 = vmatprep.subr.bf16.mxu0 %v15720_v45  ;;  %10604 = vmatprep.subr.bf16.mxu1 %v15722_v12  ;;  %v674_v17 = vld [vmem:[%s16913_s21 + $0x760] sm:$0xff]  ;;  %v13800_v37 = vrot.slane %v13792_v1, %v17188_v56  ;;  %v1670_v27 = vunpack.c.l.s8.bf16 %v794_v48 }
 0x4b6   : > { %v12912_v34 = vadd.f32 %v12442_v6, %v11912_v4  ;;  %v12914_v13 = vadd.f32 %v12450_v59, %v11914_v7  ;;  %v14925_v6 = vcombine.low %v1031_v61, %v1111_v28  ;;  %v1350_v59 = vunpack.c.l.s8.bf16 %v634_v30  ;;  %v834_v9 = vld [vmem:[%s16913_s21 + $0xc60] sm:$0xff]  ;;  %v18577_v33 = vld [vmem:[%s17134_s20 + $0x70] sm:$0xff] }
 0x4b7   : > { %v1430_v29 = vunpack.c.l.s8.bf16 %v674_v17  ;;  %v1431_v45 = vunpack.c.h.s8.bf16 %v674_v17  ;;  %v15084_v12 = vcombine.high %v1190_v16, %v1270_v26  ;;  %v15083_v52 = vcombine.low %v1190_v16, %v1270_v26  ;;  %v874_v21 = vld [vmem:[%s16913_s21 + $0xda0] sm:$0xff] }
 0x4b8   : > { %v13762_v55 = vcombine.low %v12911_v8, %v12912_v34  ;;  %v13763_v15 = vcombine.low %v12913_v11, %v12914_v13  ;;  %10564 = vmatpush1.bf16.msra.mxu0 %v15719_v57  ;;  %10605 = vmatpush1.bf16.msra.mxu1 %v15721_v20  ;;  %v15086_v57 = vcombine.high %v1191_v62, %v1271_v38  ;;  %v714_v20 = vld [vmem:[%s16913_s21 + $0x8a0] sm:$0xff]  ;;  %v1750_v19 = vunpack.c.l.s8.bf16 %v834_v9 }
 0x4b9   : > { %16039 = vmatprep.subr.msk.bf16.mxu0 %vm7202_vm0, %v15880_v58  ;;  %16041 = vmatprep.subr.msk.bf16.mxu1 %vm7202_vm0, %v15882_v39  ;;  %v754_v58 = vld [vmem:[%s16913_s21 + $0x9e0] sm:$0xff]  ;;  %v15085_v63 = vcombine.low %v1191_v62, %v1271_v38  ;;  %v15244_v41 = vcombine.high %v1350_v59, %v1430_v29  ;;  %v15246_v40 = vcombine.high %v1351_v35, %v1431_v45  ;;  %v1510_v1 = vunpack.c.l.s8.bf16 %v714_v20 }
 0x4ba   : > { %v13784_v31 = vrot.slane %v13762_v55, %v17188_v56  ;;  %v13791_v2 = vrot.slane %v13763_v15, %v17188_v56  ;;  %v1590_v3 = vunpack.c.l.s8.bf16 %v754_v58  ;;  %v1511_v25 = vunpack.c.h.s8.bf16 %v714_v20  ;;  %v914_v39 = vld [vmem:[%s16913_s21 + $0xee0] sm:$0xff] }
 0x4bb   : > { %v1591_v18 = vunpack.c.h.s8.bf16 %v754_v58  ;;  %v15243_v4 = vcombine.low %v1350_v59, %v1430_v29  ;;  %v15245_v7 = vcombine.low %v1351_v35, %v1431_v45  ;;  %v1671_v61 = vunpack.c.h.s8.bf16 %v794_v48  ;;  %v475_v29 = vld [vmem:[%s16913_s21 + $0x128] sm:$0xff] }
 0x4bc   : > { %v13793_v10 = vcombine.low %v13784_v31, %v13791_v2  ;;  %10566 = vmatpush1.bf16.msra.mxu0 %v7624_v5  ;;  %10607 = vmatpush1.bf16.msra.mxu1 %v7630_v24  ;;  %v1751_v28 = vunpack.c.h.s8.bf16 %v834_v9  ;;  %v15404_v8 = vcombine.high %v1510_v1, %v1590_v3  ;;  %v15403_v34 = vcombine.low %v1510_v1, %v1590_v3  ;;  %v18585_v5 = vld [vmem:[%s17147_s22 + $0x70] sm:$0xff]  ;;  %v515_v35 = vld [vmem:[%s16913_s21 + $0x268] sm:$0xff] }
 0x4bd   : > { %10635 = vmatprep.subr.bf16.mxu0 %v14924_v42  ;;  %10676 = vmatprep.subr.bf16.mxu1 %v14926_v51  ;;  %v15406_v11 = vcombine.high %v1511_v25, %v1591_v18  ;;  %v15405_v13 = vcombine.low %v1511_v25, %v1591_v18  ;;  %v11454_v22 = vrot.slane %v18577_v33, %v17130_v50  ;;  %v1830_v15 = vunpack.c.l.s8.bf16 %v874_v21 }
 0x4be   : > { %v13807_v46 = vrot.slane %v13793_v10, %v17188_v56  ;;  %v15564_v42 = vcombine.high %v1670_v27, %v1750_v19  ;;  %v15566_v55 = vcombine.high %v1671_v61, %v1751_v28  ;;  %v1910_v24 = vunpack.c.l.s8.bf16 %v914_v39 }
 0x4bf   : > { %16040 = vmatmul.mubr.msk.bf16.vlgmr.msra.gmra.mrb[140].mxu0 %vm7198_vm1, %v16950_v32  ;;  %16042 = vmatmul.mubr.msk.bf16.vlgmr.msra.gmra.mrb[140].mxu1 %vm7198_vm1, %v16950_v32  ;;  %v1831_v51 = vunpack.c.h.s8.bf16 %v874_v21  ;;  %v1911_v30 = vunpack.c.h.s8.bf16 %v914_v39  ;;  %v11462_v16 = vrot.slane %v18577_v33, %v17140_v53  ;;  %v11458_v26 = vrot.slane %v18577_v33, %v17143_v54 }
 0x4c0   : > { %v13808_v23 = vcombine.low %v13800_v37, %v13807_v46  ;;  %10636 = vmatpush1.bf16.msra.mxu0 %v14923_v47  ;;  %10677 = vmatpush1.bf16.msra.mxu1 %v14925_v6  ;;  %v1990_v62 = vunpack.c.l.s8.bf16 %v954_v14  ;;  %v1991_v38 = vunpack.c.h.s8.bf16 %v954_v14  ;;  %v12454_v17 = vrot.slane %v18585_v5, %v17130_v50 }
 0x4c1   : > { %10637 = vmatprep.subr.bf16.mxu0 %v15084_v12  ;;  %10678 = vmatprep.subr.bf16.mxu1 %v15086_v57  ;;  %v11466_v31 = vrot.slane %v18577_v33, %v17155_v60  ;;  %v15563_v2 = vcombine.low %v1670_v27, %v1750_v19  ;;  %v15565_v47 = vcombine.low %v1671_v61, %v1751_v28  ;;  %v1032_v3 = vunpack.c.l.s8.bf16 %v475_v29 }
 0x4c2   : > { %14136 = vst [vmem:[%s17271_s17 + $0x68] sm:$0xff] %v13808_v23  ;;  %10667 = vmatprep.mubr.bf16.mxu0 %v16605_v0  ;;  %10708 = vmatprep.mubr.bf16.mxu1 %v16605_v0  ;;  %v12462_v6 = vrot.slane %v18585_v5, %v17140_v53  ;;  %v12458_v59 = vrot.slane %v18585_v5, %v17143_v54  ;;  %v1112_v25 = vunpack.c.l.s8.bf16 %v515_v35  ;;  %v1113_v27 = vunpack.c.h.s8.bf16 %v515_v35 }
 0x4c3   : > { %v12466_v10 = vrot.slane %v18585_v5, %v17155_v60  ;;  %v15724_v45 = vcombine.high %v1830_v15, %v1910_v24  ;;  %v15726_v12 = vcombine.high %v1831_v51, %v1911_v30  ;;  %v15723_v57 = vcombine.low %v1830_v15, %v1910_v24 }
 0x4c4   : > { %10638 = vmatpush1.bf16.msra.mxu0 %v15083_v52  ;;  %10679 = vmatpush1.bf16.msra.mxu1 %v15085_v63  ;;  %v15725_v20 = vcombine.low %v1831_v51, %v1911_v30  ;;  %v15884_v58 = vcombine.high %v1990_v62, %v1990_v62  ;;  %v15883_v52 = vcombine.low %v1990_v62, %v1990_v62  ;;  %v635_v51 = vld [vmem:[%s16913_s21 + $0x628] sm:$0xff] }
 0x4c5   : > { %10639 = vmatprep.subr.bf16.mxu0 %v15244_v41  ;;  %10680 = vmatprep.subr.bf16.mxu1 %v15246_v40  ;;  %v15885_v63 = vcombine.low %v1991_v38, %v1991_v38 }
 0x4c6   : > { %v7636_v14 = vsel %vm7202_vm0, %v15883_v52, 0 }
 0x4c7   : > { %v7642_v15 = vsel %vm7202_vm0, %v15885_v63, 0 }
 0x4c8   : > { %10640 = vmatpush1.bf16.msra.mxu0 %v15243_v4  ;;  %10681 = vmatpush1.bf16.msra.mxu1 %v15245_v7  ;;  %v1033_v7 = vunpack.c.h.s8.bf16 %v475_v29  ;;  %v1353_v29 = vunpack.c.h.s8.bf16 %v635_v51 }
 0x4c9   : > { %10641 = vmatprep.subr.bf16.mxu0 %v15404_v8  ;;  %10682 = vmatprep.subr.bf16.mxu1 %v15406_v11  ;;  %v15886_v11 = vcombine.high %v1991_v38, %v1991_v38  ;;  %v675_v38 = vld [vmem:[%s16913_s21 + $0x768] sm:$0xff] }
 0x4ca   : > { %v14930_v24 = vcombine.high %v1033_v7, %v1113_v27  ;;  %v1433_v35 = vunpack.c.h.s8.bf16 %v675_v38 }
 0x4cc   : > { %10642 = vmatpush1.bf16.msra.mxu0 %v15403_v34  ;;  %10683 = vmatpush1.bf16.msra.mxu1 %v15405_v13  ;;  %v555_v34 = vld [vmem:[%s16913_s21 + $0x3a8] sm:$0xff]  ;;  %v15250_v52 = vcombine.high %v1353_v29, %v1433_v35 }
 0x4cd   : > { %10643 = vmatprep.subr.bf16.mxu0 %v15564_v42  ;;  %10684 = vmatprep.subr.bf16.mxu1 %v15566_v55  ;;  %v595_v13 = vld [vmem:[%s16913_s21 + $0x4e8] sm:$0xff]  ;;  %v1192_v30 = vunpack.c.l.s8.bf16 %v555_v34 }
 0x4ce   : > { %v10013_v37 = vpop.f32.mrb[112].mxu0  ;;  %v10054_v46 = vpop.f32.mrb[112].mxu1  ;;  %v1273_v62 = vunpack.c.h.s8.bf16 %v595_v13 }
 0x4cf   : > { %v11915_v23 = vmul.f32 %v11454_v22, %v10013_v37  ;;  %v11917_v41 = vmul.f32 %v11462_v16, %v10054_v46  ;;  %v10015_v40 = vpop.f32.mrb[113].mxu0  ;;  %v10056_v1 = vpop.f32.mrb[113].mxu1  ;;  %v14928_v22 = vcombine.high %v1032_v3, %v1112_v25  ;;  %v1272_v16 = vunpack.c.l.s8.bf16 %v595_v13  ;;  %v755_v37 = vld [vmem:[%s16913_s21 + $0x9e8] sm:$0xff] }
 0x4d0   : > { %v11916_v18 = vmul.f32 %v11458_v26, %v10015_v40  ;;  %v11918_v48 = vmul.f32 %v11466_v31, %v10056_v1  ;;  %v10017_v9 = vpop.f32.mrb[114].mxu0  ;;  %v10058_v4 = vpop.f32.mrb[114].mxu1  ;;  %10644 = vmatpush1.bf16.msra.mxu0 %v15563_v2  ;;  %10685 = vmatpush1.bf16.msra.mxu1 %v15565_v47  ;;  %v1193_v26 = vunpack.c.h.s8.bf16 %v555_v34  ;;  %v14927_v2 = vcombine.low %v1032_v3, %v1112_v25  ;;  %v795_v1 = vld [vmem:[%s16913_s21 + $0xb28] sm:$0xff] }
 0x4d1   : > { %v12915_v19 = vadd.f32 %v12454_v17, %v11915_v23  ;;  %v12917_v61 = vadd.f32 %v12462_v6, %v11917_v41  ;;  %v10018_v28 = vpop.f32.mrb[115].mxu0  ;;  %v10059_v8 = vpop.f32.mrb[115].mxu1  ;;  %10645 = vmatprep.subr.bf16.mxu0 %v15724_v45  ;;  %10686 = vmatprep.subr.bf16.mxu1 %v15726_v12  ;;  %v14929_v47 = vcombine.low %v1033_v7, %v1113_v27  ;;  %v1352_v6 = vunpack.c.l.s8.bf16 %v635_v51  ;;  %v835_v3 = vld [vmem:[%s16913_s21 + $0xc68] sm:$0xff] }
 0x4d2   : > { %v12916_v21 = vadd.f32 %v12458_v59, %v11916_v18  ;;  %v12918_v39 = vadd.f32 %v12466_v10, %v11918_v48  ;;  %v1432_v10 = vunpack.c.l.s8.bf16 %v675_v38  ;;  %v15088_v45 = vcombine.high %v1192_v30, %v1272_v16  ;;  %v915_v28 = vld [vmem:[%s16913_s21 + $0xee8] sm:$0xff] }
 0x4d3   : > { %v15090_v12 = vcombine.high %v1193_v26, %v1273_v62  ;;  %v15087_v46 = vcombine.low %v1192_v30, %v1272_v16  ;;  %v1592_v23 = vunpack.c.l.s8.bf16 %v755_v37  ;;  %v1593_v40 = vunpack.c.h.s8.bf16 %v755_v37 }
 0x4d4   : > { %v13809_v42 = vcombine.low %v12915_v19, %v12916_v21  ;;  %v13810_v55 = vcombine.low %v12917_v61, %v12918_v39  ;;  %10646 = vmatpush1.bf16.msra.mxu0 %v15723_v57  ;;  %10687 = vmatpush1.bf16.msra.mxu1 %v15725_v20  ;;  %v715_v57 = vld [vmem:[%s16913_s21 + $0x8a8] sm:$0xff]  ;;  %v15089_v20 = vcombine.low %v1193_v26, %v1273_v62  ;;  %v1672_v48 = vunpack.c.l.s8.bf16 %v795_v1 }
 0x4d5   : > { %16043 = vmatprep.subr.msk.bf16.mxu0 %vm7202_vm0, %v15884_v58  ;;  %16045 = vmatprep.subr.msk.bf16.mxu1 %vm7202_vm0, %v15886_v11  ;;  %v15248_v58 = vcombine.high %v1352_v6, %v1432_v10  ;;  %v1512_v63 = vunpack.c.l.s8.bf16 %v715_v57  ;;  %v1513_v41 = vunpack.c.h.s8.bf16 %v715_v57  ;;  %v15247_v25 = vcombine.low %v1352_v6, %v1432_v10  ;;  %v875_v61 = vld [vmem:[%s16913_s21 + $0xda8] sm:$0xff]  ;;  %v476_v10 = vld [vmem:[%s16913_s21 + $0x130] sm:$0xff] }
 0x4d6   : > { %v18612_v17 = vrot.slane %v13809_v42, %v17188_v56  ;;  %v18615_v31 = vrot.slane %v13810_v55, %v17188_v56  ;;  %v15249_v18 = vcombine.low %v1353_v29, %v1433_v35  ;;  %v1752_v9 = vunpack.c.l.s8.bf16 %v835_v3  ;;  %v955_v21 = vld [vmem:[%s16913_s21 + $0x1028] sm:$0x55]  ;;  %v516_v29 = vld [vmem:[%s16913_s21 + $0x270] sm:$0xff] }
 0x4d7   : > { %v1673_v4 = vunpack.c.h.s8.bf16 %v795_v1  ;;  %v1753_v7 = vunpack.c.h.s8.bf16 %v835_v3  ;;  %v15408_v27 = vcombine.high %v1512_v63, %v1592_v23  ;;  %v15410_v19 = vcombine.high %v1513_v41, %v1593_v40 }
 0x4d8   : > { %v13841_v59 = vcombine.low %v18612_v17, %v18615_v31  ;;  %10648 = vmatpush1.bf16.msra.mxu0 %v7636_v14  ;;  %10689 = vmatpush1.bf16.msra.mxu1 %v7642_v15  ;;  %v15407_v8 = vcombine.low %v1512_v63, %v1592_v23  ;;  %v15409_v11 = vcombine.low %v1513_v41, %v1593_v40  ;;  %v1832_v14 = vunpack.c.l.s8.bf16 %v875_v61 }
 0x4d9   : > { %10717 = vmatprep.subr.bf16.mxu0 %v14928_v22  ;;  %10758 = vmatprep.subr.bf16.mxu1 %v14930_v24  ;;  %v11470_v39 = vrot.slane %v18577_v33, %v17215_v36  ;;  %v15568_v34 = vcombine.high %v1672_v48, %v1752_v9  ;;  %v15570_v13 = vcombine.high %v1673_v4, %v1753_v7  ;;  %v1912_v22 = vunpack.c.l.s8.bf16 %v915_v28 }
 0x4da   : > { %v1833_v42 = vunpack.c.h.s8.bf16 %v875_v61  ;;  %v1913_v55 = vunpack.c.h.s8.bf16 %v915_v28  ;;  %v11478_v15 = vrot.slane %v18577_v33, %v17218_v43  ;;  %v11474_v24 = vrot.slane %v18577_v33, %v17221_v44 }
 0x4db   : > { %16044 = vmatmul.mubr.msk.bf16.vlgmr.msra.gmra.mrb[144].mxu0 %vm7198_vm1, %v16950_v32  ;;  %16046 = vmatmul.mubr.msk.bf16.vlgmr.msra.gmra.mrb[144].mxu1 %vm7198_vm1, %v16950_v32  ;;  %v1992_v51 = vunpack.c.l.s8.bf16 %v955_v21  ;;  %v1993_v30 = vunpack.c.h.s8.bf16 %v955_v21  ;;  %v12470_v16 = vrot.slane %v18585_v5, %v17215_v36  ;;  %v12478_v26 = vrot.slane %v18585_v5, %v17218_v43  ;;  %v596_v21 = vld [vmem:[%s16913_s21 + $0x4f0] sm:$0xff] }
 0x4dc   : > { %10718 = vmatpush1.bf16.msra.mxu0 %v14927_v2  ;;  %10759 = vmatpush1.bf16.msra.mxu1 %v14929_v47  ;;  %v11482_v62 = vrot.slane %v18577_v33, %v17226_v49  ;;  %v15567_v38 = vcombine.low %v1672_v48, %v1752_v9  ;;  %v12474_v2 = vrot.slane %v18585_v5, %v17221_v44  ;;  %v1034_v40 = vunpack.c.l.s8.bf16 %v476_v10 }
 0x4dd   : > { %10719 = vmatprep.subr.bf16.mxu0 %v15088_v45  ;;  %10760 = vmatprep.subr.bf16.mxu1 %v15090_v12  ;;  %v12482_v47 = vrot.slane %v18585_v5, %v17226_v49  ;;  %v15569_v6 = vcombine.low %v1673_v4, %v1753_v7  ;;  %v15728_v35 = vcombine.high %v1832_v14, %v1912_v22  ;;  %v1114_v5 = vunpack.c.l.s8.bf16 %v516_v29 }
 0x4de   : > { %10749 = vmatprep.mubr.bf16.mxu0 %v16605_v0  ;;  %10790 = vmatprep.mubr.bf16.mxu1 %v16605_v0  ;;  %v15730_v45 = vcombine.high %v1833_v42, %v1913_v55  ;;  %v15727_v12 = vcombine.low %v1832_v14, %v1912_v22  ;;  %v15729_v33 = vcombine.low %v1833_v42, %v1913_v55  ;;  %v1035_v48 = vunpack.c.h.s8.bf16 %v476_v10  ;;  %v636_v55 = vld [vmem:[%s16913_s21 + $0x630] sm:$0xff] }
 0x4df   : > { %v1115_v9 = vunpack.c.h.s8.bf16 %v516_v29  ;;  %v15890_v61 = vcombine.high %v1993_v30, %v1993_v30  ;;  %v1355_v29 = vunpack.c.h.s8.bf16 %v636_v55 }
 0x4e0   : > { %10720 = vmatpush1.bf16.msra.mxu0 %v15087_v46  ;;  %10761 = vmatpush1.bf16.msra.mxu1 %v15089_v20  ;;  %v15888_v46 = vcombine.high %v1992_v51, %v1992_v51  ;;  %v15887_v20 = vcombine.low %v1992_v51, %v1992_v51 }
 0x4e1   : > { %10721 = vmatprep.subr.bf16.mxu0 %v15248_v58  ;;  %10762 = vmatprep.subr.bf16.mxu1 %v15250_v52  ;;  %v15889_v58 = vcombine.low %v1993_v30, %v1993_v30  ;;  %v14934_v42 = vcombine.high %v1035_v48, %v1115_v9  ;;  %v1275_v30 = vunpack.c.h.s8.bf16 %v596_v21 }
 0x4e3   : > { %v7654_v22 = vsel %vm7202_vm0, %v15889_v58, 0 }
 0x4e4   : > { %10722 = vmatpush1.bf16.msra.mxu0 %v15247_v25  ;;  %10763 = vmatpush1.bf16.msra.mxu1 %v15249_v18 }
 0x4e5   : > { %10723 = vmatprep.subr.bf16.mxu0 %v15408_v27  ;;  %10764 = vmatprep.subr.bf16.mxu1 %v15410_v19 }
 0x4e8   : > { %10724 = vmatpush1.bf16.msra.mxu0 %v15407_v8  ;;  %10765 = vmatpush1.bf16.msra.mxu1 %v15409_v11  ;;  %v556_v11 = vld [vmem:[%s16913_s21 + $0x3b0] sm:$0xff] }
 0x4e9   : > { %10725 = vmatprep.subr.bf16.mxu0 %v15568_v34  ;;  %10766 = vmatprep.subr.bf16.mxu1 %v15570_v13  ;;  %v14932_v34 = vcombine.high %v1034_v40, %v1114_v5  ;;  %v1195_v51 = vunpack.c.h.s8.bf16 %v556_v11 }
 0x4ea   : > { %v10095_v57 = vpop.f32.mrb[116].mxu0  ;;  %v10136_v37 = vpop.f32.mrb[116].mxu1 }
 0x4eb   : > { %v11919_v52 = vmul.f32 %v11470_v39, %v10095_v57  ;;  %v11921_v63 = vmul.f32 %v11478_v15, %v10136_v37  ;;  %v10097_v23 = vpop.f32.mrb[117].mxu0  ;;  %v10138_v41 = vpop.f32.mrb[117].mxu1  ;;  %v7648_v39 = vsel %vm7202_vm0, %v15887_v20, 0  ;;  %v1194_v15 = vunpack.c.l.s8.bf16 %v556_v11  ;;  %v956_v11 = vld [vmem:[%s16913_s21 + $0x1030] sm:$0x55] }
 0x4ec   : > { %v11920_v1 = vmul.f32 %v11474_v24, %v10097_v23  ;;  %v11922_v3 = vmul.f32 %v11482_v62, %v10138_v41  ;;  %v10099_v25 = vpop.f32.mrb[118].mxu0  ;;  %v10140_v18 = vpop.f32.mrb[118].mxu1  ;;  %10726 = vmatpush1.bf16.msra.mxu0 %v15567_v38  ;;  %10767 = vmatpush1.bf16.msra.mxu1 %v15569_v6  ;;  %v1274_v24 = vunpack.c.l.s8.bf16 %v596_v21  ;;  %v14931_v38 = vcombine.low %v1034_v40, %v1114_v5  ;;  %v796_v40 = vld [vmem:[%s16913_s21 + $0xb30] sm:$0xff] }
 0x4ed   : > { %v12919_v4 = vadd.f32 %v12470_v16, %v11919_v52  ;;  %v12921_v7 = vadd.f32 %v12478_v26, %v11921_v63  ;;  %v10100_v27 = vpop.f32.mrb[119].mxu0  ;;  %v10141_v19 = vpop.f32.mrb[119].mxu1  ;;  %10727 = vmatprep.subr.bf16.mxu0 %v15728_v35  ;;  %10768 = vmatprep.subr.bf16.mxu1 %v15730_v45  ;;  %v676_v16 = vld [vmem:[%s16913_s21 + $0x770] sm:$0xff]  ;;  %v13849_v57 = vrot.slane %v13841_v59, %v17188_v56  ;;  %v1674_v25 = vunpack.c.l.s8.bf16 %v796_v40 }
 0x4ee   : > { %v12920_v28 = vadd.f32 %v12474_v2, %v11920_v1  ;;  %v12922_v8 = vadd.f32 %v12482_v47, %v11922_v3  ;;  %v14933_v2 = vcombine.low %v1035_v48, %v1115_v9  ;;  %v1354_v47 = vunpack.c.l.s8.bf16 %v636_v55  ;;  %v836_v5 = vld [vmem:[%s16913_s21 + $0xc70] sm:$0xff]  ;;  %v18677_v27 = vld [vmem:[%s17134_s20 + $0x78] sm:$0xff] }
 0x4ef   : > { %v1434_v10 = vunpack.c.l.s8.bf16 %v676_v16  ;;  %v1435_v35 = vunpack.c.h.s8.bf16 %v676_v16  ;;  %v15092_v45 = vcombine.high %v1194_v15, %v1274_v24  ;;  %v15091_v20 = vcombine.low %v1194_v15, %v1274_v24  ;;  %v876_v19 = vld [vmem:[%s16913_s21 + $0xdb0] sm:$0xff] }
 0x4f0   : > { %v13811_v13 = vcombine.low %v12919_v4, %v12920_v28  ;;  %v13812_v14 = vcombine.low %v12921_v7, %v12922_v8  ;;  %10728 = vmatpush1.bf16.msra.mxu0 %v15727_v12  ;;  %10769 = vmatpush1.bf16.msra.mxu1 %v15729_v33  ;;  %v15094_v12 = vcombine.high %v1195_v51, %v1275_v30  ;;  %v716_v33 = vld [vmem:[%s16913_s21 + $0x8b0] sm:$0xff]  ;;  %v1754_v18 = vunpack.c.l.s8.bf16 %v836_v5 }
 0x4f1   : > { %16047 = vmatprep.subr.msk.bf16.mxu0 %vm7202_vm0, %v15888_v46  ;;  %16049 = vmatprep.subr.msk.bf16.mxu1 %vm7202_vm0, %v15890_v61  ;;  %v756_v46 = vld [vmem:[%s16913_s21 + $0x9f0] sm:$0xff]  ;;  %v15093_v58 = vcombine.low %v1195_v51, %v1275_v30  ;;  %v15252_v17 = vcombine.high %v1354_v47, %v1434_v10  ;;  %v15254_v31 = vcombine.high %v1355_v29, %v1435_v35  ;;  %v1514_v59 = vunpack.c.l.s8.bf16 %v716_v33 }
 0x4f2   : > { %v13833_v26 = vrot.slane %v13811_v13, %v17188_v56  ;;  %v13840_v62 = vrot.slane %v13812_v14, %v17188_v56  ;;  %v1594_v63 = vunpack.c.l.s8.bf16 %v756_v46  ;;  %v1515_v23 = vunpack.c.h.s8.bf16 %v716_v33  ;;  %v916_v61 = vld [vmem:[%s16913_s21 + $0xef0] sm:$0xff] }
 0x4f3   : > { %v1595_v41 = vunpack.c.h.s8.bf16 %v756_v46  ;;  %v15251_v1 = vcombine.low %v1354_v47, %v1434_v10  ;;  %v15253_v3 = vcombine.low %v1355_v29, %v1435_v35  ;;  %v1675_v48 = vunpack.c.h.s8.bf16 %v796_v40  ;;  %v477_v10 = vld [vmem:[%s16913_s21 + $0x138] sm:$0xff] }
 0x4f4   : > { %v13842_v6 = vcombine.low %v13833_v26, %v13840_v62  ;;  %10730 = vmatpush1.bf16.msra.mxu0 %v7648_v39  ;;  %10771 = vmatpush1.bf16.msra.mxu1 %v7654_v22  ;;  %v1755_v9 = vunpack.c.h.s8.bf16 %v836_v5  ;;  %v15412_v4 = vcombine.high %v1514_v59, %v1594_v63  ;;  %v15411_v28 = vcombine.low %v1514_v59, %v1594_v63  ;;  %v18685_v39 = vld [vmem:[%s17147_s22 + $0x78] sm:$0xff] }
 0x4f5   : > { %10799 = vmatprep.subr.bf16.mxu0 %v14932_v34  ;;  %10840 = vmatprep.subr.bf16.mxu1 %v14934_v42  ;;  %v15414_v7 = vcombine.high %v1515_v23, %v1595_v41  ;;  %v15413_v8 = vcombine.low %v1515_v23, %v1595_v41  ;;  %v11486_v21 = vrot.slane %v18677_v27, %v17130_v50  ;;  %v1834_v14 = vunpack.c.l.s8.bf16 %v876_v19  ;;  %v517_v29 = vld [vmem:[%s16913_s21 + $0x278] sm:$0xff] }
 0x4f6   : > { %v13856_v37 = vrot.slane %v13842_v6, %v17188_v56  ;;  %v15572_v34 = vcombine.high %v1674_v25, %v1754_v18  ;;  %v15574_v13 = vcombine.high %v1675_v48, %v1755_v9  ;;  %v1914_v22 = vunpack.c.l.s8.bf16 %v916_v61 }
 0x4f7   : > { %16048 = vmatmul.mubr.msk.bf16.vlgmr.msra.gmra.mrb[148].mxu0 %vm7198_vm1, %v16950_v32  ;;  %16050 = vmatmul.mubr.msk.bf16.vlgmr.msra.gmra.mrb[148].mxu1 %vm7198_vm1, %v16950_v32  ;;  %v1835_v42 = vunpack.c.h.s8.bf16 %v876_v19  ;;  %v1915_v55 = vunpack.c.h.s8.bf16 %v916_v61  ;;  %v11494_v15 = vrot.slane %v18677_v27, %v17140_v53  ;;  %v11490_v24 = vrot.slane %v18677_v27, %v17143_v54 }
 0x4f8   : > { %v13857_v52 = vcombine.low %v13849_v57, %v13856_v37  ;;  %10800 = vmatpush1.bf16.msra.mxu0 %v14931_v38  ;;  %10841 = vmatpush1.bf16.msra.mxu1 %v14933_v2  ;;  %v1994_v51 = vunpack.c.l.s8.bf16 %v956_v11  ;;  %v1995_v30 = vunpack.c.h.s8.bf16 %v956_v11  ;;  %v12486_v16 = vrot.slane %v18685_v39, %v17130_v50 }
 0x4f9   : > { %10801 = vmatprep.subr.bf16.mxu0 %v15092_v45  ;;  %10842 = vmatprep.subr.bf16.mxu1 %v15094_v12  ;;  %v11498_v26 = vrot.slane %v18677_v27, %v17155_v60  ;;  %v15571_v62 = vcombine.low %v1674_v25, %v1754_v18  ;;  %v15573_v38 = vcombine.low %v1675_v48, %v1755_v9  ;;  %v1036_v63 = vunpack.c.l.s8.bf16 %v477_v10 }
 0x4fa   : > { %14137 = vst [vmem:[%s17271_s17 + $0x70] sm:$0xff] %v13857_v52  ;;  %10831 = vmatprep.mubr.bf16.mxu0 %v16605_v0  ;;  %10872 = vmatprep.mubr.bf16.mxu1 %v16605_v0  ;;  %v12494_v2 = vrot.slane %v18685_v39, %v17140_v53  ;;  %v12490_v47 = vrot.slane %v18685_v39, %v17143_v54  ;;  %v1116_v23 = vunpack.c.l.s8.bf16 %v517_v29  ;;  %v1117_v25 = vunpack.c.h.s8.bf16 %v517_v29 }
 0x4fb   : > { %v12498_v6 = vrot.slane %v18685_v39, %v17155_v60  ;;  %v15732_v35 = vcombine.high %v1834_v14, %v1914_v22  ;;  %v15734_v45 = vcombine.high %v1835_v42, %v1915_v55  ;;  %v15731_v12 = vcombine.low %v1834_v14, %v1914_v22 }
 0x4fc   : > { %10802 = vmatpush1.bf16.msra.mxu0 %v15091_v20  ;;  %10843 = vmatpush1.bf16.msra.mxu1 %v15093_v58  ;;  %v15733_v33 = vcombine.low %v1835_v42, %v1915_v55  ;;  %v15892_v46 = vcombine.high %v1994_v51, %v1994_v51  ;;  %v15891_v20 = vcombine.low %v1994_v51, %v1994_v51  ;;  %v637_v42 = vld [vmem:[%s16913_s21 + $0x638] sm:$0xff] }
 0x4fd   : > { %10803 = vmatprep.subr.bf16.mxu0 %v15252_v17  ;;  %10844 = vmatprep.subr.bf16.mxu1 %v15254_v31  ;;  %v15893_v58 = vcombine.low %v1995_v30, %v1995_v30 }
 0x4fe   : > { %v7660_v11 = vsel %vm7202_vm0, %v15891_v20, 0 }
 0x4ff   : > { %v7666_v14 = vsel %vm7202_vm0, %v15893_v58, 0 }
 0x500   : > { %10804 = vmatpush1.bf16.msra.mxu0 %v15251_v1  ;;  %10845 = vmatpush1.bf16.msra.mxu1 %v15253_v3  ;;  %v1037_v3 = vunpack.c.h.s8.bf16 %v477_v10  ;;  %v1357_v10 = vunpack.c.h.s8.bf16 %v637_v42 }
 0x501   : > { %10805 = vmatprep.subr.bf16.mxu0 %v15412_v4  ;;  %10846 = vmatprep.subr.bf16.mxu1 %v15414_v7  ;;  %v15894_v7 = vcombine.high %v1995_v30, %v1995_v30  ;;  %v677_v30 = vld [vmem:[%s16913_s21 + $0x778] sm:$0xff] }
 0x502   : > { %v14938_v22 = vcombine.high %v1037_v3, %v1117_v25  ;;  %v1437_v29 = vunpack.c.h.s8.bf16 %v677_v30 }
 0x504   : > { %10806 = vmatpush1.bf16.msra.mxu0 %v15411_v28  ;;  %10847 = vmatpush1.bf16.msra.mxu1 %v15413_v8  ;;  %v557_v28 = vld [vmem:[%s16913_s21 + $0x3b8] sm:$0xff]  ;;  %v15258_v20 = vcombine.high %v1357_v10, %v1437_v29 }
 0x505   : > { %10807 = vmatprep.subr.bf16.mxu0 %v15572_v34  ;;  %10848 = vmatprep.subr.bf16.mxu1 %v15574_v13  ;;  %v597_v8 = vld [vmem:[%s16913_s21 + $0x4f8] sm:$0xff]  ;;  %v1196_v55 = vunpack.c.l.s8.bf16 %v557_v28 }
 0x506   : > { %v10177_v57 = vpop.f32.mrb[120].mxu0  ;;  %v10218_v37 = vpop.f32.mrb[120].mxu1  ;;  %v1277_v51 = vunpack.c.h.s8.bf16 %v597_v8 }
 0x507   : > { %v11923_v52 = vmul.f32 %v11486_v21, %v10177_v57  ;;  %v11925_v17 = vmul.f32 %v11494_v15, %v10218_v37  ;;  %v10179_v31 = vpop.f32.mrb[121].mxu0  ;;  %v10220_v59 = vpop.f32.mrb[121].mxu1  ;;  %v14936_v21 = vcombine.high %v1036_v63, %v1116_v23  ;;  %v1276_v15 = vunpack.c.l.s8.bf16 %v597_v8  ;;  %v757_v57 = vld [vmem:[%s16913_s21 + $0x9f8] sm:$0xff] }
 0x508   : > { %v11924_v41 = vmul.f32 %v11490_v24, %v10179_v31  ;;  %v11926_v40 = vmul.f32 %v11498_v26, %v10220_v59  ;;  %v10181_v5 = vpop.f32.mrb[122].mxu0  ;;  %v10222_v1 = vpop.f32.mrb[122].mxu1  ;;  %10808 = vmatpush1.bf16.msra.mxu0 %v15571_v62  ;;  %10849 = vmatpush1.bf16.msra.mxu1 %v15573_v38  ;;  %v1197_v24 = vunpack.c.h.s8.bf16 %v557_v28  ;;  %v14935_v62 = vcombine.low %v1036_v63, %v1116_v23  ;;  %v797_v59 = vld [vmem:[%s16913_s21 + $0xb38] sm:$0xff] }
 0x509   : > { %v12923_v18 = vadd.f32 %v12486_v16, %v11923_v52  ;;  %v12925_v48 = vadd.f32 %v12494_v2, %v11925_v17  ;;  %v10182_v9 = vpop.f32.mrb[123].mxu0  ;;  %v10223_v4 = vpop.f32.mrb[123].mxu1  ;;  %10809 = vmatprep.subr.bf16.mxu0 %v15732_v35  ;;  %10850 = vmatprep.subr.bf16.mxu1 %v15734_v45  ;;  %v14937_v38 = vcombine.low %v1037_v3, %v1117_v25  ;;  %v1356_v2 = vunpack.c.l.s8.bf16 %v637_v42  ;;  %v837_v63 = vld [vmem:[%s16913_s21 + $0xc78] sm:$0xff] }
 0x50a   : > { %v12924_v19 = vadd.f32 %v12490_v47, %v11924_v41  ;;  %v12926_v61 = vadd.f32 %v12498_v6, %v11926_v40  ;;  %v1436_v6 = vunpack.c.l.s8.bf16 %v677_v30  ;;  %v15096_v35 = vcombine.high %v1196_v55, %v1276_v15  ;;  %v917_v9 = vld [vmem:[%s16913_s21 + $0xef8] sm:$0xff] }
 0x50b   : > { %v15098_v45 = vcombine.high %v1197_v24, %v1277_v51  ;;  %v15095_v37 = vcombine.low %v1196_v55, %v1276_v15  ;;  %v1596_v52 = vunpack.c.l.s8.bf16 %v757_v57  ;;  %v1597_v31 = vunpack.c.h.s8.bf16 %v757_v57 }
 0x50c   : > { %v13858_v34 = vcombine.low %v12923_v18, %v12924_v19  ;;  %v13859_v13 = vcombine.low %v12925_v48, %v12926_v61  ;;  %10810 = vmatpush1.bf16.msra.mxu0 %v15731_v12  ;;  %10851 = vmatpush1.bf16.msra.mxu1 %v15733_v33  ;;  %v717_v12 = vld [vmem:[%s16913_s21 + $0x8b8] sm:$0xff]  ;;  %v15097_v33 = vcombine.low %v1197_v24, %v1277_v51  ;;  %v1676_v40 = vunpack.c.l.s8.bf16 %v797_v59 }
 0x50d   : > { %16051 = vmatprep.subr.msk.bf16.mxu0 %vm7202_vm0, %v15892_v46  ;;  %16053 = vmatprep.subr.msk.bf16.mxu1 %vm7202_vm0, %v15894_v7  ;;  %v15256_v46 = vcombine.high %v1356_v2, %v1436_v6  ;;  %v1516_v58 = vunpack.c.l.s8.bf16 %v717_v12  ;;  %v1517_v17 = vunpack.c.h.s8.bf16 %v717_v12  ;;  %v15255_v23 = vcombine.low %v1356_v2, %v1436_v6  ;;  %v877_v48 = vld [vmem:[%s16913_s21 + $0xdb8] sm:$0xff] }
 0x50e   : > { %v18712_v16 = vrot.slane %v13858_v34, %v17188_v56  ;;  %v18715_v26 = vrot.slane %v13859_v13, %v17188_v56  ;;  %v15257_v41 = vcombine.low %v1357_v10, %v1437_v29  ;;  %v1756_v5 = vunpack.c.l.s8.bf16 %v837_v63  ;;  %v957_v61 = vld [vmem:[%s16913_s21 + $0x1038] sm:$0x55] }
 0x50f   : > { %v1677_v1 = vunpack.c.h.s8.bf16 %v797_v59  ;;  %v1757_v3 = vunpack.c.h.s8.bf16 %v837_v63  ;;  %v15416_v25 = vcombine.high %v1516_v58, %v1596_v52  ;;  %v15418_v18 = vcombine.high %v1517_v17, %v1597_v31 }
 0x510   : > { %v13890_v47 = vcombine.low %v18712_v16, %v18715_v26  ;;  %10812 = vmatpush1.bf16.msra.mxu0 %v7660_v11  ;;  %10853 = vmatpush1.bf16.msra.mxu1 %v7666_v14  ;;  %v15415_v4 = vcombine.low %v1516_v58, %v1596_v52  ;;  %v15417_v7 = vcombine.low %v1517_v17, %v1597_v31  ;;  %v1836_v28 = vunpack.c.l.s8.bf16 %v877_v48 }
 0x511   : > { %10881 = vmatprep.subr.bf16.mxu0 %v14936_v21  ;;  %10922 = vmatprep.subr.bf16.mxu1 %v14938_v22  ;;  %v15578_v19 = vcombine.high %v1677_v1, %v1757_v3  ;;  %v1916_v8 = vunpack.c.l.s8.bf16 %v917_v9  ;;  %v1837_v11 = vunpack.c.h.s8.bf16 %v877_v48  ;;  %v1917_v21 = vunpack.c.h.s8.bf16 %v917_v9 }
 0x512   : > { %v11502_v34 = vrot.slane %v18677_v27, %v17215_v36  ;;  %v11510_v13 = vrot.slane %v18677_v27, %v17218_v43  ;;  %v12502_v14 = vrot.slane %v18685_v39, %v17215_v36  ;;  %v11506_v22 = vrot.slane %v18677_v27, %v17221_v44 }
 0x513   : > { %16052 = vmatmul.mubr.msk.bf16.vlgmr.msra.gmra.mrb[152].mxu0 %vm7198_vm1, %v16950_v32  ;;  %16054 = vmatmul.mubr.msk.bf16.vlgmr.msra.gmra.mrb[152].mxu1 %vm7198_vm1, %v16950_v32  ;;  %v1996_v42 = vunpack.c.l.s8.bf16 %v957_v61  ;;  %v1997_v55 = vunpack.c.h.s8.bf16 %v957_v61  ;;  %v11514_v15 = vrot.slane %v18677_v27, %v17226_v49  ;;  %v15575_v24 = vcombine.low %v1676_v40, %v1756_v5  ;;  %v10979_v61 = vld [vmem:[%s17134_s20 + $0x80] sm:$0xff] }
 0x514   : > { %10882 = vmatpush1.bf16.msra.mxu0 %v14935_v62  ;;  %10923 = vmatpush1.bf16.msra.mxu1 %v14937_v38  ;;  %v15577_v51 = vcombine.low %v1677_v1, %v1757_v3  ;;  %v12510_v30 = vrot.slane %v18685_v39, %v17218_v43  ;;  %v15736_v62 = vcombine.high %v1836_v28, %v1916_v8 }
 0x515   : > { %10883 = vmatprep.subr.bf16.mxu0 %v15096_v35  ;;  %10924 = vmatprep.subr.bf16.mxu1 %v15098_v45  ;;  %v15738_v38 = vcombine.high %v1837_v11, %v1917_v21  ;;  %v12506_v10 = vrot.slane %v18685_v39, %v17221_v44  ;;  %v12514_v29 = vrot.slane %v18685_v39, %v17226_v49 }
 0x516   : > { %10913 = vmatprep.mubr.bf16.mxu0 %v16605_v0  ;;  %10954 = vmatprep.mubr.bf16.mxu1 %v16605_v0  ;;  %v15576_v0 = vcombine.high %v1676_v40, %v1756_v5  ;;  %v15735_v35 = vcombine.low %v1836_v28, %v1916_v8  ;;  %v15737_v45 = vcombine.low %v1837_v11, %v1917_v21  ;;  %v11979_v28 = vld [vmem:[%s17147_s22 + $0x80] sm:$0xff] }
 0x517   : > { %v15895_v31 = vcombine.low %v1996_v42, %v1996_v42  ;;  %v15897_v39 = vcombine.low %v1997_v55, %v1997_v55  ;;  %v11518_v8 = vrot.slane %v10979_v61, %v17130_v50  ;;  %v11526_v11 = vrot.slane %v10979_v61, %v17140_v53 }
 0x518   : > { %10884 = vmatpush1.bf16.msra.mxu0 %v15095_v37  ;;  %10925 = vmatpush1.bf16.msra.mxu1 %v15097_v33  ;;  %v15896_v33 = vcombine.high %v1996_v42, %v1996_v42  ;;  %v11522_v21 = vrot.slane %v10979_v61, %v17143_v54  ;;  %v11530_v16 = vrot.slane %v10979_v61, %v17155_v60 }
 0x519   : > { %10885 = vmatprep.subr.bf16.mxu0 %v15256_v46  ;;  %10926 = vmatprep.subr.bf16.mxu1 %v15258_v20  ;;  %v15898_v46 = vcombine.high %v1997_v55, %v1997_v55  ;;  %v12518_v26 = vrot.slane %v11979_v28, %v17130_v50 }
 0x51c   : > { %10886 = vmatpush1.bf16.msra.mxu0 %v15255_v23  ;;  %10927 = vmatpush1.bf16.msra.mxu1 %v15257_v41 }
 0x51d   : > { %10887 = vmatprep.subr.bf16.mxu0 %v15416_v25  ;;  %10928 = vmatprep.subr.bf16.mxu1 %v15418_v18  ;;  %v7672_v25 = vsel %vm7202_vm0, %v15895_v31, 0  ;;  %v7678_v18 = vsel %vm7202_vm0, %v15897_v39, 0 }
 0x520   : > { %10888 = vmatpush1.bf16.msra.mxu0 %v15415_v4  ;;  %10929 = vmatpush1.bf16.msra.mxu1 %v15417_v7  ;;  %v13898_v7 = vrot.slane %v13890_v47, %v17188_v56  ;;  %v12526_v47 = vrot.slane %v11979_v28, %v17140_v53 }
 0x521   : > { %10889 = vmatprep.subr.bf16.mxu0 %v15576_v0  ;;  %10930 = vmatprep.subr.bf16.mxu1 %v15578_v19 }
 0x522   : > { %v10259_v2 = vpop.f32.mrb[124].mxu0  ;;  %v10300_v6 = vpop.f32.mrb[124].mxu1 }
 0x523   : > { %v11927_v27 = vmul.f32 %v11502_v34, %v10259_v2  ;;  %v11929_v12 = vmul.f32 %v11510_v13, %v10300_v6  ;;  %v10261_v57 = vpop.f32.mrb[125].mxu0  ;;  %v10302_v37 = vpop.f32.mrb[125].mxu1 }
 0x524   : > { %v11928_v20 = vmul.f32 %v11506_v22, %v10261_v57  ;;  %v11930_v58 = vmul.f32 %v11514_v15, %v10302_v37  ;;  %v10263_v52 = vpop.f32.mrb[126].mxu0  ;;  %v10304_v17 = vpop.f32.mrb[126].mxu1  ;;  %10890 = vmatpush1.bf16.msra.mxu0 %v15575_v24  ;;  %10931 = vmatpush1.bf16.msra.mxu1 %v15577_v51 }
 0x525   : > { %v12927_v59 = vadd.f32 %v12502_v14, %v11927_v27  ;;  %v12929_v63 = vadd.f32 %v12510_v30, %v11929_v12  ;;  %v10264_v23 = vpop.f32.mrb[127].mxu0  ;;  %v10305_v41 = vpop.f32.mrb[127].mxu1  ;;  %10891 = vmatprep.subr.bf16.mxu0 %v15736_v62  ;;  %10932 = vmatprep.subr.bf16.mxu1 %v15738_v38  ;;  %v12530_v14 = vrot.slane %v11979_v28, %v17155_v60 }
 0x526   : > { %v12928_v40 = vadd.f32 %v12506_v10, %v11928_v20  ;;  %v12930_v5 = vadd.f32 %v12514_v29, %v11930_v58  ;;  %v11538_v20 = vrot.slane %v10979_v61, %v17221_v44  ;;  %v11546_v58 = vrot.slane %v10979_v61, %v17226_v49 }
 0x527   : > { %v12534_v52 = vrot.slane %v11979_v28, %v17215_v36  ;;  %v12542_v17 = vrot.slane %v11979_v28, %v17218_v43  ;;  %v12546_v23 = vrot.slane %v11979_v28, %v17226_v49 }
 0x528   : > { %v13860_v1 = vcombine.low %v12927_v59, %v12928_v40  ;;  %v13861_v3 = vcombine.low %v12929_v63, %v12930_v5  ;;  %10892 = vmatpush1.bf16.msra.mxu0 %v15735_v35  ;;  %10933 = vmatpush1.bf16.msra.mxu1 %v15737_v45  ;;  %v12538_v63 = vrot.slane %v11979_v28, %v17221_v44 }
 0x529   : > { %16055 = vmatprep.subr.msk.bf16.mxu0 %vm7202_vm0, %v15896_v33  ;;  %16057 = vmatprep.subr.msk.bf16.mxu1 %vm7202_vm0, %v15898_v46  ;;  %v11534_v33 = vrot.slane %v10979_v61, %v17215_v36  ;;  %v11542_v46 = vrot.slane %v10979_v61, %v17218_v43 }
 0x52a   : > { %v13882_v48 = vrot.slane %v13860_v1, %v17188_v56  ;;  %v13889_v9 = vrot.slane %v13861_v3, %v17188_v56 }
 0x52c   : > { %v13891_v4 = vcombine.low %v13882_v48, %v13889_v9  ;;  %10894 = vmatpush1.bf16.msra.mxu0 %v7672_v25  ;;  %10935 = vmatpush1.bf16.msra.mxu1 %v7678_v18 }
 0x52e   : > { %v13905_v0 = vrot.slane %v13891_v4, %v17188_v56 }
 0x52f   : > { %16056 = vmatmul.mubr.msk.bf16.vlgmr.msra.gmra.mrb[156].mxu0 %vm7198_vm1, %v16950_v32  ;;  %16058 = vmatmul.mubr.msk.bf16.vlgmr.msra.gmra.mrb[156].mxu1 %vm7198_vm1, %v16950_v32  ;;  %v12522_v32 = vrot.slane %v11979_v28, %v17143_v54 }
 0x530   : > { %v13906_v19 = vcombine.low %v13898_v7, %v13905_v0 }
 0x532   : > { %14138 = vst [vmem:[%s17271_s17 + $0x78] sm:$0xff] %v13906_v19 }
 0x53e   : > { %v10341_v34 = vpop.f32.mrb[128].mxu0  ;;  %v10382_v13 = vpop.f32.mrb[128].mxu1 }
 0x53f   : > { %v11931_v22 = vmul.f32 %v11518_v8, %v10341_v34  ;;  %v11933_v42 = vmul.f32 %v11526_v11, %v10382_v13  ;;  %v10343_v55 = vpop.f32.mrb[129].mxu0  ;;  %v10384_v15 = vpop.f32.mrb[129].mxu1  ;;  %v10980_v34 = vld [vmem:[%s17134_s20 + $0x88] sm:$0xff] }
 0x540   : > { %v11932_v24 = vmul.f32 %v11522_v21, %v10343_v55  ;;  %v11934_v51 = vmul.f32 %v11530_v16, %v10384_v15  ;;  %v10345_v30 = vpop.f32.mrb[130].mxu0  ;;  %v10386_v62 = vpop.f32.mrb[130].mxu1  ;;  %v11980_v13 = vld [vmem:[%s17147_s22 + $0x88] sm:$0xff] }
 0x541   : > { %v12931_v38 = vadd.f32 %v12518_v26, %v11931_v22  ;;  %v12933_v2 = vadd.f32 %v12526_v47, %v11933_v42  ;;  %v10346_v6 = vpop.f32.mrb[131].mxu0  ;;  %v10387_v10 = vpop.f32.mrb[131].mxu1  ;;  %v11554_v22 = vrot.slane %v10980_v34, %v17143_v54  ;;  %v11562_v42 = vrot.slane %v10980_v34, %v17155_v60 }
 0x542   : > { %v12932_v29 = vadd.f32 %v12522_v32, %v11932_v24  ;;  %v12934_v35 = vadd.f32 %v12530_v14, %v11934_v51  ;;  %v11550_v32 = vrot.slane %v10980_v34, %v17130_v50  ;;  %v11558_v14 = vrot.slane %v10980_v34, %v17140_v53 }
 0x543   : > { %v12550_v55 = vrot.slane %v11980_v13, %v17130_v50  ;;  %v12558_v15 = vrot.slane %v11980_v13, %v17140_v53  ;;  %v12554_v30 = vrot.slane %v11980_v13, %v17143_v54  ;;  %v12562_v62 = vrot.slane %v11980_v13, %v17155_v60 }
 0x544   : > { %v13907_v45 = vcombine.low %v12931_v38, %v12932_v29  ;;  %v13908_v27 = vcombine.low %v12933_v2, %v12934_v35 }
 0x546   : > { %v13917_v12 = vrot.slane %v13907_v45, %v17188_v56  ;;  %v13924_v57 = vrot.slane %v13908_v27, %v17188_v56 }
 0x548   : > { %v13939_v37 = vcombine.low %v13917_v12, %v13924_v57 }
 0x54a   : > { %v13947_v16 = vrot.slane %v13939_v37, %v17188_v56 }
 0x55a   : > { %v10423_v31 = vpop.f32.mrb[132].mxu0  ;;  %v10464_v59 = vpop.f32.mrb[132].mxu1 }
 0x55b   : > { %v11935_v41 = vmul.f32 %v11534_v33, %v10423_v31  ;;  %v11937_v39 = vmul.f32 %v11542_v46, %v10464_v59  ;;  %v10425_v40 = vpop.f32.mrb[133].mxu0  ;;  %v10466_v5 = vpop.f32.mrb[133].mxu1 }
 0x55c   : > { %v11936_v1 = vmul.f32 %v11538_v20, %v10425_v40  ;;  %v11938_v3 = vmul.f32 %v11546_v58, %v10466_v5  ;;  %v10427_v25 = vpop.f32.mrb[134].mxu0  ;;  %v10468_v18 = vpop.f32.mrb[134].mxu1  ;;  %v12566_v40 = vrot.slane %v11980_v13, %v17215_v36  ;;  %v12574_v5 = vrot.slane %v11980_v13, %v17218_v43 }
 0x55d   : > { %v12935_v48 = vadd.f32 %v12534_v52, %v11935_v41  ;;  %v12937_v9 = vadd.f32 %v12542_v17, %v11937_v39  ;;  %v10428_v4 = vpop.f32.mrb[135].mxu0  ;;  %v10469_v7 = vpop.f32.mrb[135].mxu1  ;;  %v11570_v41 = vrot.slane %v10980_v34, %v17221_v44  ;;  %v11578_v39 = vrot.slane %v10980_v34, %v17226_v49 }
 0x55e   : > { %v12936_v0 = vadd.f32 %v12538_v63, %v11936_v1  ;;  %v12938_v19 = vadd.f32 %v12546_v23, %v11938_v3  ;;  %v11566_v63 = vrot.slane %v10980_v34, %v17215_v36  ;;  %v11574_v23 = vrot.slane %v10980_v34, %v17218_v43 }
 0x55f   : > { %v12570_v25 = vrot.slane %v11980_v13, %v17221_v44  ;;  %v12578_v18 = vrot.slane %v11980_v13, %v17226_v49 }
 0x560   : > { %v13909_v61 = vcombine.low %v12935_v48, %v12936_v0  ;;  %v13910_v8 = vcombine.low %v12937_v9, %v12938_v19 }
 0x562   : > { %v13931_v28 = vrot.slane %v13909_v61, %v17188_v56  ;;  %v13938_v11 = vrot.slane %v13910_v8, %v17188_v56 }
 0x564   : > { %v13940_v21 = vcombine.low %v13931_v28, %v13938_v11 }
 0x566   : > { %v13954_v26 = vrot.slane %v13940_v21, %v17188_v56 }
 0x568   : > { %v13955_v47 = vcombine.low %v13947_v16, %v13954_v26 }
 0x56a   : > { %14139 = vst [vmem:[%s17271_s17 + $0x80] sm:$0xff] %v13955_v47 }
 0x576   : > { %v10505_v24 = vpop.f32.mrb[136].mxu0  ;;  %v10546_v51 = vpop.f32.mrb[136].mxu1 }
 0x577   : > { %v11939_v38 = vmul.f32 %v11550_v32, %v10505_v24  ;;  %v11941_v2 = vmul.f32 %v11558_v14, %v10546_v51  ;;  %v10507_v6 = vpop.f32.mrb[137].mxu0  ;;  %v10548_v10 = vpop.f32.mrb[137].mxu1  ;;  %v10981_v24 = vld [vmem:[%s17134_s20 + $0x90] sm:$0xff] }
 0x578   : > { %v11940_v29 = vmul.f32 %v11554_v22, %v10507_v6  ;;  %v11942_v35 = vmul.f32 %v11562_v42, %v10548_v10  ;;  %v10509_v45 = vpop.f32.mrb[138].mxu0  ;;  %v10550_v27 = vpop.f32.mrb[138].mxu1  ;;  %v11981_v51 = vld [vmem:[%s17147_s22 + $0x90] sm:$0xff] }
 0x579   : > { %v12939_v12 = vadd.f32 %v12550_v55, %v11939_v38  ;;  %v12941_v57 = vadd.f32 %v12558_v15, %v11941_v2  ;;  %v10510_v37 = vpop.f32.mrb[139].mxu0  ;;  %v10551_v33 = vpop.f32.mrb[139].mxu1  ;;  %v11586_v38 = vrot.slane %v10981_v24, %v17143_v54  ;;  %v11594_v2 = vrot.slane %v10981_v24, %v17155_v60 }
 0x57a   : > { %v12940_v46 = vadd.f32 %v12554_v30, %v11940_v29  ;;  %v12942_v20 = vadd.f32 %v12562_v62, %v11942_v35  ;;  %v11582_v30 = vrot.slane %v10981_v24, %v17130_v50  ;;  %v11590_v62 = vrot.slane %v10981_v24, %v17140_v53 }
 0x57b   : > { %v12582_v6 = vrot.slane %v11981_v51, %v17130_v50  ;;  %v12590_v10 = vrot.slane %v11981_v51, %v17140_v53  ;;  %v12586_v45 = vrot.slane %v11981_v51, %v17143_v54  ;;  %v12594_v27 = vrot.slane %v11981_v51, %v17155_v60 }
 0x57c   : > { %v13956_v58 = vcombine.low %v12939_v12, %v12940_v46  ;;  %v13957_v52 = vcombine.low %v12941_v57, %v12942_v20 }
 0x57e   : > { %v13966_v17 = vrot.slane %v13956_v58, %v17188_v56  ;;  %v13973_v31 = vrot.slane %v13957_v52, %v17188_v56 }
 0x580   : > { %v13988_v59 = vcombine.low %v13966_v17, %v13973_v31 }
 0x582   : > { %v13996_v42 = vrot.slane %v13988_v59, %v17188_v56 }
 0x592   : > { %v10587_v1 = vpop.f32.mrb[140].mxu0  ;;  %v10628_v3 = vpop.f32.mrb[140].mxu1 }
 0x593   : > { %v11943_v48 = vmul.f32 %v11566_v63, %v10587_v1  ;;  %v11945_v9 = vmul.f32 %v11574_v23, %v10628_v3  ;;  %v10589_v4 = vpop.f32.mrb[141].mxu0  ;;  %v10630_v7 = vpop.f32.mrb[141].mxu1 }
 0x594   : > { %v11944_v0 = vmul.f32 %v11570_v41, %v10589_v4  ;;  %v11946_v19 = vmul.f32 %v11578_v39, %v10630_v7  ;;  %v10591_v61 = vpop.f32.mrb[142].mxu0  ;;  %v10632_v8 = vpop.f32.mrb[142].mxu1  ;;  %v12598_v4 = vrot.slane %v11981_v51, %v17215_v36  ;;  %v12606_v7 = vrot.slane %v11981_v51, %v17218_v43 }
 0x595   : > { %v12943_v28 = vadd.f32 %v12566_v40, %v11943_v48  ;;  %v12945_v11 = vadd.f32 %v12574_v5, %v11945_v9  ;;  %v10592_v21 = vpop.f32.mrb[143].mxu0  ;;  %v10633_v16 = vpop.f32.mrb[143].mxu1  ;;  %v11602_v48 = vrot.slane %v10981_v24, %v17221_v44  ;;  %v11610_v9 = vrot.slane %v10981_v24, %v17226_v49 }
 0x596   : > { %v12944_v26 = vadd.f32 %v12570_v25, %v11944_v0  ;;  %v12946_v47 = vadd.f32 %v12578_v18, %v11946_v19  ;;  %v11598_v25 = vrot.slane %v10981_v24, %v17215_v36  ;;  %v11606_v18 = vrot.slane %v10981_v24, %v17218_v43 }
 0x597   : > { %v12602_v61 = vrot.slane %v11981_v51, %v17221_v44  ;;  %v12610_v8 = vrot.slane %v11981_v51, %v17226_v49 }
 0x598   : > { %v13958_v34 = vcombine.low %v12943_v28, %v12944_v26  ;;  %v13959_v32 = vcombine.low %v12945_v11, %v12946_v47 }
 0x59a   : > { %v13980_v13 = vrot.slane %v13958_v34, %v17188_v56  ;;  %v13987_v14 = vrot.slane %v13959_v32, %v17188_v56 }
 0x59c   : > { %v13989_v22 = vcombine.low %v13980_v13, %v13987_v14 }
 0x59e   : > { %v14003_v55 = vrot.slane %v13989_v22, %v17188_v56 }
 0x5a0   : > { %v14004_v15 = vcombine.low %v13996_v42, %v14003_v55 }
 0x5a2   : > { %14140 = vst [vmem:[%s17271_s17 + $0x88] sm:$0xff] %v14004_v15 }
 0x5ae   : > { %v10669_v29 = vpop.f32.mrb[144].mxu0  ;;  %v10710_v35 = vpop.f32.mrb[144].mxu1 }
 0x5af   : > { %v11947_v12 = vmul.f32 %v11582_v30, %v10669_v29  ;;  %v11949_v57 = vmul.f32 %v11590_v62, %v10710_v35  ;;  %v10671_v37 = vpop.f32.mrb[145].mxu0  ;;  %v10712_v33 = vpop.f32.mrb[145].mxu1  ;;  %v10982_v29 = vld [vmem:[%s17134_s20 + $0x98] sm:$0xff] }
 0x5b0   : > { %v11948_v46 = vmul.f32 %v11586_v38, %v10671_v37  ;;  %v11950_v20 = vmul.f32 %v11594_v2, %v10712_v33  ;;  %v10673_v58 = vpop.f32.mrb[146].mxu0  ;;  %v10714_v52 = vpop.f32.mrb[146].mxu1  ;;  %v11982_v35 = vld [vmem:[%s17147_s22 + $0x98] sm:$0xff] }
 0x5b1   : > { %v12947_v17 = vadd.f32 %v12582_v6, %v11947_v12  ;;  %v12949_v31 = vadd.f32 %v12590_v10, %v11949_v57  ;;  %v10674_v59 = vpop.f32.mrb[147].mxu0  ;;  %v10715_v63 = vpop.f32.mrb[147].mxu1  ;;  %v11618_v12 = vrot.slane %v10982_v29, %v17143_v54  ;;  %v11626_v57 = vrot.slane %v10982_v29, %v17155_v60 }
 0x5b2   : > { %v12948_v23 = vadd.f32 %v12586_v45, %v11948_v46  ;;  %v12950_v41 = vadd.f32 %v12594_v27, %v11950_v20  ;;  %v11614_v45 = vrot.slane %v10982_v29, %v17130_v50  ;;  %v11622_v27 = vrot.slane %v10982_v29, %v17140_v53 }
 0x5b3   : > { %v12614_v37 = vrot.slane %v11982_v35, %v17130_v50  ;;  %v12622_v33 = vrot.slane %v11982_v35, %v17140_v53  ;;  %v12618_v58 = vrot.slane %v11982_v35, %v17143_v54  ;;  %v12626_v52 = vrot.slane %v11982_v35, %v17155_v60 }
 0x5b4   : > { %v14005_v39 = vcombine.low %v12947_v17, %v12948_v23  ;;  %v14006_v40 = vcombine.low %v12949_v31, %v12950_v41 }
 0x5b6   : > { %v14015_v5 = vrot.slane %v14005_v39, %v17188_v56  ;;  %v14022_v1 = vrot.slane %v14006_v40, %v17188_v56 }
 0x5b8   : > { %v14037_v3 = vcombine.low %v14015_v5, %v14022_v1 }
 0x5ba   : > { %v14045_v2 = vrot.slane %v14037_v3, %v17188_v56 }
 0x5ca   : > { %v10751_v0 = vpop.f32.mrb[148].mxu0  ;;  %v10792_v19 = vpop.f32.mrb[148].mxu1 }
 0x5cb   : > { %v11951_v28 = vmul.f32 %v11598_v25, %v10751_v0  ;;  %v11953_v11 = vmul.f32 %v11606_v18, %v10792_v19  ;;  %v10753_v21 = vpop.f32.mrb[149].mxu0  ;;  %v10794_v16 = vpop.f32.mrb[149].mxu1  ;;  %v11634_v0 = vrot.slane %v10982_v29, %v17221_v44  ;;  %v11642_v19 = vrot.slane %v10982_v29, %v17226_v49 }
 0x5cc   : > { %v11952_v26 = vmul.f32 %v11602_v48, %v10753_v21  ;;  %v11954_v47 = vmul.f32 %v11610_v9, %v10794_v16  ;;  %v10755_v34 = vpop.f32.mrb[150].mxu0  ;;  %v10796_v32 = vpop.f32.mrb[150].mxu1  ;;  %v12634_v21 = vrot.slane %v11982_v35, %v17221_v44  ;;  %v12642_v16 = vrot.slane %v11982_v35, %v17226_v49 }
 0x5cd   : > { %v12951_v13 = vadd.f32 %v12598_v4, %v11951_v28  ;;  %v12953_v14 = vadd.f32 %v12606_v7, %v11953_v11  ;;  %v10756_v22 = vpop.f32.mrb[151].mxu0  ;;  %v10797_v42 = vpop.f32.mrb[151].mxu1  ;;  %v11630_v4 = vrot.slane %v10982_v29, %v17215_v36  ;;  %v11638_v7 = vrot.slane %v10982_v29, %v17218_v43 }
 0x5ce   : > { %v12952_v55 = vadd.f32 %v12602_v61, %v11952_v26  ;;  %v12954_v15 = vadd.f32 %v12610_v8, %v11954_v47  ;;  %v12630_v61 = vrot.slane %v11982_v35, %v17215_v36  ;;  %v12638_v8 = vrot.slane %v11982_v35, %v17218_v43 }
 0x5d0   : > { %v14007_v24 = vcombine.low %v12951_v13, %v12952_v55  ;;  %v14008_v30 = vcombine.low %v12953_v14, %v12954_v15 }
 0x5d2   : > { %v14029_v51 = vrot.slane %v14007_v24, %v17188_v56  ;;  %v14036_v62 = vrot.slane %v14008_v30, %v17188_v56 }
 0x5d4   : > { %v14038_v38 = vcombine.low %v14029_v51, %v14036_v62 }
 0x5d6   : > { %v14052_v6 = vrot.slane %v14038_v38, %v17188_v56 }
 0x5d8   : > { %v14053_v10 = vcombine.low %v14045_v2, %v14052_v6 }
 0x5da   : > { %14141 = vst [vmem:[%s17271_s17 + $0x90] sm:$0xff] %v14053_v10 }
 0x5e6   : > { %v10833_v46 = vpop.f32.mrb[152].mxu0  ;;  %v10874_v20 = vpop.f32.mrb[152].mxu1 }
 0x5e7   : > { %v11955_v17 = vmul.f32 %v11614_v45, %v10833_v46  ;;  %v11957_v31 = vmul.f32 %v11622_v27, %v10874_v20  ;;  %v10835_v59 = vpop.f32.mrb[153].mxu0  ;;  %v10876_v63 = vpop.f32.mrb[153].mxu1 }
 0x5e8   : > { %v11956_v23 = vmul.f32 %v11618_v12, %v10835_v59  ;;  %v11958_v41 = vmul.f32 %v11626_v57, %v10876_v63  ;;  %v10837_v39 = vpop.f32.mrb[154].mxu0  ;;  %v10878_v40 = vpop.f32.mrb[154].mxu1 }
 0x5e9   : > { %v12955_v5 = vadd.f32 %v12614_v37, %v11955_v17  ;;  %v12957_v1 = vadd.f32 %v12622_v33, %v11957_v31  ;;  %v10838_v3 = vpop.f32.mrb[155].mxu0  ;;  %v10879_v50 = vpop.f32.mrb[155].mxu1 }
 0x5ea   : > { %v12956_v25 = vadd.f32 %v12618_v58, %v11956_v23  ;;  %v12958_v53 = vadd.f32 %v12626_v52, %v11958_v41 }
 0x5ec   : > { %v14054_v18 = vcombine.low %v12955_v5, %v12956_v25  ;;  %v14055_v48 = vcombine.low %v12957_v1, %v12958_v53 }
 0x5ee   : > { %v14064_v54 = vrot.slane %v14054_v18, %v17188_v56  ;;  %v14071_v60 = vrot.slane %v14055_v48, %v17188_v56 }
 0x5f0   : > { %v14086_v9 = vcombine.low %v14064_v54, %v14071_v60 }
 0x5f2   : > { %v14094_v2 = vrot.slane %v14086_v9, %v17188_v56 }
 0x602   : > { %v10915_v28 = vpop.f32.mrb[156].mxu0  ;;  %v10956_v11 = vpop.f32.mrb[156].mxu1 }
 0x603   : > { %v11959_v26 = vmul.f32 %v11630_v4, %v10915_v28  ;;  %v11961_v47 = vmul.f32 %v11638_v7, %v10956_v11  ;;  %v10917_v34 = vpop.f32.mrb[157].mxu0  ;;  %v10958_v32 = vpop.f32.mrb[157].mxu1 }
 0x604   : > { %v11960_v13 = vmul.f32 %v11634_v0, %v10917_v34  ;;  %v11962_v14 = vmul.f32 %v11642_v19, %v10958_v32  ;;  %v10919_v22 = vpop.f32.mrb[158].mxu0  ;;  %v10960_v42 = vpop.f32.mrb[158].mxu1 }
 0x605   : > { %v12959_v55 = vadd.f32 %v12630_v61, %v11959_v26  ;;  %v12961_v15 = vadd.f32 %v12638_v8, %v11961_v47  ;;  %v10920_v36 = vpop.f32.mrb[159].mxu0  ;;  %v10961_v24 = vpop.f32.mrb[159].mxu1 }
 0x606   : > { %v12960_v43 = vadd.f32 %v12634_v21, %v11960_v13  ;;  %v12962_v30 = vadd.f32 %v12642_v16, %v11962_v14 }
 0x608   : > { %v14056_v51 = vcombine.low %v12959_v55, %v12960_v43  ;;  %v14057_v62 = vcombine.low %v12961_v15, %v12962_v30 }
 0x60a   : > { %v14078_v44 = vrot.slane %v14056_v51, %v17188_v56  ;;  %v14085_v49 = vrot.slane %v14057_v62, %v17188_v56 }
 0x60c   : > { %v14087_v38 = vcombine.low %v14078_v44, %v14085_v49  ;;  %14149 = sbr.rel (!%p19314_p3) target bundleno = 1720 (0x6b8), region = 72 }
 0x60e   : > { %v14101_v6 = vrot.slane %v14087_v38, %v17188_v56 }
 0x610   : > { %v14102_v10 = vcombine.low %v14094_v2, %v14101_v6 }
 0x612   : > { %14142 = vst [vmem:[%s17271_s17 + $0x98] sm:$0xff] %v14102_v10 }
 0x613   : > { %s19336_s8 = smov (!%p14152_p6, %s14151_s8), 160 }
 0x614   : > { %s16059_s23 = sshll.u32 %s19336_s8, 4 }
 0x615   : > { %p16061_p9 = scmp.eq.s32.totalorder %s16059_s23, 0 }
 0x616   : > { %p14160_p7 = scmp.lt.u32.totalorder (!%p16061_p9), %s19336_s8, 8 }
 0x617   : > { %14159 = sbr.rel (%p16061_p9) target bundleno = 1720 (0x6b8), region = 76 }
 0x61e   : > { %14163 = sbr.rel (%p14160_p7) target bundleno = 1711 (0x6af), region = 80  ;;  %s18877_s14 = sand.u32 (!%p14160_p7), 7, %s19336_s8  }
 0x61f   : > { %p14179_p12 = scmp.eq.s32.totalorder (!%p14160_p7), %s18877_s14, 0  ;;  %p16062_p0 = scmp.ne.s32.totalorder (!%p14160_p7), %s18877_s14, 0 }
 0x625   : > { %14182 = sbr.rel (%p16062_p0) target bundleno = 1640 (0x668), region = 95  ;;  %s14183_s0 = sshrl.u32 (!%p16062_p0), %s19336_s8, 3 }
 0x626   : > { %s18884_s26 = sshrl.u32 (!%p16062_p0), %s14183_s0, 6 }
 0x627   : > { %p16063_p1 = scmp.le.s32.totalorder (!%p16062_p0), %s18884_s26, 0 }
 0x62c   : > { %14649 = sbr.rel (%p16063_p1) target bundleno = 1620 (0x654), region = 195  ;;  %s19315_s27 = smov (!%p16063_p1), %s18870_s19 }
 0x62d   : > { %s19316_s24 = smov (!%p16063_p1), %s17271_s17  ;;  %s18893_s10 = smov (!%p16063_p1), 0  }
 0x62e   : > { %s18895_s15 = smov (!%p16063_p1), 0  }
 0x633 LB: >> { %v14196_v56 = vld [vmem:[%s16540_s24] sm:$0xff]  ;;  %v14198_v29 = vld [vmem:[%s16540_s24 + $0x8] sm:$0xff]  ;;  %v14200_v35 = vld [vmem:[%s16540_s24 + $0x10] sm:$0xff]  ;;  %s14324_s12 = sadd.s32 1, %s16544_s10  ;;  %s14190_s15 = sadd.s32 1, %s16548_s15   ;;  %s16548_s15 = sphi %s18895_s15, %s14190_s15   ;;  %s16544_s10 = sphi %s18893_s10, %s19319_s10   ;;  %s16540_s24 = sphi %s19316_s24, %s19318_s24   ;;  %s16536_s27 = sphi %s19315_s27, %s19317_s27  }
 0x634   : >> { %14197 = vst [vmem:[%s16536_s27] sm:$0xff] %v14196_v56  ;;  %14199 = vst [vmem:[%s16536_s27 + $0x8] sm:$0xff] %v14198_v29  ;;  %v14202_v45 = vld [vmem:[%s16540_s24 + $0x18] sm:$0xff]  ;;  %v14204_v27 = vld [vmem:[%s16540_s24 + $0x20] sm:$0xff]  ;;  %p14325_p4 = scmp.ge.s32.totalorder %s14324_s12, %s18884_s26  ;;  %p14189_p8 = scmp.ge.s32.totalorder %s14190_s15, %s18884_s26 }
 0x635   : >> { %14201 = vst [vmem:[%s16536_s27 + $0x10] sm:$0xff] %v14200_v35  ;;  %v14206_v12 = vld [vmem:[%s16540_s24 + $0x28] sm:$0xff]  ;;  %14203 = vst [vmem:[%s16536_s27 + $0x18] sm:$0xff] %v14202_v45  ;;  %v14208_v57 = vld [vmem:[%s16540_s24 + $0x30] sm:$0xff] }
 0x636   : >> { %14205 = vst [vmem:[%s16536_s27 + $0x20] sm:$0xff] %v14204_v27  ;;  %14207 = vst [vmem:[%s16536_s27 + $0x28] sm:$0xff] %v14206_v12  ;;  %v14210_v37 = vld [vmem:[%s16540_s24 + $0x38] sm:$0xff]  ;;  %v14212_v33 = vld [vmem:[%s16540_s24 + $0x40] sm:$0xff]  ;;  %s19338_s12 = smov (%p14325_p4, %s14324_s12), 0 }
 0x637   : >> { %14209 = vst [vmem:[%s16536_s27 + $0x30] sm:$0xff] %v14208_v57  ;;  %14211 = vst [vmem:[%s16536_s27 + $0x38] sm:$0xff] %v14210_v37  ;;  %v14214_v46 = vld [vmem:[%s16540_s24 + $0x48] sm:$0xff]  ;;  %v14216_v20 = vld [vmem:[%s16540_s24 + $0x50] sm:$0xff]  ;;  %s16064_s21 = sshll.u32 %s19338_s12, 9  ;;  %s19319_s10 = smov %s19338_s12 }
 0x638   : >> { %14213 = vst [vmem:[%s16536_s27 + $0x40] sm:$0xff] %v14212_v33  ;;  %v14218_v58 = vld [vmem:[%s16540_s24 + $0x58] sm:$0xff]  ;;  %14215 = vst [vmem:[%s16536_s27 + $0x48] sm:$0xff] %v14214_v46  ;;  %v14220_v52 = vld [vmem:[%s16540_s24 + $0x60] sm:$0xff]  ;;  %s18951_s13 = scalar_lea.vmem %s17271_s17, %s16064_s21 [#allocation11]   ;;  %s18954_s25 = scalar_lea.vmem %s18870_s19, %s16064_s21  }
 0x639   : >> { %14217 = vst [vmem:[%s16536_s27 + $0x50] sm:$0xff] %v14216_v20  ;;  %14219 = vst [vmem:[%s16536_s27 + $0x58] sm:$0xff] %v14218_v58  ;;  %v14222_v17 = vld [vmem:[%s16540_s24 + $0x68] sm:$0xff]  ;;  %v14224_v31 = vld [vmem:[%s16540_s24 + $0x70] sm:$0xff] }
 0x63a   : >> { %14221 = vst [vmem:[%s16536_s27 + $0x60] sm:$0xff] %v14220_v52  ;;  %14223 = vst [vmem:[%s16536_s27 + $0x68] sm:$0xff] %v14222_v17  ;;  %v14226_v59 = vld [vmem:[%s16540_s24 + $0x78] sm:$0xff]  ;;  %v14228_v63 = vld [vmem:[%s16540_s24 + $0x80] sm:$0xff] }
 0x63b   : >> { %14225 = vst [vmem:[%s16536_s27 + $0x70] sm:$0xff] %v14224_v31  ;;  %v14230_v23 = vld [vmem:[%s16540_s24 + $0x88] sm:$0xff]  ;;  %14227 = vst [vmem:[%s16536_s27 + $0x78] sm:$0xff] %v14226_v59  ;;  %v14232_v41 = vld [vmem:[%s16540_s24 + $0x90] sm:$0xff] }
 0x63c   : >> { %14229 = vst [vmem:[%s16536_s27 + $0x80] sm:$0xff] %v14228_v63  ;;  %14231 = vst [vmem:[%s16536_s27 + $0x88] sm:$0xff] %v14230_v23  ;;  %v14234_v39 = vld [vmem:[%s16540_s24 + $0x98] sm:$0xff]  ;;  %v14236_v40 = vld [vmem:[%s16540_s24 + $0xa0] sm:$0xff] }
 0x63d   : >> { %14233 = vst [vmem:[%s16536_s27 + $0x90] sm:$0xff] %v14232_v41  ;;  %14235 = vst [vmem:[%s16536_s27 + $0x98] sm:$0xff] %v14234_v39  ;;  %v14238_v5 = vld [vmem:[%s16540_s24 + $0xa8] sm:$0xff]  ;;  %v14240_v1 = vld [vmem:[%s16540_s24 + $0xb0] sm:$0xff] }
 0x63e   : >> { %14237 = vst [vmem:[%s16536_s27 + $0xa0] sm:$0xff] %v14236_v40  ;;  %v14242_v3 = vld [vmem:[%s16540_s24 + $0xb8] sm:$0xff]  ;;  %14239 = vst [vmem:[%s16536_s27 + $0xa8] sm:$0xff] %v14238_v5  ;;  %v14244_v50 = vld [vmem:[%s16540_s24 + $0xc0] sm:$0xff] }
 0x63f   : >> { %14241 = vst [vmem:[%s16536_s27 + $0xb0] sm:$0xff] %v14240_v1  ;;  %14243 = vst [vmem:[%s16536_s27 + $0xb8] sm:$0xff] %v14242_v3  ;;  %v14246_v25 = vld [vmem:[%s16540_s24 + $0xc8] sm:$0xff]  ;;  %v14248_v53 = vld [vmem:[%s16540_s24 + $0xd0] sm:$0xff] }
 0x640   : >> { %14245 = vst [vmem:[%s16536_s27 + $0xc0] sm:$0xff] %v14244_v50  ;;  %14247 = vst [vmem:[%s16536_s27 + $0xc8] sm:$0xff] %v14246_v25  ;;  %v14250_v18 = vld [vmem:[%s16540_s24 + $0xd8] sm:$0xff]  ;;  %v14252_v48 = vld [vmem:[%s16540_s24 + $0xe0] sm:$0xff] }
 0x641   : >> { %14249 = vst [vmem:[%s16536_s27 + $0xd0] sm:$0xff] %v14248_v53  ;;  %v14254_v54 = vld [vmem:[%s16540_s24 + $0xe8] sm:$0xff]  ;;  %14251 = vst [vmem:[%s16536_s27 + $0xd8] sm:$0xff] %v14250_v18  ;;  %v14256_v60 = vld [vmem:[%s16540_s24 + $0xf0] sm:$0xff] }
 0x642   : >> { %14253 = vst [vmem:[%s16536_s27 + $0xe0] sm:$0xff] %v14252_v48  ;;  %14255 = vst [vmem:[%s16536_s27 + $0xe8] sm:$0xff] %v14254_v54  ;;  %v14258_v9 = vld [vmem:[%s16540_s24 + $0xf8] sm:$0xff]  ;;  %v14260_v4 = vld [vmem:[%s16540_s24 + $0x100] sm:$0xff] }
 0x643   : >> { %14257 = vst [vmem:[%s16536_s27 + $0xf0] sm:$0xff] %v14256_v60  ;;  %14259 = vst [vmem:[%s16536_s27 + $0xf8] sm:$0xff] %v14258_v9  ;;  %v14262_v7 = vld [vmem:[%s16540_s24 + $0x108] sm:$0xff]  ;;  %v14264_v0 = vld [vmem:[%s16540_s24 + $0x110] sm:$0xff] }
 0x644   : >> { %14261 = vst [vmem:[%s16536_s27 + $0x100] sm:$0xff] %v14260_v4  ;;  %v14266_v19 = vld [vmem:[%s16540_s24 + $0x118] sm:$0xff]  ;;  %14263 = vst [vmem:[%s16536_s27 + $0x108] sm:$0xff] %v14262_v7  ;;  %v14268_v61 = vld [vmem:[%s16540_s24 + $0x120] sm:$0xff] }
 0x645   : >> { %14265 = vst [vmem:[%s16536_s27 + $0x110] sm:$0xff] %v14264_v0  ;;  %14267 = vst [vmem:[%s16536_s27 + $0x118] sm:$0xff] %v14266_v19  ;;  %v14270_v8 = vld [vmem:[%s16540_s24 + $0x128] sm:$0xff]  ;;  %v14272_v28 = vld [vmem:[%s16540_s24 + $0x130] sm:$0xff] }
 0x646   : >> { %14269 = vst [vmem:[%s16536_s27 + $0x120] sm:$0xff] %v14268_v61  ;;  %14271 = vst [vmem:[%s16536_s27 + $0x128] sm:$0xff] %v14270_v8  ;;  %v14274_v11 = vld [vmem:[%s16540_s24 + $0x138] sm:$0xff]  ;;  %v14276_v21 = vld [vmem:[%s16540_s24 + $0x140] sm:$0xff] }
 0x647   : >> { %14273 = vst [vmem:[%s16536_s27 + $0x130] sm:$0xff] %v14272_v28  ;;  %v14278_v16 = vld [vmem:[%s16540_s24 + $0x148] sm:$0xff]  ;;  %14275 = vst [vmem:[%s16536_s27 + $0x138] sm:$0xff] %v14274_v11  ;;  %v14280_v26 = vld [vmem:[%s16540_s24 + $0x150] sm:$0xff] }
 0x648   : >> { %14277 = vst [vmem:[%s16536_s27 + $0x140] sm:$0xff] %v14276_v21  ;;  %14279 = vst [vmem:[%s16536_s27 + $0x148] sm:$0xff] %v14278_v16  ;;  %v14282_v47 = vld [vmem:[%s16540_s24 + $0x158] sm:$0xff]  ;;  %v14284_v34 = vld [vmem:[%s16540_s24 + $0x160] sm:$0xff] }
 0x649   : >> { %14281 = vst [vmem:[%s16536_s27 + $0x150] sm:$0xff] %v14280_v26  ;;  %14283 = vst [vmem:[%s16536_s27 + $0x158] sm:$0xff] %v14282_v47  ;;  %v14286_v32 = vld [vmem:[%s16540_s24 + $0x168] sm:$0xff]  ;;  %v14288_v13 = vld [vmem:[%s16540_s24 + $0x170] sm:$0xff] }
 0x64a   : >> { %14285 = vst [vmem:[%s16536_s27 + $0x160] sm:$0xff] %v14284_v34  ;;  %v14290_v14 = vld [vmem:[%s16540_s24 + $0x178] sm:$0xff]  ;;  %14287 = vst [vmem:[%s16536_s27 + $0x168] sm:$0xff] %v14286_v32  ;;  %v14292_v22 = vld [vmem:[%s16540_s24 + $0x180] sm:$0xff] }
 0x64b   : >> { %14289 = vst [vmem:[%s16536_s27 + $0x170] sm:$0xff] %v14288_v13  ;;  %14291 = vst [vmem:[%s16536_s27 + $0x178] sm:$0xff] %v14290_v14  ;;  %v14294_v42 = vld [vmem:[%s16540_s24 + $0x188] sm:$0xff]  ;;  %v14296_v55 = vld [vmem:[%s16540_s24 + $0x190] sm:$0xff] }
 0x64c   : >> { %14293 = vst [vmem:[%s16536_s27 + $0x180] sm:$0xff] %v14292_v22  ;;  %14295 = vst [vmem:[%s16536_s27 + $0x188] sm:$0xff] %v14294_v42  ;;  %v14298_v15 = vld [vmem:[%s16540_s24 + $0x198] sm:$0xff]  ;;  %v14300_v36 = vld [vmem:[%s16540_s24 + $0x1a0] sm:$0xff] }
 0x64d   : >> { %14297 = vst [vmem:[%s16536_s27 + $0x190] sm:$0xff] %v14296_v55  ;;  %v14302_v24 = vld [vmem:[%s16540_s24 + $0x1a8] sm:$0xff]  ;;  %14299 = vst [vmem:[%s16536_s27 + $0x198] sm:$0xff] %v14298_v15  ;;  %v14304_v43 = vld [vmem:[%s16540_s24 + $0x1b0] sm:$0xff]  ;;  %14192 = sbr.rel (!%p14189_p8) target bundleno = 1587 (0x633), region = 201 }
 0x64e   : >> { %14301 = vst [vmem:[%s16536_s27 + $0x1a0] sm:$0xff] %v14300_v36  ;;  %14303 = vst [vmem:[%s16536_s27 + $0x1a8] sm:$0xff] %v14302_v24  ;;  %v14306_v30 = vld [vmem:[%s16540_s24 + $0x1b8] sm:$0xff]  ;;  %v14308_v51 = vld [vmem:[%s16540_s24 + $0x1c0] sm:$0xff] }
 0x64f   : >> { %14305 = vst [vmem:[%s16536_s27 + $0x1b0] sm:$0xff] %v14304_v43  ;;  %14307 = vst [vmem:[%s16536_s27 + $0x1b8] sm:$0xff] %v14306_v30  ;;  %v14310_v62 = vld [vmem:[%s16540_s24 + $0x1c8] sm:$0xff]  ;;  %v14312_v44 = vld [vmem:[%s16540_s24 + $0x1d0] sm:$0xff] }
 0x650   : >> { %14309 = vst [vmem:[%s16536_s27 + $0x1c0] sm:$0xff] %v14308_v51  ;;  %v14314_v49 = vld [vmem:[%s16540_s24 + $0x1d8] sm:$0xff]  ;;  %14311 = vst [vmem:[%s16536_s27 + $0x1c8] sm:$0xff] %v14310_v62  ;;  %v14316_v38 = vld [vmem:[%s16540_s24 + $0x1e0] sm:$0xff] }
 0x651   : >> { %14313 = vst [vmem:[%s16536_s27 + $0x1d0] sm:$0xff] %v14312_v44  ;;  %14315 = vst [vmem:[%s16536_s27 + $0x1d8] sm:$0xff] %v14314_v49  ;;  %v14318_v2 = vld [vmem:[%s16540_s24 + $0x1e8] sm:$0xff]  ;;  %v14320_v6 = vld [vmem:[%s16540_s24 + $0x1f0] sm:$0xff] }
 0x652   : >> { %14317 = vst [vmem:[%s16536_s27 + $0x1e0] sm:$0xff] %v14316_v38  ;;  %14319 = vst [vmem:[%s16536_s27 + $0x1e8] sm:$0xff] %v14318_v2  ;;  %v14322_v10 = vld [vmem:[%s16540_s24 + $0x1f8] sm:$0xff]  ;;  %s19318_s24 = smov %s18951_s13 }
 0x653   : >> { %14321 = vst [vmem:[%s16536_s27 + $0x1f0] sm:$0xff] %v14320_v6  ;;  %14323 = vst [vmem:[%s16536_s27 + $0x1f8] sm:$0xff] %v14322_v10  ;;  %s19317_s27 = smov %s18954_s25 }
 0x654 PF: > { %s19060_s9 = sand.u32 63, %s14183_s0   ;;  %s16087_s20 = sshll.u32 %s18884_s26, 13 }
 0x655   : > { %s14335_s22 = sshra.s32 %s16087_s20, 4  ;;  %p16069_p5 = scmp.le.s32.totalorder %s19060_s9, 0 }
 0x656   : > { %s14336_s28 = scalar_lea.vmem %s17271_s17, %s14335_s22 [#allocation11]   ;;  %s14339_s16 = scalar_lea.vmem %s18870_s19, %s14335_s22  }
 0x657   : > { %14663 = sbr.rel (%p16069_p5) target bundleno = 1640 (0x668), region = 206  ;;  %s16550_s18 = smov (!%p16069_p5), %s14339_s16  }
 0x658   : > { %s16554_s23 = smov (!%p16069_p5), %s14336_s28   ;;  %s16558_s12 = smov (!%p16069_p5), 0  }
 0x659   : > { %s16562_s15 = smov (!%p16069_p5), 0  }
 0x65e LB: >> { %v14351_v56 = vld [vmem:[%s16556_s23] sm:$0xff]  ;;  %s14353_s0 = sadd.s32 1, %s16560_s12  ;;  %s14345_s15 = sadd.s32 1, %s16564_s15   ;;  %s16564_s15 = sphi %s16562_s15, %s14345_s15   ;;  %s16560_s12 = sphi %s16558_s12, %s16559_s12   ;;  %s16556_s23 = sphi %s16554_s23, %s14358_s23   ;;  %s16552_s18 = sphi %s16550_s18, %s14359_s18  }
 0x65f   : >> { %14352 = vst [vmem:[%s16552_s18] sm:$0xff] %v14351_v56  ;;  %p14354_p11 = scmp.ge.s32.totalorder %s14353_s0, %s19060_s9  ;;  %p14344_p10 = scmp.ge.s32.totalorder %s14345_s15, %s19060_s9 }
 0x661   : >> { %s19340_s0 = smov (%p14354_p11, %s14353_s0), 0  ;;  %14347 = sbr.rel (!%p14344_p10) target bundleno = 1630 (0x65e), region = 212 }
 0x662   : >> { %s16070_s26 = sshll.u32 %s19340_s0, 3  ;;  %s16559_s12 = smov %s19340_s0  }
 0x663   : >> { %s14358_s23 = scalar_lea.vmem %s14336_s28, %s16070_s26 [#allocation11]   ;;  %s14359_s18 = scalar_lea.vmem %s14339_s16, %s16070_s26  }
 0x668 PF: > { %14362 = sbr.rel (%p14179_p12) target bundleno = 1711 (0x6af), region = 113  ;;  %s19072_s27 = ssub.s32 (!%p14179_p12), %s19336_s8, %s18877_s14 }
 0x669   : > { %s14368_s24 = sshrl.u32 (!%p14179_p12), %s19336_s8, 3  ;;  %s14365_s10 = scalar_lea.vmem (!%p14179_p12), %s17271_s17, %s19072_s27 [#allocation11] }
 0x66a   : > { %s14367_s21 = scalar_lea.vmem (!%p14179_p12), %s18870_s19, %s19072_s27  ;;  %s19081_s13 = sshrl.u32 (!%p14179_p12), %s14368_s24, 6 }
 0x66b   : > { %p16072_p2 = scmp.le.s32.totalorder (!%p14179_p12), %s19081_s13, 0 }
 0x66f   : > { %14677 = sbr.rel (%p16072_p2) target bundleno = 1687 (0x697), region = 217  ;;  %s19320_s25 = smov (!%p16072_p2), %s18870_s19 }
 0x670   : > { %s19321_s9 = smov (!%p16072_p2), %s17271_s17  ;;  %s19090_s20 = smov (!%p16072_p2), 0  }
 0x671   : > { %s19092_s22 = smov (!%p16072_p2), 0  }
 0x676 LB: >> { %v14381_v29 = vld [vmem:[%s16572_s9] sm:$0xff]  ;;  %v14383_v35 = vld [vmem:[%s16572_s9 + $0x8] sm:$0xff]  ;;  %v14385_v45 = vld [vmem:[%s16572_s9 + $0x10] sm:$0xff]  ;;  %s14509_s28 = sadd.s32 1, %s16576_s20  ;;  %s14375_s22 = sadd.s32 1, %s16580_s22   ;;  %s16580_s22 = sphi %s19092_s22, %s14375_s22   ;;  %s16576_s20 = sphi %s19090_s20, %s19324_s20   ;;  %s16572_s9 = sphi %s19321_s9, %s19323_s9   ;;  %s16568_s25 = sphi %s19320_s25, %s19322_s25  }
 0x677   : >> { %14382 = vst [vmem:[%s16568_s25] sm:$0xff] %v14381_v29  ;;  %14384 = vst [vmem:[%s16568_s25 + $0x8] sm:$0xff] %v14383_v35  ;;  %v14387_v27 = vld [vmem:[%s16572_s9 + $0x18] sm:$0xff]  ;;  %v14389_v12 = vld [vmem:[%s16572_s9 + $0x20] sm:$0xff]  ;;  %p14510_p13 = scmp.ge.s32.totalorder %s14509_s28, %s19081_s13  ;;  %p14374_p3 = scmp.ge.s32.totalorder %s14375_s22, %s19081_s13 }
 0x678   : >> { %14386 = vst [vmem:[%s16568_s25 + $0x10] sm:$0xff] %v14385_v45  ;;  %v14391_v57 = vld [vmem:[%s16572_s9 + $0x28] sm:$0xff]  ;;  %14388 = vst [vmem:[%s16568_s25 + $0x18] sm:$0xff] %v14387_v27  ;;  %v14393_v37 = vld [vmem:[%s16572_s9 + $0x30] sm:$0xff] }
 0x679   : >> { %14390 = vst [vmem:[%s16568_s25 + $0x20] sm:$0xff] %v14389_v12  ;;  %14392 = vst [vmem:[%s16568_s25 + $0x28] sm:$0xff] %v14391_v57  ;;  %v14395_v33 = vld [vmem:[%s16572_s9 + $0x38] sm:$0xff]  ;;  %v14397_v46 = vld [vmem:[%s16572_s9 + $0x40] sm:$0xff]  ;;  %s19342_s28 = smov (%p14510_p13, %s14509_s28), 0 }
 0x67a   : >> { %14394 = vst [vmem:[%s16568_s25 + $0x30] sm:$0xff] %v14393_v37  ;;  %14396 = vst [vmem:[%s16568_s25 + $0x38] sm:$0xff] %v14395_v33  ;;  %v14399_v20 = vld [vmem:[%s16572_s9 + $0x48] sm:$0xff]  ;;  %v14401_v58 = vld [vmem:[%s16572_s9 + $0x50] sm:$0xff]  ;;  %s16073_s16 = sshll.u32 %s19342_s28, 9  ;;  %s19324_s20 = smov %s19342_s28 }
 0x67b   : >> { %14398 = vst [vmem:[%s16568_s25 + $0x40] sm:$0xff] %v14397_v46  ;;  %v14403_v52 = vld [vmem:[%s16572_s9 + $0x58] sm:$0xff]  ;;  %14400 = vst [vmem:[%s16568_s25 + $0x48] sm:$0xff] %v14399_v20  ;;  %v14405_v17 = vld [vmem:[%s16572_s9 + $0x60] sm:$0xff]  ;;  %s19148_s18 = scalar_lea.vmem %s17271_s17, %s16073_s16 [#allocation11]   ;;  %s19151_s23 = scalar_lea.vmem %s18870_s19, %s16073_s16  }
 0x67c   : >> { %14402 = vst [vmem:[%s16568_s25 + $0x50] sm:$0xff] %v14401_v58  ;;  %14404 = vst [vmem:[%s16568_s25 + $0x58] sm:$0xff] %v14403_v52  ;;  %v14407_v31 = vld [vmem:[%s16572_s9 + $0x68] sm:$0xff]  ;;  %v14409_v59 = vld [vmem:[%s16572_s9 + $0x70] sm:$0xff] }
 0x67d   : >> { %14406 = vst [vmem:[%s16568_s25 + $0x60] sm:$0xff] %v14405_v17  ;;  %14408 = vst [vmem:[%s16568_s25 + $0x68] sm:$0xff] %v14407_v31  ;;  %v14411_v63 = vld [vmem:[%s16572_s9 + $0x78] sm:$0xff]  ;;  %v14413_v23 = vld [vmem:[%s16572_s9 + $0x80] sm:$0xff] }
 0x67e   : >> { %14410 = vst [vmem:[%s16568_s25 + $0x70] sm:$0xff] %v14409_v59  ;;  %v14415_v41 = vld [vmem:[%s16572_s9 + $0x88] sm:$0xff]  ;;  %14412 = vst [vmem:[%s16568_s25 + $0x78] sm:$0xff] %v14411_v63  ;;  %v14417_v39 = vld [vmem:[%s16572_s9 + $0x90] sm:$0xff] }
 0x67f   : >> { %14414 = vst [vmem:[%s16568_s25 + $0x80] sm:$0xff] %v14413_v23  ;;  %14416 = vst [vmem:[%s16568_s25 + $0x88] sm:$0xff] %v14415_v41  ;;  %v14419_v40 = vld [vmem:[%s16572_s9 + $0x98] sm:$0xff]  ;;  %v14421_v5 = vld [vmem:[%s16572_s9 + $0xa0] sm:$0xff] }
 0x680   : >> { %14418 = vst [vmem:[%s16568_s25 + $0x90] sm:$0xff] %v14417_v39  ;;  %14420 = vst [vmem:[%s16568_s25 + $0x98] sm:$0xff] %v14419_v40  ;;  %v14423_v1 = vld [vmem:[%s16572_s9 + $0xa8] sm:$0xff]  ;;  %v14425_v3 = vld [vmem:[%s16572_s9 + $0xb0] sm:$0xff] }
 0x681   : >> { %14422 = vst [vmem:[%s16568_s25 + $0xa0] sm:$0xff] %v14421_v5  ;;  %v14427_v50 = vld [vmem:[%s16572_s9 + $0xb8] sm:$0xff]  ;;  %14424 = vst [vmem:[%s16568_s25 + $0xa8] sm:$0xff] %v14423_v1  ;;  %v14429_v25 = vld [vmem:[%s16572_s9 + $0xc0] sm:$0xff] }
 0x682   : >> { %14426 = vst [vmem:[%s16568_s25 + $0xb0] sm:$0xff] %v14425_v3  ;;  %14428 = vst [vmem:[%s16568_s25 + $0xb8] sm:$0xff] %v14427_v50  ;;  %v14431_v53 = vld [vmem:[%s16572_s9 + $0xc8] sm:$0xff]  ;;  %v14433_v18 = vld [vmem:[%s16572_s9 + $0xd0] sm:$0xff] }
 0x683   : >> { %14430 = vst [vmem:[%s16568_s25 + $0xc0] sm:$0xff] %v14429_v25  ;;  %14432 = vst [vmem:[%s16568_s25 + $0xc8] sm:$0xff] %v14431_v53  ;;  %v14435_v48 = vld [vmem:[%s16572_s9 + $0xd8] sm:$0xff]  ;;  %v14437_v54 = vld [vmem:[%s16572_s9 + $0xe0] sm:$0xff] }
 0x684   : >> { %14434 = vst [vmem:[%s16568_s25 + $0xd0] sm:$0xff] %v14433_v18  ;;  %v14439_v60 = vld [vmem:[%s16572_s9 + $0xe8] sm:$0xff]  ;;  %14436 = vst [vmem:[%s16568_s25 + $0xd8] sm:$0xff] %v14435_v48  ;;  %v14441_v9 = vld [vmem:[%s16572_s9 + $0xf0] sm:$0xff] }
 0x685   : >> { %14438 = vst [vmem:[%s16568_s25 + $0xe0] sm:$0xff] %v14437_v54  ;;  %14440 = vst [vmem:[%s16568_s25 + $0xe8] sm:$0xff] %v14439_v60  ;;  %v14443_v4 = vld [vmem:[%s16572_s9 + $0xf8] sm:$0xff]  ;;  %v14445_v7 = vld [vmem:[%s16572_s9 + $0x100] sm:$0xff] }
 0x686   : >> { %14442 = vst [vmem:[%s16568_s25 + $0xf0] sm:$0xff] %v14441_v9  ;;  %14444 = vst [vmem:[%s16568_s25 + $0xf8] sm:$0xff] %v14443_v4  ;;  %v14447_v0 = vld [vmem:[%s16572_s9 + $0x108] sm:$0xff]  ;;  %v14449_v19 = vld [vmem:[%s16572_s9 + $0x110] sm:$0xff] }
 0x687   : >> { %14446 = vst [vmem:[%s16568_s25 + $0x100] sm:$0xff] %v14445_v7  ;;  %v14451_v61 = vld [vmem:[%s16572_s9 + $0x118] sm:$0xff]  ;;  %14448 = vst [vmem:[%s16568_s25 + $0x108] sm:$0xff] %v14447_v0  ;;  %v14453_v8 = vld [vmem:[%s16572_s9 + $0x120] sm:$0xff] }
 0x688   : >> { %14450 = vst [vmem:[%s16568_s25 + $0x110] sm:$0xff] %v14449_v19  ;;  %14452 = vst [vmem:[%s16568_s25 + $0x118] sm:$0xff] %v14451_v61  ;;  %v14455_v28 = vld [vmem:[%s16572_s9 + $0x128] sm:$0xff]  ;;  %v14457_v11 = vld [vmem:[%s16572_s9 + $0x130] sm:$0xff] }
 0x689   : >> { %14454 = vst [vmem:[%s16568_s25 + $0x120] sm:$0xff] %v14453_v8  ;;  %14456 = vst [vmem:[%s16568_s25 + $0x128] sm:$0xff] %v14455_v28  ;;  %v14459_v21 = vld [vmem:[%s16572_s9 + $0x138] sm:$0xff]  ;;  %v14461_v16 = vld [vmem:[%s16572_s9 + $0x140] sm:$0xff] }
 0x68a   : >> { %14458 = vst [vmem:[%s16568_s25 + $0x130] sm:$0xff] %v14457_v11  ;;  %v14463_v26 = vld [vmem:[%s16572_s9 + $0x148] sm:$0xff]  ;;  %14460 = vst [vmem:[%s16568_s25 + $0x138] sm:$0xff] %v14459_v21  ;;  %v14465_v47 = vld [vmem:[%s16572_s9 + $0x150] sm:$0xff] }
 0x68b   : >> { %14462 = vst [vmem:[%s16568_s25 + $0x140] sm:$0xff] %v14461_v16  ;;  %14464 = vst [vmem:[%s16568_s25 + $0x148] sm:$0xff] %v14463_v26  ;;  %v14467_v34 = vld [vmem:[%s16572_s9 + $0x158] sm:$0xff]  ;;  %v14469_v32 = vld [vmem:[%s16572_s9 + $0x160] sm:$0xff] }
 0x68c   : >> { %14466 = vst [vmem:[%s16568_s25 + $0x150] sm:$0xff] %v14465_v47  ;;  %14468 = vst [vmem:[%s16568_s25 + $0x158] sm:$0xff] %v14467_v34  ;;  %v14471_v13 = vld [vmem:[%s16572_s9 + $0x168] sm:$0xff]  ;;  %v14473_v14 = vld [vmem:[%s16572_s9 + $0x170] sm:$0xff] }
 0x68d   : >> { %14470 = vst [vmem:[%s16568_s25 + $0x160] sm:$0xff] %v14469_v32  ;;  %v14475_v22 = vld [vmem:[%s16572_s9 + $0x178] sm:$0xff]  ;;  %14472 = vst [vmem:[%s16568_s25 + $0x168] sm:$0xff] %v14471_v13  ;;  %v14477_v42 = vld [vmem:[%s16572_s9 + $0x180] sm:$0xff] }
 0x68e   : >> { %14474 = vst [vmem:[%s16568_s25 + $0x170] sm:$0xff] %v14473_v14  ;;  %14476 = vst [vmem:[%s16568_s25 + $0x178] sm:$0xff] %v14475_v22  ;;  %v14479_v55 = vld [vmem:[%s16572_s9 + $0x188] sm:$0xff]  ;;  %v14481_v15 = vld [vmem:[%s16572_s9 + $0x190] sm:$0xff] }
 0x68f   : >> { %14478 = vst [vmem:[%s16568_s25 + $0x180] sm:$0xff] %v14477_v42  ;;  %14480 = vst [vmem:[%s16568_s25 + $0x188] sm:$0xff] %v14479_v55  ;;  %v14483_v36 = vld [vmem:[%s16572_s9 + $0x198] sm:$0xff]  ;;  %v14485_v24 = vld [vmem:[%s16572_s9 + $0x1a0] sm:$0xff] }
 0x690   : >> { %14482 = vst [vmem:[%s16568_s25 + $0x190] sm:$0xff] %v14481_v15  ;;  %v14487_v43 = vld [vmem:[%s16572_s9 + $0x1a8] sm:$0xff]  ;;  %14484 = vst [vmem:[%s16568_s25 + $0x198] sm:$0xff] %v14483_v36  ;;  %v14489_v30 = vld [vmem:[%s16572_s9 + $0x1b0] sm:$0xff]  ;;  %14377 = sbr.rel (!%p14374_p3) target bundleno = 1654 (0x676), region = 223 }
 0x691   : >> { %14486 = vst [vmem:[%s16568_s25 + $0x1a0] sm:$0xff] %v14485_v24  ;;  %14488 = vst [vmem:[%s16568_s25 + $0x1a8] sm:$0xff] %v14487_v43  ;;  %v14491_v51 = vld [vmem:[%s16572_s9 + $0x1b8] sm:$0xff]  ;;  %v14493_v62 = vld [vmem:[%s16572_s9 + $0x1c0] sm:$0xff] }
 0x692   : >> { %14490 = vst [vmem:[%s16568_s25 + $0x1b0] sm:$0xff] %v14489_v30  ;;  %14492 = vst [vmem:[%s16568_s25 + $0x1b8] sm:$0xff] %v14491_v51  ;;  %v14495_v44 = vld [vmem:[%s16572_s9 + $0x1c8] sm:$0xff]  ;;  %v14497_v49 = vld [vmem:[%s16572_s9 + $0x1d0] sm:$0xff] }
 0x693   : >> { %14494 = vst [vmem:[%s16568_s25 + $0x1c0] sm:$0xff] %v14493_v62  ;;  %v14499_v38 = vld [vmem:[%s16572_s9 + $0x1d8] sm:$0xff]  ;;  %14496 = vst [vmem:[%s16568_s25 + $0x1c8] sm:$0xff] %v14495_v44  ;;  %v14501_v2 = vld [vmem:[%s16572_s9 + $0x1e0] sm:$0xff] }
 0x694   : >> { %14498 = vst [vmem:[%s16568_s25 + $0x1d0] sm:$0xff] %v14497_v49  ;;  %14500 = vst [vmem:[%s16568_s25 + $0x1d8] sm:$0xff] %v14499_v38  ;;  %v14503_v6 = vld [vmem:[%s16572_s9 + $0x1e8] sm:$0xff]  ;;  %v14505_v10 = vld [vmem:[%s16572_s9 + $0x1f0] sm:$0xff] }
 0x695   : >> { %14502 = vst [vmem:[%s16568_s25 + $0x1e0] sm:$0xff] %v14501_v2  ;;  %14504 = vst [vmem:[%s16568_s25 + $0x1e8] sm:$0xff] %v14503_v6  ;;  %v14507_v56 = vld [vmem:[%s16572_s9 + $0x1f8] sm:$0xff]  ;;  %s19323_s9 = smov %s19148_s18 }
 0x696   : >> { %14506 = vst [vmem:[%s16568_s25 + $0x1f0] sm:$0xff] %v14505_v10  ;;  %14508 = vst [vmem:[%s16568_s25 + $0x1f8] sm:$0xff] %v14507_v56  ;;  %s19322_s25 = smov %s19151_s23 }
 0x697 PF: > { %s19257_s12 = sand.u32 63, %s14368_s24   ;;  %s16089_s15 = sshll.u32 %s19081_s13, 13 }
 0x698   : > { %s14520_s0 = sshra.s32 %s16089_s15, 4  ;;  %p16078_p6 = scmp.le.s32.totalorder %s19257_s12, 0 }
 0x699   : > { %s14521_s26 = scalar_lea.vmem %s17271_s17, %s14520_s0 [#allocation11]   ;;  %s14524_s16 = scalar_lea.vmem %s18870_s19, %s14520_s0  }
 0x69a   : > { %14691 = sbr.rel (%p16078_p6) target bundleno = 1707 (0x6ab), region = 228  ;;  %s16582_s18 = smov (!%p16078_p6), %s14524_s16  }
 0x69b   : > { %s16586_s28 = smov (!%p16078_p6), %s14521_s26   ;;  %s16590_s23 = smov (!%p16078_p6), 0  }
 0x69c   : > { %s16594_s22 = smov (!%p16078_p6), 0  }
 0x6a1 LB: >> { %v14536_v29 = vld [vmem:[%s16588_s28] sm:$0xff]  ;;  %s14538_s24 = sadd.s32 1, %s16592_s23  ;;  %s14530_s22 = sadd.s32 1, %s16596_s22   ;;  %s16596_s22 = sphi %s16594_s22, %s14530_s22   ;;  %s16592_s23 = sphi %s16590_s23, %s16591_s23   ;;  %s16588_s28 = sphi %s16586_s28, %s14543_s28   ;;  %s16584_s18 = sphi %s16582_s18, %s14544_s18  }
 0x6a2   : >> { %14537 = vst [vmem:[%s16584_s18] sm:$0xff] %v14536_v29  ;;  %p14539_p9 = scmp.ge.s32.totalorder %s14538_s24, %s19257_s12  ;;  %p14529_p7 = scmp.ge.s32.totalorder %s14530_s22, %s19257_s12 }
 0x6a4   : >> { %s19344_s24 = smov (%p14539_p9, %s14538_s24), 0  ;;  %14532 = sbr.rel (!%p14529_p7) target bundleno = 1697 (0x6a1), region = 234 }
 0x6a5   : >> { %s16079_s13 = sshll.u32 %s19344_s24, 3  ;;  %s16591_s23 = smov %s19344_s24  }
 0x6a6   : >> { %s14543_s28 = scalar_lea.vmem %s14521_s26, %s16079_s13 [#allocation11]   ;;  %s14544_s18 = scalar_lea.vmem %s14524_s16, %s16079_s13  }
 0x6ab PF: > { %s16607_s25 = smov 0  }
 0x6ac   : > { %s14545_s9 = sshllo.u32 %s16607_s25, %s18877_s14 }
 0x6ad   : > { %v14554_v35 = vld [vmem:[%s14365_s10] sm:%s14545_s9] }
 0x6ae   : > { %14555 = vst [vmem:[%s14367_s21] sm:%s14545_s9] %v14554_v35 }
 0x6af PF: > { %p16081_p12 = scmp.ge.u32.totalorder %s19336_s8, 8 }
 0x6b0   : > { %s16608_s20 = smov (!%p16081_p12), 0  }
 0x6b1   : > { %14166 = sbr.rel (%p16081_p12) target bundleno = 1720 (0x6b8), region = 84  ;;  %s14167_s12 = sshllo.u32 (!%p16081_p12), %s16608_s20, %s19336_s8 }
 0x6b2   : > { %v14176_v45 = vld [vmem:[%s17271_s17] sm:%s14167_s12] (!%p16081_p12) }
 0x6b3   : > { %14177 = vst [vmem:[%s18870_s19] sm:%s14167_s12] (!%p16081_p12), %v14176_v45 }
 0x6b8 PF: > { %p18_p0 = scmp.ge.s32.totalorder %s16677_s1, 4   ;;  %s19325_s28 = smov %s16524_s29 }
 0x6b9   : > { %s19326_s29 = smov %s16528_s30  ;;  %s19327_s30 = smov %s16687_s11 }
 0x6ba   : > { %s19328_s8 = smov %s16677_s1  ;;  %20 = sbr.rel (!%p18_p0) target bundleno = 6 (0x6), region = 245 }
 0x6c1   :  { %14569 = vsyncpa [#allocation5], 1 }
 0x6c2   :  { %14571 = vsyncpa [#allocation5 + $0x1], 1 }
 0x6c3   :  { %14572 = vsyncpa [#allocation7], 1 }

</bundles_post_ra>
